<compile_context>
chip_gen: v7x
topology: tpu7x:2x2x1
jax: 0.10.0
libtpu: 0.0.40
codegen_flags: <defaults>
</compile_context>

<pallas_src>
import functools

import jax
import jax.numpy as jnp
from jax import lax
from jax.experimental import pallas as pl
from jax.experimental.pallas import tpu as pltpu

_LANE = 128


# ----------------------------------------------------------------------------
# Host-side weight prep: pad channels to lane width, store per-tap bf16 weights
# ----------------------------------------------------------------------------
def _pad_w_taps(w, Cp):
    """(K,K,cin,cout) HWIO -> (K*K, Cp, Cp) bf16 per-tap matmul weights."""
    K1, K2, cin, cout = w.shape
    wp = jnp.pad(w, ((0, 0), (0, 0), (0, Cp - cin), (0, Cp - cout)))
    return wp.reshape(K1 * K2, Cp, Cp).astype(jnp.bfloat16)
    # TODO(synk): conv_in / conv_out could contract over an 8-padded cin
    # instead of Cp to skip wasted MACs on the first/last matmuls.


def _pad_b(b, Cp):
    return jnp.pad(b, (0, Cp - b.shape[0])).astype(jnp.float32).reshape(1, Cp)


def _conv_layer(w, b, Cp, *, d=1, relu_in=False, relu_out=False):
    return dict(kind="conv", K=w.shape[0], d=d, relu_in=relu_in,
                relu_out=relu_out, args=(_pad_w_taps(w, Cp), _pad_b(b, Cp)))


def _res_layer(rp, Cp, *, d):
    return dict(kind="res", d=d,
                args=(_pad_w_taps(rp["w1"], Cp), _pad_b(rp["b1"], Cp),
                      _pad_w_taps(rp["w2"], Cp), _pad_b(rp["b2"], Cp)))


def _resident_spec(shape):
    rank = len(shape)
    return pl.BlockSpec(shape, lambda n: (0,) * rank)


# ----------------------------------------------------------------------------
# Fused-stage Pallas kernel: [optional 2x upsample] + chain of convs/resblocks
# ----------------------------------------------------------------------------
def _make_stage_kernel(descs, upsample):
    """descs: static layer descriptors
         ("conv", K, dilation, relu_in, relu_out) -> consumes (w_taps, b)
         ("res", dilation)                        -> consumes (w1,b1,w2,b2)
    """

    def kernel(*refs):
        x_ref = refs[0]
        w_start = 2 if upsample else 1
        o_ref, act_ref, pad_ref = refs[-3], refs[-2], refs[-1]

        Hw, Ww, Cp = act_ref.shape
        Hp, Wp, _ = pad_ref.shape
        mp = (Hp - Hw) // 2                      # max halo (= max dilation pad)

        # Zero ONLY the halo border strips, once per grid step.  Every conv in
        # the stage writes its input into the same interior window, so the
        # border stays zero for every dilation used later in the stage.
        if mp > 0:
            pad_ref[0:mp, :, :] = jnp.zeros((mp, Wp, Cp), jnp.float32)
            pad_ref[mp + Hw:Hp, :, :] = jnp.zeros((Hp - mp - Hw, Wp, Cp),
                                                  jnp.float32)
            pad_ref[:, 0:mp, :] = jnp.zeros((Hp, mp, Cp), jnp.float32)
            pad_ref[:, mp + Ww:Wp, :] = jnp.zeros((Hp, Wp - mp - Ww, Cp),
                                                  jnp.float32)

        def conv(a, w_ref, b_ref, K, d, relu_in, relu_out):
            """a: (Hw,Ww,Cp) f32 value -> (Hw,Ww,Cp) f32 value (no im2col buf)."""
            if relu_in:                          # hoisted: applied once
                a = jnp.maximum(a, 0.0)
            if K == 1:
                acc = jnp.dot(a.reshape(Hw * Ww, Cp).astype(jnp.bfloat16),
                              w_ref[0], preferred_element_type=jnp.float32)
            else:
                p = d * (K - 1) // 2
                pad_ref[mp:mp + Hw, mp:mp + Ww, :] = a
                base = mp - p
                acc = None
                # TODO(synk): stage the padded copy in bf16 and realize the
                # kw*d sublane shift with pltpu.roll (XLU) once packed
                # misaligned slices are proven; f32 staging guarantees lowering
                # of the dilated tap slices today.
                for kh in range(K):
                    for kw in range(K):
                        patch = pad_ref[base + kh * d:base + kh * d + Hw,
                                        base + kw * d:base + kw * d + Ww, :]
                        contrib = jnp.dot(
                            patch.reshape(Hw * Ww, Cp).astype(jnp.bfloat16),
                            w_ref[kh * K + kw],
                            preferred_element_type=jnp.float32)
                        acc = contrib if acc is None else acc + contrib
            out = acc + b_ref[...]               # (H*W, Cp) + (1, Cp)
            if relu_out:
                out = jnp.maximum(out, 0.0)
            return out.reshape(Hw, Ww, Cp)

        # ---- load (and, for stages > 0, 2x nearest-upsample) the input ----
        x = x_ref[0].astype(jnp.float32)         # (Hin, Win, Cp)
        if upsample:
            u_ref = refs[1]                      # (2*Win, Win) 0/1 bf16 matrix
            Hin, Win = x.shape[0], x.shape[1]
            # rows: broadcast + merge of untiled leading dims (layout no-op)
            xh = jnp.broadcast_to(x[:, None, :, :], (Hin, 2, Win, Cp))
            xh = xh.reshape(2 * Hin, Win, Cp).astype(jnp.bfloat16)
            # cols (sublane axis): tiny batched 0/1 matmul on the MXU
            u = jnp.broadcast_to(u_ref[...][None, :, :], (2 * Hin, 2 * Win, Win))
            x = lax.dot_general(u, xh,
                                dimension_numbers=(((2,), (1,)), ((0,), (0,))),
                                preferred_element_type=jnp.float32)
        act_ref[...] = x                         # running activation (VMEM, f32)

        # ---- layer chain; activation stays resident in act_ref ----
        idx = w_start
        for desc in descs:
            if desc[0] == "conv":
                _, K, d, ri, ro = desc
                act_ref[...] = conv(act_ref[...], refs[idx], refs[idx + 1],
                                    K, d, ri, ro)
                idx += 2
            else:                                # pre-activation residual block
                _, d = desc
                h = conv(act_ref[...], refs[idx], refs[idx + 1], 3, d,
                         True, False)
                t = conv(h, refs[idx + 2], refs[idx + 3], 1, 1, True, False)
                act_ref[...] = act_ref[...] + t
                idx += 4

        o_ref[0] = act_ref[...].astype(o_ref.dtype)

    return kernel


def fused_stage(x, layers, *, upsample, out_dtype):
    """One pallas_call for an upsample-delimited stage.  `x` is an NHWC,
    channel-padded activation; if `upsample`, x is the quarter-size input and
    the 2x nearest replication happens inside the kernel."""
    N, Hin, Win, Cp = x.shape
    Hw, Ww = (2 * Hin, 2 * Win) if upsample else (Hin, Win)

    descs, wargs, max_pad = [], [], 1
    for L in layers:
        wargs += list(L["args"])
        if L["kind"] == "conv":
            descs.append(("conv", L["K"], L["d"], L["relu_in"], L["relu_out"]))
            max_pad = max(max_pad, L["d"] * (L["K"] - 1) // 2)
        else:
            descs.append(("res", L["d"]))
            max_pad = max(max_pad, L["d"])
    Hp, Wp = Hw + 2 * max_pad, Ww + 2 * max_pad

    kernel = _make_stage_kernel(tuple(descs), upsample)

    inputs = [x]
    in_specs = [pl.BlockSpec((1, Hin, Win, Cp), lambda n: (n, 0, 0, 0))]
    if upsample:
        # 0/1 selection matrix for nearest-neighbour column replication
        U = (jnp.arange(2 * Win)[:, None] // 2 == jnp.arange(Win)[None, :])
        inputs.append(U.astype(jnp.bfloat16))
        in_specs.append(_resident_spec((2 * Win, Win)))
    for a in wargs:
        inputs.append(a)
        in_specs.append(_resident_spec(a.shape))

    # FLOP / byte hint for XLA scheduling around the custom call.
    flops = 0
    for L in layers:
        taps = L["K"] ** 2 if L["kind"] == "conv" else 10   # 3x3 + 1x1
        flops += 2 * Hw * Ww * taps * Cp * Cp
    flops *= N
    w_bytes = sum(int(a.size) * a.dtype.itemsize for a in wargs)
    in_bytes = int(x.size) * x.dtype.itemsize
    out_bytes = N * Hw * Ww * Cp * jnp.dtype(out_dtype).itemsize
    cost = pl.CostEstimate(flops=flops, transcendentals=0,
                           bytes_accessed=in_bytes + out_bytes + w_bytes)

    # VMEM budget: double-buffered in/out blocks + resident weights + scratch.
    vmem_est = (2 * Hin * Win * Cp * x.dtype.itemsize
                + 2 * Hw * Ww * Cp * jnp.dtype(out_dtype).itemsize
                + w_bytes
                + Hw * Ww * Cp * 4 + Hp * Wp * Cp * 4)
    vmem_limit = int(min(48 * 2 ** 20, max(32 * 2 ** 20, 2 * vmem_est)))

    # TODO(synk): for production widths (512ch, large spatial) add H-row tiling
    # with a max-dilation halo as a second "parallel" grid axis so a stage fits
    # v7x's 64 MiB VMEM and both v7x TensorCores stay busy even when N == 1.
    return pl.pallas_call(
        kernel,
        out_shape=jax.ShapeDtypeStruct((N, Hw, Ww, Cp), out_dtype),
        grid=(N,),
        in_specs=in_specs,
        out_specs=pl.BlockSpec((1, Hw, Ww, Cp), lambda n: (n, 0, 0, 0)),
        scratch_shapes=[pltpu.VMEM((Hw, Ww, Cp), jnp.float32),   # act_ref
                        pltpu.VMEM((Hp, Wp, Cp), jnp.float32)],  # halo pad_ref
        compiler_params=pltpu.CompilerParams(
            dimension_semantics=("parallel",),
            vmem_limit_bytes=vmem_limit),
        cost_estimate=cost,
    )(*inputs)


# ----------------------------------------------------------------------------
# Decoder forward (Pallas path) — mirrors the PyTorch nn.Sequential
# ----------------------------------------------------------------------------
def decoder_forward_pallas(x_nchw, params, cfg):
    Cp = max(cfg["width"], cfg["output_emb_width"], cfg["input_emb_width"])
    Cp = ((Cp + _LANE - 1) // _LANE) * _LANE

    x = jnp.transpose(x_nchw, (0, 2, 3, 1))                          # NCHW->NHWC
    x = jnp.pad(x, ((0, 0), (0, 0), (0, 0), (0, Cp - x.shape[-1])))  # lane-dense

    dils = [cfg["dilation_growth_rate"] ** d for d in range(cfg["depth"])][::-1]
    down_t = cfg["down_t"]

    # Stage k (k = 0..down_t):
    #   k == 0 : conv_in + ReLU, then resnet blocks of up[0]
    #   k  > 0 : in-kernel 2x upsample, up[k-1] 3x3 conv, then resnet of up[k]
    #   k == down_t : ... then conv_post + ReLU + conv_out (final, f32 output)
    for k in range(down_t + 1):
        layers = []
        if k == 0:
            layers.append(_conv_layer(params["conv_in"]["w"],
                                      params["conv_in"]["b"], Cp, relu_out=True))
        else:
            pu = params["up"][k - 1]
            layers.append(_conv_layer(pu["w"], pu["b"], Cp))
        if k < down_t:
            pu = params["up"][k]
            layers += [_res_layer(pu["res"][j], Cp, d=d)
                       for j, d in enumerate(dils)]
            out_dtype = jnp.bfloat16          # halve inter-stage HBM traffic
        else:
            layers += [_conv_layer(params["conv_post"]["w"],
                                   params["conv_post"]["b"], Cp, relu_out=True),
                       _conv_layer(params["conv_out"]["w"],
                                   params["conv_out"]["b"], Cp)]
            out_dtype = jnp.float32
        x = fused_stage(x, layers, upsample=(k > 0), out_dtype=out_dtype)

    x = x[..., :cfg["input_emb_width"]]                              # drop pad
    return jnp.transpose(x, (0, 3, 1, 2))                            # NHWC->NCHW


# ----------------------------------------------------------------------------
# Pure-JAX reference of the same graph (correctness check only)
# ----------------------------------------------------------------------------
def conv2d_ref(x, w, b, *, dilation=1, relu_in=False, relu_out=False,
               residual=None):
    xi = jnp.maximum(x, 0.0) if relu_in else x
    KH, KW = w.shape[0], w.shape[1]
    ph = dilation * (KH - 1) // 2
    pw = dilation * (KW - 1) // 2
    y = lax.conv_general_dilated(
        xi, w, window_strides=(1, 1), padding=[(ph, ph), (pw, pw)],
        rhs_dilation=(dilation, dilation),
        dimension_numbers=("NHWC", "HWIO", "NHWC"),
        precision=lax.Precision.HIGHEST) + b
    if residual is not None:
        y = y + residual
    if relu_out:
        y = jnp.maximum(y, 0.0)
    return y


def decoder_forward_ref(x_nchw, params, cfg):
    x = jnp.transpose(x_nchw, (0, 2, 3, 1))
    x = conv2d_ref(x, params["conv_in"]["w"], params["conv_in"]["b"],
                   relu_out=True)
    dils = [cfg["dilation_growth_rate"] ** d for d in range(cfg["depth"])][::-1]
    for i in range(cfg["down_t"]):
        p = params["up"][i]
        for j, d in enumerate(dils):
            rp = p["res"][j]
            h = conv2d_ref(x, rp["w1"], rp["b1"], dilation=d, relu_in=True)
            x = conv2d_ref(h, rp["w2"], rp["b2"], relu_in=True, residual=x)
        x = jnp.repeat(jnp.repeat(x, 2, axis=1), 2, axis=2)
        x = conv2d_ref(x, p["w"], p["b"])
    x = conv2d_ref(x, params["conv_post"]["w"], params["conv_post"]["b"],
                   relu_out=True)
    x = conv2d_ref(x, params["conv_out"]["w"], params["conv_out"]["b"])
    return jnp.transpose(x, (0, 3, 1, 2))


# ----------------------------------------------------------------------------
# Deterministic parameter init
# ----------------------------------------------------------------------------
def _conv_params(key, kh, kw, cin, cout, scale=0.05):
    kw_key, kb_key = jax.random.split(key)
    return {"w": jax.random.normal(kw_key, (kh, kw, cin, cout), jnp.float32) * scale,
            "b": jax.random.normal(kb_key, (cout,), jnp.float32) * 0.02}


def init_params(key, cfg):
    W = cfg["width"]
    params = {}
    k = 0

    def nk():
        nonlocal k
        k += 1
        return jax.random.fold_in(key, k)

    params["conv_in"] = _conv_params(nk(), 3, 3, cfg["output_emb_width"], W)
    ups = []
    for _ in range(cfg["down_t"]):
        res = []
        for _ in range(cfg["depth"]):
            p1 = _conv_params(nk(), 3, 3, W, W)
            p2 = _conv_params(nk(), 1, 1, W, W)
            res.append({"w1": p1["w"], "b1": p1["b"],
                        "w2": p2["w"], "b2": p2["b"]})
        pc = _conv_params(nk(), 3, 3, W, W)
        ups.append({"res": res, "w": pc["w"], "b": pc["b"]})
    params["up"] = ups
    params["conv_post"] = _conv_params(nk(), 3, 3, W, W)
    params["conv_out"] = _conv_params(nk(), 3, 3, W, cfg["input_emb_width"])
    return params


# ----------------------------------------------------------------------------
if __name__ == "__main__":
    cfg = dict(input_emb_width=3, output_emb_width=8, down_t=2,
               width=16, depth=2, dilation_growth_rate=3)

    key = jax.random.PRNGKey(0)
    kx, kp = jax.random.split(key)
    # latent input: (N, output_emb_width, H, W) in NCHW, like the PyTorch module
    x = jax.random.normal(kx, (2, cfg["output_emb_width"], 4, 4), jnp.float32)
    params = init_params(kp, cfg)

    fwd = jax.jit(functools.partial(decoder_forward_pallas, cfg=cfg))
    out = jax.block_until_ready(fwd(x, params))

    ref = jax.block_until_ready(decoder_forward_ref(x, params, cfg))
    assert out.shape == (2, cfg["input_emb_width"], 16, 16), out.shape
    max_err = float(jnp.max(jnp.abs(out - ref)))
    # bf16 MXU operands + bf16 inter-stage activations (f32 accumulation)
    assert jnp.allclose(out, ref, rtol=3e-2, atol=3e-2), max_err

    print("KERNEL_OK")
</pallas_src>

<mosaic_0001>
module attributes {stable_mosaic.version = 11 : i64} {
  func.func @kernel(%arg0: i32, %arg1: memref<1x4x4x128xf32, #tpu.memory_space<vmem>>, %arg2: memref<9x128x128xbf16, #tpu.memory_space<vmem>>, %arg3: memref<1x128xf32, #tpu.memory_space<vmem>>, %arg4: memref<9x128x128xbf16, #tpu.memory_space<vmem>>, %arg5: memref<1x128xf32, #tpu.memory_space<vmem>>, %arg6: memref<1x128x128xbf16, #tpu.memory_space<vmem>>, %arg7: memref<1x128xf32, #tpu.memory_space<vmem>>, %arg8: memref<9x128x128xbf16, #tpu.memory_space<vmem>>, %arg9: memref<1x128xf32, #tpu.memory_space<vmem>>, %arg10: memref<1x128x128xbf16, #tpu.memory_space<vmem>>, %arg11: memref<1x128xf32, #tpu.memory_space<vmem>>, %arg12: memref<1x4x4x128xbf16, #tpu.memory_space<vmem>>, %arg13: memref<4x4x128xf32, #tpu.memory_space<vmem>>, %arg14: memref<10x10x128xf32, #tpu.memory_space<vmem>>) attributes {dimension_semantics = [#tpu.dimension_semantics<parallel>], iteration_bounds = array<i64: 2>, scalar_prefetch = 0 : i64, scratch_operands = 2 : i64, tpu.core_type = #tpu.core_type<tc>, window_params = [{transform_indices = @transform_0, window_bounds = array<i64: 1, 4, 4, 128>}, {pipeline_mode = #tpu.pipeline_mode<synchronous>, transform_indices = @transform_1, window_bounds = array<i64: 9, 128, 128>}, {pipeline_mode = #tpu.pipeline_mode<synchronous>, transform_indices = @transform_2, window_bounds = array<i64: 1, 128>}, {pipeline_mode = #tpu.pipeline_mode<synchronous>, transform_indices = @transform_3, window_bounds = array<i64: 9, 128, 128>}, {pipeline_mode = #tpu.pipeline_mode<synchronous>, transform_indices = @transform_4, window_bounds = array<i64: 1, 128>}, {pipeline_mode = #tpu.pipeline_mode<synchronous>, transform_indices = @transform_5, window_bounds = array<i64: 1, 128, 128>}, {pipeline_mode = #tpu.pipeline_mode<synchronous>, transform_indices = @transform_6, window_bounds = array<i64: 1, 128>}, {pipeline_mode = #tpu.pipeline_mode<synchronous>, transform_indices = @transform_7, window_bounds = array<i64: 9, 128, 128>}, {pipeline_mode = #tpu.pipeline_mode<synchronous>, transform_indices = @transform_8, window_bounds = array<i64: 1, 128>}, {pipeline_mode = #tpu.pipeline_mode<synchronous>, transform_indices = @transform_9, window_bounds = array<i64: 1, 128, 128>}, {pipeline_mode = #tpu.pipeline_mode<synchronous>, transform_indices = @transform_10, window_bounds = array<i64: 1, 128>}, {transform_indices = @transform_11, window_bounds = array<i64: 1, 4, 4, 128>}]} {
    %cst = arith.constant 0.000000e+00 : f32
    %0 = vector.broadcast %cst : f32 to vector<3x10x128xf32>
    %c0 = arith.constant 0 : index
    %c0_0 = arith.constant 0 : index
    %c0_1 = arith.constant 0 : index
    %1 = vector.load %arg14[%c0, %c0_0, %c0_1] : memref<10x10x128xf32, #tpu.memory_space<vmem>>, vector<3x10x128xf32>
    tpu.vector_store %arg14[%c0, %c0_0, %c0_1], %0 {strides = array<i32>} : memref<10x10x128xf32, #tpu.memory_space<vmem>>, vector<3x10x128xf32>,
    %cst_2 = arith.constant 0.000000e+00 : f32
    %2 = vector.broadcast %cst_2 : f32 to vector<3x10x128xf32>
    %c7 = arith.constant 7 : index
    %c0_3 = arith.constant 0 : index
    %c0_4 = arith.constant 0 : index
    %3 = vector.load %arg14[%c7, %c0_3, %c0_4] : memref<10x10x128xf32, #tpu.memory_space<vmem>>, vector<3x10x128xf32>
    tpu.vector_store %arg14[%c7, %c0_3, %c0_4], %2 {strides = array<i32>} : memref<10x10x128xf32, #tpu.memory_space<vmem>>, vector<3x10x128xf32>,
    %cst_5 = arith.constant 0.000000e+00 : f32
    %4 = vector.broadcast %cst_5 : f32 to vector<10x3x128xf32>
    %c0_6 = arith.constant 0 : index
    %c0_7 = arith.constant 0 : index
    %c0_8 = arith.constant 0 : index
    %5 = vector.load %arg14[%c0_6, %c0_7, %c0_8] : memref<10x10x128xf32, #tpu.memory_space<vmem>>, vector<10x3x128xf32>
    tpu.vector_store %arg14[%c0_6, %c0_7, %c0_8], %4 {strides = array<i32>} : memref<10x10x128xf32, #tpu.memory_space<vmem>>, vector<10x3x128xf32>,
    %cst_9 = arith.constant 0.000000e+00 : f32
    %6 = vector.broadcast %cst_9 : f32 to vector<10x3x128xf32>
    %c0_10 = arith.constant 0 : index
    %c7_11 = arith.constant 7 : index
    %c0_12 = arith.constant 0 : index
    %7 = vector.load %arg14[%c0_10, %c7_11, %c0_12] : memref<10x10x128xf32, #tpu.memory_space<vmem>>, vector<10x3x128xf32>
    tpu.vector_store %arg14[%c0_10, %c7_11, %c0_12], %6 {strides = array<i32>} : memref<10x10x128xf32, #tpu.memory_space<vmem>>, vector<10x3x128xf32>,
    %c0_13 = arith.constant 0 : index
    %c0_14 = arith.constant 0 : index
    %c0_15 = arith.constant 0 : index
    %c0_16 = arith.constant 0 : index
    %8 = vector.load %arg1[%c0_13, %c0_14, %c0_15, %c0_16] : memref<1x4x4x128xf32, #tpu.memory_space<vmem>>, vector<1x4x4x128xf32>
    %9 = vector.shape_cast %8 : vector<1x4x4x128xf32> to vector<4x4x128xf32>
    %c0_17 = arith.constant 0 : index
    %c0_18 = arith.constant 0 : index
    %c0_19 = arith.constant 0 : index
    %10 = vector.load %arg13[%c0_17, %c0_18, %c0_19] : memref<4x4x128xf32, #tpu.memory_space<vmem>>, vector<4x4x128xf32>
    tpu.vector_store %arg13[%c0_17, %c0_18, %c0_19], %9 {strides = array<i32>} : memref<4x4x128xf32, #tpu.memory_space<vmem>>, vector<4x4x128xf32>,
    %c0_20 = arith.constant 0 : index
    %c0_21 = arith.constant 0 : index
    %c0_22 = arith.constant 0 : index
    %11 = vector.load %arg13[%c0_20, %c0_21, %c0_22] : memref<4x4x128xf32, #tpu.memory_space<vmem>>, vector<4x4x128xf32>
    %c3 = arith.constant 3 : index
    %c3_23 = arith.constant 3 : index
    %c0_24 = arith.constant 0 : index
    %12 = vector.load %arg14[%c3, %c3_23, %c0_24] : memref<10x10x128xf32, #tpu.memory_space<vmem>>, vector<4x4x128xf32>
    tpu.vector_store %arg14[%c3, %c3_23, %c0_24], %11 {strides = array<i32>} : memref<10x10x128xf32, #tpu.memory_space<vmem>>, vector<4x4x128xf32>,
    %c2 = arith.constant 2 : index
    %c2_25 = arith.constant 2 : index
    %c0_26 = arith.constant 0 : index
    %13 = vector.load %arg14[%c2, %c2_25, %c0_26] : memref<10x10x128xf32, #tpu.memory_space<vmem>>, vector<4x4x128xf32>
    %14 = vector.shape_cast %13 : vector<4x4x128xf32> to vector<16x128xf32>
    %15 = arith.truncf %14 : vector<16x128xf32> to vector<16x128xbf16>
    %c0_27 = arith.constant 0 : index
    %c0_28 = arith.constant 0 : index
    %c0_29 = arith.constant 0 : index
    %16 = vector.load %arg2[%c0_27, %c0_28, %c0_29] : memref<9x128x128xbf16, #tpu.memory_space<vmem>>, vector<1x128x128xbf16>
    %17 = vector.shape_cast %16 : vector<1x128x128xbf16> to vector<128x128xbf16>
    %cst_30 = arith.constant dense<0.000000e+00> : vector<16x128xf32>
    %18 = tpu.matmul %15, %17, %cst_30 {dimension_numbers = #tpu.dot_dimension_numbers<[1], [0], [0], [1], [0, 0, 1, 1], [], []>} : vector<16x128xbf16>, vector<128x128xbf16>, vector<16x128xf32> -> vector<16x128xf32>
    %c2_31 = arith.constant 2 : index
    %c3_32 = arith.constant 3 : index
    %c0_33 = arith.constant 0 : index
    %19 = vector.load %arg14[%c2_31, %c3_32, %c0_33] : memref<10x10x128xf32, #tpu.memory_space<vmem>>, vector<4x4x128xf32>
    %20 = vector.shape_cast %19 : vector<4x4x128xf32> to vector<16x128xf32>
    %21 = arith.truncf %20 : vector<16x128xf32> to vector<16x128xbf16>
    %c1 = arith.constant 1 : index
    %c0_34 = arith.constant 0 : index
    %c0_35 = arith.constant 0 : index
    %22 = vector.load %arg2[%c1, %c0_34, %c0_35] : memref<9x128x128xbf16, #tpu.memory_space<vmem>>, vector<1x128x128xbf16>
    %23 = vector.shape_cast %22 : vector<1x128x128xbf16> to vector<128x128xbf16>
    %cst_36 = arith.constant dense<0.000000e+00> : vector<16x128xf32>
    %24 = tpu.matmul %21, %23, %cst_36 {dimension_numbers = #tpu.dot_dimension_numbers<[1], [0], [0], [1], [0, 0, 1, 1], [], []>} : vector<16x128xbf16>, vector<128x128xbf16>, vector<16x128xf32> -> vector<16x128xf32>
    %25 = arith.addf %18, %24 : vector<16x128xf32>
    %c2_37 = arith.constant 2 : index
    %c4 = arith.constant 4 : index
    %c0_38 = arith.constant 0 : index
    %26 = vector.load %arg14[%c2_37, %c4, %c0_38] : memref<10x10x128xf32, #tpu.memory_space<vmem>>, vector<4x4x128xf32>
    %27 = vector.shape_cast %26 : vector<4x4x128xf32> to vector<16x128xf32>
    %28 = arith.truncf %27 : vector<16x128xf32> to vector<16x128xbf16>
    %c2_39 = arith.constant 2 : index
    %c0_40 = arith.constant 0 : index
    %c0_41 = arith.constant 0 : index
    %29 = vector.load %arg2[%c2_39, %c0_40, %c0_41] : memref<9x128x128xbf16, #tpu.memory_space<vmem>>, vector<1x128x128xbf16>
    %30 = vector.shape_cast %29 : vector<1x128x128xbf16> to vector<128x128xbf16>
    %cst_42 = arith.constant dense<0.000000e+00> : vector<16x128xf32>
    %31 = tpu.matmul %28, %30, %cst_42 {dimension_numbers = #tpu.dot_dimension_numbers<[1], [0], [0], [1], [0, 0, 1, 1], [], []>} : vector<16x128xbf16>, vector<128x128xbf16>, vector<16x128xf32> -> vector<16x128xf32>
    %32 = arith.addf %25, %31 : vector<16x128xf32>
    %c3_43 = arith.constant 3 : index
    %c2_44 = arith.constant 2 : index
    %c0_45 = arith.constant 0 : index
    %33 = vector.load %arg14[%c3_43, %c2_44, %c0_45] : memref<10x10x128xf32, #tpu.memory_space<vmem>>, vector<4x4x128xf32>
    %34 = vector.shape_cast %33 : vector<4x4x128xf32> to vector<16x128xf32>
    %35 = arith.truncf %34 : vector<16x128xf32> to vector<16x128xbf16>
    %c3_46 = arith.constant 3 : index
    %c0_47 = arith.constant 0 : index
    %c0_48 = arith.constant 0 : index
    %36 = vector.load %arg2[%c3_46, %c0_47, %c0_48] : memref<9x128x128xbf16, #tpu.memory_space<vmem>>, vector<1x128x128xbf16>
    %37 = vector.shape_cast %36 : vector<1x128x128xbf16> to vector<128x128xbf16>
    %cst_49 = arith.constant dense<0.000000e+00> : vector<16x128xf32>
    %38 = tpu.matmul %35, %37, %cst_49 {dimension_numbers = #tpu.dot_dimension_numbers<[1], [0], [0], [1], [0, 0, 1, 1], [], []>} : vector<16x128xbf16>, vector<128x128xbf16>, vector<16x128xf32> -> vector<16x128xf32>
    %39 = arith.addf %32, %38 : vector<16x128xf32>
    %c3_50 = arith.constant 3 : index
    %c3_51 = arith.constant 3 : index
    %c0_52 = arith.constant 0 : index
    %40 = vector.load %arg14[%c3_50, %c3_51, %c0_52] : memref<10x10x128xf32, #tpu.memory_space<vmem>>, vector<4x4x128xf32>
    %41 = vector.shape_cast %40 : vector<4x4x128xf32> to vector<16x128xf32>
    %42 = arith.truncf %41 : vector<16x128xf32> to vector<16x128xbf16>
    %c4_53 = arith.constant 4 : index
    %c0_54 = arith.constant 0 : index
    %c0_55 = arith.constant 0 : index
    %43 = vector.load %arg2[%c4_53, %c0_54, %c0_55] : memref<9x128x128xbf16, #tpu.memory_space<vmem>>, vector<1x128x128xbf16>
    %44 = vector.shape_cast %43 : vector<1x128x128xbf16> to vector<128x128xbf16>
    %cst_56 = arith.constant dense<0.000000e+00> : vector<16x128xf32>
    %45 = tpu.matmul %42, %44, %cst_56 {dimension_numbers = #tpu.dot_dimension_numbers<[1], [0], [0], [1], [0, 0, 1, 1], [], []>} : vector<16x128xbf16>, vector<128x128xbf16>, vector<16x128xf32> -> vector<16x128xf32>
    %46 = arith.addf %39, %45 : vector<16x128xf32>
    %c3_57 = arith.constant 3 : index
    %c4_58 = arith.constant 4 : index
    %c0_59 = arith.constant 0 : index
    %47 = vector.load %arg14[%c3_57, %c4_58, %c0_59] : memref<10x10x128xf32, #tpu.memory_space<vmem>>, vector<4x4x128xf32>
    %48 = vector.shape_cast %47 : vector<4x4x128xf32> to vector<16x128xf32>
    %49 = arith.truncf %48 : vector<16x128xf32> to vector<16x128xbf16>
    %c5 = arith.constant 5 : index
    %c0_60 = arith.constant 0 : index
    %c0_61 = arith.constant 0 : index
    %50 = vector.load %arg2[%c5, %c0_60, %c0_61] : memref<9x128x128xbf16, #tpu.memory_space<vmem>>, vector<1x128x128xbf16>
    %51 = vector.shape_cast %50 : vector<1x128x128xbf16> to vector<128x128xbf16>
    %cst_62 = arith.constant dense<0.000000e+00> : vector<16x128xf32>
    %52 = tpu.matmul %49, %51, %cst_62 {dimension_numbers = #tpu.dot_dimension_numbers<[1], [0], [0], [1], [0, 0, 1, 1], [], []>} : vector<16x128xbf16>, vector<128x128xbf16>, vector<16x128xf32> -> vector<16x128xf32>
    %53 = arith.addf %46, %52 : vector<16x128xf32>
    %c4_63 = arith.constant 4 : index
    %c2_64 = arith.constant 2 : index
    %c0_65 = arith.constant 0 : index
    %54 = vector.load %arg14[%c4_63, %c2_64, %c0_65] : memref<10x10x128xf32, #tpu.memory_space<vmem>>, vector<4x4x128xf32>
    %55 = vector.shape_cast %54 : vector<4x4x128xf32> to vector<16x128xf32>
    %56 = arith.truncf %55 : vector<16x128xf32> to vector<16x128xbf16>
    %c6 = arith.constant 6 : index
    %c0_66 = arith.constant 0 : index
    %c0_67 = arith.constant 0 : index
    %57 = vector.load %arg2[%c6, %c0_66, %c0_67] : memref<9x128x128xbf16, #tpu.memory_space<vmem>>, vector<1x128x128xbf16>
    %58 = vector.shape_cast %57 : vector<1x128x128xbf16> to vector<128x128xbf16>
    %cst_68 = arith.constant dense<0.000000e+00> : vector<16x128xf32>
    %59 = tpu.matmul %56, %58, %cst_68 {dimension_numbers = #tpu.dot_dimension_numbers<[1], [0], [0], [1], [0, 0, 1, 1], [], []>} : vector<16x128xbf16>, vector<128x128xbf16>, vector<16x128xf32> -> vector<16x128xf32>
    %60 = arith.addf %53, %59 : vector<16x128xf32>
    %c4_69 = arith.constant 4 : index
    %c3_70 = arith.constant 3 : index
    %c0_71 = arith.constant 0 : index
    %61 = vector.load %arg14[%c4_69, %c3_70, %c0_71] : memref<10x10x128xf32, #tpu.memory_space<vmem>>, vector<4x4x128xf32>
    %62 = vector.shape_cast %61 : vector<4x4x128xf32> to vector<16x128xf32>
    %63 = arith.truncf %62 : vector<16x128xf32> to vector<16x128xbf16>
    %c7_72 = arith.constant 7 : index
    %c0_73 = arith.constant 0 : index
    %c0_74 = arith.constant 0 : index
    %64 = vector.load %arg2[%c7_72, %c0_73, %c0_74] : memref<9x128x128xbf16, #tpu.memory_space<vmem>>, vector<1x128x128xbf16>
    %65 = vector.shape_cast %64 : vector<1x128x128xbf16> to vector<128x128xbf16>
    %cst_75 = arith.constant dense<0.000000e+00> : vector<16x128xf32>
    %66 = tpu.matmul %63, %65, %cst_75 {dimension_numbers = #tpu.dot_dimension_numbers<[1], [0], [0], [1], [0, 0, 1, 1], [], []>} : vector<16x128xbf16>, vector<128x128xbf16>, vector<16x128xf32> -> vector<16x128xf32>
    %67 = arith.addf %60, %66 : vector<16x128xf32>
    %c4_76 = arith.constant 4 : index
    %c4_77 = arith.constant 4 : index
    %c0_78 = arith.constant 0 : index
    %68 = vector.load %arg14[%c4_76, %c4_77, %c0_78] : memref<10x10x128xf32, #tpu.memory_space<vmem>>, vector<4x4x128xf32>
    %69 = vector.shape_cast %68 : vector<4x4x128xf32> to vector<16x128xf32>
    %70 = arith.truncf %69 : vector<16x128xf32> to vector<16x128xbf16>
    %c8 = arith.constant 8 : index
    %c0_79 = arith.constant 0 : index
    %c0_80 = arith.constant 0 : index
    %71 = vector.load %arg2[%c8, %c0_79, %c0_80] : memref<9x128x128xbf16, #tpu.memory_space<vmem>>, vector<1x128x128xbf16>
    %72 = vector.shape_cast %71 : vector<1x128x128xbf16> to vector<128x128xbf16>
    %cst_81 = arith.constant dense<0.000000e+00> : vector<16x128xf32>
    %73 = tpu.matmul %70, %72, %cst_81 {dimension_numbers = #tpu.dot_dimension_numbers<[1], [0], [0], [1], [0, 0, 1, 1], [], []>} : vector<16x128xbf16>, vector<128x128xbf16>, vector<16x128xf32> -> vector<16x128xf32>
    %74 = arith.addf %67, %73 : vector<16x128xf32>
    %c0_82 = arith.constant 0 : index
    %c0_83 = arith.constant 0 : index
    %75 = vector.load %arg3[%c0_82, %c0_83] : memref<1x128xf32, #tpu.memory_space<vmem>>, vector<1x128xf32>
    %76 = vector.broadcast %75 : vector<1x128xf32> to vector<16x128xf32>
    %77 = arith.addf %74, %76 : vector<16x128xf32>
    %cst_84 = arith.constant 0.000000e+00 : f32
    %78 = vector.broadcast %cst_84 : f32 to vector<16x128xf32>
    %79 = arith.maximumf %77, %78 : vector<16x128xf32>
    %80 = vector.shape_cast %79 : vector<16x128xf32> to vector<4x4x128xf32>
    %c0_85 = arith.constant 0 : index
    %c0_86 = arith.constant 0 : index
    %c0_87 = arith.constant 0 : index
    %81 = vector.load %arg13[%c0_85, %c0_86, %c0_87] : memref<4x4x128xf32, #tpu.memory_space<vmem>>, vector<4x4x128xf32>
    tpu.vector_store %arg13[%c0_85, %c0_86, %c0_87], %80 {strides = array<i32>} : memref<4x4x128xf32, #tpu.memory_space<vmem>>, vector<4x4x128xf32>,
    %c0_88 = arith.constant 0 : index
    %c0_89 = arith.constant 0 : index
    %c0_90 = arith.constant 0 : index
    %82 = vector.load %arg13[%c0_88, %c0_89, %c0_90] : memref<4x4x128xf32, #tpu.memory_space<vmem>>, vector<4x4x128xf32>
    %cst_91 = arith.constant 0.000000e+00 : f32
    %83 = vector.broadcast %cst_91 : f32 to vector<4x4x128xf32>
    %84 = arith.maximumf %82, %83 : vector<4x4x128xf32>
    %c3_92 = arith.constant 3 : index
    %c3_93 = arith.constant 3 : index
    %c0_94 = arith.constant 0 : index
    %85 = vector.load %arg14[%c3_92, %c3_93, %c0_94] : memref<10x10x128xf32, #tpu.memory_space<vmem>>, vector<4x4x128xf32>
    tpu.vector_store %arg14[%c3_92, %c3_93, %c0_94], %84 {strides = array<i32>} : memref<10x10x128xf32, #tpu.memory_space<vmem>>, vector<4x4x128xf32>,
    %c0_95 = arith.constant 0 : index
    %c0_96 = arith.constant 0 : index
    %c0_97 = arith.constant 0 : index
    %86 = vector.load %arg14[%c0_95, %c0_96, %c0_97] : memref<10x10x128xf32, #tpu.memory_space<vmem>>, vector<4x4x128xf32>
    %87 = vector.shape_cast %86 : vector<4x4x128xf32> to vector<16x128xf32>
    %88 = arith.truncf %87 : vector<16x128xf32> to vector<16x128xbf16>
    %c0_98 = arith.constant 0 : index
    %c0_99 = arith.constant 0 : index
    %c0_100 = arith.constant 0 : index
    %89 = vector.load %arg4[%c0_98, %c0_99, %c0_100] : memref<9x128x128xbf16, #tpu.memory_space<vmem>>, vector<1x128x128xbf16>
    %90 = vector.shape_cast %89 : vector<1x128x128xbf16> to vector<128x128xbf16>
    %cst_101 = arith.constant dense<0.000000e+00> : vector<16x128xf32>
    %91 = tpu.matmul %88, %90, %cst_101 {dimension_numbers = #tpu.dot_dimension_numbers<[1], [0], [0], [1], [0, 0, 1, 1], [], []>} : vector<16x128xbf16>, vector<128x128xbf16>, vector<16x128xf32> -> vector<16x128xf32>
    %c0_102 = arith.constant 0 : index
    %c3_103 = arith.constant 3 : index
    %c0_104 = arith.constant 0 : index
    %92 = vector.load %arg14[%c0_102, %c3_103, %c0_104] : memref<10x10x128xf32, #tpu.memory_space<vmem>>, vector<4x4x128xf32>
    %93 = vector.shape_cast %92 : vector<4x4x128xf32> to vector<16x128xf32>
    %94 = arith.truncf %93 : vector<16x128xf32> to vector<16x128xbf16>
    %c1_105 = arith.constant 1 : index
    %c0_106 = arith.constant 0 : index
    %c0_107 = arith.constant 0 : index
    %95 = vector.load %arg4[%c1_105, %c0_106, %c0_107] : memref<9x128x128xbf16, #tpu.memory_space<vmem>>, vector<1x128x128xbf16>
    %96 = vector.shape_cast %95 : vector<1x128x128xbf16> to vector<128x128xbf16>
    %cst_108 = arith.constant dense<0.000000e+00> : vector<16x128xf32>
    %97 = tpu.matmul %94, %96, %cst_108 {dimension_numbers = #tpu.dot_dimension_numbers<[1], [0], [0], [1], [0, 0, 1, 1], [], []>} : vector<16x128xbf16>, vector<128x128xbf16>, vector<16x128xf32> -> vector<16x128xf32>
    %98 = arith.addf %91, %97 : vector<16x128xf32>
    %c0_109 = arith.constant 0 : index
    %c6_110 = arith.constant 6 : index
    %c0_111 = arith.constant 0 : index
    %99 = vector.load %arg14[%c0_109, %c6_110, %c0_111] : memref<10x10x128xf32, #tpu.memory_space<vmem>>, vector<4x4x128xf32>
    %100 = vector.shape_cast %99 : vector<4x4x128xf32> to vector<16x128xf32>
    %101 = arith.truncf %100 : vector<16x128xf32> to vector<16x128xbf16>
    %c2_112 = arith.constant 2 : index
    %c0_113 = arith.constant 0 : index
    %c0_114 = arith.constant 0 : index
    %102 = vector.load %arg4[%c2_112, %c0_113, %c0_114] : memref<9x128x128xbf16, #tpu.memory_space<vmem>>, vector<1x128x128xbf16>
    %103 = vector.shape_cast %102 : vector<1x128x128xbf16> to vector<128x128xbf16>
    %cst_115 = arith.constant dense<0.000000e+00> : vector<16x128xf32>
    %104 = tpu.matmul %101, %103, %cst_115 {dimension_numbers = #tpu.dot_dimension_numbers<[1], [0], [0], [1], [0, 0, 1, 1], [], []>} : vector<16x128xbf16>, vector<128x128xbf16>, vector<16x128xf32> -> vector<16x128xf32>
    %105 = arith.addf %98, %104 : vector<16x128xf32>
    %c3_116 = arith.constant 3 : index
    %c0_117 = arith.constant 0 : index
    %c0_118 = arith.constant 0 : index
    %106 = vector.load %arg14[%c3_116, %c0_117, %c0_118] : memref<10x10x128xf32, #tpu.memory_space<vmem>>, vector<4x4x128xf32>
    %107 = vector.shape_cast %106 : vector<4x4x128xf32> to vector<16x128xf32>
    %108 = arith.truncf %107 : vector<16x128xf32> to vector<16x128xbf16>
    %c3_119 = arith.constant 3 : index
    %c0_120 = arith.constant 0 : index
    %c0_121 = arith.constant 0 : index
    %109 = vector.load %arg4[%c3_119, %c0_120, %c0_121] : memref<9x128x128xbf16, #tpu.memory_space<vmem>>, vector<1x128x128xbf16>
    %110 = vector.shape_cast %109 : vector<1x128x128xbf16> to vector<128x128xbf16>
    %cst_122 = arith.constant dense<0.000000e+00> : vector<16x128xf32>
    %111 = tpu.matmul %108, %110, %cst_122 {dimension_numbers = #tpu.dot_dimension_numbers<[1], [0], [0], [1], [0, 0, 1, 1], [], []>} : vector<16x128xbf16>, vector<128x128xbf16>, vector<16x128xf32> -> vector<16x128xf32>
    %112 = arith.addf %105, %111 : vector<16x128xf32>
    %c3_123 = arith.constant 3 : index
    %c3_124 = arith.constant 3 : index
    %c0_125 = arith.constant 0 : index
    %113 = vector.load %arg14[%c3_123, %c3_124, %c0_125] : memref<10x10x128xf32, #tpu.memory_space<vmem>>, vector<4x4x128xf32>
    %114 = vector.shape_cast %113 : vector<4x4x128xf32> to vector<16x128xf32>
    %115 = arith.truncf %114 : vector<16x128xf32> to vector<16x128xbf16>
    %c4_126 = arith.constant 4 : index
    %c0_127 = arith.constant 0 : index
    %c0_128 = arith.constant 0 : index
    %116 = vector.load %arg4[%c4_126, %c0_127, %c0_128] : memref<9x128x128xbf16, #tpu.memory_space<vmem>>, vector<1x128x128xbf16>
    %117 = vector.shape_cast %116 : vector<1x128x128xbf16> to vector<128x128xbf16>
    %cst_129 = arith.constant dense<0.000000e+00> : vector<16x128xf32>
    %118 = tpu.matmul %115, %117, %cst_129 {dimension_numbers = #tpu.dot_dimension_numbers<[1], [0], [0], [1], [0, 0, 1, 1], [], []>} : vector<16x128xbf16>, vector<128x128xbf16>, vector<16x128xf32> -> vector<16x128xf32>
    %119 = arith.addf %112, %118 : vector<16x128xf32>
    %c3_130 = arith.constant 3 : index
    %c6_131 = arith.constant 6 : index
    %c0_132 = arith.constant 0 : index
    %120 = vector.load %arg14[%c3_130, %c6_131, %c0_132] : memref<10x10x128xf32, #tpu.memory_space<vmem>>, vector<4x4x128xf32>
    %121 = vector.shape_cast %120 : vector<4x4x128xf32> to vector<16x128xf32>
    %122 = arith.truncf %121 : vector<16x128xf32> to vector<16x128xbf16>
    %c5_133 = arith.constant 5 : index
    %c0_134 = arith.constant 0 : index
    %c0_135 = arith.constant 0 : index
    %123 = vector.load %arg4[%c5_133, %c0_134, %c0_135] : memref<9x128x128xbf16, #tpu.memory_space<vmem>>, vector<1x128x128xbf16>
    %124 = vector.shape_cast %123 : vector<1x128x128xbf16> to vector<128x128xbf16>
    %cst_136 = arith.constant dense<0.000000e+00> : vector<16x128xf32>
    %125 = tpu.matmul %122, %124, %cst_136 {dimension_numbers = #tpu.dot_dimension_numbers<[1], [0], [0], [1], [0, 0, 1, 1], [], []>} : vector<16x128xbf16>, vector<128x128xbf16>, vector<16x128xf32> -> vector<16x128xf32>
    %126 = arith.addf %119, %125 : vector<16x128xf32>
    %c6_137 = arith.constant 6 : index
    %c0_138 = arith.constant 0 : index
    %c0_139 = arith.constant 0 : index
    %127 = vector.load %arg14[%c6_137, %c0_138, %c0_139] : memref<10x10x128xf32, #tpu.memory_space<vmem>>, vector<4x4x128xf32>
    %128 = vector.shape_cast %127 : vector<4x4x128xf32> to vector<16x128xf32>
    %129 = arith.truncf %128 : vector<16x128xf32> to vector<16x128xbf16>
    %c6_140 = arith.constant 6 : index
    %c0_141 = arith.constant 0 : index
    %c0_142 = arith.constant 0 : index
    %130 = vector.load %arg4[%c6_140, %c0_141, %c0_142] : memref<9x128x128xbf16, #tpu.memory_space<vmem>>, vector<1x128x128xbf16>
    %131 = vector.shape_cast %130 : vector<1x128x128xbf16> to vector<128x128xbf16>
    %cst_143 = arith.constant dense<0.000000e+00> : vector<16x128xf32>
    %132 = tpu.matmul %129, %131, %cst_143 {dimension_numbers = #tpu.dot_dimension_numbers<[1], [0], [0], [1], [0, 0, 1, 1], [], []>} : vector<16x128xbf16>, vector<128x128xbf16>, vector<16x128xf32> -> vector<16x128xf32>
    %133 = arith.addf %126, %132 : vector<16x128xf32>
    %c6_144 = arith.constant 6 : index
    %c3_145 = arith.constant 3 : index
    %c0_146 = arith.constant 0 : index
    %134 = vector.load %arg14[%c6_144, %c3_145, %c0_146] : memref<10x10x128xf32, #tpu.memory_space<vmem>>, vector<4x4x128xf32>
    %135 = vector.shape_cast %134 : vector<4x4x128xf32> to vector<16x128xf32>
    %136 = arith.truncf %135 : vector<16x128xf32> to vector<16x128xbf16>
    %c7_147 = arith.constant 7 : index
    %c0_148 = arith.constant 0 : index
    %c0_149 = arith.constant 0 : index
    %137 = vector.load %arg4[%c7_147, %c0_148, %c0_149] : memref<9x128x128xbf16, #tpu.memory_space<vmem>>, vector<1x128x128xbf16>
    %138 = vector.shape_cast %137 : vector<1x128x128xbf16> to vector<128x128xbf16>
    %cst_150 = arith.constant dense<0.000000e+00> : vector<16x128xf32>
    %139 = tpu.matmul %136, %138, %cst_150 {dimension_numbers = #tpu.dot_dimension_numbers<[1], [0], [0], [1], [0, 0, 1, 1], [], []>} : vector<16x128xbf16>, vector<128x128xbf16>, vector<16x128xf32> -> vector<16x128xf32>
    %140 = arith.addf %133, %139 : vector<16x128xf32>
    %c6_151 = arith.constant 6 : index
    %c6_152 = arith.constant 6 : index
    %c0_153 = arith.constant 0 : index
    %141 = vector.load %arg14[%c6_151, %c6_152, %c0_153] : memref<10x10x128xf32, #tpu.memory_space<vmem>>, vector<4x4x128xf32>
    %142 = vector.shape_cast %141 : vector<4x4x128xf32> to vector<16x128xf32>
    %143 = arith.truncf %142 : vector<16x128xf32> to vector<16x128xbf16>
    %c8_154 = arith.constant 8 : index
    %c0_155 = arith.constant 0 : index
    %c0_156 = arith.constant 0 : index
    %144 = vector.load %arg4[%c8_154, %c0_155, %c0_156] : memref<9x128x128xbf16, #tpu.memory_space<vmem>>, vector<1x128x128xbf16>
    %145 = vector.shape_cast %144 : vector<1x128x128xbf16> to vector<128x128xbf16>
    %cst_157 = arith.constant dense<0.000000e+00> : vector<16x128xf32>
    %146 = tpu.matmul %143, %145, %cst_157 {dimension_numbers = #tpu.dot_dimension_numbers<[1], [0], [0], [1], [0, 0, 1, 1], [], []>} : vector<16x128xbf16>, vector<128x128xbf16>, vector<16x128xf32> -> vector<16x128xf32>
    %147 = arith.addf %140, %146 : vector<16x128xf32>
    %c0_158 = arith.constant 0 : index
    %c0_159 = arith.constant 0 : index
    %148 = vector.load %arg5[%c0_158, %c0_159] : memref<1x128xf32, #tpu.memory_space<vmem>>, vector<1x128xf32>
    %149 = vector.broadcast %148 : vector<1x128xf32> to vector<16x128xf32>
    %150 = arith.addf %147, %149 : vector<16x128xf32>
    %151 = vector.shape_cast %150 : vector<16x128xf32> to vector<4x4x128xf32>
    %cst_160 = arith.constant 0.000000e+00 : f32
    %152 = vector.broadcast %cst_160 : f32 to vector<4x4x128xf32>
    %153 = arith.maximumf %151, %152 : vector<4x4x128xf32>
    %154 = vector.shape_cast %153 : vector<4x4x128xf32> to vector<16x128xf32>
    %155 = arith.truncf %154 : vector<16x128xf32> to vector<16x128xbf16>
    %c0_161 = arith.constant 0 : index
    %c0_162 = arith.constant 0 : index
    %c0_163 = arith.constant 0 : index
    %156 = vector.load %arg6[%c0_161, %c0_162, %c0_163] : memref<1x128x128xbf16, #tpu.memory_space<vmem>>, vector<1x128x128xbf16>
    %157 = vector.shape_cast %156 : vector<1x128x128xbf16> to vector<128x128xbf16>
    %cst_164 = arith.constant dense<0.000000e+00> : vector<16x128xf32>
    %158 = tpu.matmul %155, %157, %cst_164 {dimension_numbers = #tpu.dot_dimension_numbers<[1], [0], [0], [1], [0, 0, 1, 1], [], []>} : vector<16x128xbf16>, vector<128x128xbf16>, vector<16x128xf32> -> vector<16x128xf32>
    %c0_165 = arith.constant 0 : index
    %c0_166 = arith.constant 0 : index
    %159 = vector.load %arg7[%c0_165, %c0_166] : memref<1x128xf32, #tpu.memory_space<vmem>>, vector<1x128xf32>
    %160 = vector.broadcast %159 : vector<1x128xf32> to vector<16x128xf32>
    %161 = arith.addf %158, %160 : vector<16x128xf32>
    %162 = vector.shape_cast %161 : vector<16x128xf32> to vector<4x4x128xf32>
    %c0_167 = arith.constant 0 : index
    %c0_168 = arith.constant 0 : index
    %c0_169 = arith.constant 0 : index
    %163 = vector.load %arg13[%c0_167, %c0_168, %c0_169] : memref<4x4x128xf32, #tpu.memory_space<vmem>>, vector<4x4x128xf32>
    %164 = arith.addf %163, %162 : vector<4x4x128xf32>
    %c0_170 = arith.constant 0 : index
    %c0_171 = arith.constant 0 : index
    %c0_172 = arith.constant 0 : index
    %165 = vector.load %arg13[%c0_170, %c0_171, %c0_172] : memref<4x4x128xf32, #tpu.memory_space<vmem>>, vector<4x4x128xf32>
    tpu.vector_store %arg13[%c0_170, %c0_171, %c0_172], %164 {strides = array<i32>} : memref<4x4x128xf32, #tpu.memory_space<vmem>>, vector<4x4x128xf32>,
    %c0_173 = arith.constant 0 : index
    %c0_174 = arith.constant 0 : index
    %c0_175 = arith.constant 0 : index
    %166 = vector.load %arg13[%c0_173, %c0_174, %c0_175] : memref<4x4x128xf32, #tpu.memory_space<vmem>>, vector<4x4x128xf32>
    %cst_176 = arith.constant 0.000000e+00 : f32
    %167 = vector.broadcast %cst_176 : f32 to vector<4x4x128xf32>
    %168 = arith.maximumf %166, %167 : vector<4x4x128xf32>
    %c3_177 = arith.constant 3 : index
    %c3_178 = arith.constant 3 : index
    %c0_179 = arith.constant 0 : index
    %169 = vector.load %arg14[%c3_177, %c3_178, %c0_179] : memref<10x10x128xf32, #tpu.memory_space<vmem>>, vector<4x4x128xf32>
    tpu.vector_store %arg14[%c3_177, %c3_178, %c0_179], %168 {strides = array<i32>} : memref<10x10x128xf32, #tpu.memory_space<vmem>>, vector<4x4x128xf32>,
    %c2_180 = arith.constant 2 : index
    %c2_181 = arith.constant 2 : index
    %c0_182 = arith.constant 0 : index
    %170 = vector.load %arg14[%c2_180, %c2_181, %c0_182] : memref<10x10x128xf32, #tpu.memory_space<vmem>>, vector<4x4x128xf32>
    %171 = vector.shape_cast %170 : vector<4x4x128xf32> to vector<16x128xf32>
    %172 = arith.truncf %171 : vector<16x128xf32> to vector<16x128xbf16>
    %c0_183 = arith.constant 0 : index
    %c0_184 = arith.constant 0 : index
    %c0_185 = arith.constant 0 : index
    %173 = vector.load %arg8[%c0_183, %c0_184, %c0_185] : memref<9x128x128xbf16, #tpu.memory_space<vmem>>, vector<1x128x128xbf16>
    %174 = vector.shape_cast %173 : vector<1x128x128xbf16> to vector<128x128xbf16>
    %cst_186 = arith.constant dense<0.000000e+00> : vector<16x128xf32>
    %175 = tpu.matmul %172, %174, %cst_186 {dimension_numbers = #tpu.dot_dimension_numbers<[1], [0], [0], [1], [0, 0, 1, 1], [], []>} : vector<16x128xbf16>, vector<128x128xbf16>, vector<16x128xf32> -> vector<16x128xf32>
    %c2_187 = arith.constant 2 : index
    %c3_188 = arith.constant 3 : index
    %c0_189 = arith.constant 0 : index
    %176 = vector.load %arg14[%c2_187, %c3_188, %c0_189] : memref<10x10x128xf32, #tpu.memory_space<vmem>>, vector<4x4x128xf32>
    %177 = vector.shape_cast %176 : vector<4x4x128xf32> to vector<16x128xf32>
    %178 = arith.truncf %177 : vector<16x128xf32> to vector<16x128xbf16>
    %c1_190 = arith.constant 1 : index
    %c0_191 = arith.constant 0 : index
    %c0_192 = arith.constant 0 : index
    %179 = vector.load %arg8[%c1_190, %c0_191, %c0_192] : memref<9x128x128xbf16, #tpu.memory_space<vmem>>, vector<1x128x128xbf16>
    %180 = vector.shape_cast %179 : vector<1x128x128xbf16> to vector<128x128xbf16>
    %cst_193 = arith.constant dense<0.000000e+00> : vector<16x128xf32>
    %181 = tpu.matmul %178, %180, %cst_193 {dimension_numbers = #tpu.dot_dimension_numbers<[1], [0], [0], [1], [0, 0, 1, 1], [], []>} : vector<16x128xbf16>, vector<128x128xbf16>, vector<16x128xf32> -> vector<16x128xf32>
    %182 = arith.addf %175, %181 : vector<16x128xf32>
    %c2_194 = arith.constant 2 : index
    %c4_195 = arith.constant 4 : index
    %c0_196 = arith.constant 0 : index
    %183 = vector.load %arg14[%c2_194, %c4_195, %c0_196] : memref<10x10x128xf32, #tpu.memory_space<vmem>>, vector<4x4x128xf32>
    %184 = vector.shape_cast %183 : vector<4x4x128xf32> to vector<16x128xf32>
    %185 = arith.truncf %184 : vector<16x128xf32> to vector<16x128xbf16>
    %c2_197 = arith.constant 2 : index
    %c0_198 = arith.constant 0 : index
    %c0_199 = arith.constant 0 : index
    %186 = vector.load %arg8[%c2_197, %c0_198, %c0_199] : memref<9x128x128xbf16, #tpu.memory_space<vmem>>, vector<1x128x128xbf16>
    %187 = vector.shape_cast %186 : vector<1x128x128xbf16> to vector<128x128xbf16>
    %cst_200 = arith.constant dense<0.000000e+00> : vector<16x128xf32>
    %188 = tpu.matmul %185, %187, %cst_200 {dimension_numbers = #tpu.dot_dimension_numbers<[1], [0], [0], [1], [0, 0, 1, 1], [], []>} : vector<16x128xbf16>, vector<128x128xbf16>, vector<16x128xf32> -> vector<16x128xf32>
    %189 = arith.addf %182, %188 : vector<16x128xf32>
    %c3_201 = arith.constant 3 : index
    %c2_202 = arith.constant 2 : index
    %c0_203 = arith.constant 0 : index
    %190 = vector.load %arg14[%c3_201, %c2_202, %c0_203] : memref<10x10x128xf32, #tpu.memory_space<vmem>>, vector<4x4x128xf32>
    %191 = vector.shape_cast %190 : vector<4x4x128xf32> to vector<16x128xf32>
    %192 = arith.truncf %191 : vector<16x128xf32> to vector<16x128xbf16>
    %c3_204 = arith.constant 3 : index
    %c0_205 = arith.constant 0 : index
    %c0_206 = arith.constant 0 : index
    %193 = vector.load %arg8[%c3_204, %c0_205, %c0_206] : memref<9x128x128xbf16, #tpu.memory_space<vmem>>, vector<1x128x128xbf16>
    %194 = vector.shape_cast %193 : vector<1x128x128xbf16> to vector<128x128xbf16>
    %cst_207 = arith.constant dense<0.000000e+00> : vector<16x128xf32>
    %195 = tpu.matmul %192, %194, %cst_207 {dimension_numbers = #tpu.dot_dimension_numbers<[1], [0], [0], [1], [0, 0, 1, 1], [], []>} : vector<16x128xbf16>, vector<128x128xbf16>, vector<16x128xf32> -> vector<16x128xf32>
    %196 = arith.addf %189, %195 : vector<16x128xf32>
    %c3_208 = arith.constant 3 : index
    %c3_209 = arith.constant 3 : index
    %c0_210 = arith.constant 0 : index
    %197 = vector.load %arg14[%c3_208, %c3_209, %c0_210] : memref<10x10x128xf32, #tpu.memory_space<vmem>>, vector<4x4x128xf32>
    %198 = vector.shape_cast %197 : vector<4x4x128xf32> to vector<16x128xf32>
    %199 = arith.truncf %198 : vector<16x128xf32> to vector<16x128xbf16>
    %c4_211 = arith.constant 4 : index
    %c0_212 = arith.constant 0 : index
    %c0_213 = arith.constant 0 : index
    %200 = vector.load %arg8[%c4_211, %c0_212, %c0_213] : memref<9x128x128xbf16, #tpu.memory_space<vmem>>, vector<1x128x128xbf16>
    %201 = vector.shape_cast %200 : vector<1x128x128xbf16> to vector<128x128xbf16>
    %cst_214 = arith.constant dense<0.000000e+00> : vector<16x128xf32>
    %202 = tpu.matmul %199, %201, %cst_214 {dimension_numbers = #tpu.dot_dimension_numbers<[1], [0], [0], [1], [0, 0, 1, 1], [], []>} : vector<16x128xbf16>, vector<128x128xbf16>, vector<16x128xf32> -> vector<16x128xf32>
    %203 = arith.addf %196, %202 : vector<16x128xf32>
    %c3_215 = arith.constant 3 : index
    %c4_216 = arith.constant 4 : index
    %c0_217 = arith.constant 0 : index
    %204 = vector.load %arg14[%c3_215, %c4_216, %c0_217] : memref<10x10x128xf32, #tpu.memory_space<vmem>>, vector<4x4x128xf32>
    %205 = vector.shape_cast %204 : vector<4x4x128xf32> to vector<16x128xf32>
    %206 = arith.truncf %205 : vector<16x128xf32> to vector<16x128xbf16>
    %c5_218 = arith.constant 5 : index
    %c0_219 = arith.constant 0 : index
    %c0_220 = arith.constant 0 : index
    %207 = vector.load %arg8[%c5_218, %c0_219, %c0_220] : memref<9x128x128xbf16, #tpu.memory_space<vmem>>, vector<1x128x128xbf16>
    %208 = vector.shape_cast %207 : vector<1x128x128xbf16> to vector<128x128xbf16>
    %cst_221 = arith.constant dense<0.000000e+00> : vector<16x128xf32>
    %209 = tpu.matmul %206, %208, %cst_221 {dimension_numbers = #tpu.dot_dimension_numbers<[1], [0], [0], [1], [0, 0, 1, 1], [], []>} : vector<16x128xbf16>, vector<128x128xbf16>, vector<16x128xf32> -> vector<16x128xf32>
    %210 = arith.addf %203, %209 : vector<16x128xf32>
    %c4_222 = arith.constant 4 : index
    %c2_223 = arith.constant 2 : index
    %c0_224 = arith.constant 0 : index
    %211 = vector.load %arg14[%c4_222, %c2_223, %c0_224] : memref<10x10x128xf32, #tpu.memory_space<vmem>>, vector<4x4x128xf32>
    %212 = vector.shape_cast %211 : vector<4x4x128xf32> to vector<16x128xf32>
    %213 = arith.truncf %212 : vector<16x128xf32> to vector<16x128xbf16>
    %c6_225 = arith.constant 6 : index
    %c0_226 = arith.constant 0 : index
    %c0_227 = arith.constant 0 : index
    %214 = vector.load %arg8[%c6_225, %c0_226, %c0_227] : memref<9x128x128xbf16, #tpu.memory_space<vmem>>, vector<1x128x128xbf16>
    %215 = vector.shape_cast %214 : vector<1x128x128xbf16> to vector<128x128xbf16>
    %cst_228 = arith.constant dense<0.000000e+00> : vector<16x128xf32>
    %216 = tpu.matmul %213, %215, %cst_228 {dimension_numbers = #tpu.dot_dimension_numbers<[1], [0], [0], [1], [0, 0, 1, 1], [], []>} : vector<16x128xbf16>, vector<128x128xbf16>, vector<16x128xf32> -> vector<16x128xf32>
    %217 = arith.addf %210, %216 : vector<16x128xf32>
    %c4_229 = arith.constant 4 : index
    %c3_230 = arith.constant 3 : index
    %c0_231 = arith.constant 0 : index
    %218 = vector.load %arg14[%c4_229, %c3_230, %c0_231] : memref<10x10x128xf32, #tpu.memory_space<vmem>>, vector<4x4x128xf32>
    %219 = vector.shape_cast %218 : vector<4x4x128xf32> to vector<16x128xf32>
    %220 = arith.truncf %219 : vector<16x128xf32> to vector<16x128xbf16>
    %c7_232 = arith.constant 7 : index
    %c0_233 = arith.constant 0 : index
    %c0_234 = arith.constant 0 : index
    %221 = vector.load %arg8[%c7_232, %c0_233, %c0_234] : memref<9x128x128xbf16, #tpu.memory_space<vmem>>, vector<1x128x128xbf16>
    %222 = vector.shape_cast %221 : vector<1x128x128xbf16> to vector<128x128xbf16>
    %cst_235 = arith.constant dense<0.000000e+00> : vector<16x128xf32>
    %223 = tpu.matmul %220, %222, %cst_235 {dimension_numbers = #tpu.dot_dimension_numbers<[1], [0], [0], [1], [0, 0, 1, 1], [], []>} : vector<16x128xbf16>, vector<128x128xbf16>, vector<16x128xf32> -> vector<16x128xf32>
    %224 = arith.addf %217, %223 : vector<16x128xf32>
    %c4_236 = arith.constant 4 : index
    %c4_237 = arith.constant 4 : index
    %c0_238 = arith.constant 0 : index
    %225 = vector.load %arg14[%c4_236, %c4_237, %c0_238] : memref<10x10x128xf32, #tpu.memory_space<vmem>>, vector<4x4x128xf32>
    %226 = vector.shape_cast %225 : vector<4x4x128xf32> to vector<16x128xf32>
    %227 = arith.truncf %226 : vector<16x128xf32> to vector<16x128xbf16>
    %c8_239 = arith.constant 8 : index
    %c0_240 = arith.constant 0 : index
    %c0_241 = arith.constant 0 : index
    %228 = vector.load %arg8[%c8_239, %c0_240, %c0_241] : memref<9x128x128xbf16, #tpu.memory_space<vmem>>, vector<1x128x128xbf16>
    %229 = vector.shape_cast %228 : vector<1x128x128xbf16> to vector<128x128xbf16>
    %cst_242 = arith.constant dense<0.000000e+00> : vector<16x128xf32>
    %230 = tpu.matmul %227, %229, %cst_242 {dimension_numbers = #tpu.dot_dimension_numbers<[1], [0], [0], [1], [0, 0, 1, 1], [], []>} : vector<16x128xbf16>, vector<128x128xbf16>, vector<16x128xf32> -> vector<16x128xf32>
    %231 = arith.addf %224, %230 : vector<16x128xf32>
    %c0_243 = arith.constant 0 : index
    %c0_244 = arith.constant 0 : index
    %232 = vector.load %arg9[%c0_243, %c0_244] : memref<1x128xf32, #tpu.memory_space<vmem>>, vector<1x128xf32>
    %233 = vector.broadcast %232 : vector<1x128xf32> to vector<16x128xf32>
    %234 = arith.addf %231, %233 : vector<16x128xf32>
    %235 = vector.shape_cast %234 : vector<16x128xf32> to vector<4x4x128xf32>
    %cst_245 = arith.constant 0.000000e+00 : f32
    %236 = vector.broadcast %cst_245 : f32 to vector<4x4x128xf32>
    %237 = arith.maximumf %235, %236 : vector<4x4x128xf32>
    %238 = vector.shape_cast %237 : vector<4x4x128xf32> to vector<16x128xf32>
    %239 = arith.truncf %238 : vector<16x128xf32> to vector<16x128xbf16>
    %c0_246 = arith.constant 0 : index
    %c0_247 = arith.constant 0 : index
    %c0_248 = arith.constant 0 : index
    %240 = vector.load %arg10[%c0_246, %c0_247, %c0_248] : memref<1x128x128xbf16, #tpu.memory_space<vmem>>, vector<1x128x128xbf16>
    %241 = vector.shape_cast %240 : vector<1x128x128xbf16> to vector<128x128xbf16>
    %cst_249 = arith.constant dense<0.000000e+00> : vector<16x128xf32>
    %242 = tpu.matmul %239, %241, %cst_249 {dimension_numbers = #tpu.dot_dimension_numbers<[1], [0], [0], [1], [0, 0, 1, 1], [], []>} : vector<16x128xbf16>, vector<128x128xbf16>, vector<16x128xf32> -> vector<16x128xf32>
    %c0_250 = arith.constant 0 : index
    %c0_251 = arith.constant 0 : index
    %243 = vector.load %arg11[%c0_250, %c0_251] : memref<1x128xf32, #tpu.memory_space<vmem>>, vector<1x128xf32>
    %244 = vector.broadcast %243 : vector<1x128xf32> to vector<16x128xf32>
    %245 = arith.addf %242, %244 : vector<16x128xf32>
    %246 = vector.shape_cast %245 : vector<16x128xf32> to vector<4x4x128xf32>
    %c0_252 = arith.constant 0 : index
    %c0_253 = arith.constant 0 : index
    %c0_254 = arith.constant 0 : index
    %247 = vector.load %arg13[%c0_252, %c0_253, %c0_254] : memref<4x4x128xf32, #tpu.memory_space<vmem>>, vector<4x4x128xf32>
    %248 = arith.addf %247, %246 : vector<4x4x128xf32>
    %c0_255 = arith.constant 0 : index
    %c0_256 = arith.constant 0 : index
    %c0_257 = arith.constant 0 : index
    %249 = vector.load %arg13[%c0_255, %c0_256, %c0_257] : memref<4x4x128xf32, #tpu.memory_space<vmem>>, vector<4x4x128xf32>
    tpu.vector_store %arg13[%c0_255, %c0_256, %c0_257], %248 {strides = array<i32>} : memref<4x4x128xf32, #tpu.memory_space<vmem>>, vector<4x4x128xf32>,
    %c0_258 = arith.constant 0 : index
    %c0_259 = arith.constant 0 : index
    %c0_260 = arith.constant 0 : index
    %250 = vector.load %arg13[%c0_258, %c0_259, %c0_260] : memref<4x4x128xf32, #tpu.memory_space<vmem>>, vector<4x4x128xf32>
    %251 = arith.truncf %250 : vector<4x4x128xf32> to vector<4x4x128xbf16>
    %c0_261 = arith.constant 0 : index
    %c0_262 = arith.constant 0 : index
    %c0_263 = arith.constant 0 : index
    %c0_264 = arith.constant 0 : index
    %252 = vector.load %arg12[%c0_261, %c0_262, %c0_263, %c0_264] : memref<1x4x4x128xbf16, #tpu.memory_space<vmem>>, vector<1x4x4x128xbf16>
    %253 = vector.shape_cast %252 : vector<1x4x4x128xbf16> to vector<4x4x128xbf16>
    %254 = vector.shape_cast %251 : vector<4x4x128xbf16> to vector<1x4x4x128xbf16>
    tpu.vector_store %arg12[%c0_261, %c0_262, %c0_263, %c0_264], %254 {strides = array<i32>} : memref<1x4x4x128xbf16, #tpu.memory_space<vmem>>, vector<1x4x4x128xbf16>,
    return
  }
  func.func @transform_0(%arg0: i32) -> (i32, i32, i32, i32) {
    %c0_i32 = arith.constant 0 : i32
    %c0_i32_0 = arith.constant 0 : i32
    %c0_i32_1 = arith.constant 0 : i32
    %c0_i32_2 = arith.constant 0 : i32
    return %arg0, %c0_i32, %c0_i32_0, %c0_i32_1 : i32, i32, i32, i32
  }
  func.func @transform_1(%arg0: i32) -> (i32, i32, i32) {
    %c0_i32 = arith.constant 0 : i32
    %c0_i32_0 = arith.constant 0 : i32
    %c0_i32_1 = arith.constant 0 : i32
    %c0_i32_2 = arith.constant 0 : i32
    return %c0_i32, %c0_i32_0, %c0_i32_1 : i32, i32, i32
  }
  func.func @transform_2(%arg0: i32) -> (i32, i32) {
    %c0_i32 = arith.constant 0 : i32
    %c0_i32_0 = arith.constant 0 : i32
    %c0_i32_1 = arith.constant 0 : i32
    return %c0_i32, %c0_i32_0 : i32, i32
  }
  func.func @transform_3(%arg0: i32) -> (i32, i32, i32) {
    %c0_i32 = arith.constant 0 : i32
    %c0_i32_0 = arith.constant 0 : i32
    %c0_i32_1 = arith.constant 0 : i32
    %c0_i32_2 = arith.constant 0 : i32
    return %c0_i32, %c0_i32_0, %c0_i32_1 : i32, i32, i32
  }
  func.func @transform_4(%arg0: i32) -> (i32, i32) {
    %c0_i32 = arith.constant 0 : i32
    %c0_i32_0 = arith.constant 0 : i32
    %c0_i32_1 = arith.constant 0 : i32
    return %c0_i32, %c0_i32_0 : i32, i32
  }
  func.func @transform_5(%arg0: i32) -> (i32, i32, i32) {
    %c0_i32 = arith.constant 0 : i32
    %c0_i32_0 = arith.constant 0 : i32
    %c0_i32_1 = arith.constant 0 : i32
    %c0_i32_2 = arith.constant 0 : i32
    return %c0_i32, %c0_i32_0, %c0_i32_1 : i32, i32, i32
  }
  func.func @transform_6(%arg0: i32) -> (i32, i32) {
    %c0_i32 = arith.constant 0 : i32
    %c0_i32_0 = arith.constant 0 : i32
    %c0_i32_1 = arith.constant 0 : i32
    return %c0_i32, %c0_i32_0 : i32, i32
  }
  func.func @transform_7(%arg0: i32) -> (i32, i32, i32) {
    %c0_i32 = arith.constant 0 : i32
    %c0_i32_0 = arith.constant 0 : i32
    %c0_i32_1 = arith.constant 0 : i32
    %c0_i32_2 = arith.constant 0 : i32
    return %c0_i32, %c0_i32_0, %c0_i32_1 : i32, i32, i32
  }
  func.func @transform_8(%arg0: i32) -> (i32, i32) {
    %c0_i32 = arith.constant 0 : i32
    %c0_i32_0 = arith.constant 0 : i32
    %c0_i32_1 = arith.constant 0 : i32
    return %c0_i32, %c0_i32_0 : i32, i32
  }
  func.func @transform_9(%arg0: i32) -> (i32, i32, i32) {
    %c0_i32 = arith.constant 0 : i32
    %c0_i32_0 = arith.constant 0 : i32
    %c0_i32_1 = arith.constant 0 : i32
    %c0_i32_2 = arith.constant 0 : i32
    return %c0_i32, %c0_i32_0, %c0_i32_1 : i32, i32, i32
  }
  func.func @transform_10(%arg0: i32) -> (i32, i32) {
    %c0_i32 = arith.constant 0 : i32
    %c0_i32_0 = arith.constant 0 : i32
    %c0_i32_1 = arith.constant 0 : i32
    return %c0_i32, %c0_i32_0 : i32, i32
  }
  func.func @transform_11(%arg0: i32) -> (i32, i32, i32, i32) {
    %c0_i32 = arith.constant 0 : i32
    %c0_i32_0 = arith.constant 0 : i32
    %c0_i32_1 = arith.constant 0 : i32
    %c0_i32_2 = arith.constant 0 : i32
    return %arg0, %c0_i32, %c0_i32_0, %c0_i32_1 : i32, i32, i32, i32
  }
}

module attributes {stable_mosaic.version = 11 : i64} {
  func.func @kernel(%arg0: i32, %arg1: memref<1x4x4x128xbf16, #tpu.memory_space<vmem>>, %arg2: memref<8x4xbf16, #tpu.memory_space<vmem>>, %arg3: memref<9x128x128xbf16, #tpu.memory_space<vmem>>, %arg4: memref<1x128xf32, #tpu.memory_space<vmem>>, %arg5: memref<9x128x128xbf16, #tpu.memory_space<vmem>>, %arg6: memref<1x128xf32, #tpu.memory_space<vmem>>, %arg7: memref<1x128x128xbf16, #tpu.memory_space<vmem>>, %arg8: memref<1x128xf32, #tpu.memory_space<vmem>>, %arg9: memref<9x128x128xbf16, #tpu.memory_space<vmem>>, %arg10: memref<1x128xf32, #tpu.memory_space<vmem>>, %arg11: memref<1x128x128xbf16, #tpu.memory_space<vmem>>, %arg12: memref<1x128xf32, #tpu.memory_space<vmem>>, %arg13: memref<1x8x8x128xbf16, #tpu.memory_space<vmem>>, %arg14: memref<8x8x128xf32, #tpu.memory_space<vmem>>, %arg15: memref<14x14x128xf32, #tpu.memory_space<vmem>>) attributes {dimension_semantics = [#tpu.dimension_semantics<parallel>], iteration_bounds = array<i64: 2>, scalar_prefetch = 0 : i64, scratch_operands = 2 : i64, tpu.core_type = #tpu.core_type<tc>, window_params = [{transform_indices = @transform_0, window_bounds = array<i64: 1, 4, 4, 128>}, {pipeline_mode = #tpu.pipeline_mode<synchronous>, transform_indices = @transform_1, window_bounds = array<i64: 8, 4>}, {pipeline_mode = #tpu.pipeline_mode<synchronous>, transform_indices = @transform_2, window_bounds = array<i64: 9, 128, 128>}, {pipeline_mode = #tpu.pipeline_mode<synchronous>, transform_indices = @transform_3, window_bounds = array<i64: 1, 128>}, {pipeline_mode = #tpu.pipeline_mode<synchronous>, transform_indices = @transform_4, window_bounds = array<i64: 9, 128, 128>}, {pipeline_mode = #tpu.pipeline_mode<synchronous>, transform_indices = @transform_5, window_bounds = array<i64: 1, 128>}, {pipeline_mode = #tpu.pipeline_mode<synchronous>, transform_indices = @transform_6, window_bounds = array<i64: 1, 128, 128>}, {pipeline_mode = #tpu.pipeline_mode<synchronous>, transform_indices = @transform_7, window_bounds = array<i64: 1, 128>}, {pipeline_mode = #tpu.pipeline_mode<synchronous>, transform_indices = @transform_8, window_bounds = array<i64: 9, 128, 128>}, {pipeline_mode = #tpu.pipeline_mode<synchronous>, transform_indices = @transform_9, window_bounds = array<i64: 1, 128>}, {pipeline_mode = #tpu.pipeline_mode<synchronous>, transform_indices = @transform_10, window_bounds = array<i64: 1, 128, 128>}, {pipeline_mode = #tpu.pipeline_mode<synchronous>, transform_indices = @transform_11, window_bounds = array<i64: 1, 128>}, {transform_indices = @transform_12, window_bounds = array<i64: 1, 8, 8, 128>}]} {
    %cst = arith.constant 0.000000e+00 : f32
    %0 = vector.broadcast %cst : f32 to vector<3x14x128xf32>
    %c0 = arith.constant 0 : index
    %c0_0 = arith.constant 0 : index
    %c0_1 = arith.constant 0 : index
    %1 = vector.load %arg15[%c0, %c0_0, %c0_1] : memref<14x14x128xf32, #tpu.memory_space<vmem>>, vector<3x14x128xf32>
    tpu.vector_store %arg15[%c0, %c0_0, %c0_1], %0 {strides = array<i32>} : memref<14x14x128xf32, #tpu.memory_space<vmem>>, vector<3x14x128xf32>,
    %cst_2 = arith.constant 0.000000e+00 : f32
    %2 = vector.broadcast %cst_2 : f32 to vector<3x14x128xf32>
    %c11 = arith.constant 11 : index
    %c0_3 = arith.constant 0 : index
    %c0_4 = arith.constant 0 : index
    %3 = vector.load %arg15[%c11, %c0_3, %c0_4] : memref<14x14x128xf32, #tpu.memory_space<vmem>>, vector<3x14x128xf32>
    tpu.vector_store %arg15[%c11, %c0_3, %c0_4], %2 {strides = array<i32>} : memref<14x14x128xf32, #tpu.memory_space<vmem>>, vector<3x14x128xf32>,
    %cst_5 = arith.constant 0.000000e+00 : f32
    %4 = vector.broadcast %cst_5 : f32 to vector<14x3x128xf32>
    %c0_6 = arith.constant 0 : index
    %c0_7 = arith.constant 0 : index
    %c0_8 = arith.constant 0 : index
    %5 = vector.load %arg15[%c0_6, %c0_7, %c0_8] : memref<14x14x128xf32, #tpu.memory_space<vmem>>, vector<14x3x128xf32>
    tpu.vector_store %arg15[%c0_6, %c0_7, %c0_8], %4 {strides = array<i32>} : memref<14x14x128xf32, #tpu.memory_space<vmem>>, vector<14x3x128xf32>,
    %cst_9 = arith.constant 0.000000e+00 : f32
    %6 = vector.broadcast %cst_9 : f32 to vector<14x3x128xf32>
    %c0_10 = arith.constant 0 : index
    %c11_11 = arith.constant 11 : index
    %c0_12 = arith.constant 0 : index
    %7 = vector.load %arg15[%c0_10, %c11_11, %c0_12] : memref<14x14x128xf32, #tpu.memory_space<vmem>>, vector<14x3x128xf32>
    tpu.vector_store %arg15[%c0_10, %c11_11, %c0_12], %6 {strides = array<i32>} : memref<14x14x128xf32, #tpu.memory_space<vmem>>, vector<14x3x128xf32>,
    %c0_13 = arith.constant 0 : index
    %c0_14 = arith.constant 0 : index
    %c0_15 = arith.constant 0 : index
    %c0_16 = arith.constant 0 : index
    %8 = vector.load %arg1[%c0_13, %c0_14, %c0_15, %c0_16] : memref<1x4x4x128xbf16, #tpu.memory_space<vmem>>, vector<1x4x4x128xbf16>
    %9 = vector.shape_cast %8 : vector<1x4x4x128xbf16> to vector<4x4x128xbf16>
    %10 = arith.extf %9 : vector<4x4x128xbf16> to vector<4x4x128xf32>
    %11 = vector.shape_cast %10 : vector<4x4x128xf32> to vector<4x1x4x128xf32>
    %12 = vector.shape_cast %11 : vector<4x1x4x128xf32> to vector<4x1x4x128xf32>
    %13 = vector.broadcast %12 : vector<4x1x4x128xf32> to vector<4x2x4x128xf32>
    %14 = vector.shape_cast %13 : vector<4x2x4x128xf32> to vector<8x4x128xf32>
    %15 = arith.truncf %14 : vector<8x4x128xf32> to vector<8x4x128xbf16>
    %c0_17 = arith.constant 0 : index
    %c0_18 = arith.constant 0 : index
    %16 = vector.load %arg2[%c0_17, %c0_18] : memref<8x4xbf16, #tpu.memory_space<vmem>>, vector<8x4xbf16>
    %17 = vector.shape_cast %16 : vector<8x4xbf16> to vector<1x8x4xbf16>
    %18 = vector.shape_cast %17 : vector<1x8x4xbf16> to vector<1x8x4xbf16>
    %19 = vector.broadcast %18 : vector<1x8x4xbf16> to vector<8x8x4xbf16>
    %cst_19 = arith.constant dense<0.000000e+00> : vector<8x8x128xf32>
    %20 = tpu.matmul %19, %15, %cst_19 {dimension_numbers = #tpu.dot_dimension_numbers<[2], [1], [1], [2], [0, 0, 0, 1, 1, 2], [0], [0]>} : vector<8x8x4xbf16>, vector<8x4x128xbf16>, vector<8x8x128xf32> -> vector<8x8x128xf32>
    %c0_20 = arith.constant 0 : index
    %c0_21 = arith.constant 0 : index
    %c0_22 = arith.constant 0 : index
    %21 = vector.load %arg14[%c0_20, %c0_21, %c0_22] : memref<8x8x128xf32, #tpu.memory_space<vmem>>, vector<8x8x128xf32>
    tpu.vector_store %arg14[%c0_20, %c0_21, %c0_22], %20 {strides = array<i32>} : memref<8x8x128xf32, #tpu.memory_space<vmem>>, vector<8x8x128xf32>,
    %c0_23 = arith.constant 0 : index
    %c0_24 = arith.constant 0 : index
    %c0_25 = arith.constant 0 : index
    %22 = vector.load %arg14[%c0_23, %c0_24, %c0_25] : memref<8x8x128xf32, #tpu.memory_space<vmem>>, vector<8x8x128xf32>
    %c3 = arith.constant 3 : index
    %c3_26 = arith.constant 3 : index
    %c0_27 = arith.constant 0 : index
    %23 = vector.load %arg15[%c3, %c3_26, %c0_27] : memref<14x14x128xf32, #tpu.memory_space<vmem>>, vector<8x8x128xf32>
    tpu.vector_store %arg15[%c3, %c3_26, %c0_27], %22 {strides = array<i32>} : memref<14x14x128xf32, #tpu.memory_space<vmem>>, vector<8x8x128xf32>,
    %c2 = arith.constant 2 : index
    %c2_28 = arith.constant 2 : index
    %c0_29 = arith.constant 0 : index
    %24 = vector.load %arg15[%c2, %c2_28, %c0_29] : memref<14x14x128xf32, #tpu.memory_space<vmem>>, vector<8x8x128xf32>
    %25 = vector.shape_cast %24 : vector<8x8x128xf32> to vector<64x128xf32>
    %26 = arith.truncf %25 : vector<64x128xf32> to vector<64x128xbf16>
    %c0_30 = arith.constant 0 : index
    %c0_31 = arith.constant 0 : index
    %c0_32 = arith.constant 0 : index
    %27 = vector.load %arg3[%c0_30, %c0_31, %c0_32] : memref<9x128x128xbf16, #tpu.memory_space<vmem>>, vector<1x128x128xbf16>
    %28 = vector.shape_cast %27 : vector<1x128x128xbf16> to vector<128x128xbf16>
    %cst_33 = arith.constant dense<0.000000e+00> : vector<64x128xf32>
    %29 = tpu.matmul %26, %28, %cst_33 {dimension_numbers = #tpu.dot_dimension_numbers<[1], [0], [0], [1], [0, 0, 1, 1], [], []>} : vector<64x128xbf16>, vector<128x128xbf16>, vector<64x128xf32> -> vector<64x128xf32>
    %c2_34 = arith.constant 2 : index
    %c3_35 = arith.constant 3 : index
    %c0_36 = arith.constant 0 : index
    %30 = vector.load %arg15[%c2_34, %c3_35, %c0_36] : memref<14x14x128xf32, #tpu.memory_space<vmem>>, vector<8x8x128xf32>
    %31 = vector.shape_cast %30 : vector<8x8x128xf32> to vector<64x128xf32>
    %32 = arith.truncf %31 : vector<64x128xf32> to vector<64x128xbf16>
    %c1 = arith.constant 1 : index
    %c0_37 = arith.constant 0 : index
    %c0_38 = arith.constant 0 : index
    %33 = vector.load %arg3[%c1, %c0_37, %c0_38] : memref<9x128x128xbf16, #tpu.memory_space<vmem>>, vector<1x128x128xbf16>
    %34 = vector.shape_cast %33 : vector<1x128x128xbf16> to vector<128x128xbf16>
    %cst_39 = arith.constant dense<0.000000e+00> : vector<64x128xf32>
    %35 = tpu.matmul %32, %34, %cst_39 {dimension_numbers = #tpu.dot_dimension_numbers<[1], [0], [0], [1], [0, 0, 1, 1], [], []>} : vector<64x128xbf16>, vector<128x128xbf16>, vector<64x128xf32> -> vector<64x128xf32>
    %36 = arith.addf %29, %35 : vector<64x128xf32>
    %c2_40 = arith.constant 2 : index
    %c4 = arith.constant 4 : index
    %c0_41 = arith.constant 0 : index
    %37 = vector.load %arg15[%c2_40, %c4, %c0_41] : memref<14x14x128xf32, #tpu.memory_space<vmem>>, vector<8x8x128xf32>
    %38 = vector.shape_cast %37 : vector<8x8x128xf32> to vector<64x128xf32>
    %39 = arith.truncf %38 : vector<64x128xf32> to vector<64x128xbf16>
    %c2_42 = arith.constant 2 : index
    %c0_43 = arith.constant 0 : index
    %c0_44 = arith.constant 0 : index
    %40 = vector.load %arg3[%c2_42, %c0_43, %c0_44] : memref<9x128x128xbf16, #tpu.memory_space<vmem>>, vector<1x128x128xbf16>
    %41 = vector.shape_cast %40 : vector<1x128x128xbf16> to vector<128x128xbf16>
    %cst_45 = arith.constant dense<0.000000e+00> : vector<64x128xf32>
    %42 = tpu.matmul %39, %41, %cst_45 {dimension_numbers = #tpu.dot_dimension_numbers<[1], [0], [0], [1], [0, 0, 1, 1], [], []>} : vector<64x128xbf16>, vector<128x128xbf16>, vector<64x128xf32> -> vector<64x128xf32>
    %43 = arith.addf %36, %42 : vector<64x128xf32>
    %c3_46 = arith.constant 3 : index
    %c2_47 = arith.constant 2 : index
    %c0_48 = arith.constant 0 : index
    %44 = vector.load %arg15[%c3_46, %c2_47, %c0_48] : memref<14x14x128xf32, #tpu.memory_space<vmem>>, vector<8x8x128xf32>
    %45 = vector.shape_cast %44 : vector<8x8x128xf32> to vector<64x128xf32>
    %46 = arith.truncf %45 : vector<64x128xf32> to vector<64x128xbf16>
    %c3_49 = arith.constant 3 : index
    %c0_50 = arith.constant 0 : index
    %c0_51 = arith.constant 0 : index
    %47 = vector.load %arg3[%c3_49, %c0_50, %c0_51] : memref<9x128x128xbf16, #tpu.memory_space<vmem>>, vector<1x128x128xbf16>
    %48 = vector.shape_cast %47 : vector<1x128x128xbf16> to vector<128x128xbf16>
    %cst_52 = arith.constant dense<0.000000e+00> : vector<64x128xf32>
    %49 = tpu.matmul %46, %48, %cst_52 {dimension_numbers = #tpu.dot_dimension_numbers<[1], [0], [0], [1], [0, 0, 1, 1], [], []>} : vector<64x128xbf16>, vector<128x128xbf16>, vector<64x128xf32> -> vector<64x128xf32>
    %50 = arith.addf %43, %49 : vector<64x128xf32>
    %c3_53 = arith.constant 3 : index
    %c3_54 = arith.constant 3 : index
    %c0_55 = arith.constant 0 : index
    %51 = vector.load %arg15[%c3_53, %c3_54, %c0_55] : memref<14x14x128xf32, #tpu.memory_space<vmem>>, vector<8x8x128xf32>
    %52 = vector.shape_cast %51 : vector<8x8x128xf32> to vector<64x128xf32>
    %53 = arith.truncf %52 : vector<64x128xf32> to vector<64x128xbf16>
    %c4_56 = arith.constant 4 : index
    %c0_57 = arith.constant 0 : index
    %c0_58 = arith.constant 0 : index
    %54 = vector.load %arg3[%c4_56, %c0_57, %c0_58] : memref<9x128x128xbf16, #tpu.memory_space<vmem>>, vector<1x128x128xbf16>
    %55 = vector.shape_cast %54 : vector<1x128x128xbf16> to vector<128x128xbf16>
    %cst_59 = arith.constant dense<0.000000e+00> : vector<64x128xf32>
    %56 = tpu.matmul %53, %55, %cst_59 {dimension_numbers = #tpu.dot_dimension_numbers<[1], [0], [0], [1], [0, 0, 1, 1], [], []>} : vector<64x128xbf16>, vector<128x128xbf16>, vector<64x128xf32> -> vector<64x128xf32>
    %57 = arith.addf %50, %56 : vector<64x128xf32>
    %c3_60 = arith.constant 3 : index
    %c4_61 = arith.constant 4 : index
    %c0_62 = arith.constant 0 : index
    %58 = vector.load %arg15[%c3_60, %c4_61, %c0_62] : memref<14x14x128xf32, #tpu.memory_space<vmem>>, vector<8x8x128xf32>
    %59 = vector.shape_cast %58 : vector<8x8x128xf32> to vector<64x128xf32>
    %60 = arith.truncf %59 : vector<64x128xf32> to vector<64x128xbf16>
    %c5 = arith.constant 5 : index
    %c0_63 = arith.constant 0 : index
    %c0_64 = arith.constant 0 : index
    %61 = vector.load %arg3[%c5, %c0_63, %c0_64] : memref<9x128x128xbf16, #tpu.memory_space<vmem>>, vector<1x128x128xbf16>
    %62 = vector.shape_cast %61 : vector<1x128x128xbf16> to vector<128x128xbf16>
    %cst_65 = arith.constant dense<0.000000e+00> : vector<64x128xf32>
    %63 = tpu.matmul %60, %62, %cst_65 {dimension_numbers = #tpu.dot_dimension_numbers<[1], [0], [0], [1], [0, 0, 1, 1], [], []>} : vector<64x128xbf16>, vector<128x128xbf16>, vector<64x128xf32> -> vector<64x128xf32>
    %64 = arith.addf %57, %63 : vector<64x128xf32>
    %c4_66 = arith.constant 4 : index
    %c2_67 = arith.constant 2 : index
    %c0_68 = arith.constant 0 : index
    %65 = vector.load %arg15[%c4_66, %c2_67, %c0_68] : memref<14x14x128xf32, #tpu.memory_space<vmem>>, vector<8x8x128xf32>
    %66 = vector.shape_cast %65 : vector<8x8x128xf32> to vector<64x128xf32>
    %67 = arith.truncf %66 : vector<64x128xf32> to vector<64x128xbf16>
    %c6 = arith.constant 6 : index
    %c0_69 = arith.constant 0 : index
    %c0_70 = arith.constant 0 : index
    %68 = vector.load %arg3[%c6, %c0_69, %c0_70] : memref<9x128x128xbf16, #tpu.memory_space<vmem>>, vector<1x128x128xbf16>
    %69 = vector.shape_cast %68 : vector<1x128x128xbf16> to vector<128x128xbf16>
    %cst_71 = arith.constant dense<0.000000e+00> : vector<64x128xf32>
    %70 = tpu.matmul %67, %69, %cst_71 {dimension_numbers = #tpu.dot_dimension_numbers<[1], [0], [0], [1], [0, 0, 1, 1], [], []>} : vector<64x128xbf16>, vector<128x128xbf16>, vector<64x128xf32> -> vector<64x128xf32>
    %71 = arith.addf %64, %70 : vector<64x128xf32>
    %c4_72 = arith.constant 4 : index
    %c3_73 = arith.constant 3 : index
    %c0_74 = arith.constant 0 : index
    %72 = vector.load %arg15[%c4_72, %c3_73, %c0_74] : memref<14x14x128xf32, #tpu.memory_space<vmem>>, vector<8x8x128xf32>
    %73 = vector.shape_cast %72 : vector<8x8x128xf32> to vector<64x128xf32>
    %74 = arith.truncf %73 : vector<64x128xf32> to vector<64x128xbf16>
    %c7 = arith.constant 7 : index
    %c0_75 = arith.constant 0 : index
    %c0_76 = arith.constant 0 : index
    %75 = vector.load %arg3[%c7, %c0_75, %c0_76] : memref<9x128x128xbf16, #tpu.memory_space<vmem>>, vector<1x128x128xbf16>
    %76 = vector.shape_cast %75 : vector<1x128x128xbf16> to vector<128x128xbf16>
    %cst_77 = arith.constant dense<0.000000e+00> : vector<64x128xf32>
    %77 = tpu.matmul %74, %76, %cst_77 {dimension_numbers = #tpu.dot_dimension_numbers<[1], [0], [0], [1], [0, 0, 1, 1], [], []>} : vector<64x128xbf16>, vector<128x128xbf16>, vector<64x128xf32> -> vector<64x128xf32>
    %78 = arith.addf %71, %77 : vector<64x128xf32>
    %c4_78 = arith.constant 4 : index
    %c4_79 = arith.constant 4 : index
    %c0_80 = arith.constant 0 : index
    %79 = vector.load %arg15[%c4_78, %c4_79, %c0_80] : memref<14x14x128xf32, #tpu.memory_space<vmem>>, vector<8x8x128xf32>
    %80 = vector.shape_cast %79 : vector<8x8x128xf32> to vector<64x128xf32>
    %81 = arith.truncf %80 : vector<64x128xf32> to vector<64x128xbf16>
    %c8 = arith.constant 8 : index
    %c0_81 = arith.constant 0 : index
    %c0_82 = arith.constant 0 : index
    %82 = vector.load %arg3[%c8, %c0_81, %c0_82] : memref<9x128x128xbf16, #tpu.memory_space<vmem>>, vector<1x128x128xbf16>
    %83 = vector.shape_cast %82 : vector<1x128x128xbf16> to vector<128x128xbf16>
    %cst_83 = arith.constant dense<0.000000e+00> : vector<64x128xf32>
    %84 = tpu.matmul %81, %83, %cst_83 {dimension_numbers = #tpu.dot_dimension_numbers<[1], [0], [0], [1], [0, 0, 1, 1], [], []>} : vector<64x128xbf16>, vector<128x128xbf16>, vector<64x128xf32> -> vector<64x128xf32>
    %85 = arith.addf %78, %84 : vector<64x128xf32>
    %c0_84 = arith.constant 0 : index
    %c0_85 = arith.constant 0 : index
    %86 = vector.load %arg4[%c0_84, %c0_85] : memref<1x128xf32, #tpu.memory_space<vmem>>, vector<1x128xf32>
    %87 = vector.broadcast %86 : vector<1x128xf32> to vector<64x128xf32>
    %88 = arith.addf %85, %87 : vector<64x128xf32>
    %89 = vector.shape_cast %88 : vector<64x128xf32> to vector<8x8x128xf32>
    %c0_86 = arith.constant 0 : index
    %c0_87 = arith.constant 0 : index
    %c0_88 = arith.constant 0 : index
    %90 = vector.load %arg14[%c0_86, %c0_87, %c0_88] : memref<8x8x128xf32, #tpu.memory_space<vmem>>, vector<8x8x128xf32>
    tpu.vector_store %arg14[%c0_86, %c0_87, %c0_88], %89 {strides = array<i32>} : memref<8x8x128xf32, #tpu.memory_space<vmem>>, vector<8x8x128xf32>,
    %c0_89 = arith.constant 0 : index
    %c0_90 = arith.constant 0 : index
    %c0_91 = arith.constant 0 : index
    %91 = vector.load %arg14[%c0_89, %c0_90, %c0_91] : memref<8x8x128xf32, #tpu.memory_space<vmem>>, vector<8x8x128xf32>
    %cst_92 = arith.constant 0.000000e+00 : f32
    %92 = vector.broadcast %cst_92 : f32 to vector<8x8x128xf32>
    %93 = arith.maximumf %91, %92 : vector<8x8x128xf32>
    %c3_93 = arith.constant 3 : index
    %c3_94 = arith.constant 3 : index
    %c0_95 = arith.constant 0 : index
    %94 = vector.load %arg15[%c3_93, %c3_94, %c0_95] : memref<14x14x128xf32, #tpu.memory_space<vmem>>, vector<8x8x128xf32>
    tpu.vector_store %arg15[%c3_93, %c3_94, %c0_95], %93 {strides = array<i32>} : memref<14x14x128xf32, #tpu.memory_space<vmem>>, vector<8x8x128xf32>,
    %c0_96 = arith.constant 0 : index
    %c0_97 = arith.constant 0 : index
    %c0_98 = arith.constant 0 : index
    %95 = vector.load %arg15[%c0_96, %c0_97, %c0_98] : memref<14x14x128xf32, #tpu.memory_space<vmem>>, vector<8x8x128xf32>
    %96 = vector.shape_cast %95 : vector<8x8x128xf32> to vector<64x128xf32>
    %97 = arith.truncf %96 : vector<64x128xf32> to vector<64x128xbf16>
    %c0_99 = arith.constant 0 : index
    %c0_100 = arith.constant 0 : index
    %c0_101 = arith.constant 0 : index
    %98 = vector.load %arg5[%c0_99, %c0_100, %c0_101] : memref<9x128x128xbf16, #tpu.memory_space<vmem>>, vector<1x128x128xbf16>
    %99 = vector.shape_cast %98 : vector<1x128x128xbf16> to vector<128x128xbf16>
    %cst_102 = arith.constant dense<0.000000e+00> : vector<64x128xf32>
    %100 = tpu.matmul %97, %99, %cst_102 {dimension_numbers = #tpu.dot_dimension_numbers<[1], [0], [0], [1], [0, 0, 1, 1], [], []>} : vector<64x128xbf16>, vector<128x128xbf16>, vector<64x128xf32> -> vector<64x128xf32>
    %c0_103 = arith.constant 0 : index
    %c3_104 = arith.constant 3 : index
    %c0_105 = arith.constant 0 : index
    %101 = vector.load %arg15[%c0_103, %c3_104, %c0_105] : memref<14x14x128xf32, #tpu.memory_space<vmem>>, vector<8x8x128xf32>
    %102 = vector.shape_cast %101 : vector<8x8x128xf32> to vector<64x128xf32>
    %103 = arith.truncf %102 : vector<64x128xf32> to vector<64x128xbf16>
    %c1_106 = arith.constant 1 : index
    %c0_107 = arith.constant 0 : index
    %c0_108 = arith.constant 0 : index
    %104 = vector.load %arg5[%c1_106, %c0_107, %c0_108] : memref<9x128x128xbf16, #tpu.memory_space<vmem>>, vector<1x128x128xbf16>
    %105 = vector.shape_cast %104 : vector<1x128x128xbf16> to vector<128x128xbf16>
    %cst_109 = arith.constant dense<0.000000e+00> : vector<64x128xf32>
    %106 = tpu.matmul %103, %105, %cst_109 {dimension_numbers = #tpu.dot_dimension_numbers<[1], [0], [0], [1], [0, 0, 1, 1], [], []>} : vector<64x128xbf16>, vector<128x128xbf16>, vector<64x128xf32> -> vector<64x128xf32>
    %107 = arith.addf %100, %106 : vector<64x128xf32>
    %c0_110 = arith.constant 0 : index
    %c6_111 = arith.constant 6 : index
    %c0_112 = arith.constant 0 : index
    %108 = vector.load %arg15[%c0_110, %c6_111, %c0_112] : memref<14x14x128xf32, #tpu.memory_space<vmem>>, vector<8x8x128xf32>
    %109 = vector.shape_cast %108 : vector<8x8x128xf32> to vector<64x128xf32>
    %110 = arith.truncf %109 : vector<64x128xf32> to vector<64x128xbf16>
    %c2_113 = arith.constant 2 : index
    %c0_114 = arith.constant 0 : index
    %c0_115 = arith.constant 0 : index
    %111 = vector.load %arg5[%c2_113, %c0_114, %c0_115] : memref<9x128x128xbf16, #tpu.memory_space<vmem>>, vector<1x128x128xbf16>
    %112 = vector.shape_cast %111 : vector<1x128x128xbf16> to vector<128x128xbf16>
    %cst_116 = arith.constant dense<0.000000e+00> : vector<64x128xf32>
    %113 = tpu.matmul %110, %112, %cst_116 {dimension_numbers = #tpu.dot_dimension_numbers<[1], [0], [0], [1], [0, 0, 1, 1], [], []>} : vector<64x128xbf16>, vector<128x128xbf16>, vector<64x128xf32> -> vector<64x128xf32>
    %114 = arith.addf %107, %113 : vector<64x128xf32>
    %c3_117 = arith.constant 3 : index
    %c0_118 = arith.constant 0 : index
    %c0_119 = arith.constant 0 : index
    %115 = vector.load %arg15[%c3_117, %c0_118, %c0_119] : memref<14x14x128xf32, #tpu.memory_space<vmem>>, vector<8x8x128xf32>
    %116 = vector.shape_cast %115 : vector<8x8x128xf32> to vector<64x128xf32>
    %117 = arith.truncf %116 : vector<64x128xf32> to vector<64x128xbf16>
    %c3_120 = arith.constant 3 : index
    %c0_121 = arith.constant 0 : index
    %c0_122 = arith.constant 0 : index
    %118 = vector.load %arg5[%c3_120, %c0_121, %c0_122] : memref<9x128x128xbf16, #tpu.memory_space<vmem>>, vector<1x128x128xbf16>
    %119 = vector.shape_cast %118 : vector<1x128x128xbf16> to vector<128x128xbf16>
    %cst_123 = arith.constant dense<0.000000e+00> : vector<64x128xf32>
    %120 = tpu.matmul %117, %119, %cst_123 {dimension_numbers = #tpu.dot_dimension_numbers<[1], [0], [0], [1], [0, 0, 1, 1], [], []>} : vector<64x128xbf16>, vector<128x128xbf16>, vector<64x128xf32> -> vector<64x128xf32>
    %121 = arith.addf %114, %120 : vector<64x128xf32>
    %c3_124 = arith.constant 3 : index
    %c3_125 = arith.constant 3 : index
    %c0_126 = arith.constant 0 : index
    %122 = vector.load %arg15[%c3_124, %c3_125, %c0_126] : memref<14x14x128xf32, #tpu.memory_space<vmem>>, vector<8x8x128xf32>
    %123 = vector.shape_cast %122 : vector<8x8x128xf32> to vector<64x128xf32>
    %124 = arith.truncf %123 : vector<64x128xf32> to vector<64x128xbf16>
    %c4_127 = arith.constant 4 : index
    %c0_128 = arith.constant 0 : index
    %c0_129 = arith.constant 0 : index
    %125 = vector.load %arg5[%c4_127, %c0_128, %c0_129] : memref<9x128x128xbf16, #tpu.memory_space<vmem>>, vector<1x128x128xbf16>
    %126 = vector.shape_cast %125 : vector<1x128x128xbf16> to vector<128x128xbf16>
    %cst_130 = arith.constant dense<0.000000e+00> : vector<64x128xf32>
    %127 = tpu.matmul %124, %126, %cst_130 {dimension_numbers = #tpu.dot_dimension_numbers<[1], [0], [0], [1], [0, 0, 1, 1], [], []>} : vector<64x128xbf16>, vector<128x128xbf16>, vector<64x128xf32> -> vector<64x128xf32>
    %128 = arith.addf %121, %127 : vector<64x128xf32>
    %c3_131 = arith.constant 3 : index
    %c6_132 = arith.constant 6 : index
    %c0_133 = arith.constant 0 : index
    %129 = vector.load %arg15[%c3_131, %c6_132, %c0_133] : memref<14x14x128xf32, #tpu.memory_space<vmem>>, vector<8x8x128xf32>
    %130 = vector.shape_cast %129 : vector<8x8x128xf32> to vector<64x128xf32>
    %131 = arith.truncf %130 : vector<64x128xf32> to vector<64x128xbf16>
    %c5_134 = arith.constant 5 : index
    %c0_135 = arith.constant 0 : index
    %c0_136 = arith.constant 0 : index
    %132 = vector.load %arg5[%c5_134, %c0_135, %c0_136] : memref<9x128x128xbf16, #tpu.memory_space<vmem>>, vector<1x128x128xbf16>
    %133 = vector.shape_cast %132 : vector<1x128x128xbf16> to vector<128x128xbf16>
    %cst_137 = arith.constant dense<0.000000e+00> : vector<64x128xf32>
    %134 = tpu.matmul %131, %133, %cst_137 {dimension_numbers = #tpu.dot_dimension_numbers<[1], [0], [0], [1], [0, 0, 1, 1], [], []>} : vector<64x128xbf16>, vector<128x128xbf16>, vector<64x128xf32> -> vector<64x128xf32>
    %135 = arith.addf %128, %134 : vector<64x128xf32>
    %c6_138 = arith.constant 6 : index
    %c0_139 = arith.constant 0 : index
    %c0_140 = arith.constant 0 : index
    %136 = vector.load %arg15[%c6_138, %c0_139, %c0_140] : memref<14x14x128xf32, #tpu.memory_space<vmem>>, vector<8x8x128xf32>
    %137 = vector.shape_cast %136 : vector<8x8x128xf32> to vector<64x128xf32>
    %138 = arith.truncf %137 : vector<64x128xf32> to vector<64x128xbf16>
    %c6_141 = arith.constant 6 : index
    %c0_142 = arith.constant 0 : index
    %c0_143 = arith.constant 0 : index
    %139 = vector.load %arg5[%c6_141, %c0_142, %c0_143] : memref<9x128x128xbf16, #tpu.memory_space<vmem>>, vector<1x128x128xbf16>
    %140 = vector.shape_cast %139 : vector<1x128x128xbf16> to vector<128x128xbf16>
    %cst_144 = arith.constant dense<0.000000e+00> : vector<64x128xf32>
    %141 = tpu.matmul %138, %140, %cst_144 {dimension_numbers = #tpu.dot_dimension_numbers<[1], [0], [0], [1], [0, 0, 1, 1], [], []>} : vector<64x128xbf16>, vector<128x128xbf16>, vector<64x128xf32> -> vector<64x128xf32>
    %142 = arith.addf %135, %141 : vector<64x128xf32>
    %c6_145 = arith.constant 6 : index
    %c3_146 = arith.constant 3 : index
    %c0_147 = arith.constant 0 : index
    %143 = vector.load %arg15[%c6_145, %c3_146, %c0_147] : memref<14x14x128xf32, #tpu.memory_space<vmem>>, vector<8x8x128xf32>
    %144 = vector.shape_cast %143 : vector<8x8x128xf32> to vector<64x128xf32>
    %145 = arith.truncf %144 : vector<64x128xf32> to vector<64x128xbf16>
    %c7_148 = arith.constant 7 : index
    %c0_149 = arith.constant 0 : index
    %c0_150 = arith.constant 0 : index
    %146 = vector.load %arg5[%c7_148, %c0_149, %c0_150] : memref<9x128x128xbf16, #tpu.memory_space<vmem>>, vector<1x128x128xbf16>
    %147 = vector.shape_cast %146 : vector<1x128x128xbf16> to vector<128x128xbf16>
    %cst_151 = arith.constant dense<0.000000e+00> : vector<64x128xf32>
    %148 = tpu.matmul %145, %147, %cst_151 {dimension_numbers = #tpu.dot_dimension_numbers<[1], [0], [0], [1], [0, 0, 1, 1], [], []>} : vector<64x128xbf16>, vector<128x128xbf16>, vector<64x128xf32> -> vector<64x128xf32>
    %149 = arith.addf %142, %148 : vector<64x128xf32>
    %c6_152 = arith.constant 6 : index
    %c6_153 = arith.constant 6 : index
    %c0_154 = arith.constant 0 : index
    %150 = vector.load %arg15[%c6_152, %c6_153, %c0_154] : memref<14x14x128xf32, #tpu.memory_space<vmem>>, vector<8x8x128xf32>
    %151 = vector.shape_cast %150 : vector<8x8x128xf32> to vector<64x128xf32>
    %152 = arith.truncf %151 : vector<64x128xf32> to vector<64x128xbf16>
    %c8_155 = arith.constant 8 : index
    %c0_156 = arith.constant 0 : index
    %c0_157 = arith.constant 0 : index
    %153 = vector.load %arg5[%c8_155, %c0_156, %c0_157] : memref<9x128x128xbf16, #tpu.memory_space<vmem>>, vector<1x128x128xbf16>
    %154 = vector.shape_cast %153 : vector<1x128x128xbf16> to vector<128x128xbf16>
    %cst_158 = arith.constant dense<0.000000e+00> : vector<64x128xf32>
    %155 = tpu.matmul %152, %154, %cst_158 {dimension_numbers = #tpu.dot_dimension_numbers<[1], [0], [0], [1], [0, 0, 1, 1], [], []>} : vector<64x128xbf16>, vector<128x128xbf16>, vector<64x128xf32> -> vector<64x128xf32>
    %156 = arith.addf %149, %155 : vector<64x128xf32>
    %c0_159 = arith.constant 0 : index
    %c0_160 = arith.constant 0 : index
    %157 = vector.load %arg6[%c0_159, %c0_160] : memref<1x128xf32, #tpu.memory_space<vmem>>, vector<1x128xf32>
    %158 = vector.broadcast %157 : vector<1x128xf32> to vector<64x128xf32>
    %159 = arith.addf %156, %158 : vector<64x128xf32>
    %160 = vector.shape_cast %159 : vector<64x128xf32> to vector<8x8x128xf32>
    %cst_161 = arith.constant 0.000000e+00 : f32
    %161 = vector.broadcast %cst_161 : f32 to vector<8x8x128xf32>
    %162 = arith.maximumf %160, %161 : vector<8x8x128xf32>
    %163 = vector.shape_cast %162 : vector<8x8x128xf32> to vector<64x128xf32>
    %164 = arith.truncf %163 : vector<64x128xf32> to vector<64x128xbf16>
    %c0_162 = arith.constant 0 : index
    %c0_163 = arith.constant 0 : index
    %c0_164 = arith.constant 0 : index
    %165 = vector.load %arg7[%c0_162, %c0_163, %c0_164] : memref<1x128x128xbf16, #tpu.memory_space<vmem>>, vector<1x128x128xbf16>
    %166 = vector.shape_cast %165 : vector<1x128x128xbf16> to vector<128x128xbf16>
    %cst_165 = arith.constant dense<0.000000e+00> : vector<64x128xf32>
    %167 = tpu.matmul %164, %166, %cst_165 {dimension_numbers = #tpu.dot_dimension_numbers<[1], [0], [0], [1], [0, 0, 1, 1], [], []>} : vector<64x128xbf16>, vector<128x128xbf16>, vector<64x128xf32> -> vector<64x128xf32>
    %c0_166 = arith.constant 0 : index
    %c0_167 = arith.constant 0 : index
    %168 = vector.load %arg8[%c0_166, %c0_167] : memref<1x128xf32, #tpu.memory_space<vmem>>, vector<1x128xf32>
    %169 = vector.broadcast %168 : vector<1x128xf32> to vector<64x128xf32>
    %170 = arith.addf %167, %169 : vector<64x128xf32>
    %171 = vector.shape_cast %170 : vector<64x128xf32> to vector<8x8x128xf32>
    %c0_168 = arith.constant 0 : index
    %c0_169 = arith.constant 0 : index
    %c0_170 = arith.constant 0 : index
    %172 = vector.load %arg14[%c0_168, %c0_169, %c0_170] : memref<8x8x128xf32, #tpu.memory_space<vmem>>, vector<8x8x128xf32>
    %173 = arith.addf %172, %171 : vector<8x8x128xf32>
    %c0_171 = arith.constant 0 : index
    %c0_172 = arith.constant 0 : index
    %c0_173 = arith.constant 0 : index
    %174 = vector.load %arg14[%c0_171, %c0_172, %c0_173] : memref<8x8x128xf32, #tpu.memory_space<vmem>>, vector<8x8x128xf32>
    tpu.vector_store %arg14[%c0_171, %c0_172, %c0_173], %173 {strides = array<i32>} : memref<8x8x128xf32, #tpu.memory_space<vmem>>, vector<8x8x128xf32>,
    %c0_174 = arith.constant 0 : index
    %c0_175 = arith.constant 0 : index
    %c0_176 = arith.constant 0 : index
    %175 = vector.load %arg14[%c0_174, %c0_175, %c0_176] : memref<8x8x128xf32, #tpu.memory_space<vmem>>, vector<8x8x128xf32>
    %cst_177 = arith.constant 0.000000e+00 : f32
    %176 = vector.broadcast %cst_177 : f32 to vector<8x8x128xf32>
    %177 = arith.maximumf %175, %176 : vector<8x8x128xf32>
    %c3_178 = arith.constant 3 : index
    %c3_179 = arith.constant 3 : index
    %c0_180 = arith.constant 0 : index
    %178 = vector.load %arg15[%c3_178, %c3_179, %c0_180] : memref<14x14x128xf32, #tpu.memory_space<vmem>>, vector<8x8x128xf32>
    tpu.vector_store %arg15[%c3_178, %c3_179, %c0_180], %177 {strides = array<i32>} : memref<14x14x128xf32, #tpu.memory_space<vmem>>, vector<8x8x128xf32>,
    %c2_181 = arith.constant 2 : index
    %c2_182 = arith.constant 2 : index
    %c0_183 = arith.constant 0 : index
    %179 = vector.load %arg15[%c2_181, %c2_182, %c0_183] : memref<14x14x128xf32, #tpu.memory_space<vmem>>, vector<8x8x128xf32>
    %180 = vector.shape_cast %179 : vector<8x8x128xf32> to vector<64x128xf32>
    %181 = arith.truncf %180 : vector<64x128xf32> to vector<64x128xbf16>
    %c0_184 = arith.constant 0 : index
    %c0_185 = arith.constant 0 : index
    %c0_186 = arith.constant 0 : index
    %182 = vector.load %arg9[%c0_184, %c0_185, %c0_186] : memref<9x128x128xbf16, #tpu.memory_space<vmem>>, vector<1x128x128xbf16>
    %183 = vector.shape_cast %182 : vector<1x128x128xbf16> to vector<128x128xbf16>
    %cst_187 = arith.constant dense<0.000000e+00> : vector<64x128xf32>
    %184 = tpu.matmul %181, %183, %cst_187 {dimension_numbers = #tpu.dot_dimension_numbers<[1], [0], [0], [1], [0, 0, 1, 1], [], []>} : vector<64x128xbf16>, vector<128x128xbf16>, vector<64x128xf32> -> vector<64x128xf32>
    %c2_188 = arith.constant 2 : index
    %c3_189 = arith.constant 3 : index
    %c0_190 = arith.constant 0 : index
    %185 = vector.load %arg15[%c2_188, %c3_189, %c0_190] : memref<14x14x128xf32, #tpu.memory_space<vmem>>, vector<8x8x128xf32>
    %186 = vector.shape_cast %185 : vector<8x8x128xf32> to vector<64x128xf32>
    %187 = arith.truncf %186 : vector<64x128xf32> to vector<64x128xbf16>
    %c1_191 = arith.constant 1 : index
    %c0_192 = arith.constant 0 : index
    %c0_193 = arith.constant 0 : index
    %188 = vector.load %arg9[%c1_191, %c0_192, %c0_193] : memref<9x128x128xbf16, #tpu.memory_space<vmem>>, vector<1x128x128xbf16>
    %189 = vector.shape_cast %188 : vector<1x128x128xbf16> to vector<128x128xbf16>
    %cst_194 = arith.constant dense<0.000000e+00> : vector<64x128xf32>
    %190 = tpu.matmul %187, %189, %cst_194 {dimension_numbers = #tpu.dot_dimension_numbers<[1], [0], [0], [1], [0, 0, 1, 1], [], []>} : vector<64x128xbf16>, vector<128x128xbf16>, vector<64x128xf32> -> vector<64x128xf32>
    %191 = arith.addf %184, %190 : vector<64x128xf32>
    %c2_195 = arith.constant 2 : index
    %c4_196 = arith.constant 4 : index
    %c0_197 = arith.constant 0 : index
    %192 = vector.load %arg15[%c2_195, %c4_196, %c0_197] : memref<14x14x128xf32, #tpu.memory_space<vmem>>, vector<8x8x128xf32>
    %193 = vector.shape_cast %192 : vector<8x8x128xf32> to vector<64x128xf32>
    %194 = arith.truncf %193 : vector<64x128xf32> to vector<64x128xbf16>
    %c2_198 = arith.constant 2 : index
    %c0_199 = arith.constant 0 : index
    %c0_200 = arith.constant 0 : index
    %195 = vector.load %arg9[%c2_198, %c0_199, %c0_200] : memref<9x128x128xbf16, #tpu.memory_space<vmem>>, vector<1x128x128xbf16>
    %196 = vector.shape_cast %195 : vector<1x128x128xbf16> to vector<128x128xbf16>
    %cst_201 = arith.constant dense<0.000000e+00> : vector<64x128xf32>
    %197 = tpu.matmul %194, %196, %cst_201 {dimension_numbers = #tpu.dot_dimension_numbers<[1], [0], [0], [1], [0, 0, 1, 1], [], []>} : vector<64x128xbf16>, vector<128x128xbf16>, vector<64x128xf32> -> vector<64x128xf32>
    %198 = arith.addf %191, %197 : vector<64x128xf32>
    %c3_202 = arith.constant 3 : index
    %c2_203 = arith.constant 2 : index
    %c0_204 = arith.constant 0 : index
    %199 = vector.load %arg15[%c3_202, %c2_203, %c0_204] : memref<14x14x128xf32, #tpu.memory_space<vmem>>, vector<8x8x128xf32>
    %200 = vector.shape_cast %199 : vector<8x8x128xf32> to vector<64x128xf32>
    %201 = arith.truncf %200 : vector<64x128xf32> to vector<64x128xbf16>
    %c3_205 = arith.constant 3 : index
    %c0_206 = arith.constant 0 : index
    %c0_207 = arith.constant 0 : index
    %202 = vector.load %arg9[%c3_205, %c0_206, %c0_207] : memref<9x128x128xbf16, #tpu.memory_space<vmem>>, vector<1x128x128xbf16>
    %203 = vector.shape_cast %202 : vector<1x128x128xbf16> to vector<128x128xbf16>
    %cst_208 = arith.constant dense<0.000000e+00> : vector<64x128xf32>
    %204 = tpu.matmul %201, %203, %cst_208 {dimension_numbers = #tpu.dot_dimension_numbers<[1], [0], [0], [1], [0, 0, 1, 1], [], []>} : vector<64x128xbf16>, vector<128x128xbf16>, vector<64x128xf32> -> vector<64x128xf32>
    %205 = arith.addf %198, %204 : vector<64x128xf32>
    %c3_209 = arith.constant 3 : index
    %c3_210 = arith.constant 3 : index
    %c0_211 = arith.constant 0 : index
    %206 = vector.load %arg15[%c3_209, %c3_210, %c0_211] : memref<14x14x128xf32, #tpu.memory_space<vmem>>, vector<8x8x128xf32>
    %207 = vector.shape_cast %206 : vector<8x8x128xf32> to vector<64x128xf32>
    %208 = arith.truncf %207 : vector<64x128xf32> to vector<64x128xbf16>
    %c4_212 = arith.constant 4 : index
    %c0_213 = arith.constant 0 : index
    %c0_214 = arith.constant 0 : index
    %209 = vector.load %arg9[%c4_212, %c0_213, %c0_214] : memref<9x128x128xbf16, #tpu.memory_space<vmem>>, vector<1x128x128xbf16>
    %210 = vector.shape_cast %209 : vector<1x128x128xbf16> to vector<128x128xbf16>
    %cst_215 = arith.constant dense<0.000000e+00> : vector<64x128xf32>
    %211 = tpu.matmul %208, %210, %cst_215 {dimension_numbers = #tpu.dot_dimension_numbers<[1], [0], [0], [1], [0, 0, 1, 1], [], []>} : vector<64x128xbf16>, vector<128x128xbf16>, vector<64x128xf32> -> vector<64x128xf32>
    %212 = arith.addf %205, %211 : vector<64x128xf32>
    %c3_216 = arith.constant 3 : index
    %c4_217 = arith.constant 4 : index
    %c0_218 = arith.constant 0 : index
    %213 = vector.load %arg15[%c3_216, %c4_217, %c0_218] : memref<14x14x128xf32, #tpu.memory_space<vmem>>, vector<8x8x128xf32>
    %214 = vector.shape_cast %213 : vector<8x8x128xf32> to vector<64x128xf32>
    %215 = arith.truncf %214 : vector<64x128xf32> to vector<64x128xbf16>
    %c5_219 = arith.constant 5 : index
    %c0_220 = arith.constant 0 : index
    %c0_221 = arith.constant 0 : index
    %216 = vector.load %arg9[%c5_219, %c0_220, %c0_221] : memref<9x128x128xbf16, #tpu.memory_space<vmem>>, vector<1x128x128xbf16>
    %217 = vector.shape_cast %216 : vector<1x128x128xbf16> to vector<128x128xbf16>
    %cst_222 = arith.constant dense<0.000000e+00> : vector<64x128xf32>
    %218 = tpu.matmul %215, %217, %cst_222 {dimension_numbers = #tpu.dot_dimension_numbers<[1], [0], [0], [1], [0, 0, 1, 1], [], []>} : vector<64x128xbf16>, vector<128x128xbf16>, vector<64x128xf32> -> vector<64x128xf32>
    %219 = arith.addf %212, %218 : vector<64x128xf32>
    %c4_223 = arith.constant 4 : index
    %c2_224 = arith.constant 2 : index
    %c0_225 = arith.constant 0 : index
    %220 = vector.load %arg15[%c4_223, %c2_224, %c0_225] : memref<14x14x128xf32, #tpu.memory_space<vmem>>, vector<8x8x128xf32>
    %221 = vector.shape_cast %220 : vector<8x8x128xf32> to vector<64x128xf32>
    %222 = arith.truncf %221 : vector<64x128xf32> to vector<64x128xbf16>
    %c6_226 = arith.constant 6 : index
    %c0_227 = arith.constant 0 : index
    %c0_228 = arith.constant 0 : index
    %223 = vector.load %arg9[%c6_226, %c0_227, %c0_228] : memref<9x128x128xbf16, #tpu.memory_space<vmem>>, vector<1x128x128xbf16>
    %224 = vector.shape_cast %223 : vector<1x128x128xbf16> to vector<128x128xbf16>
    %cst_229 = arith.constant dense<0.000000e+00> : vector<64x128xf32>
    %225 = tpu.matmul %222, %224, %cst_229 {dimension_numbers = #tpu.dot_dimension_numbers<[1], [0], [0], [1], [0, 0, 1, 1], [], []>} : vector<64x128xbf16>, vector<128x128xbf16>, vector<64x128xf32> -> vector<64x128xf32>
    %226 = arith.addf %219, %225 : vector<64x128xf32>
    %c4_230 = arith.constant 4 : index
    %c3_231 = arith.constant 3 : index
    %c0_232 = arith.constant 0 : index
    %227 = vector.load %arg15[%c4_230, %c3_231, %c0_232] : memref<14x14x128xf32, #tpu.memory_space<vmem>>, vector<8x8x128xf32>
    %228 = vector.shape_cast %227 : vector<8x8x128xf32> to vector<64x128xf32>
    %229 = arith.truncf %228 : vector<64x128xf32> to vector<64x128xbf16>
    %c7_233 = arith.constant 7 : index
    %c0_234 = arith.constant 0 : index
    %c0_235 = arith.constant 0 : index
    %230 = vector.load %arg9[%c7_233, %c0_234, %c0_235] : memref<9x128x128xbf16, #tpu.memory_space<vmem>>, vector<1x128x128xbf16>
    %231 = vector.shape_cast %230 : vector<1x128x128xbf16> to vector<128x128xbf16>
    %cst_236 = arith.constant dense<0.000000e+00> : vector<64x128xf32>
    %232 = tpu.matmul %229, %231, %cst_236 {dimension_numbers = #tpu.dot_dimension_numbers<[1], [0], [0], [1], [0, 0, 1, 1], [], []>} : vector<64x128xbf16>, vector<128x128xbf16>, vector<64x128xf32> -> vector<64x128xf32>
    %233 = arith.addf %226, %232 : vector<64x128xf32>
    %c4_237 = arith.constant 4 : index
    %c4_238 = arith.constant 4 : index
    %c0_239 = arith.constant 0 : index
    %234 = vector.load %arg15[%c4_237, %c4_238, %c0_239] : memref<14x14x128xf32, #tpu.memory_space<vmem>>, vector<8x8x128xf32>
    %235 = vector.shape_cast %234 : vector<8x8x128xf32> to vector<64x128xf32>
    %236 = arith.truncf %235 : vector<64x128xf32> to vector<64x128xbf16>
    %c8_240 = arith.constant 8 : index
    %c0_241 = arith.constant 0 : index
    %c0_242 = arith.constant 0 : index
    %237 = vector.load %arg9[%c8_240, %c0_241, %c0_242] : memref<9x128x128xbf16, #tpu.memory_space<vmem>>, vector<1x128x128xbf16>
    %238 = vector.shape_cast %237 : vector<1x128x128xbf16> to vector<128x128xbf16>
    %cst_243 = arith.constant dense<0.000000e+00> : vector<64x128xf32>
    %239 = tpu.matmul %236, %238, %cst_243 {dimension_numbers = #tpu.dot_dimension_numbers<[1], [0], [0], [1], [0, 0, 1, 1], [], []>} : vector<64x128xbf16>, vector<128x128xbf16>, vector<64x128xf32> -> vector<64x128xf32>
    %240 = arith.addf %233, %239 : vector<64x128xf32>
    %c0_244 = arith.constant 0 : index
    %c0_245 = arith.constant 0 : index
    %241 = vector.load %arg10[%c0_244, %c0_245] : memref<1x128xf32, #tpu.memory_space<vmem>>, vector<1x128xf32>
    %242 = vector.broadcast %241 : vector<1x128xf32> to vector<64x128xf32>
    %243 = arith.addf %240, %242 : vector<64x128xf32>
    %244 = vector.shape_cast %243 : vector<64x128xf32> to vector<8x8x128xf32>
    %cst_246 = arith.constant 0.000000e+00 : f32
    %245 = vector.broadcast %cst_246 : f32 to vector<8x8x128xf32>
    %246 = arith.maximumf %244, %245 : vector<8x8x128xf32>
    %247 = vector.shape_cast %246 : vector<8x8x128xf32> to vector<64x128xf32>
    %248 = arith.truncf %247 : vector<64x128xf32> to vector<64x128xbf16>
    %c0_247 = arith.constant 0 : index
    %c0_248 = arith.constant 0 : index
    %c0_249 = arith.constant 0 : index
    %249 = vector.load %arg11[%c0_247, %c0_248, %c0_249] : memref<1x128x128xbf16, #tpu.memory_space<vmem>>, vector<1x128x128xbf16>
    %250 = vector.shape_cast %249 : vector<1x128x128xbf16> to vector<128x128xbf16>
    %cst_250 = arith.constant dense<0.000000e+00> : vector<64x128xf32>
    %251 = tpu.matmul %248, %250, %cst_250 {dimension_numbers = #tpu.dot_dimension_numbers<[1], [0], [0], [1], [0, 0, 1, 1], [], []>} : vector<64x128xbf16>, vector<128x128xbf16>, vector<64x128xf32> -> vector<64x128xf32>
    %c0_251 = arith.constant 0 : index
    %c0_252 = arith.constant 0 : index
    %252 = vector.load %arg12[%c0_251, %c0_252] : memref<1x128xf32, #tpu.memory_space<vmem>>, vector<1x128xf32>
    %253 = vector.broadcast %252 : vector<1x128xf32> to vector<64x128xf32>
    %254 = arith.addf %251, %253 : vector<64x128xf32>
    %255 = vector.shape_cast %254 : vector<64x128xf32> to vector<8x8x128xf32>
    %c0_253 = arith.constant 0 : index
    %c0_254 = arith.constant 0 : index
    %c0_255 = arith.constant 0 : index
    %256 = vector.load %arg14[%c0_253, %c0_254, %c0_255] : memref<8x8x128xf32, #tpu.memory_space<vmem>>, vector<8x8x128xf32>
    %257 = arith.addf %256, %255 : vector<8x8x128xf32>
    %c0_256 = arith.constant 0 : index
    %c0_257 = arith.constant 0 : index
    %c0_258 = arith.constant 0 : index
    %258 = vector.load %arg14[%c0_256, %c0_257, %c0_258] : memref<8x8x128xf32, #tpu.memory_space<vmem>>, vector<8x8x128xf32>
    tpu.vector_store %arg14[%c0_256, %c0_257, %c0_258], %257 {strides = array<i32>} : memref<8x8x128xf32, #tpu.memory_space<vmem>>, vector<8x8x128xf32>,
    %c0_259 = arith.constant 0 : index
    %c0_260 = arith.constant 0 : index
    %c0_261 = arith.constant 0 : index
    %259 = vector.load %arg14[%c0_259, %c0_260, %c0_261] : memref<8x8x128xf32, #tpu.memory_space<vmem>>, vector<8x8x128xf32>
    %260 = arith.truncf %259 : vector<8x8x128xf32> to vector<8x8x128xbf16>
    %c0_262 = arith.constant 0 : index
    %c0_263 = arith.constant 0 : index
    %c0_264 = arith.constant 0 : index
    %c0_265 = arith.constant 0 : index
    %261 = vector.load %arg13[%c0_262, %c0_263, %c0_264, %c0_265] : memref<1x8x8x128xbf16, #tpu.memory_space<vmem>>, vector<1x8x8x128xbf16>
    %262 = vector.shape_cast %261 : vector<1x8x8x128xbf16> to vector<8x8x128xbf16>
    %263 = vector.shape_cast %260 : vector<8x8x128xbf16> to vector<1x8x8x128xbf16>
    tpu.vector_store %arg13[%c0_262, %c0_263, %c0_264, %c0_265], %263 {strides = array<i32>} : memref<1x8x8x128xbf16, #tpu.memory_space<vmem>>, vector<1x8x8x128xbf16>,
    return
  }
  func.func @transform_0(%arg0: i32) -> (i32, i32, i32, i32) {
    %c0_i32 = arith.constant 0 : i32
    %c0_i32_0 = arith.constant 0 : i32
    %c0_i32_1 = arith.constant 0 : i32
    %c0_i32_2 = arith.constant 0 : i32
    return %arg0, %c0_i32, %c0_i32_0, %c0_i32_1 : i32, i32, i32, i32
  }
  func.func @transform_1(%arg0: i32) -> (i32, i32) {
    %c0_i32 = arith.constant 0 : i32
    %c0_i32_0 = arith.constant 0 : i32
    %c0_i32_1 = arith.constant 0 : i32
    return %c0_i32, %c0_i32_0 : i32, i32
  }
  func.func @transform_2(%arg0: i32) -> (i32, i32, i32) {
    %c0_i32 = arith.constant 0 : i32
    %c0_i32_0 = arith.constant 0 : i32
    %c0_i32_1 = arith.constant 0 : i32
    %c0_i32_2 = arith.constant 0 : i32
    return %c0_i32, %c0_i32_0, %c0_i32_1 : i32, i32, i32
  }
  func.func @transform_3(%arg0: i32) -> (i32, i32) {
    %c0_i32 = arith.constant 0 : i32
    %c0_i32_0 = arith.constant 0 : i32
    %c0_i32_1 = arith.constant 0 : i32
    return %c0_i32, %c0_i32_0 : i32, i32
  }
  func.func @transform_4(%arg0: i32) -> (i32, i32, i32) {
    %c0_i32 = arith.constant 0 : i32
    %c0_i32_0 = arith.constant 0 : i32
    %c0_i32_1 = arith.constant 0 : i32
    %c0_i32_2 = arith.constant 0 : i32
    return %c0_i32, %c0_i32_0, %c0_i32_1 : i32, i32, i32
  }
  func.func @transform_5(%arg0: i32) -> (i32, i32) {
    %c0_i32 = arith.constant 0 : i32
    %c0_i32_0 = arith.constant 0 : i32
    %c0_i32_1 = arith.constant 0 : i32
    return %c0_i32, %c0_i32_0 : i32, i32
  }
  func.func @transform_6(%arg0: i32) -> (i32, i32, i32) {
    %c0_i32 = arith.constant 0 : i32
    %c0_i32_0 = arith.constant 0 : i32
    %c0_i32_1 = arith.constant 0 : i32
    %c0_i32_2 = arith.constant 0 : i32
    return %c0_i32, %c0_i32_0, %c0_i32_1 : i32, i32, i32
  }
  func.func @transform_7(%arg0: i32) -> (i32, i32) {
    %c0_i32 = arith.constant 0 : i32
    %c0_i32_0 = arith.constant 0 : i32
    %c0_i32_1 = arith.constant 0 : i32
    return %c0_i32, %c0_i32_0 : i32, i32
  }
  func.func @transform_8(%arg0: i32) -> (i32, i32, i32) {
    %c0_i32 = arith.constant 0 : i32
    %c0_i32_0 = arith.constant 0 : i32
    %c0_i32_1 = arith.constant 0 : i32
    %c0_i32_2 = arith.constant 0 : i32
    return %c0_i32, %c0_i32_0, %c0_i32_1 : i32, i32, i32
  }
  func.func @transform_9(%arg0: i32) -> (i32, i32) {
    %c0_i32 = arith.constant 0 : i32
    %c0_i32_0 = arith.constant 0 : i32
    %c0_i32_1 = arith.constant 0 : i32
    return %c0_i32, %c0_i32_0 : i32, i32
  }
  func.func @transform_10(%arg0: i32) -> (i32, i32, i32) {
    %c0_i32 = arith.constant 0 : i32
    %c0_i32_0 = arith.constant 0 : i32
    %c0_i32_1 = arith.constant 0 : i32
    %c0_i32_2 = arith.constant 0 : i32
    return %c0_i32, %c0_i32_0, %c0_i32_1 : i32, i32, i32
  }
  func.func @transform_11(%arg0: i32) -> (i32, i32) {
    %c0_i32 = arith.constant 0 : i32
    %c0_i32_0 = arith.constant 0 : i32
    %c0_i32_1 = arith.constant 0 : i32
    return %c0_i32, %c0_i32_0 : i32, i32
  }
  func.func @transform_12(%arg0: i32) -> (i32, i32, i32, i32) {
    %c0_i32 = arith.constant 0 : i32
    %c0_i32_0 = arith.constant 0 : i32
    %c0_i32_1 = arith.constant 0 : i32
    %c0_i32_2 = arith.constant 0 : i32
    return %arg0, %c0_i32, %c0_i32_0, %c0_i32_1 : i32, i32, i32, i32
  }
}

module attributes {stable_mosaic.version = 11 : i64} {
  func.func @kernel(%arg0: i32, %arg1: memref<1x8x8x128xbf16, #tpu.memory_space<vmem>>, %arg2: memref<16x8xbf16, #tpu.memory_space<vmem>>, %arg3: memref<9x128x128xbf16, #tpu.memory_space<vmem>>, %arg4: memref<1x128xf32, #tpu.memory_space<vmem>>, %arg5: memref<9x128x128xbf16, #tpu.memory_space<vmem>>, %arg6: memref<1x128xf32, #tpu.memory_space<vmem>>, %arg7: memref<9x128x128xbf16, #tpu.memory_space<vmem>>, %arg8: memref<1x128xf32, #tpu.memory_space<vmem>>, %arg9: memref<1x16x16x128xf32, #tpu.memory_space<vmem>>, %arg10: memref<16x16x128xf32, #tpu.memory_space<vmem>>, %arg11: memref<18x18x128xf32, #tpu.memory_space<vmem>>) attributes {dimension_semantics = [#tpu.dimension_semantics<parallel>], iteration_bounds = array<i64: 2>, scalar_prefetch = 0 : i64, scratch_operands = 2 : i64, tpu.core_type = #tpu.core_type<tc>, window_params = [{transform_indices = @transform_0, window_bounds = array<i64: 1, 8, 8, 128>}, {pipeline_mode = #tpu.pipeline_mode<synchronous>, transform_indices = @transform_1, window_bounds = array<i64: 16, 8>}, {pipeline_mode = #tpu.pipeline_mode<synchronous>, transform_indices = @transform_2, window_bounds = array<i64: 9, 128, 128>}, {pipeline_mode = #tpu.pipeline_mode<synchronous>, transform_indices = @transform_3, window_bounds = array<i64: 1, 128>}, {pipeline_mode = #tpu.pipeline_mode<synchronous>, transform_indices = @transform_4, window_bounds = array<i64: 9, 128, 128>}, {pipeline_mode = #tpu.pipeline_mode<synchronous>, transform_indices = @transform_5, window_bounds = array<i64: 1, 128>}, {pipeline_mode = #tpu.pipeline_mode<synchronous>, transform_indices = @transform_6, window_bounds = array<i64: 9, 128, 128>}, {pipeline_mode = #tpu.pipeline_mode<synchronous>, transform_indices = @transform_7, window_bounds = array<i64: 1, 128>}, {transform_indices = @transform_8, window_bounds = array<i64: 1, 16, 16, 128>}]} {
    %cst = arith.constant 0.000000e+00 : f32
    %0 = vector.broadcast %cst : f32 to vector<1x18x128xf32>
    %c0 = arith.constant 0 : index
    %c0_0 = arith.constant 0 : index
    %c0_1 = arith.constant 0 : index
    %1 = vector.load %arg11[%c0, %c0_0, %c0_1] : memref<18x18x128xf32, #tpu.memory_space<vmem>>, vector<1x18x128xf32>
    tpu.vector_store %arg11[%c0, %c0_0, %c0_1], %0 {strides = array<i32>} : memref<18x18x128xf32, #tpu.memory_space<vmem>>, vector<1x18x128xf32>,
    %cst_2 = arith.constant 0.000000e+00 : f32
    %2 = vector.broadcast %cst_2 : f32 to vector<1x18x128xf32>
    %c17 = arith.constant 17 : index
    %c0_3 = arith.constant 0 : index
    %c0_4 = arith.constant 0 : index
    %3 = vector.load %arg11[%c17, %c0_3, %c0_4] : memref<18x18x128xf32, #tpu.memory_space<vmem>>, vector<1x18x128xf32>
    tpu.vector_store %arg11[%c17, %c0_3, %c0_4], %2 {strides = array<i32>} : memref<18x18x128xf32, #tpu.memory_space<vmem>>, vector<1x18x128xf32>,
    %cst_5 = arith.constant 0.000000e+00 : f32
    %4 = vector.broadcast %cst_5 : f32 to vector<18x1x128xf32>
    %c0_6 = arith.constant 0 : index
    %c0_7 = arith.constant 0 : index
    %c0_8 = arith.constant 0 : index
    %5 = vector.load %arg11[%c0_6, %c0_7, %c0_8] : memref<18x18x128xf32, #tpu.memory_space<vmem>>, vector<18x1x128xf32>
    tpu.vector_store %arg11[%c0_6, %c0_7, %c0_8], %4 {strides = array<i32>} : memref<18x18x128xf32, #tpu.memory_space<vmem>>, vector<18x1x128xf32>,
    %cst_9 = arith.constant 0.000000e+00 : f32
    %6 = vector.broadcast %cst_9 : f32 to vector<18x1x128xf32>
    %c0_10 = arith.constant 0 : index
    %c17_11 = arith.constant 17 : index
    %c0_12 = arith.constant 0 : index
    %7 = vector.load %arg11[%c0_10, %c17_11, %c0_12] : memref<18x18x128xf32, #tpu.memory_space<vmem>>, vector<18x1x128xf32>
    tpu.vector_store %arg11[%c0_10, %c17_11, %c0_12], %6 {strides = array<i32>} : memref<18x18x128xf32, #tpu.memory_space<vmem>>, vector<18x1x128xf32>,
    %c0_13 = arith.constant 0 : index
    %c0_14 = arith.constant 0 : index
    %c0_15 = arith.constant 0 : index
    %c0_16 = arith.constant 0 : index
    %8 = vector.load %arg1[%c0_13, %c0_14, %c0_15, %c0_16] : memref<1x8x8x128xbf16, #tpu.memory_space<vmem>>, vector<1x8x8x128xbf16>
    %9 = vector.shape_cast %8 : vector<1x8x8x128xbf16> to vector<8x8x128xbf16>
    %10 = arith.extf %9 : vector<8x8x128xbf16> to vector<8x8x128xf32>
    %11 = vector.shape_cast %10 : vector<8x8x128xf32> to vector<8x1x8x128xf32>
    %12 = vector.shape_cast %11 : vector<8x1x8x128xf32> to vector<8x1x8x128xf32>
    %13 = vector.broadcast %12 : vector<8x1x8x128xf32> to vector<8x2x8x128xf32>
    %14 = vector.shape_cast %13 : vector<8x2x8x128xf32> to vector<16x8x128xf32>
    %15 = arith.truncf %14 : vector<16x8x128xf32> to vector<16x8x128xbf16>
    %c0_17 = arith.constant 0 : index
    %c0_18 = arith.constant 0 : index
    %16 = vector.load %arg2[%c0_17, %c0_18] : memref<16x8xbf16, #tpu.memory_space<vmem>>, vector<16x8xbf16>
    %17 = vector.shape_cast %16 : vector<16x8xbf16> to vector<1x16x8xbf16>
    %18 = vector.shape_cast %17 : vector<1x16x8xbf16> to vector<1x16x8xbf16>
    %19 = vector.broadcast %18 : vector<1x16x8xbf16> to vector<16x16x8xbf16>
    %cst_19 = arith.constant dense<0.000000e+00> : vector<16x16x128xf32>
    %20 = tpu.matmul %19, %15, %cst_19 {dimension_numbers = #tpu.dot_dimension_numbers<[2], [1], [1], [2], [0, 0, 0, 1, 1, 2], [0], [0]>} : vector<16x16x8xbf16>, vector<16x8x128xbf16>, vector<16x16x128xf32> -> vector<16x16x128xf32>
    %c0_20 = arith.constant 0 : index
    %c0_21 = arith.constant 0 : index
    %c0_22 = arith.constant 0 : index
    %21 = vector.load %arg10[%c0_20, %c0_21, %c0_22] : memref<16x16x128xf32, #tpu.memory_space<vmem>>, vector<16x16x128xf32>
    tpu.vector_store %arg10[%c0_20, %c0_21, %c0_22], %20 {strides = array<i32>} : memref<16x16x128xf32, #tpu.memory_space<vmem>>, vector<16x16x128xf32>,
    %c0_23 = arith.constant 0 : index
    %c0_24 = arith.constant 0 : index
    %c0_25 = arith.constant 0 : index
    %22 = vector.load %arg10[%c0_23, %c0_24, %c0_25] : memref<16x16x128xf32, #tpu.memory_space<vmem>>, vector<16x16x128xf32>
    %c1 = arith.constant 1 : index
    %c1_26 = arith.constant 1 : index
    %c0_27 = arith.constant 0 : index
    %23 = vector.load %arg11[%c1, %c1_26, %c0_27] : memref<18x18x128xf32, #tpu.memory_space<vmem>>, vector<16x16x128xf32>
    tpu.vector_store %arg11[%c1, %c1_26, %c0_27], %22 {strides = array<i32>} : memref<18x18x128xf32, #tpu.memory_space<vmem>>, vector<16x16x128xf32>,
    %c0_28 = arith.constant 0 : index
    %c0_29 = arith.constant 0 : index
    %c0_30 = arith.constant 0 : index
    %24 = vector.load %arg11[%c0_28, %c0_29, %c0_30] : memref<18x18x128xf32, #tpu.memory_space<vmem>>, vector<16x16x128xf32>
    %25 = vector.shape_cast %24 : vector<16x16x128xf32> to vector<256x128xf32>
    %26 = arith.truncf %25 : vector<256x128xf32> to vector<256x128xbf16>
    %c0_31 = arith.constant 0 : index
    %c0_32 = arith.constant 0 : index
    %c0_33 = arith.constant 0 : index
    %27 = vector.load %arg3[%c0_31, %c0_32, %c0_33] : memref<9x128x128xbf16, #tpu.memory_space<vmem>>, vector<1x128x128xbf16>
    %28 = vector.shape_cast %27 : vector<1x128x128xbf16> to vector<128x128xbf16>
    %cst_34 = arith.constant dense<0.000000e+00> : vector<256x128xf32>
    %29 = tpu.matmul %26, %28, %cst_34 {dimension_numbers = #tpu.dot_dimension_numbers<[1], [0], [0], [1], [0, 0, 1, 1], [], []>} : vector<256x128xbf16>, vector<128x128xbf16>, vector<256x128xf32> -> vector<256x128xf32>
    %c0_35 = arith.constant 0 : index
    %c1_36 = arith.constant 1 : index
    %c0_37 = arith.constant 0 : index
    %30 = vector.load %arg11[%c0_35, %c1_36, %c0_37] : memref<18x18x128xf32, #tpu.memory_space<vmem>>, vector<16x16x128xf32>
    %31 = vector.shape_cast %30 : vector<16x16x128xf32> to vector<256x128xf32>
    %32 = arith.truncf %31 : vector<256x128xf32> to vector<256x128xbf16>
    %c1_38 = arith.constant 1 : index
    %c0_39 = arith.constant 0 : index
    %c0_40 = arith.constant 0 : index
    %33 = vector.load %arg3[%c1_38, %c0_39, %c0_40] : memref<9x128x128xbf16, #tpu.memory_space<vmem>>, vector<1x128x128xbf16>
    %34 = vector.shape_cast %33 : vector<1x128x128xbf16> to vector<128x128xbf16>
    %cst_41 = arith.constant dense<0.000000e+00> : vector<256x128xf32>
    %35 = tpu.matmul %32, %34, %cst_41 {dimension_numbers = #tpu.dot_dimension_numbers<[1], [0], [0], [1], [0, 0, 1, 1], [], []>} : vector<256x128xbf16>, vector<128x128xbf16>, vector<256x128xf32> -> vector<256x128xf32>
    %36 = arith.addf %29, %35 : vector<256x128xf32>
    %c0_42 = arith.constant 0 : index
    %c2 = arith.constant 2 : index
    %c0_43 = arith.constant 0 : index
    %37 = vector.load %arg11[%c0_42, %c2, %c0_43] : memref<18x18x128xf32, #tpu.memory_space<vmem>>, vector<16x16x128xf32>
    %38 = vector.shape_cast %37 : vector<16x16x128xf32> to vector<256x128xf32>
    %39 = arith.truncf %38 : vector<256x128xf32> to vector<256x128xbf16>
    %c2_44 = arith.constant 2 : index
    %c0_45 = arith.constant 0 : index
    %c0_46 = arith.constant 0 : index
    %40 = vector.load %arg3[%c2_44, %c0_45, %c0_46] : memref<9x128x128xbf16, #tpu.memory_space<vmem>>, vector<1x128x128xbf16>
    %41 = vector.shape_cast %40 : vector<1x128x128xbf16> to vector<128x128xbf16>
    %cst_47 = arith.constant dense<0.000000e+00> : vector<256x128xf32>
    %42 = tpu.matmul %39, %41, %cst_47 {dimension_numbers = #tpu.dot_dimension_numbers<[1], [0], [0], [1], [0, 0, 1, 1], [], []>} : vector<256x128xbf16>, vector<128x128xbf16>, vector<256x128xf32> -> vector<256x128xf32>
    %43 = arith.addf %36, %42 : vector<256x128xf32>
    %c1_48 = arith.constant 1 : index
    %c0_49 = arith.constant 0 : index
    %c0_50 = arith.constant 0 : index
    %44 = vector.load %arg11[%c1_48, %c0_49, %c0_50] : memref<18x18x128xf32, #tpu.memory_space<vmem>>, vector<16x16x128xf32>
    %45 = vector.shape_cast %44 : vector<16x16x128xf32> to vector<256x128xf32>
    %46 = arith.truncf %45 : vector<256x128xf32> to vector<256x128xbf16>
    %c3 = arith.constant 3 : index
    %c0_51 = arith.constant 0 : index
    %c0_52 = arith.constant 0 : index
    %47 = vector.load %arg3[%c3, %c0_51, %c0_52] : memref<9x128x128xbf16, #tpu.memory_space<vmem>>, vector<1x128x128xbf16>
    %48 = vector.shape_cast %47 : vector<1x128x128xbf16> to vector<128x128xbf16>
    %cst_53 = arith.constant dense<0.000000e+00> : vector<256x128xf32>
    %49 = tpu.matmul %46, %48, %cst_53 {dimension_numbers = #tpu.dot_dimension_numbers<[1], [0], [0], [1], [0, 0, 1, 1], [], []>} : vector<256x128xbf16>, vector<128x128xbf16>, vector<256x128xf32> -> vector<256x128xf32>
    %50 = arith.addf %43, %49 : vector<256x128xf32>
    %c1_54 = arith.constant 1 : index
    %c1_55 = arith.constant 1 : index
    %c0_56 = arith.constant 0 : index
    %51 = vector.load %arg11[%c1_54, %c1_55, %c0_56] : memref<18x18x128xf32, #tpu.memory_space<vmem>>, vector<16x16x128xf32>
    %52 = vector.shape_cast %51 : vector<16x16x128xf32> to vector<256x128xf32>
    %53 = arith.truncf %52 : vector<256x128xf32> to vector<256x128xbf16>
    %c4 = arith.constant 4 : index
    %c0_57 = arith.constant 0 : index
    %c0_58 = arith.constant 0 : index
    %54 = vector.load %arg3[%c4, %c0_57, %c0_58] : memref<9x128x128xbf16, #tpu.memory_space<vmem>>, vector<1x128x128xbf16>
    %55 = vector.shape_cast %54 : vector<1x128x128xbf16> to vector<128x128xbf16>
    %cst_59 = arith.constant dense<0.000000e+00> : vector<256x128xf32>
    %56 = tpu.matmul %53, %55, %cst_59 {dimension_numbers = #tpu.dot_dimension_numbers<[1], [0], [0], [1], [0, 0, 1, 1], [], []>} : vector<256x128xbf16>, vector<128x128xbf16>, vector<256x128xf32> -> vector<256x128xf32>
    %57 = arith.addf %50, %56 : vector<256x128xf32>
    %c1_60 = arith.constant 1 : index
    %c2_61 = arith.constant 2 : index
    %c0_62 = arith.constant 0 : index
    %58 = vector.load %arg11[%c1_60, %c2_61, %c0_62] : memref<18x18x128xf32, #tpu.memory_space<vmem>>, vector<16x16x128xf32>
    %59 = vector.shape_cast %58 : vector<16x16x128xf32> to vector<256x128xf32>
    %60 = arith.truncf %59 : vector<256x128xf32> to vector<256x128xbf16>
    %c5 = arith.constant 5 : index
    %c0_63 = arith.constant 0 : index
    %c0_64 = arith.constant 0 : index
    %61 = vector.load %arg3[%c5, %c0_63, %c0_64] : memref<9x128x128xbf16, #tpu.memory_space<vmem>>, vector<1x128x128xbf16>
    %62 = vector.shape_cast %61 : vector<1x128x128xbf16> to vector<128x128xbf16>
    %cst_65 = arith.constant dense<0.000000e+00> : vector<256x128xf32>
    %63 = tpu.matmul %60, %62, %cst_65 {dimension_numbers = #tpu.dot_dimension_numbers<[1], [0], [0], [1], [0, 0, 1, 1], [], []>} : vector<256x128xbf16>, vector<128x128xbf16>, vector<256x128xf32> -> vector<256x128xf32>
    %64 = arith.addf %57, %63 : vector<256x128xf32>
    %c2_66 = arith.constant 2 : index
    %c0_67 = arith.constant 0 : index
    %c0_68 = arith.constant 0 : index
    %65 = vector.load %arg11[%c2_66, %c0_67, %c0_68] : memref<18x18x128xf32, #tpu.memory_space<vmem>>, vector<16x16x128xf32>
    %66 = vector.shape_cast %65 : vector<16x16x128xf32> to vector<256x128xf32>
    %67 = arith.truncf %66 : vector<256x128xf32> to vector<256x128xbf16>
    %c6 = arith.constant 6 : index
    %c0_69 = arith.constant 0 : index
    %c0_70 = arith.constant 0 : index
    %68 = vector.load %arg3[%c6, %c0_69, %c0_70] : memref<9x128x128xbf16, #tpu.memory_space<vmem>>, vector<1x128x128xbf16>
    %69 = vector.shape_cast %68 : vector<1x128x128xbf16> to vector<128x128xbf16>
    %cst_71 = arith.constant dense<0.000000e+00> : vector<256x128xf32>
    %70 = tpu.matmul %67, %69, %cst_71 {dimension_numbers = #tpu.dot_dimension_numbers<[1], [0], [0], [1], [0, 0, 1, 1], [], []>} : vector<256x128xbf16>, vector<128x128xbf16>, vector<256x128xf32> -> vector<256x128xf32>
    %71 = arith.addf %64, %70 : vector<256x128xf32>
    %c2_72 = arith.constant 2 : index
    %c1_73 = arith.constant 1 : index
    %c0_74 = arith.constant 0 : index
    %72 = vector.load %arg11[%c2_72, %c1_73, %c0_74] : memref<18x18x128xf32, #tpu.memory_space<vmem>>, vector<16x16x128xf32>
    %73 = vector.shape_cast %72 : vector<16x16x128xf32> to vector<256x128xf32>
    %74 = arith.truncf %73 : vector<256x128xf32> to vector<256x128xbf16>
    %c7 = arith.constant 7 : index
    %c0_75 = arith.constant 0 : index
    %c0_76 = arith.constant 0 : index
    %75 = vector.load %arg3[%c7, %c0_75, %c0_76] : memref<9x128x128xbf16, #tpu.memory_space<vmem>>, vector<1x128x128xbf16>
    %76 = vector.shape_cast %75 : vector<1x128x128xbf16> to vector<128x128xbf16>
    %cst_77 = arith.constant dense<0.000000e+00> : vector<256x128xf32>
    %77 = tpu.matmul %74, %76, %cst_77 {dimension_numbers = #tpu.dot_dimension_numbers<[1], [0], [0], [1], [0, 0, 1, 1], [], []>} : vector<256x128xbf16>, vector<128x128xbf16>, vector<256x128xf32> -> vector<256x128xf32>
    %78 = arith.addf %71, %77 : vector<256x128xf32>
    %c2_78 = arith.constant 2 : index
    %c2_79 = arith.constant 2 : index
    %c0_80 = arith.constant 0 : index
    %79 = vector.load %arg11[%c2_78, %c2_79, %c0_80] : memref<18x18x128xf32, #tpu.memory_space<vmem>>, vector<16x16x128xf32>
    %80 = vector.shape_cast %79 : vector<16x16x128xf32> to vector<256x128xf32>
    %81 = arith.truncf %80 : vector<256x128xf32> to vector<256x128xbf16>
    %c8 = arith.constant 8 : index
    %c0_81 = arith.constant 0 : index
    %c0_82 = arith.constant 0 : index
    %82 = vector.load %arg3[%c8, %c0_81, %c0_82] : memref<9x128x128xbf16, #tpu.memory_space<vmem>>, vector<1x128x128xbf16>
    %83 = vector.shape_cast %82 : vector<1x128x128xbf16> to vector<128x128xbf16>
    %cst_83 = arith.constant dense<0.000000e+00> : vector<256x128xf32>
    %84 = tpu.matmul %81, %83, %cst_83 {dimension_numbers = #tpu.dot_dimension_numbers<[1], [0], [0], [1], [0, 0, 1, 1], [], []>} : vector<256x128xbf16>, vector<128x128xbf16>, vector<256x128xf32> -> vector<256x128xf32>
    %85 = arith.addf %78, %84 : vector<256x128xf32>
    %c0_84 = arith.constant 0 : index
    %c0_85 = arith.constant 0 : index
    %86 = vector.load %arg4[%c0_84, %c0_85] : memref<1x128xf32, #tpu.memory_space<vmem>>, vector<1x128xf32>
    %87 = vector.broadcast %86 : vector<1x128xf32> to vector<256x128xf32>
    %88 = arith.addf %85, %87 : vector<256x128xf32>
    %89 = vector.shape_cast %88 : vector<256x128xf32> to vector<16x16x128xf32>
    %c0_86 = arith.constant 0 : index
    %c0_87 = arith.constant 0 : index
    %c0_88 = arith.constant 0 : index
    %90 = vector.load %arg10[%c0_86, %c0_87, %c0_88] : memref<16x16x128xf32, #tpu.memory_space<vmem>>, vector<16x16x128xf32>
    tpu.vector_store %arg10[%c0_86, %c0_87, %c0_88], %89 {strides = array<i32>} : memref<16x16x128xf32, #tpu.memory_space<vmem>>, vector<16x16x128xf32>,
    %c0_89 = arith.constant 0 : index
    %c0_90 = arith.constant 0 : index
    %c0_91 = arith.constant 0 : index
    %91 = vector.load %arg10[%c0_89, %c0_90, %c0_91] : memref<16x16x128xf32, #tpu.memory_space<vmem>>, vector<16x16x128xf32>
    %c1_92 = arith.constant 1 : index
    %c1_93 = arith.constant 1 : index
    %c0_94 = arith.constant 0 : index
    %92 = vector.load %arg11[%c1_92, %c1_93, %c0_94] : memref<18x18x128xf32, #tpu.memory_space<vmem>>, vector<16x16x128xf32>
    tpu.vector_store %arg11[%c1_92, %c1_93, %c0_94], %91 {strides = array<i32>} : memref<18x18x128xf32, #tpu.memory_space<vmem>>, vector<16x16x128xf32>,
    %c0_95 = arith.constant 0 : index
    %c0_96 = arith.constant 0 : index
    %c0_97 = arith.constant 0 : index
    %93 = vector.load %arg11[%c0_95, %c0_96, %c0_97] : memref<18x18x128xf32, #tpu.memory_space<vmem>>, vector<16x16x128xf32>
    %94 = vector.shape_cast %93 : vector<16x16x128xf32> to vector<256x128xf32>
    %95 = arith.truncf %94 : vector<256x128xf32> to vector<256x128xbf16>
    %c0_98 = arith.constant 0 : index
    %c0_99 = arith.constant 0 : index
    %c0_100 = arith.constant 0 : index
    %96 = vector.load %arg5[%c0_98, %c0_99, %c0_100] : memref<9x128x128xbf16, #tpu.memory_space<vmem>>, vector<1x128x128xbf16>
    %97 = vector.shape_cast %96 : vector<1x128x128xbf16> to vector<128x128xbf16>
    %cst_101 = arith.constant dense<0.000000e+00> : vector<256x128xf32>
    %98 = tpu.matmul %95, %97, %cst_101 {dimension_numbers = #tpu.dot_dimension_numbers<[1], [0], [0], [1], [0, 0, 1, 1], [], []>} : vector<256x128xbf16>, vector<128x128xbf16>, vector<256x128xf32> -> vector<256x128xf32>
    %c0_102 = arith.constant 0 : index
    %c1_103 = arith.constant 1 : index
    %c0_104 = arith.constant 0 : index
    %99 = vector.load %arg11[%c0_102, %c1_103, %c0_104] : memref<18x18x128xf32, #tpu.memory_space<vmem>>, vector<16x16x128xf32>
    %100 = vector.shape_cast %99 : vector<16x16x128xf32> to vector<256x128xf32>
    %101 = arith.truncf %100 : vector<256x128xf32> to vector<256x128xbf16>
    %c1_105 = arith.constant 1 : index
    %c0_106 = arith.constant 0 : index
    %c0_107 = arith.constant 0 : index
    %102 = vector.load %arg5[%c1_105, %c0_106, %c0_107] : memref<9x128x128xbf16, #tpu.memory_space<vmem>>, vector<1x128x128xbf16>
    %103 = vector.shape_cast %102 : vector<1x128x128xbf16> to vector<128x128xbf16>
    %cst_108 = arith.constant dense<0.000000e+00> : vector<256x128xf32>
    %104 = tpu.matmul %101, %103, %cst_108 {dimension_numbers = #tpu.dot_dimension_numbers<[1], [0], [0], [1], [0, 0, 1, 1], [], []>} : vector<256x128xbf16>, vector<128x128xbf16>, vector<256x128xf32> -> vector<256x128xf32>
    %105 = arith.addf %98, %104 : vector<256x128xf32>
    %c0_109 = arith.constant 0 : index
    %c2_110 = arith.constant 2 : index
    %c0_111 = arith.constant 0 : index
    %106 = vector.load %arg11[%c0_109, %c2_110, %c0_111] : memref<18x18x128xf32, #tpu.memory_space<vmem>>, vector<16x16x128xf32>
    %107 = vector.shape_cast %106 : vector<16x16x128xf32> to vector<256x128xf32>
    %108 = arith.truncf %107 : vector<256x128xf32> to vector<256x128xbf16>
    %c2_112 = arith.constant 2 : index
    %c0_113 = arith.constant 0 : index
    %c0_114 = arith.constant 0 : index
    %109 = vector.load %arg5[%c2_112, %c0_113, %c0_114] : memref<9x128x128xbf16, #tpu.memory_space<vmem>>, vector<1x128x128xbf16>
    %110 = vector.shape_cast %109 : vector<1x128x128xbf16> to vector<128x128xbf16>
    %cst_115 = arith.constant dense<0.000000e+00> : vector<256x128xf32>
    %111 = tpu.matmul %108, %110, %cst_115 {dimension_numbers = #tpu.dot_dimension_numbers<[1], [0], [0], [1], [0, 0, 1, 1], [], []>} : vector<256x128xbf16>, vector<128x128xbf16>, vector<256x128xf32> -> vector<256x128xf32>
    %112 = arith.addf %105, %111 : vector<256x128xf32>
    %c1_116 = arith.constant 1 : index
    %c0_117 = arith.constant 0 : index
    %c0_118 = arith.constant 0 : index
    %113 = vector.load %arg11[%c1_116, %c0_117, %c0_118] : memref<18x18x128xf32, #tpu.memory_space<vmem>>, vector<16x16x128xf32>
    %114 = vector.shape_cast %113 : vector<16x16x128xf32> to vector<256x128xf32>
    %115 = arith.truncf %114 : vector<256x128xf32> to vector<256x128xbf16>
    %c3_119 = arith.constant 3 : index
    %c0_120 = arith.constant 0 : index
    %c0_121 = arith.constant 0 : index
    %116 = vector.load %arg5[%c3_119, %c0_120, %c0_121] : memref<9x128x128xbf16, #tpu.memory_space<vmem>>, vector<1x128x128xbf16>
    %117 = vector.shape_cast %116 : vector<1x128x128xbf16> to vector<128x128xbf16>
    %cst_122 = arith.constant dense<0.000000e+00> : vector<256x128xf32>
    %118 = tpu.matmul %115, %117, %cst_122 {dimension_numbers = #tpu.dot_dimension_numbers<[1], [0], [0], [1], [0, 0, 1, 1], [], []>} : vector<256x128xbf16>, vector<128x128xbf16>, vector<256x128xf32> -> vector<256x128xf32>
    %119 = arith.addf %112, %118 : vector<256x128xf32>
    %c1_123 = arith.constant 1 : index
    %c1_124 = arith.constant 1 : index
    %c0_125 = arith.constant 0 : index
    %120 = vector.load %arg11[%c1_123, %c1_124, %c0_125] : memref<18x18x128xf32, #tpu.memory_space<vmem>>, vector<16x16x128xf32>
    %121 = vector.shape_cast %120 : vector<16x16x128xf32> to vector<256x128xf32>
    %122 = arith.truncf %121 : vector<256x128xf32> to vector<256x128xbf16>
    %c4_126 = arith.constant 4 : index
    %c0_127 = arith.constant 0 : index
    %c0_128 = arith.constant 0 : index
    %123 = vector.load %arg5[%c4_126, %c0_127, %c0_128] : memref<9x128x128xbf16, #tpu.memory_space<vmem>>, vector<1x128x128xbf16>
    %124 = vector.shape_cast %123 : vector<1x128x128xbf16> to vector<128x128xbf16>
    %cst_129 = arith.constant dense<0.000000e+00> : vector<256x128xf32>
    %125 = tpu.matmul %122, %124, %cst_129 {dimension_numbers = #tpu.dot_dimension_numbers<[1], [0], [0], [1], [0, 0, 1, 1], [], []>} : vector<256x128xbf16>, vector<128x128xbf16>, vector<256x128xf32> -> vector<256x128xf32>
    %126 = arith.addf %119, %125 : vector<256x128xf32>
    %c1_130 = arith.constant 1 : index
    %c2_131 = arith.constant 2 : index
    %c0_132 = arith.constant 0 : index
    %127 = vector.load %arg11[%c1_130, %c2_131, %c0_132] : memref<18x18x128xf32, #tpu.memory_space<vmem>>, vector<16x16x128xf32>
    %128 = vector.shape_cast %127 : vector<16x16x128xf32> to vector<256x128xf32>
    %129 = arith.truncf %128 : vector<256x128xf32> to vector<256x128xbf16>
    %c5_133 = arith.constant 5 : index
    %c0_134 = arith.constant 0 : index
    %c0_135 = arith.constant 0 : index
    %130 = vector.load %arg5[%c5_133, %c0_134, %c0_135] : memref<9x128x128xbf16, #tpu.memory_space<vmem>>, vector<1x128x128xbf16>
    %131 = vector.shape_cast %130 : vector<1x128x128xbf16> to vector<128x128xbf16>
    %cst_136 = arith.constant dense<0.000000e+00> : vector<256x128xf32>
    %132 = tpu.matmul %129, %131, %cst_136 {dimension_numbers = #tpu.dot_dimension_numbers<[1], [0], [0], [1], [0, 0, 1, 1], [], []>} : vector<256x128xbf16>, vector<128x128xbf16>, vector<256x128xf32> -> vector<256x128xf32>
    %133 = arith.addf %126, %132 : vector<256x128xf32>
    %c2_137 = arith.constant 2 : index
    %c0_138 = arith.constant 0 : index
    %c0_139 = arith.constant 0 : index
    %134 = vector.load %arg11[%c2_137, %c0_138, %c0_139] : memref<18x18x128xf32, #tpu.memory_space<vmem>>, vector<16x16x128xf32>
    %135 = vector.shape_cast %134 : vector<16x16x128xf32> to vector<256x128xf32>
    %136 = arith.truncf %135 : vector<256x128xf32> to vector<256x128xbf16>
    %c6_140 = arith.constant 6 : index
    %c0_141 = arith.constant 0 : index
    %c0_142 = arith.constant 0 : index
    %137 = vector.load %arg5[%c6_140, %c0_141, %c0_142] : memref<9x128x128xbf16, #tpu.memory_space<vmem>>, vector<1x128x128xbf16>
    %138 = vector.shape_cast %137 : vector<1x128x128xbf16> to vector<128x128xbf16>
    %cst_143 = arith.constant dense<0.000000e+00> : vector<256x128xf32>
    %139 = tpu.matmul %136, %138, %cst_143 {dimension_numbers = #tpu.dot_dimension_numbers<[1], [0], [0], [1], [0, 0, 1, 1], [], []>} : vector<256x128xbf16>, vector<128x128xbf16>, vector<256x128xf32> -> vector<256x128xf32>
    %140 = arith.addf %133, %139 : vector<256x128xf32>
    %c2_144 = arith.constant 2 : index
    %c1_145 = arith.constant 1 : index
    %c0_146 = arith.constant 0 : index
    %141 = vector.load %arg11[%c2_144, %c1_145, %c0_146] : memref<18x18x128xf32, #tpu.memory_space<vmem>>, vector<16x16x128xf32>
    %142 = vector.shape_cast %141 : vector<16x16x128xf32> to vector<256x128xf32>
    %143 = arith.truncf %142 : vector<256x128xf32> to vector<256x128xbf16>
    %c7_147 = arith.constant 7 : index
    %c0_148 = arith.constant 0 : index
    %c0_149 = arith.constant 0 : index
    %144 = vector.load %arg5[%c7_147, %c0_148, %c0_149] : memref<9x128x128xbf16, #tpu.memory_space<vmem>>, vector<1x128x128xbf16>
    %145 = vector.shape_cast %144 : vector<1x128x128xbf16> to vector<128x128xbf16>
    %cst_150 = arith.constant dense<0.000000e+00> : vector<256x128xf32>
    %146 = tpu.matmul %143, %145, %cst_150 {dimension_numbers = #tpu.dot_dimension_numbers<[1], [0], [0], [1], [0, 0, 1, 1], [], []>} : vector<256x128xbf16>, vector<128x128xbf16>, vector<256x128xf32> -> vector<256x128xf32>
    %147 = arith.addf %140, %146 : vector<256x128xf32>
    %c2_151 = arith.constant 2 : index
    %c2_152 = arith.constant 2 : index
    %c0_153 = arith.constant 0 : index
    %148 = vector.load %arg11[%c2_151, %c2_152, %c0_153] : memref<18x18x128xf32, #tpu.memory_space<vmem>>, vector<16x16x128xf32>
    %149 = vector.shape_cast %148 : vector<16x16x128xf32> to vector<256x128xf32>
    %150 = arith.truncf %149 : vector<256x128xf32> to vector<256x128xbf16>
    %c8_154 = arith.constant 8 : index
    %c0_155 = arith.constant 0 : index
    %c0_156 = arith.constant 0 : index
    %151 = vector.load %arg5[%c8_154, %c0_155, %c0_156] : memref<9x128x128xbf16, #tpu.memory_space<vmem>>, vector<1x128x128xbf16>
    %152 = vector.shape_cast %151 : vector<1x128x128xbf16> to vector<128x128xbf16>
    %cst_157 = arith.constant dense<0.000000e+00> : vector<256x128xf32>
    %153 = tpu.matmul %150, %152, %cst_157 {dimension_numbers = #tpu.dot_dimension_numbers<[1], [0], [0], [1], [0, 0, 1, 1], [], []>} : vector<256x128xbf16>, vector<128x128xbf16>, vector<256x128xf32> -> vector<256x128xf32>
    %154 = arith.addf %147, %153 : vector<256x128xf32>
    %c0_158 = arith.constant 0 : index
    %c0_159 = arith.constant 0 : index
    %155 = vector.load %arg6[%c0_158, %c0_159] : memref<1x128xf32, #tpu.memory_space<vmem>>, vector<1x128xf32>
    %156 = vector.broadcast %155 : vector<1x128xf32> to vector<256x128xf32>
    %157 = arith.addf %154, %156 : vector<256x128xf32>
    %cst_160 = arith.constant 0.000000e+00 : f32
    %158 = vector.broadcast %cst_160 : f32 to vector<256x128xf32>
    %159 = arith.maximumf %157, %158 : vector<256x128xf32>
    %160 = vector.shape_cast %159 : vector<256x128xf32> to vector<16x16x128xf32>
    %c0_161 = arith.constant 0 : index
    %c0_162 = arith.constant 0 : index
    %c0_163 = arith.constant 0 : index
    %161 = vector.load %arg10[%c0_161, %c0_162, %c0_163] : memref<16x16x128xf32, #tpu.memory_space<vmem>>, vector<16x16x128xf32>
    tpu.vector_store %arg10[%c0_161, %c0_162, %c0_163], %160 {strides = array<i32>} : memref<16x16x128xf32, #tpu.memory_space<vmem>>, vector<16x16x128xf32>,
    %c0_164 = arith.constant 0 : index
    %c0_165 = arith.constant 0 : index
    %c0_166 = arith.constant 0 : index
    %162 = vector.load %arg10[%c0_164, %c0_165, %c0_166] : memref<16x16x128xf32, #tpu.memory_space<vmem>>, vector<16x16x128xf32>
    %c1_167 = arith.constant 1 : index
    %c1_168 = arith.constant 1 : index
    %c0_169 = arith.constant 0 : index
    %163 = vector.load %arg11[%c1_167, %c1_168, %c0_169] : memref<18x18x128xf32, #tpu.memory_space<vmem>>, vector<16x16x128xf32>
    tpu.vector_store %arg11[%c1_167, %c1_168, %c0_169], %162 {strides = array<i32>} : memref<18x18x128xf32, #tpu.memory_space<vmem>>, vector<16x16x128xf32>,
    %c0_170 = arith.constant 0 : index
    %c0_171 = arith.constant 0 : index
    %c0_172 = arith.constant 0 : index
    %164 = vector.load %arg11[%c0_170, %c0_171, %c0_172] : memref<18x18x128xf32, #tpu.memory_space<vmem>>, vector<16x16x128xf32>
    %165 = vector.shape_cast %164 : vector<16x16x128xf32> to vector<256x128xf32>
    %166 = arith.truncf %165 : vector<256x128xf32> to vector<256x128xbf16>
    %c0_173 = arith.constant 0 : index
    %c0_174 = arith.constant 0 : index
    %c0_175 = arith.constant 0 : index
    %167 = vector.load %arg7[%c0_173, %c0_174, %c0_175] : memref<9x128x128xbf16, #tpu.memory_space<vmem>>, vector<1x128x128xbf16>
    %168 = vector.shape_cast %167 : vector<1x128x128xbf16> to vector<128x128xbf16>
    %cst_176 = arith.constant dense<0.000000e+00> : vector<256x128xf32>
    %169 = tpu.matmul %166, %168, %cst_176 {dimension_numbers = #tpu.dot_dimension_numbers<[1], [0], [0], [1], [0, 0, 1, 1], [], []>} : vector<256x128xbf16>, vector<128x128xbf16>, vector<256x128xf32> -> vector<256x128xf32>
    %c0_177 = arith.constant 0 : index
    %c1_178 = arith.constant 1 : index
    %c0_179 = arith.constant 0 : index
    %170 = vector.load %arg11[%c0_177, %c1_178, %c0_179] : memref<18x18x128xf32, #tpu.memory_space<vmem>>, vector<16x16x128xf32>
    %171 = vector.shape_cast %170 : vector<16x16x128xf32> to vector<256x128xf32>
    %172 = arith.truncf %171 : vector<256x128xf32> to vector<256x128xbf16>
    %c1_180 = arith.constant 1 : index
    %c0_181 = arith.constant 0 : index
    %c0_182 = arith.constant 0 : index
    %173 = vector.load %arg7[%c1_180, %c0_181, %c0_182] : memref<9x128x128xbf16, #tpu.memory_space<vmem>>, vector<1x128x128xbf16>
    %174 = vector.shape_cast %173 : vector<1x128x128xbf16> to vector<128x128xbf16>
    %cst_183 = arith.constant dense<0.000000e+00> : vector<256x128xf32>
    %175 = tpu.matmul %172, %174, %cst_183 {dimension_numbers = #tpu.dot_dimension_numbers<[1], [0], [0], [1], [0, 0, 1, 1], [], []>} : vector<256x128xbf16>, vector<128x128xbf16>, vector<256x128xf32> -> vector<256x128xf32>
    %176 = arith.addf %169, %175 : vector<256x128xf32>
    %c0_184 = arith.constant 0 : index
    %c2_185 = arith.constant 2 : index
    %c0_186 = arith.constant 0 : index
    %177 = vector.load %arg11[%c0_184, %c2_185, %c0_186] : memref<18x18x128xf32, #tpu.memory_space<vmem>>, vector<16x16x128xf32>
    %178 = vector.shape_cast %177 : vector<16x16x128xf32> to vector<256x128xf32>
    %179 = arith.truncf %178 : vector<256x128xf32> to vector<256x128xbf16>
    %c2_187 = arith.constant 2 : index
    %c0_188 = arith.constant 0 : index
    %c0_189 = arith.constant 0 : index
    %180 = vector.load %arg7[%c2_187, %c0_188, %c0_189] : memref<9x128x128xbf16, #tpu.memory_space<vmem>>, vector<1x128x128xbf16>
    %181 = vector.shape_cast %180 : vector<1x128x128xbf16> to vector<128x128xbf16>
    %cst_190 = arith.constant dense<0.000000e+00> : vector<256x128xf32>
    %182 = tpu.matmul %179, %181, %cst_190 {dimension_numbers = #tpu.dot_dimension_numbers<[1], [0], [0], [1], [0, 0, 1, 1], [], []>} : vector<256x128xbf16>, vector<128x128xbf16>, vector<256x128xf32> -> vector<256x128xf32>
    %183 = arith.addf %176, %182 : vector<256x128xf32>
    %c1_191 = arith.constant 1 : index
    %c0_192 = arith.constant 0 : index
    %c0_193 = arith.constant 0 : index
    %184 = vector.load %arg11[%c1_191, %c0_192, %c0_193] : memref<18x18x128xf32, #tpu.memory_space<vmem>>, vector<16x16x128xf32>
    %185 = vector.shape_cast %184 : vector<16x16x128xf32> to vector<256x128xf32>
    %186 = arith.truncf %185 : vector<256x128xf32> to vector<256x128xbf16>
    %c3_194 = arith.constant 3 : index
    %c0_195 = arith.constant 0 : index
    %c0_196 = arith.constant 0 : index
    %187 = vector.load %arg7[%c3_194, %c0_195, %c0_196] : memref<9x128x128xbf16, #tpu.memory_space<vmem>>, vector<1x128x128xbf16>
    %188 = vector.shape_cast %187 : vector<1x128x128xbf16> to vector<128x128xbf16>
    %cst_197 = arith.constant dense<0.000000e+00> : vector<256x128xf32>
    %189 = tpu.matmul %186, %188, %cst_197 {dimension_numbers = #tpu.dot_dimension_numbers<[1], [0], [0], [1], [0, 0, 1, 1], [], []>} : vector<256x128xbf16>, vector<128x128xbf16>, vector<256x128xf32> -> vector<256x128xf32>
    %190 = arith.addf %183, %189 : vector<256x128xf32>
    %c1_198 = arith.constant 1 : index
    %c1_199 = arith.constant 1 : index
    %c0_200 = arith.constant 0 : index
    %191 = vector.load %arg11[%c1_198, %c1_199, %c0_200] : memref<18x18x128xf32, #tpu.memory_space<vmem>>, vector<16x16x128xf32>
    %192 = vector.shape_cast %191 : vector<16x16x128xf32> to vector<256x128xf32>
    %193 = arith.truncf %192 : vector<256x128xf32> to vector<256x128xbf16>
    %c4_201 = arith.constant 4 : index
    %c0_202 = arith.constant 0 : index
    %c0_203 = arith.constant 0 : index
    %194 = vector.load %arg7[%c4_201, %c0_202, %c0_203] : memref<9x128x128xbf16, #tpu.memory_space<vmem>>, vector<1x128x128xbf16>
    %195 = vector.shape_cast %194 : vector<1x128x128xbf16> to vector<128x128xbf16>
    %cst_204 = arith.constant dense<0.000000e+00> : vector<256x128xf32>
    %196 = tpu.matmul %193, %195, %cst_204 {dimension_numbers = #tpu.dot_dimension_numbers<[1], [0], [0], [1], [0, 0, 1, 1], [], []>} : vector<256x128xbf16>, vector<128x128xbf16>, vector<256x128xf32> -> vector<256x128xf32>
    %197 = arith.addf %190, %196 : vector<256x128xf32>
    %c1_205 = arith.constant 1 : index
    %c2_206 = arith.constant 2 : index
    %c0_207 = arith.constant 0 : index
    %198 = vector.load %arg11[%c1_205, %c2_206, %c0_207] : memref<18x18x128xf32, #tpu.memory_space<vmem>>, vector<16x16x128xf32>
    %199 = vector.shape_cast %198 : vector<16x16x128xf32> to vector<256x128xf32>
    %200 = arith.truncf %199 : vector<256x128xf32> to vector<256x128xbf16>
    %c5_208 = arith.constant 5 : index
    %c0_209 = arith.constant 0 : index
    %c0_210 = arith.constant 0 : index
    %201 = vector.load %arg7[%c5_208, %c0_209, %c0_210] : memref<9x128x128xbf16, #tpu.memory_space<vmem>>, vector<1x128x128xbf16>
    %202 = vector.shape_cast %201 : vector<1x128x128xbf16> to vector<128x128xbf16>
    %cst_211 = arith.constant dense<0.000000e+00> : vector<256x128xf32>
    %203 = tpu.matmul %200, %202, %cst_211 {dimension_numbers = #tpu.dot_dimension_numbers<[1], [0], [0], [1], [0, 0, 1, 1], [], []>} : vector<256x128xbf16>, vector<128x128xbf16>, vector<256x128xf32> -> vector<256x128xf32>
    %204 = arith.addf %197, %203 : vector<256x128xf32>
    %c2_212 = arith.constant 2 : index
    %c0_213 = arith.constant 0 : index
    %c0_214 = arith.constant 0 : index
    %205 = vector.load %arg11[%c2_212, %c0_213, %c0_214] : memref<18x18x128xf32, #tpu.memory_space<vmem>>, vector<16x16x128xf32>
    %206 = vector.shape_cast %205 : vector<16x16x128xf32> to vector<256x128xf32>
    %207 = arith.truncf %206 : vector<256x128xf32> to vector<256x128xbf16>
    %c6_215 = arith.constant 6 : index
    %c0_216 = arith.constant 0 : index
    %c0_217 = arith.constant 0 : index
    %208 = vector.load %arg7[%c6_215, %c0_216, %c0_217] : memref<9x128x128xbf16, #tpu.memory_space<vmem>>, vector<1x128x128xbf16>
    %209 = vector.shape_cast %208 : vector<1x128x128xbf16> to vector<128x128xbf16>
    %cst_218 = arith.constant dense<0.000000e+00> : vector<256x128xf32>
    %210 = tpu.matmul %207, %209, %cst_218 {dimension_numbers = #tpu.dot_dimension_numbers<[1], [0], [0], [1], [0, 0, 1, 1], [], []>} : vector<256x128xbf16>, vector<128x128xbf16>, vector<256x128xf32> -> vector<256x128xf32>
    %211 = arith.addf %204, %210 : vector<256x128xf32>
    %c2_219 = arith.constant 2 : index
    %c1_220 = arith.constant 1 : index
    %c0_221 = arith.constant 0 : index
    %212 = vector.load %arg11[%c2_219, %c1_220, %c0_221] : memref<18x18x128xf32, #tpu.memory_space<vmem>>, vector<16x16x128xf32>
    %213 = vector.shape_cast %212 : vector<16x16x128xf32> to vector<256x128xf32>
    %214 = arith.truncf %213 : vector<256x128xf32> to vector<256x128xbf16>
    %c7_222 = arith.constant 7 : index
    %c0_223 = arith.constant 0 : index
    %c0_224 = arith.constant 0 : index
    %215 = vector.load %arg7[%c7_222, %c0_223, %c0_224] : memref<9x128x128xbf16, #tpu.memory_space<vmem>>, vector<1x128x128xbf16>
    %216 = vector.shape_cast %215 : vector<1x128x128xbf16> to vector<128x128xbf16>
    %cst_225 = arith.constant dense<0.000000e+00> : vector<256x128xf32>
    %217 = tpu.matmul %214, %216, %cst_225 {dimension_numbers = #tpu.dot_dimension_numbers<[1], [0], [0], [1], [0, 0, 1, 1], [], []>} : vector<256x128xbf16>, vector<128x128xbf16>, vector<256x128xf32> -> vector<256x128xf32>
    %218 = arith.addf %211, %217 : vector<256x128xf32>
    %c2_226 = arith.constant 2 : index
    %c2_227 = arith.constant 2 : index
    %c0_228 = arith.constant 0 : index
    %219 = vector.load %arg11[%c2_226, %c2_227, %c0_228] : memref<18x18x128xf32, #tpu.memory_space<vmem>>, vector<16x16x128xf32>
    %220 = vector.shape_cast %219 : vector<16x16x128xf32> to vector<256x128xf32>
    %221 = arith.truncf %220 : vector<256x128xf32> to vector<256x128xbf16>
    %c8_229 = arith.constant 8 : index
    %c0_230 = arith.constant 0 : index
    %c0_231 = arith.constant 0 : index
    %222 = vector.load %arg7[%c8_229, %c0_230, %c0_231] : memref<9x128x128xbf16, #tpu.memory_space<vmem>>, vector<1x128x128xbf16>
    %223 = vector.shape_cast %222 : vector<1x128x128xbf16> to vector<128x128xbf16>
    %cst_232 = arith.constant dense<0.000000e+00> : vector<256x128xf32>
    %224 = tpu.matmul %221, %223, %cst_232 {dimension_numbers = #tpu.dot_dimension_numbers<[1], [0], [0], [1], [0, 0, 1, 1], [], []>} : vector<256x128xbf16>, vector<128x128xbf16>, vector<256x128xf32> -> vector<256x128xf32>
    %225 = arith.addf %218, %224 : vector<256x128xf32>
    %c0_233 = arith.constant 0 : index
    %c0_234 = arith.constant 0 : index
    %226 = vector.load %arg8[%c0_233, %c0_234] : memref<1x128xf32, #tpu.memory_space<vmem>>, vector<1x128xf32>
    %227 = vector.broadcast %226 : vector<1x128xf32> to vector<256x128xf32>
    %228 = arith.addf %225, %227 : vector<256x128xf32>
    %229 = vector.shape_cast %228 : vector<256x128xf32> to vector<16x16x128xf32>
    %c0_235 = arith.constant 0 : index
    %c0_236 = arith.constant 0 : index
    %c0_237 = arith.constant 0 : index
    %230 = vector.load %arg10[%c0_235, %c0_236, %c0_237] : memref<16x16x128xf32, #tpu.memory_space<vmem>>, vector<16x16x128xf32>
    tpu.vector_store %arg10[%c0_235, %c0_236, %c0_237], %229 {strides = array<i32>} : memref<16x16x128xf32, #tpu.memory_space<vmem>>, vector<16x16x128xf32>,
    %c0_238 = arith.constant 0 : index
    %c0_239 = arith.constant 0 : index
    %c0_240 = arith.constant 0 : index
    %231 = vector.load %arg10[%c0_238, %c0_239, %c0_240] : memref<16x16x128xf32, #tpu.memory_space<vmem>>, vector<16x16x128xf32>
    %c0_241 = arith.constant 0 : index
    %c0_242 = arith.constant 0 : index
    %c0_243 = arith.constant 0 : index
    %c0_244 = arith.constant 0 : index
    %232 = vector.load %arg9[%c0_241, %c0_242, %c0_243, %c0_244] : memref<1x16x16x128xf32, #tpu.memory_space<vmem>>, vector<1x16x16x128xf32>
    %233 = vector.shape_cast %232 : vector<1x16x16x128xf32> to vector<16x16x128xf32>
    %234 = vector.shape_cast %231 : vector<16x16x128xf32> to vector<1x16x16x128xf32>
    tpu.vector_store %arg9[%c0_241, %c0_242, %c0_243, %c0_244], %234 {strides = array<i32>} : memref<1x16x16x128xf32, #tpu.memory_space<vmem>>, vector<1x16x16x128xf32>,
    return
  }
  func.func @transform_0(%arg0: i32) -> (i32, i32, i32, i32) {
    %c0_i32 = arith.constant 0 : i32
    %c0_i32_0 = arith.constant 0 : i32
    %c0_i32_1 = arith.constant 0 : i32
    %c0_i32_2 = arith.constant 0 : i32
    return %arg0, %c0_i32, %c0_i32_0, %c0_i32_1 : i32, i32, i32, i32
  }
  func.func @transform_1(%arg0: i32) -> (i32, i32) {
    %c0_i32 = arith.constant 0 : i32
    %c0_i32_0 = arith.constant 0 : i32
    %c0_i32_1 = arith.constant 0 : i32
    return %c0_i32, %c0_i32_0 : i32, i32
  }
  func.func @transform_2(%arg0: i32) -> (i32, i32, i32) {
    %c0_i32 = arith.constant 0 : i32
    %c0_i32_0 = arith.constant 0 : i32
    %c0_i32_1 = arith.constant 0 : i32
    %c0_i32_2 = arith.constant 0 : i32
    return %c0_i32, %c0_i32_0, %c0_i32_1 : i32, i32, i32
  }
  func.func @transform_3(%arg0: i32) -> (i32, i32) {
    %c0_i32 = arith.constant 0 : i32
    %c0_i32_0 = arith.constant 0 : i32
    %c0_i32_1 = arith.constant 0 : i32
    return %c0_i32, %c0_i32_0 : i32, i32
  }
  func.func @transform_4(%arg0: i32) -> (i32, i32, i32) {
    %c0_i32 = arith.constant 0 : i32
    %c0_i32_0 = arith.constant 0 : i32
    %c0_i32_1 = arith.constant 0 : i32
    %c0_i32_2 = arith.constant 0 : i32
    return %c0_i32, %c0_i32_0, %c0_i32_1 : i32, i32, i32
  }
  func.func @transform_5(%arg0: i32) -> (i32, i32) {
    %c0_i32 = arith.constant 0 : i32
    %c0_i32_0 = arith.constant 0 : i32
    %c0_i32_1 = arith.constant 0 : i32
    return %c0_i32, %c0_i32_0 : i32, i32
  }
  func.func @transform_6(%arg0: i32) -> (i32, i32, i32) {
    %c0_i32 = arith.constant 0 : i32
    %c0_i32_0 = arith.constant 0 : i32
    %c0_i32_1 = arith.constant 0 : i32
    %c0_i32_2 = arith.constant 0 : i32
    return %c0_i32, %c0_i32_0, %c0_i32_1 : i32, i32, i32
  }
  func.func @transform_7(%arg0: i32) -> (i32, i32) {
    %c0_i32 = arith.constant 0 : i32
    %c0_i32_0 = arith.constant 0 : i32
    %c0_i32_1 = arith.constant 0 : i32
    return %c0_i32, %c0_i32_0 : i32, i32
  }
  func.func @transform_8(%arg0: i32) -> (i32, i32, i32, i32) {
    %c0_i32 = arith.constant 0 : i32
    %c0_i32_0 = arith.constant 0 : i32
    %c0_i32_1 = arith.constant 0 : i32
    %c0_i32_2 = arith.constant 0 : i32
    return %arg0, %c0_i32, %c0_i32_0, %c0_i32_1 : i32, i32, i32, i32
  }
}

</mosaic_0001>

<bundles_post_ra>
// kernel: decoder_forward_pallas.3
= control target key start
LH: loop header
LB: loop body
LE: loop exit
PB: predicated region body
PF: predicated region fallthrough
CT: control target
= control target key end

     0   :  { %s5962_s17 = smov 0   ;;  %s7020_s0 = inlined_call_operand.vmem [shape: f32[2,4,4,128], index: 0, kind: input, shape index: {}]   ;;  %s7021_s1 = inlined_call_operand.vmem [shape: bf16[9,128,128], index: 1, kind: input, shape index: {}]   ;;  %s7022_s2 = inlined_call_operand.vmem [shape: f32[1,128], index: 2, kind: input, shape index: {}]   ;;  %s7023_s3 = inlined_call_operand.vmem [shape: bf16[9,128,128], index: 3, kind: input, shape index: {}]   ;;  %s7024_s4 = inlined_call_operand.vmem [shape: f32[1,128], index: 4, kind: input, shape index: {}]   ;;  %s7025_s5 = inlined_call_operand.vmem [shape: bf16[1,128,128], index: 5, kind: input, shape index: {}]   ;;  %s7026_s6 = inlined_call_operand.vmem [shape: f32[1,128], index: 6, kind: input, shape index: {}]   ;;  %s7027_s7 = inlined_call_operand.vmem [shape: bf16[9,128,128], index: 7, kind: input, shape index: {}]   ;;  %s7028_s8 = inlined_call_operand.vmem [shape: f32[1,128], index: 8, kind: input, shape index: {}]   ;;  %s7029_s9 = inlined_call_operand.vmem [shape: bf16[1,128,128], index: 9, kind: input, shape index: {}]   ;;  %s7030_s10 = inlined_call_operand.vmem [shape: f32[1,128], index: 10, kind: input, shape index: {}]   ;;  %s7031_s11 = inlined_call_operand.vmem [shape: bf16[2,4,4,128], index: 11, kind: output, shape index: {}]  }
   0x1 LB: > { %s4121_s18 = sadd.s32 4294967295, %s5898_s17   ;;  %p4125_p0 = scmp.ge.s32.totalorder %s5898_s17, 1  ;;  %s5898_s17 = sphi %s5962_s17, %s21_s17  }
   0x2   : > { %p337_p1 = scmp.lt.s32.totalorder %s5898_s17, 3 }
   0x4   : > { %p338_p2 = pnand %p4125_p0, %p337_p1 }
   0x5   : > { %v5606_v0 = vld [vmem:[%s7021_s1 + $0x40] sm:$0xff] (!%p338_p2)   ;;  %v5900_v1 = vmov (!%p338_p2), 0.0   ;;  %v5608_v3 = vld [vmem:[%s7021_s1 + $0x48] sm:$0xff] (!%p338_p2)   ;;  %vm5901_vm0 = vmmov (!%p338_p2), 0   ;;  %p377_p3 = scmp.lt.s32.totalorder (!%p338_p2), %s4121_s18, 1  ;;  %v5610_v5 = vld [vmem:[%s7021_s1 + $0x50] sm:$0xff] (!%p338_p2)  }
   0x6   : > { %341 = sbr.rel (%p338_p2) target bundleno = 1584 (0x630), region = 64  ;;  %5016 = vmatprep.subr.bf16.mxu0 (!%p338_p2), %v5900_v1  ;;  %388 = vst [vmem:[#allocation3] sm:$0xff] (!%p338_p2), %v5900_v1  ;;  %389 = vst [vmem:[#allocation3 + $0x8] sm:$0x3] (!%p338_p2), %v5900_v1  ;;  %5036 = vmatprep.subr.bf16.mxu1 (!%p338_p2), %v5900_v1  ;;  %v5607_v2 = vld [vmem:[%s7021_s1] sm:$0xff] (!%p338_p2)   ;;  %v5609_v4 = vld [vmem:[%s7021_s1 + $0x8] sm:$0xff] (!%p338_p2)  }
   0x7   : > { %390 = vst [vmem:[#allocation3 + $0x10] sm:$0xff] (!%p338_p2), %v5900_v1  ;;  %391 = vst [vmem:[#allocation3 + $0x18] sm:$0x3] (!%p338_p2), %v5900_v1  ;;  %5017 = vmatpush3.bf16.msra.mxu0 (!%p338_p2), %v5606_v0  ;;  %5032 = vmatprep.mubr.msk.bf16.mxu0 (!%p338_p2), %vm5901_vm0, %v5900_v1  ;;  %v5611_v6 = vld [vmem:[%s7021_s1 + $0x10] sm:$0xff] (!%p338_p2)   ;;  %v5612_v7 = vld [vmem:[%s7021_s1 + $0x58] sm:$0xff] (!%p338_p2)  }
   0x8   : > { %392 = vst [vmem:[#allocation3 + $0x20] sm:$0xff] (!%p338_p2), %v5900_v1  ;;  %393 = vst [vmem:[#allocation3 + $0x28] sm:$0x3] (!%p338_p2), %v5900_v1  ;;  %5037 = vmatpush3.bf16.msra.mxu1 (!%p338_p2), %v5607_v2  ;;  %5018 = vmatprep.subr.bf16.mxu0 (!%p338_p2), %v5900_v1  ;;  %v5613_v8 = vld [vmem:[%s7021_s1 + $0x18] sm:$0xff] (!%p338_p2)   ;;  %v5614_v9 = vld [vmem:[%s7021_s1 + $0x60] sm:$0xff] (!%p338_p2)  }
   0x9   : > { %395 = vst [vmem:[#allocation3 + $0x70] sm:$0xff] (!%p338_p2), %v5900_v1  ;;  %396 = vst [vmem:[#allocation3 + $0x78] sm:$0x3] (!%p338_p2), %v5900_v1  ;;  %5038 = vmatprep.subr.bf16.mxu1 (!%p338_p2), %v5900_v1  ;;  %5052 = vmatprep.mubr.msk.bf16.mxu1 (!%p338_p2), %vm5901_vm0, %v5900_v1  ;;  %v5615_v10 = vld [vmem:[%s7021_s1 + $0x20] sm:$0xff] (!%p338_p2)   ;;  %v5616_v13 = vld [vmem:[%s7021_s1 + $0x68] sm:$0xff] (!%p338_p2)  }
   0xa   : > { %397 = vst [vmem:[#allocation3 + $0x80] sm:$0xff] (!%p338_p2), %v5900_v1  ;;  %398 = vst [vmem:[#allocation3 + $0x88] sm:$0x3] (!%p338_p2), %v5900_v1  ;;  %v5617_v14 = vld [vmem:[%s7021_s1 + $0x28] sm:$0xff] (!%p338_p2)   ;;  %v5618_v15 = vld [vmem:[%s7021_s1 + $0x70] sm:$0xff] (!%p338_p2)  }
   0xb   : > { %399 = vst [vmem:[#allocation3 + $0x90] sm:$0xff] (!%p338_p2), %v5900_v1  ;;  %400 = vst [vmem:[#allocation3 + $0x98] sm:$0x3] (!%p338_p2), %v5900_v1  ;;  %5019 = vmatpush3.bf16.msra.mxu0 (!%p338_p2), %v5608_v3  ;;  %v5619_v16 = vld [vmem:[%s7021_s1 + $0x30] sm:$0xff] (!%p338_p2)   ;;  %v5620_v20 = vld [vmem:[%s7021_s1 + $0x78] sm:$0xff] (!%p338_p2)  }
   0xc   : > { %404 = vst [vmem:[#allocation3 + $0x30] sm:$0x7] (!%p338_p2), %v5900_v1  ;;  %405 = vst [vmem:[#allocation3 + $0x40] sm:$0x7] (!%p338_p2), %v5900_v1  ;;  %5039 = vmatpush3.bf16.msra.mxu1 (!%p338_p2), %v5609_v4  ;;  %5020 = vmatprep.subr.bf16.mxu0 (!%p338_p2), %v5900_v1  ;;  %v5621_v21 = vld [vmem:[%s7021_s1 + $0x38] sm:$0xff] (!%p338_p2)   ;;  %v5626_v22 = vld [vmem:[%s7021_s1 + $0x80] sm:$0xff] (!%p338_p2)  }
   0xd   : > { %406 = vst [vmem:[#allocation3 + $0x50] sm:$0x7] %v5900_v1  ;;  %407 = vst [vmem:[#allocation3 + $0x60] sm:$0x7] %v5900_v1  ;;  %s7033_s18 = smov (!%p377_p3, %s4121_s18), 1  ;;  %5040 = vmatprep.subr.bf16.mxu1 %v5900_v1  ;;  %v5627_v28 = vld [vmem:[%s7021_s1 + $0xc0] sm:$0xff]  }
   0xe   : > { %414 = vst [vmem:[#allocation3 + $0x37] sm:$0x7] %v5900_v1  ;;  %415 = vst [vmem:[#allocation3 + $0x47] sm:$0x7] %v5900_v1  ;;  %s4753_s14 = sshll.u32 %s7033_s18, 4  ;;  %v5628_v30 = vld [vmem:[%s7021_s1 + $0x88] sm:$0xff]  }
   0xf   : > { %416 = vst [vmem:[#allocation3 + $0x57] sm:$0x7] %v5900_v1  ;;  %417 = vst [vmem:[#allocation3 + $0x67] sm:$0x7] %v5900_v1  ;;  %5021 = vmatpush3.bf16.msra.mxu0 %v5610_v5  ;;  %s381_s21 = scalar_lea.vmem %s7020_s0, %s4753_s14  ;;  %v5629_v31 = vld [vmem:[%s7021_s1 + $0xc8] sm:$0xff]   ;;  %v5630_v33 = vld [vmem:[%s7021_s1 + $0x90] sm:$0xff]  }
  0x10   : > { %401 = vst [vmem:[#allocation3] sm:$0x7] %v5900_v1  ;;  %402 = vst [vmem:[#allocation3 + $0x10] sm:$0x7] %v5900_v1  ;;  %5041 = vmatpush3.bf16.msra.mxu1 %v5611_v6  ;;  %5022 = vmatprep.subr.bf16.mxu0 %v5900_v1  ;;  %v421_v11 = vld [vmem:[%s381_s21] sm:$0xff]   ;;  %v423_v12 = vld [vmem:[%s381_s21 + $0x8] sm:$0xff]  }
  0x11   : > { %403 = vst [vmem:[#allocation3 + $0x20] sm:$0x7] %v5900_v1  ;;  %408 = vst [vmem:[#allocation3 + $0x70] sm:$0x7] %v5900_v1  ;;  %5042 = vmatprep.subr.bf16.mxu1 %v5900_v1  ;;  %v5631_v34 = vld [vmem:[%s7021_s1 + $0xd0] sm:$0xff]   ;;  %v5632_v35 = vld [vmem:[%s7021_s1 + $0x98] sm:$0xff]  }
  0x12   : > { %409 = vst [vmem:[#allocation3 + $0x80] sm:$0x7] %v5900_v1  ;;  %410 = vst [vmem:[#allocation3 + $0x90] sm:$0x7] %v5900_v1  ;;  %v5633_v36 = vld [vmem:[%s7021_s1 + $0xd8] sm:$0xff]   ;;  %v5634_v37 = vld [vmem:[%s7021_s1 + $0xa0] sm:$0xff]  }
  0x13   : > { %411 = vst [vmem:[#allocation3 + $0x7] sm:$0x7] %v5900_v1  ;;  %412 = vst [vmem:[#allocation3 + $0x17] sm:$0x7] %v5900_v1  ;;  %5023 = vmatpush3.bf16.msra.mxu0 %v5612_v7  ;;  %v5635_v38 = vld [vmem:[%s7021_s1 + $0xe0] sm:$0xff]   ;;  %v5636_v39 = vld [vmem:[%s7021_s1 + $0xa8] sm:$0xff]  }
  0x14   : > { %413 = vst [vmem:[#allocation3 + $0x27] sm:$0x7] %v5900_v1  ;;  %418 = vst [vmem:[#allocation3 + $0x77] sm:$0x7] %v5900_v1  ;;  %5043 = vmatpush3.bf16.msra.mxu1 %v5613_v8  ;;  %5024 = vmatprep.subr.bf16.mxu0 %v5900_v1  ;;  %v5637_v40 = vld [vmem:[%s7021_s1 + $0xe8] sm:$0xff]   ;;  %v5638_v41 = vld [vmem:[%s7021_s1 + $0xb0] sm:$0xff]  }
  0x15   : > { %419 = vst [vmem:[#allocation3 + $0x87] sm:$0x7] %v5900_v1  ;;  %420 = vst [vmem:[#allocation3 + $0x97] sm:$0x7] %v5900_v1  ;;  %5044 = vmatprep.subr.bf16.mxu1 %v5900_v1  ;;  %v5639_v42 = vld [vmem:[%s7021_s1 + $0xf0] sm:$0xff]   ;;  %v5640_v45 = vld [vmem:[%s7021_s1 + $0xb8] sm:$0xff]  }
  0x16   : > { %425 = vst [vmem:[#allocation2] sm:$0xff] %v421_v11   ;;  %427 = vst [vmem:[#allocation2 + $0x8] sm:$0xff] %v423_v12   ;;  %v5641_v48 = vld [vmem:[%s7021_s1 + $0xf8] sm:$0xff]   ;;  %v5644_v50 = vld [vmem:[%s7021_s1 + $0x100] sm:$0xff]   ;;  %s4754_s21 = sshll.u32 %s7033_s18, 3 }
  0x17   : > { %5025 = vmatpush3.bf16.msra.mxu0 %v5614_v9  ;;  %v5647_v52 = vld [vmem:[%s7021_s1 + $0x140] sm:$0xff]   ;;  %v5648_v53 = vld [vmem:[%s7021_s1 + $0x108] sm:$0xff]   ;;  %v5650_v55 = vld [vmem:[%s7021_s1 + $0x110] sm:$0xff]   ;;  %s386_s24 = scalar_lea.vmem %s7031_s11, %s4754_s21 }
  0x18   : > { %5045 = vmatpush3.bf16.msra.mxu1 %v5615_v10  ;;  %5026 = vmatprep.subr.bf16.mxu0 %v5900_v1  ;;  %v5649_v54 = vld [vmem:[%s7021_s1 + $0x148] sm:$0xff]   ;;  %v5651_v56 = vld [vmem:[%s7021_s1 + $0x150] sm:$0xff]   ;;  %v5652_v57 = vld [vmem:[%s7021_s1 + $0x118] sm:$0xff]  }
  0x19   : > { %5046 = vmatprep.subr.bf16.mxu1 %v5900_v1  ;;  %v5653_v58 = vld [vmem:[%s7021_s1 + $0x158] sm:$0xff]   ;;  %v5654_v59 = vld [vmem:[%s7021_s1 + $0x120] sm:$0xff]   ;;  %v5656_v61 = vld [vmem:[%s7021_s1 + $0x128] sm:$0xff]  }
  0x1a   : > { %v5655_v60 = vld [vmem:[%s7021_s1 + $0x160] sm:$0xff]   ;;  %v5657_v62 = vld [vmem:[%s7021_s1 + $0x168] sm:$0xff]   ;;  %v5658_v63 = vld [vmem:[%s7021_s1 + $0x130] sm:$0xff]  }
  0x1b   : > { %5027 = vmatpush3.bf16.msra.mxu0 %v5616_v13  ;;  %v5659_v0 = vld [vmem:[%s7021_s1 + $0x170] sm:$0xff]   ;;  %v5660_v4 = vld [vmem:[%s7021_s1 + $0x138] sm:$0xff]   ;;  %v5664_v8 = vld [vmem:[%s7021_s1 + $0x180] sm:$0xff]  }
  0x1c   : > { %5047 = vmatpush3.bf16.msra.mxu1 %v5617_v14  ;;  %5028 = vmatprep.subr.bf16.mxu0 %v5900_v1  ;;  %v5661_v7 = vld [vmem:[%s7021_s1 + $0x178] sm:$0xff]   ;;  %v5667_v10 = vld [vmem:[%s7021_s1 + $0x1c0] sm:$0xff]   ;;  %v5668_v12 = vld [vmem:[%s7021_s1 + $0x188] sm:$0xff]  }
  0x1d   : > { %5048 = vmatprep.subr.bf16.mxu1 %v5900_v1  ;;  %v429_v17 = vld [vmem:[#allocation2] sm:$0xf]  ;;  %v430_v18 = vld [vmem:[#allocation2 + $0x4] sm:$0xf]  ;;  %v431_v19 = vld [vmem:[#allocation2 + $0x8] sm:$0xf] }
  0x1e   : > { %434 = vst [vmem:[#allocation3 + $0x33] sm:$0xf] %v429_v17  ;;  %435 = vst [vmem:[#allocation3 + $0x43] sm:$0xf] %v430_v18  ;;  %v432_v32 = vld [vmem:[#allocation2 + $0xc] sm:$0xf] }
  0x1f   : > { %436 = vst [vmem:[#allocation3 + $0x53] sm:$0xf] %v431_v19  ;;  %5029 = vmatpush3.bf16.msra.mxu0 %v5618_v15  ;;  %437 = vst [vmem:[#allocation3 + $0x63] sm:$0xf] %v432_v32  ;;  %v5669_v13 = vld [vmem:[%s7021_s1 + $0x1c8] sm:$0xff]   ;;  %v5670_v14 = vld [vmem:[%s7021_s1 + $0x190] sm:$0xff]  }
  0x20   : > { %5049 = vmatpush3.bf16.msra.mxu1 %v5619_v16  ;;  %5030 = vmatprep.subr.bf16.mxu0 %v5900_v1  ;;  %v5671_v15 = vld [vmem:[%s7021_s1 + $0x1d0] sm:$0xff]   ;;  %v5672_v16 = vld [vmem:[%s7021_s1 + $0x198] sm:$0xff]   ;;  %v5674_v18 = vld [vmem:[%s7021_s1 + $0x1a0] sm:$0xff]  }
  0x21   : > { %5050 = vmatprep.subr.bf16.mxu1 %v5900_v1  ;;  %v5673_v17 = vld [vmem:[%s7021_s1 + $0x1d8] sm:$0xff]   ;;  %v5675_v19 = vld [vmem:[%s7021_s1 + $0x1e0] sm:$0xff]  }
  0x23   : > { %5031 = vmatpush3.bf16.msra.mxu0 %v5620_v20  ;;  %v5676_v20 = vld [vmem:[%s7021_s1 + $0x1a8] sm:$0xff]  }
  0x24   : > { %5051 = vmatpush3.bf16.msra.mxu1 %v5621_v21  ;;  %5056 = vmatprep.subr.bf16.mxu0 %v5900_v1  ;;  %v5677_v21 = vld [vmem:[%s7021_s1 + $0x1e8] sm:$0xff]  }
  0x25   : > { %5076 = vmatprep.subr.bf16.mxu1 %v5900_v1  ;;  %v5622_v23 = vld [vmem:[#allocation3 + $0x23] ss:$16 sps:$4 sm:$0xff]  }
  0x26   : > { %v5623_v24 = vld [vmem:[#allocation3 + $0x43] ss:$16 sps:$4 sm:$0xff]  }
  0x27   : > { %v5624_v25 = vld [vmem:[#allocation3 + $0x22] ss:$16 sps:$4 sm:$0xff]   ;;  %v480_v26 = vpack.c.bf16 %v5623_v24, %v5622_v23 }
  0x28   : > { %v5625_v27 = vld [vmem:[#allocation3 + $0x42] ss:$16 sps:$4 sm:$0xff]  }
  0x29   : > { %5033 = vmatmul.mubr.bf16.vlgmr.msra.gmra.mrb[0].mxu0 %v480_v26  ;;  %v451_v29 = vpack.c.bf16 %v5625_v27, %v5624_v25  ;;  %v5642_v43 = vld [vmem:[#allocation3 + $0x24] ss:$16 sps:$4 sm:$0xff]   ;;  %v5680_v26 = vld [vmem:[%s7021_s1 + $0x1b8] sm:$0xff]  }
  0x2a   : > { %5057 = vmatpush3.bf16.msra.mxu0 %v5626_v22  ;;  %5072 = vmatprep.mubr.msk.bf16.mxu0 %vm5901_vm0, %v5900_v1  ;;  %v5643_v44 = vld [vmem:[#allocation3 + $0x44] ss:$16 sps:$4 sm:$0xff]  }
  0x2b   : > { %5053 = vmatmul.mubr.bf16.vlgmr.msra.gmra.mrb[0].mxu1 %v451_v29  ;;  %5058 = vmatprep.subr.bf16.mxu0 %v5900_v1  ;;  %v5645_v46 = vld [vmem:[#allocation3 + $0x32] ss:$16 sps:$4 sm:$0xff]   ;;  %v688_v49 = vpack.c.bf16 %v5643_v44, %v5642_v43  ;;  %v5681_v29 = vld [vmem:[%s7021_s1 + $0x1f8] sm:$0xff]  }
  0x2c   : > { %5077 = vmatpush3.bf16.msra.mxu1 %v5627_v28  ;;  %5092 = vmatprep.mubr.msk.bf16.mxu1 %vm5901_vm0, %v5900_v1  ;;  %v5646_v47 = vld [vmem:[#allocation3 + $0x52] ss:$16 sps:$4 sm:$0xff]  }
  0x2d   : > { %5078 = vmatprep.subr.bf16.mxu1 %v5900_v1  ;;  %v809_v51 = vpack.c.bf16 %v5646_v47, %v5645_v46  ;;  %v5662_v2 = vld [vmem:[#allocation3 + $0x33] ss:$16 sps:$4 sm:$0xff]   ;;  %v5698_v46 = vld [vmem:[%s7023_s3 + $0x48] sm:$0xff]  }
  0x2e   : > { %5059 = vmatpush3.bf16.msra.mxu0 %v5628_v30  ;;  %v5663_v3 = vld [vmem:[#allocation3 + $0x53] ss:$16 sps:$4 sm:$0xff]   ;;  %v5699_v47 = vld [vmem:[%s7023_s3 + $0x8] sm:$0xff]  }
  0x2f   : > { %5060 = vmatprep.subr.bf16.mxu0 %v5900_v1  ;;  %v5665_v5 = vld [vmem:[#allocation3 + $0x34] ss:$16 sps:$4 sm:$0xff]   ;;  %v930_v9 = vpack.c.bf16 %v5663_v3, %v5662_v2 }
  0x30   : > { %5079 = vmatpush3.bf16.msra.mxu1 %v5629_v31  ;;  %v5666_v6 = vld [vmem:[#allocation3 + $0x54] ss:$16 sps:$4 sm:$0xff]  }
  0x31   : > { %5080 = vmatprep.subr.bf16.mxu1 %v5900_v1  ;;  %v1051_v11 = vpack.c.bf16 %v5666_v6, %v5665_v5  ;;  %v5678_v22 = vld [vmem:[%s7021_s1 + $0x1b0] sm:$0xff]   ;;  %v5684_v30 = vld [vmem:[%s7021_s1 + $0x200] sm:$0xff]   ;;  %v5711_v5 = vld [vmem:[%s7023_s3 + $0x38] sm:$0xff]  }
  0x32   : > { %5061 = vmatpush3.bf16.msra.mxu0 %v5630_v33  ;;  %v5679_v23 = vld [vmem:[%s7021_s1 + $0x1f0] sm:$0xff]   ;;  %v5687_v33 = vld [vmem:[%s7021_s1 + $0x208] sm:$0xff]   ;;  %v5696_v43 = vld [vmem:[%s7023_s3 + $0x40] sm:$0xff]  }
  0x33   : > { %5062 = vmatprep.subr.bf16.mxu0 %v5900_v1  ;;  %v5682_v24 = vld [vmem:[#allocation3 + $0x42] ss:$16 sps:$4 sm:$0xff]  }
  0x34   : > { %5081 = vmatpush3.bf16.msra.mxu1 %v5631_v34  ;;  %v5683_v25 = vld [vmem:[#allocation3 + $0x62] ss:$16 sps:$4 sm:$0xff]  }
  0x35   : > { %5082 = vmatprep.subr.bf16.mxu1 %v5900_v1  ;;  %v5685_v27 = vld [vmem:[#allocation3 + $0x43] ss:$16 sps:$4 sm:$0xff]   ;;  %v1173_v31 = vpack.c.bf16 %v5683_v25, %v5682_v24 }
  0x36   : > { %5063 = vmatpush3.bf16.msra.mxu0 %v5632_v35  ;;  %v5686_v28 = vld [vmem:[#allocation3 + $0x63] ss:$16 sps:$4 sm:$0xff]   ;;  %v5689_v35 = vld [vmem:[%s7021_s1 + $0x218] sm:$0xff]  }
  0x37   : > { %5064 = vmatprep.subr.bf16.mxu0 %v5900_v1  ;;  %v1294_v32 = vpack.c.bf16 %v5686_v28, %v5685_v27  ;;  %v5688_v34 = vld [vmem:[%s7021_s1 + $0x210] sm:$0xff]   ;;  %v5697_v44 = vld [vmem:[%s7023_s3] sm:$0xff]  }
  0x38   : > { %5083 = vmatpush3.bf16.msra.mxu1 %v5633_v36  ;;  %v5690_v36 = vld [vmem:[%s7021_s1 + $0x220] sm:$0xff]   ;;  %v5708_v2 = vld [vmem:[%s7023_s3 + $0x70] sm:$0xff]  }
  0x39   : > { %5084 = vmatprep.subr.bf16.mxu1 %v5900_v1  ;;  %v5709_v3 = vld [vmem:[%s7023_s3 + $0x30] sm:$0xff]  }
  0x3a   : > { %5065 = vmatpush3.bf16.msra.mxu0 %v5634_v37  ;;  %v5691_v37 = vld [vmem:[%s7021_s1 + $0x228] sm:$0xff]  }
  0x3b   : > { %5066 = vmatprep.subr.bf16.mxu0 %v5900_v1 }
  0x3c   : > { %5085 = vmatpush3.bf16.msra.mxu1 %v5635_v38  ;;  %v5692_v38 = vld [vmem:[%s7021_s1 + $0x230] sm:$0xff]  }
  0x3d   : > { %5086 = vmatprep.subr.bf16.mxu1 %v5900_v1 }
  0x3e   : > { %5067 = vmatpush3.bf16.msra.mxu0 %v5636_v39  ;;  %v5694_v39 = vld [vmem:[#allocation3 + $0x44] ss:$16 sps:$4 sm:$0xff]  }
  0x3f   : > { %5068 = vmatprep.subr.bf16.mxu0 %v5900_v1 }
  0x40   : > { %5087 = vmatpush3.bf16.msra.mxu1 %v5637_v40  ;;  %v5695_v40 = vld [vmem:[#allocation3 + $0x64] ss:$16 sps:$4 sm:$0xff]  }
  0x41   : > { %5088 = vmatprep.subr.bf16.mxu1 %v5900_v1 }
  0x42   : > { %5069 = vmatpush3.bf16.msra.mxu0 %v5638_v41  ;;  %v5693_v41 = vld [vmem:[%s7021_s1 + $0x238] sm:$0xff]  }
  0x43   : > { %5070 = vmatprep.subr.bf16.mxu0 %v5900_v1 }
  0x44   : > { %5089 = vmatpush3.bf16.msra.mxu1 %v5639_v42  ;;  %v1415_v42 = vpack.c.bf16 %v5695_v40, %v5694_v39 }
  0x45   : > { %5090 = vmatprep.subr.bf16.mxu1 %v5900_v1 }
  0x46   : > { %5071 = vmatpush3.bf16.msra.mxu0 %v5640_v45 }
  0x47   : > { %5096 = vmatprep.subr.bf16.mxu0 %v5900_v1 }
  0x48   : > { %5091 = vmatpush3.bf16.msra.mxu1 %v5641_v48 }
  0x49   : > { %5073 = vmatmul.mubr.bf16.vlgmr.msra.gmra.mrb[4].mxu0 %v688_v49  ;;  %5116 = vmatprep.subr.bf16.mxu1 %v5900_v1 }
  0x4a   : > { %5097 = vmatpush3.bf16.msra.mxu0 %v5644_v50  ;;  %5112 = vmatprep.mubr.msk.bf16.mxu0 %vm5901_vm0, %v5900_v1 }
  0x4b   : > { %5093 = vmatmul.mubr.bf16.vlgmr.msra.gmra.mrb[4].mxu1 %v809_v51  ;;  %5098 = vmatprep.subr.bf16.mxu0 %v5900_v1 }
  0x4c   : > { %5117 = vmatpush3.bf16.msra.mxu1 %v5647_v52  ;;  %5132 = vmatprep.mubr.msk.bf16.mxu1 %vm5901_vm0, %v5900_v1 }
  0x4d   : > { %5118 = vmatprep.subr.bf16.mxu1 %v5900_v1 }
  0x4e   : > { %5099 = vmatpush3.bf16.msra.mxu0 %v5648_v53 }
  0x4f   : > { %5100 = vmatprep.subr.bf16.mxu0 %v5900_v1 }
  0x50   : > { %5119 = vmatpush3.bf16.msra.mxu1 %v5649_v54 }
  0x51   : > { %5120 = vmatprep.subr.bf16.mxu1 %v5900_v1 }
  0x52   : > { %5101 = vmatpush3.bf16.msra.mxu0 %v5650_v55  ;;  %v5700_v55 = vld [vmem:[%s7023_s3 + $0x50] sm:$0xff]  }
  0x53   : > { %5102 = vmatprep.subr.bf16.mxu0 %v5900_v1 }
  0x54   : > { %5121 = vmatpush3.bf16.msra.mxu1 %v5651_v56  ;;  %v5701_v56 = vld [vmem:[%s7023_s3 + $0x10] sm:$0xff]  }
  0x55   : > { %5122 = vmatprep.subr.bf16.mxu1 %v5900_v1 }
  0x56   : > { %5103 = vmatpush3.bf16.msra.mxu0 %v5652_v57 }
  0x57   : > { %5104 = vmatprep.subr.bf16.mxu0 %v5900_v1 }
  0x58   : > { %5123 = vmatpush3.bf16.msra.mxu1 %v5653_v58 }
  0x59   : > { %5124 = vmatprep.subr.bf16.mxu1 %v5900_v1 }
  0x5a   : > { %5105 = vmatpush3.bf16.msra.mxu0 %v5654_v59  ;;  %v5702_v59 = vld [vmem:[%s7023_s3 + $0x58] sm:$0xff]  }
  0x5b   : > { %5106 = vmatprep.subr.bf16.mxu0 %v5900_v1 }
  0x5c   : > { %5125 = vmatpush3.bf16.msra.mxu1 %v5655_v60  ;;  %v5703_v60 = vld [vmem:[%s7023_s3 + $0x18] sm:$0xff]  }
  0x5d   : > { %5126 = vmatprep.subr.bf16.mxu1 %v5900_v1 }
  0x5e   : > { %5107 = vmatpush3.bf16.msra.mxu0 %v5656_v61  ;;  %v5704_v61 = vld [vmem:[%s7023_s3 + $0x60] sm:$0xff]  }
  0x5f   : > { %5108 = vmatprep.subr.bf16.mxu0 %v5900_v1 }
  0x60   : > { %5127 = vmatpush3.bf16.msra.mxu1 %v5657_v62  ;;  %v5705_v62 = vld [vmem:[%s7023_s3 + $0x20] sm:$0xff]  }
  0x61   : > { %5128 = vmatprep.subr.bf16.mxu1 %v5900_v1 }
  0x62   : > { %5109 = vmatpush3.bf16.msra.mxu0 %v5658_v63  ;;  %v5706_v63 = vld [vmem:[%s7023_s3 + $0x68] sm:$0xff]  }
  0x63   : > { %5110 = vmatprep.subr.bf16.mxu0 %v5900_v1 }
  0x64   : > { %5129 = vmatpush3.bf16.msra.mxu1 %v5659_v0  ;;  %v5707_v0 = vld [vmem:[%s7023_s3 + $0x28] sm:$0xff]  }
  0x65   : > { %5130 = vmatprep.subr.bf16.mxu1 %v5900_v1 }
  0x66   : > { %5111 = vmatpush3.bf16.msra.mxu0 %v5660_v4  ;;  %v5710_v4 = vld [vmem:[%s7023_s3 + $0x78] sm:$0xff]  }
  0x67   : > { %5136 = vmatprep.subr.bf16.mxu0 %v5900_v1 }
  0x68   : > { %5131 = vmatpush3.bf16.msra.mxu1 %v5661_v7 }
  0x69   : > { %5113 = vmatmul.mubr.bf16.vlgmr.msra.gmra.mrb[8].mxu0 %v930_v9  ;;  %5156 = vmatprep.subr.bf16.mxu1 %v5900_v1 }
  0x6a   : > { %5137 = vmatpush3.bf16.msra.mxu0 %v5664_v8  ;;  %5152 = vmatprep.mubr.msk.bf16.mxu0 %vm5901_vm0, %v5900_v1 }
  0x6b   : > { %5133 = vmatmul.mubr.bf16.vlgmr.msra.gmra.mrb[8].mxu1 %v1051_v11  ;;  %5138 = vmatprep.subr.bf16.mxu0 %v5900_v1 }
  0x6c   : > { %5157 = vmatpush3.bf16.msra.mxu1 %v5667_v10  ;;  %5172 = vmatprep.mubr.msk.bf16.mxu1 %vm5901_vm0, %v5900_v1 }
  0x6d   : > { %5158 = vmatprep.subr.bf16.mxu1 %v5900_v1 }
  0x6e   : > { %5139 = vmatpush3.bf16.msra.mxu0 %v5668_v12 }
  0x6f   : > { %5140 = vmatprep.subr.bf16.mxu0 %v5900_v1 }
  0x70   : > { %5159 = vmatpush3.bf16.msra.mxu1 %v5669_v13 }
  0x71   : > { %5160 = vmatprep.subr.bf16.mxu1 %v5900_v1 }
  0x72   : > { %5141 = vmatpush3.bf16.msra.mxu0 %v5670_v14 }
  0x73   : > { %5142 = vmatprep.subr.bf16.mxu0 %v5900_v1 }
  0x74   : > { %5161 = vmatpush3.bf16.msra.mxu1 %v5671_v15 }
  0x75   : > { %5162 = vmatprep.subr.bf16.mxu1 %v5900_v1 }
  0x76   : > { %5143 = vmatpush3.bf16.msra.mxu0 %v5672_v16 }
  0x77   : > { %5144 = vmatprep.subr.bf16.mxu0 %v5900_v1 }
  0x78   : > { %5163 = vmatpush3.bf16.msra.mxu1 %v5673_v17 }
  0x79   : > { %5164 = vmatprep.subr.bf16.mxu1 %v5900_v1 }
  0x7a   : > { %5145 = vmatpush3.bf16.msra.mxu0 %v5674_v18 }
  0x7b   : > { %5146 = vmatprep.subr.bf16.mxu0 %v5900_v1 }
  0x7c   : > { %5165 = vmatpush3.bf16.msra.mxu1 %v5675_v19 }
  0x7d   : > { %5166 = vmatprep.subr.bf16.mxu1 %v5900_v1 }
  0x7e   : > { %5147 = vmatpush3.bf16.msra.mxu0 %v5676_v20 }
  0x7f   : > { %5148 = vmatprep.subr.bf16.mxu0 %v5900_v1 }
  0x80   : > { %5167 = vmatpush3.bf16.msra.mxu1 %v5677_v21 }
  0x81   : > { %5168 = vmatprep.subr.bf16.mxu1 %v5900_v1 }
  0x82   : > { %5149 = vmatpush3.bf16.msra.mxu0 %v5678_v22 }
  0x83   : > { %5150 = vmatprep.subr.bf16.mxu0 %v5900_v1 }
  0x84   : > { %5169 = vmatpush3.bf16.msra.mxu1 %v5679_v23 }
  0x85   : > { %5170 = vmatprep.subr.bf16.mxu1 %v5900_v1 }
  0x86   : > { %5151 = vmatpush3.bf16.msra.mxu0 %v5680_v26 }
  0x87   : > { %5176 = vmatprep.subr.bf16.mxu0 %v5900_v1 }
  0x88   : > { %5171 = vmatpush3.bf16.msra.mxu1 %v5681_v29 }
  0x89   : > { %5153 = vmatmul.mubr.bf16.vlgmr.msra.gmra.mrb[12].mxu0 %v1173_v31  ;;  %5196 = vmatprep.subr.bf16.mxu1 %v5900_v1 }
  0x8a   : > { %5177 = vmatpush3.bf16.msra.mxu0 %v5684_v30  ;;  %5192 = vmatprep.mubr.msk.bf16.mxu0 %vm5901_vm0, %v5900_v1 }
  0x8b   : > { %5173 = vmatmul.mubr.bf16.vlgmr.msra.gmra.mrb[12].mxu1 %v1294_v32  ;;  %5178 = vmatprep.subr.bf16.mxu0 %v5900_v1 }
  0x8c   : > { %5212 = vmatprep.mubr.msk.bf16.mxu1 %vm5901_vm0, %v5900_v1  ;;  %5197 = vmatpush3.bf16.msra.mxu1 %v5696_v43  ;;  %v4330_v43 = vld [vmem:[%s7022_s2] ss:$0 sm:$0xff] }
  0x8d   : > { %5198 = vmatprep.subr.bf16.mxu1 %v5900_v1 }
  0x8e   : > { %5179 = vmatpush3.bf16.msra.mxu0 %v5687_v33 }
  0x8f   : > { %5180 = vmatprep.subr.bf16.mxu0 %v5900_v1 }
  0x90   : > { %5199 = vmatpush3.bf16.msra.mxu1 %v5698_v46 }
  0x91   : > { %5200 = vmatprep.subr.bf16.mxu1 %v5900_v1 }
  0x92   : > { %5181 = vmatpush3.bf16.msra.mxu0 %v5688_v34 }
  0x93   : > { %5182 = vmatprep.subr.bf16.mxu0 %v5900_v1 }
  0x94   : > { %5201 = vmatpush3.bf16.msra.mxu1 %v5700_v55 }
  0x95   : > { %5202 = vmatprep.subr.bf16.mxu1 %v5900_v1 }
  0x96   : > { %5183 = vmatpush3.bf16.msra.mxu0 %v5689_v35 }
  0x97   : > { %5184 = vmatprep.subr.bf16.mxu0 %v5900_v1 }
  0x98   : > { %5203 = vmatpush3.bf16.msra.mxu1 %v5702_v59 }
  0x99   : > { %5204 = vmatprep.subr.bf16.mxu1 %v5900_v1 }
  0x9a   : > { %5185 = vmatpush3.bf16.msra.mxu0 %v5690_v36 }
  0x9b   : > { %5186 = vmatprep.subr.bf16.mxu0 %v5900_v1 }
  0x9c   : > { %5205 = vmatpush3.bf16.msra.mxu1 %v5704_v61 }
  0x9d   : > { %5206 = vmatprep.subr.bf16.mxu1 %v5900_v1 }
  0x9e   : > { %5187 = vmatpush3.bf16.msra.mxu0 %v5691_v37 }
  0x9f   : > { %5188 = vmatprep.subr.bf16.mxu0 %v5900_v1 }
  0xa0   : > { %5207 = vmatpush3.bf16.msra.mxu1 %v5706_v63  ;;  %v5712_v63 = vld [vmem:[#allocation3 + $0x3] ss:$16 sps:$4 sm:$0xff]  }
  0xa1   : > { %5208 = vmatprep.subr.bf16.mxu1 %v5900_v1 }
  0xa2   : > { %5189 = vmatpush3.bf16.msra.mxu0 %v5692_v38 }
  0xa3   : > { %5190 = vmatprep.subr.bf16.mxu0 %v5900_v1 }
  0xa4   : > { %5209 = vmatpush3.bf16.msra.mxu1 %v5708_v2  ;;  %v5716_v2 = vld [vmem:[%s7023_s3 + $0x80] sm:$0xff]  }
  0xa5   : > { %5210 = vmatprep.subr.bf16.mxu1 %v5900_v1 }
  0xa6   : > { %5191 = vmatpush3.bf16.msra.mxu0 %v5693_v41 }
  0xa7   : > { %5216 = vmatprep.subr.bf16.mxu0 %v5900_v1 }
  0xa8   : > { %5211 = vmatpush3.bf16.msra.mxu1 %v5710_v4 }
  0xa9   : > { %5193 = vmatmul.mubr.bf16.vlgmr.msra.gmra.mrb[16].mxu0 %v1415_v42  ;;  %5236 = vmatprep.subr.bf16.mxu1 %v5900_v1 }
  0xaa   : > { %5232 = vmatprep.mubr.msk.bf16.mxu0 %vm5901_vm0, %v5900_v1  ;;  %5217 = vmatpush3.bf16.msra.mxu0 %v5697_v44 }
  0xab   : > { %5218 = vmatprep.subr.bf16.mxu0 %v5900_v1 }
  0xae   : > { %5219 = vmatpush3.bf16.msra.mxu0 %v5699_v47 }
  0xaf   : > { %5220 = vmatprep.subr.bf16.mxu0 %v5900_v1 }
  0xb2   : > { %5221 = vmatpush3.bf16.msra.mxu0 %v5701_v56 }
  0xb3   : > { %5222 = vmatprep.subr.bf16.mxu0 %v5900_v1 }
  0xb6   : > { %5223 = vmatpush3.bf16.msra.mxu0 %v5703_v60 }
  0xb7   : > { %5224 = vmatprep.subr.bf16.mxu0 %v5900_v1 }
  0xba   : > { %5225 = vmatpush3.bf16.msra.mxu0 %v5705_v62 }
  0xbb   : > { %5226 = vmatprep.subr.bf16.mxu0 %v5900_v1 }
  0xbe   : > { %5227 = vmatpush3.bf16.msra.mxu0 %v5707_v0  ;;  %v5714_v0 = vld [vmem:[#allocation3] ss:$16 sps:$4 sm:$0xff]  }
  0xbf   : > { %5228 = vmatprep.subr.bf16.mxu0 %v5900_v1 }
  0xc2   : > { %5229 = vmatpush3.bf16.msra.mxu0 %v5709_v3 }
  0xc3   : > { %5230 = vmatprep.subr.bf16.mxu0 %v5900_v1 }
  0xc6   : > { %5231 = vmatpush3.bf16.msra.mxu0 %v5711_v5  ;;  %v5717_v5 = vld [vmem:[%s7023_s3 + $0xc0] sm:$0xff]  }
  0xc7   : > { %5256 = vmatprep.subr.bf16.mxu0 %v5900_v1 }
  0xfc   : > { %v580_v45 = vpop.f32.mrb[0].mxu0 }
  0xfd   : > { %v5034_v48 = vpop.f32.mrb[1].mxu0 }
  0xfe   : > { %v669_v49 = vpop.f32.mrb[0].mxu1  ;;  %v583_v50 = vpop.f32.mrb[2].mxu0 }
  0xff   : > { %v670_v51 = vadd.f32 %v669_v49, %v580_v45  ;;  %v5054_v52 = vpop.f32.mrb[1].mxu1  ;;  %v5035_v53 = vpop.f32.mrb[3].mxu0 }
 0x100   : > { %v672_v54 = vpop.f32.mrb[2].mxu1 }
 0x101   : > { %v673_v57 = vadd.f32 %v672_v54, %v583_v50  ;;  %v5055_v58 = vpop.f32.mrb[3].mxu1 }
 0x11c   : > { %v788_v6 = vpop.f32.mrb[4].mxu0 }
 0x11d   : > { %v795_v7 = vadd.f32 %v788_v6, %v670_v51  ;;  %v5074_v8 = vpop.f32.mrb[5].mxu0 }
 0x11e   : > { %v791_v9 = vpop.f32.mrb[6].mxu0  ;;  %v909_v10 = vpop.f32.mrb[4].mxu1  ;;  %v5718_v8 = vld [vmem:[%s7023_s3 + $0x88] sm:$0xff]  }
 0x11f   : > { %v796_v11 = vadd.f32 %v791_v9, %v673_v57  ;;  %v916_v12 = vadd.f32 %v909_v10, %v795_v7  ;;  %v5075_v13 = vpop.f32.mrb[7].mxu0  ;;  %v5094_v14 = vpop.f32.mrb[5].mxu1  ;;  %v5719_v9 = vld [vmem:[%s7023_s3 + $0xc8] sm:$0xff]   ;;  %v5720_v10 = vld [vmem:[%s7023_s3 + $0x90] sm:$0xff]  }
 0x120   : > { %v912_v15 = vpop.f32.mrb[6].mxu1  ;;  %v5723_v13 = vld [vmem:[%s7023_s3 + $0xd8] sm:$0xff]   ;;  %v5724_v14 = vld [vmem:[%s7023_s3 + $0xa0] sm:$0xff]  }
 0x121   : > { %v917_v16 = vadd.f32 %v912_v15, %v796_v11  ;;  %v5095_v17 = vpop.f32.mrb[7].mxu1  ;;  %v5721_v11 = vld [vmem:[%s7023_s3 + $0xd0] sm:$0xff]   ;;  %v5725_v15 = vld [vmem:[%s7023_s3 + $0xe0] sm:$0xff]  }
 0x122   : > { %v5727_v17 = vld [vmem:[%s7023_s3 + $0xe8] sm:$0xff]  }
 0x13c   : > { %v1030_v18 = vpop.f32.mrb[8].mxu0 }
 0x13d   : > { %v1037_v19 = vadd.f32 %v1030_v18, %v916_v12  ;;  %v5114_v20 = vpop.f32.mrb[9].mxu0  ;;  %v5722_v12 = vld [vmem:[%s7023_s3 + $0x98] sm:$0xff]   ;;  %v5728_v18 = vld [vmem:[%s7023_s3 + $0xb0] sm:$0xff]  }
 0x13e   : > { %v1033_v21 = vpop.f32.mrb[10].mxu0  ;;  %v1151_v22 = vpop.f32.mrb[8].mxu1  ;;  %v5730_v20 = vld [vmem:[%s7023_s3 + $0xb8] sm:$0xff]  }
 0x13f   : > { %v1038_v23 = vadd.f32 %v1033_v21, %v917_v16  ;;  %v1158_v24 = vadd.f32 %v1151_v22, %v1037_v19  ;;  %v5115_v25 = vpop.f32.mrb[11].mxu0  ;;  %v5134_v26 = vpop.f32.mrb[9].mxu1  ;;  %v5726_v16 = vld [vmem:[%s7023_s3 + $0xa8] sm:$0xff]   ;;  %v5729_v19 = vld [vmem:[%s7023_s3 + $0xf0] sm:$0xff]   ;;  %v5731_v21 = vld [vmem:[%s7023_s3 + $0xf8] sm:$0xff]  }
 0x140   : > { %v1154_v27 = vpop.f32.mrb[10].mxu1  ;;  %v5732_v22 = vld [vmem:[#allocation3 + $0x6] ss:$16 sps:$4 sm:$0xff]  }
 0x141   : > { %v1159_v28 = vadd.f32 %v1154_v27, %v1038_v23  ;;  %v5135_v29 = vpop.f32.mrb[11].mxu1  ;;  %v5736_v26 = vld [vmem:[%s7023_s3 + $0x100] sm:$0xff]  }
 0x15c   : > { %v1273_v30 = vpop.f32.mrb[12].mxu0 }
 0x15d   : > { %v1280_v31 = vadd.f32 %v1273_v30, %v1158_v24  ;;  %v5154_v32 = vpop.f32.mrb[13].mxu0  ;;  %v5738_v30 = vld [vmem:[%s7023_s3 + $0x108] sm:$0xff]  }
 0x15e   : > { %v1276_v33 = vpop.f32.mrb[14].mxu0  ;;  %v1394_v34 = vpop.f32.mrb[12].mxu1  ;;  %v5740_v32 = vld [vmem:[%s7023_s3 + $0x110] sm:$0xff]  }
 0x15f   : > { %v1281_v35 = vadd.f32 %v1276_v33, %v1159_v28  ;;  %v1401_v36 = vadd.f32 %v1394_v34, %v1280_v31  ;;  %v5155_v37 = vpop.f32.mrb[15].mxu0  ;;  %v5174_v38 = vpop.f32.mrb[13].mxu1  ;;  %v5737_v28 = vld [vmem:[%s7023_s3 + $0x140] sm:$0xff]   ;;  %v5739_v31 = vld [vmem:[%s7023_s3 + $0x148] sm:$0xff]   ;;  %v5741_v33 = vld [vmem:[%s7023_s3 + $0x150] sm:$0xff]  }
 0x160   : > { %v1397_v39 = vpop.f32.mrb[14].mxu1  ;;  %v5742_v34 = vld [vmem:[%s7023_s3 + $0x118] sm:$0xff]   ;;  %v5745_v37 = vld [vmem:[%s7023_s3 + $0x160] sm:$0xff]   ;;  %v5746_v38 = vld [vmem:[%s7023_s3 + $0x128] sm:$0xff]  }
 0x161   : > { %v1402_v40 = vadd.f32 %v1397_v39, %v1281_v35  ;;  %v5175_v41 = vpop.f32.mrb[15].mxu1  ;;  %v5743_v35 = vld [vmem:[%s7023_s3 + $0x158] sm:$0xff]   ;;  %v5747_v39 = vld [vmem:[%s7023_s3 + $0x168] sm:$0xff]  }
 0x162   : > { %v5749_v41 = vld [vmem:[%s7023_s3 + $0x170] sm:$0xff]  }
 0x17c   : > { %v1515_v42 = vpop.f32.mrb[16].mxu0 }
 0x17d   : > { %v1522_v44 = vadd.f32 %v1515_v42, %v1401_v36  ;;  %v5194_v45 = vpop.f32.mrb[17].mxu0  ;;  %v5744_v36 = vld [vmem:[%s7023_s3 + $0x120] sm:$0xff]   ;;  %v5750_v42 = vld [vmem:[%s7023_s3 + $0x138] sm:$0xff]  }
 0x17e   : > { %v1518_v46 = vpop.f32.mrb[18].mxu0 }
 0x17f   : > { %v1531_v47 = vadd.f32 %v4330_v43, %v1522_v44  ;;  %v1523_v48 = vadd.f32 %v1518_v46, %v1402_v40  ;;  %v5195_v49 = vpop.f32.mrb[19].mxu0  ;;  %v5748_v40 = vld [vmem:[%s7023_s3 + $0x130] sm:$0xff]  }
 0x181   : > { %v1533_v50 = vmax.f32 %v1531_v47, 0.0  ;;  %v1532_v51 = vadd.f32 %v4330_v43, %v1523_v48  ;;  %v5751_v43 = vld [vmem:[%s7023_s3 + $0x178] sm:$0xff]   ;;  %v5756_v48 = vld [vmem:[%s7023_s3 + $0x180] sm:$0xff]  }
 0x183   : > { %v1537_v52 = vcombine.high %v1533_v50, %v1533_v50  ;;  %1541 = vst [vmem:[#allocation2] sm:$0xf] %v1533_v50  ;;  %v1534_v53 = vmax.f32 %v1532_v51, 0.0  ;;  %v5757_v50 = vld [vmem:[%s7023_s3 + $0x1c0] sm:$0xff]  }
 0x185   : > { %1542 = vst [vmem:[#allocation2 + $0x4] sm:$0xf] %v1537_v52  ;;  %v1538_v54 = vcombine.high %v1534_v53, %v1534_v53  ;;  %1543 = vst [vmem:[#allocation2 + $0x8] sm:$0xf] %v1534_v53  ;;  %v5758_v52 = vld [vmem:[%s7023_s3 + $0x188] sm:$0xff]  }
 0x186   : > { %v5759_v53 = vld [vmem:[%s7023_s3 + $0x1c8] sm:$0xff]  }
 0x187   : > { %1544 = vst [vmem:[#allocation2 + $0xc] sm:$0xf] %v1538_v54  ;;  %v5760_v54 = vld [vmem:[%s7023_s3 + $0x190] sm:$0xff]  }
 0x18a   : > { %v1545_v55 = vld [vmem:[#allocation2] sm:$0xf] }
 0x18b   : > { %v1549_v56 = vmax.f32 %v1545_v55, 0.0  ;;  %v5761_v55 = vld [vmem:[%s7023_s3 + $0x1d0] sm:$0xff]  }
 0x18c   : > { %v1546_v57 = vld [vmem:[#allocation2 + $0x4] sm:$0xf]  ;;  %v1547_v58 = vld [vmem:[#allocation2 + $0x8] sm:$0xf] }
 0x18d   : > { %v1550_v59 = vmax.f32 %v1546_v57, 0.0  ;;  %1553 = vst [vmem:[#allocation3 + $0x33] sm:$0xf] %v1549_v56  ;;  %v1551_v60 = vmax.f32 %v1547_v58, 0.0  ;;  %v5762_v56 = vld [vmem:[%s7023_s3 + $0x198] sm:$0xff]   ;;  %v5764_v58 = vld [vmem:[%s7023_s3 + $0x1a0] sm:$0xff]  }
 0x18e   : > { %v1548_v61 = vld [vmem:[#allocation2 + $0xc] sm:$0xf]  ;;  %v5763_v57 = vld [vmem:[%s7023_s3 + $0x1d8] sm:$0xff]  }
 0x18f   : > { %1554 = vst [vmem:[#allocation3 + $0x43] sm:$0xf] %v1550_v59  ;;  %v1552_v62 = vmax.f32 %v1548_v61, 0.0  ;;  %1555 = vst [vmem:[#allocation3 + $0x53] sm:$0xf] %v1551_v60  ;;  %v5765_v59 = vld [vmem:[%s7023_s3 + $0x1e0] sm:$0xff]  }
 0x190   : > { %v5766_v60 = vld [vmem:[%s7023_s3 + $0x1a8] sm:$0xff]  }
 0x191   : > { %1556 = vst [vmem:[#allocation3 + $0x63] sm:$0xf] %v1552_v62  ;;  %v5767_v61 = vld [vmem:[%s7023_s3 + $0x1e8] sm:$0xff]   ;;  %v5768_v62 = vld [vmem:[%s7023_s3 + $0x1b0] sm:$0xff]  }
 0x194   : > { %v5713_v3 = vld [vmem:[#allocation3 + $0x23] ss:$16 sps:$4 sm:$0xff]  }
 0x195   : > { %v5715_v4 = vld [vmem:[#allocation3 + $0x20] ss:$16 sps:$4 sm:$0xff]   ;;  %v1598_v6 = vpack.c.bf16 %v5713_v3, %v5712_v63  ;;  %v5733_v23 = vld [vmem:[#allocation3 + $0x26] ss:$16 sps:$4 sm:$0xff]  }
 0x196   : > { %v1569_v7 = vpack.c.bf16 %v5715_v4, %v5714_v0  ;;  %v5734_v25 = vld [vmem:[#allocation3 + $0x30] ss:$16 sps:$4 sm:$0xff]   ;;  %v1806_v27 = vpack.c.bf16 %v5733_v23, %v5732_v22  ;;  %v5754_v47 = vld [vmem:[#allocation3 + $0x36] ss:$16 sps:$4 sm:$0xff]  }
 0x197   : > { %5213 = vmatmul.mubr.bf16.vlgmr.msra.gmra.mrb[16].mxu1 %v1598_v6  ;;  %v5752_v46 = vld [vmem:[#allocation3 + $0x33] ss:$16 sps:$4 sm:$0xff]   ;;  %v5770_v0 = vld [vmem:[%s7023_s3 + $0x1b8] sm:$0xff]  }
 0x198   : > { %5233 = vmatmul.mubr.bf16.vlgmr.msra.gmra.mrb[20].mxu0 %v1569_v7  ;;  %5237 = vmatpush3.bf16.msra.mxu1 %v5716_v2  ;;  %v5735_v24 = vld [vmem:[#allocation3 + $0x50] ss:$16 sps:$4 sm:$0xff]   ;;  %v5755_v45 = vld [vmem:[#allocation3 + $0x56] ss:$16 sps:$4 sm:$0xff]  }
 0x199   : > { %5257 = vmatpush3.bf16.msra.mxu0 %v5717_v5  ;;  %5238 = vmatprep.subr.bf16.mxu1 %v5900_v1  ;;  %v1927_v29 = vpack.c.bf16 %v5735_v24, %v5734_v25  ;;  %v5753_v44 = vld [vmem:[#allocation3 + $0x53] ss:$16 sps:$4 sm:$0xff]   ;;  %v2169_v51 = vpack.c.bf16 %v5755_v45, %v5754_v47  ;;  %v5771_v2 = vld [vmem:[%s7023_s3 + $0x1f8] sm:$0xff]  }
 0x19a   : > { %5258 = vmatprep.subr.bf16.mxu0 %v5900_v1  ;;  %5252 = vmatprep.mubr.msk.bf16.mxu1 %vm5901_vm0, %v5900_v1  ;;  %v2048_v49 = vpack.c.bf16 %v5753_v44, %v5752_v46  ;;  %v5769_v63 = vld [vmem:[%s7023_s3 + $0x1f0] sm:$0xff]   ;;  %v5776_v7 = vld [vmem:[%s7023_s3 + $0x200] sm:$0xff]   ;;  %v5789_v23 = vld [vmem:[%s7025_s5 + $0x18] sm:$0xff]  }
 0x19b   : > { %5272 = vmatprep.mubr.msk.bf16.mxu0 %vm5901_vm0, %v5900_v1  ;;  %v5772_v3 = vld [vmem:[#allocation3 + $0x60] ss:$16 sps:$4 sm:$0xff]  }
 0x19c   : > { %5239 = vmatpush3.bf16.msra.mxu1 %v5718_v8  ;;  %v5773_v4 = vld [vmem:[#allocation3 + $0x80] ss:$16 sps:$4 sm:$0xff]  }
 0x19d   : > { %5259 = vmatpush3.bf16.msra.mxu0 %v5719_v9  ;;  %5240 = vmatprep.subr.bf16.mxu1 %v5900_v1  ;;  %v5774_v5 = vld [vmem:[#allocation3 + $0x63] ss:$16 sps:$4 sm:$0xff]   ;;  %v2291_v8 = vpack.c.bf16 %v5773_v4, %v5772_v3 }
 0x19e   : > { %5260 = vmatprep.subr.bf16.mxu0 %v5900_v1  ;;  %v5775_v6 = vld [vmem:[#allocation3 + $0x83] ss:$16 sps:$4 sm:$0xff]  }
 0x19f   : > { %v2412_v9 = vpack.c.bf16 %v5775_v6, %v5774_v5  ;;  %v5788_v22 = vld [vmem:[%s7025_s5 + $0x10] sm:$0xff]  }
 0x1a0   : > { %5241 = vmatpush3.bf16.msra.mxu1 %v5720_v10  ;;  %v5777_v10 = vld [vmem:[%s7023_s3 + $0x208] sm:$0xff]  }
 0x1a1   : > { %5261 = vmatpush3.bf16.msra.mxu0 %v5721_v11  ;;  %5242 = vmatprep.subr.bf16.mxu1 %v5900_v1  ;;  %v5778_v11 = vld [vmem:[%s7023_s3 + $0x210] sm:$0xff]  }
 0x1a2   : > { %5262 = vmatprep.subr.bf16.mxu0 %v5900_v1 }
 0x1a4   : > { %5243 = vmatpush3.bf16.msra.mxu1 %v5722_v12  ;;  %v5779_v12 = vld [vmem:[%s7023_s3 + $0x218] sm:$0xff]  }
 0x1a5   : > { %5263 = vmatpush3.bf16.msra.mxu0 %v5723_v13  ;;  %5244 = vmatprep.subr.bf16.mxu1 %v5900_v1  ;;  %v5780_v13 = vld [vmem:[%s7023_s3 + $0x220] sm:$0xff]  }
 0x1a6   : > { %5264 = vmatprep.subr.bf16.mxu0 %v5900_v1 }
 0x1a8   : > { %5245 = vmatpush3.bf16.msra.mxu1 %v5724_v14  ;;  %v5781_v14 = vld [vmem:[%s7023_s3 + $0x228] sm:$0xff]  }
 0x1a9   : > { %5265 = vmatpush3.bf16.msra.mxu0 %v5725_v15  ;;  %5246 = vmatprep.subr.bf16.mxu1 %v5900_v1  ;;  %v5782_v15 = vld [vmem:[%s7023_s3 + $0x230] sm:$0xff]  }
 0x1aa   : > { %5266 = vmatprep.subr.bf16.mxu0 %v5900_v1 }
 0x1ac   : > { %5247 = vmatpush3.bf16.msra.mxu1 %v5726_v16  ;;  %v5783_v16 = vld [vmem:[%s7023_s3 + $0x238] sm:$0xff]  }
 0x1ad   : > { %5267 = vmatpush3.bf16.msra.mxu0 %v5727_v17  ;;  %5248 = vmatprep.subr.bf16.mxu1 %v5900_v1  ;;  %v5784_v17 = vld [vmem:[#allocation3 + $0x66] ss:$16 sps:$4 sm:$0xff]  }
 0x1ae   : > { %5268 = vmatprep.subr.bf16.mxu0 %v5900_v1 }
 0x1b0   : > { %5249 = vmatpush3.bf16.msra.mxu1 %v5728_v18  ;;  %v5785_v18 = vld [vmem:[#allocation3 + $0x86] ss:$16 sps:$4 sm:$0xff]  }
 0x1b1   : > { %5269 = vmatpush3.bf16.msra.mxu0 %v5729_v19  ;;  %5250 = vmatprep.subr.bf16.mxu1 %v5900_v1  ;;  %v2533_v19 = vpack.c.bf16 %v5785_v18, %v5784_v17 }
 0x1b2   : > { %5270 = vmatprep.subr.bf16.mxu0 %v5900_v1 }
 0x1b4   : > { %5251 = vmatpush3.bf16.msra.mxu1 %v5730_v20  ;;  %v5786_v20 = vld [vmem:[%s7025_s5] sm:$0xff]  }
 0x1b5   : > { %5271 = vmatpush3.bf16.msra.mxu0 %v5731_v21  ;;  %5276 = vmatprep.subr.bf16.mxu1 %v5900_v1  ;;  %v5787_v21 = vld [vmem:[%s7025_s5 + $0x8] sm:$0xff]  }
 0x1b6   : > { %5296 = vmatprep.subr.bf16.mxu0 %v5900_v1 }
 0x1b7   : > { %5253 = vmatmul.mubr.bf16.vlgmr.msra.gmra.mrb[20].mxu1 %v1806_v27 }
 0x1b8   : > { %5273 = vmatmul.mubr.bf16.vlgmr.msra.gmra.mrb[24].mxu0 %v1927_v29  ;;  %5277 = vmatpush3.bf16.msra.mxu1 %v5736_v26 }
 0x1b9   : > { %5297 = vmatpush3.bf16.msra.mxu0 %v5737_v28  ;;  %5278 = vmatprep.subr.bf16.mxu1 %v5900_v1 }
 0x1ba   : > { %5298 = vmatprep.subr.bf16.mxu0 %v5900_v1  ;;  %5292 = vmatprep.mubr.msk.bf16.mxu1 %vm5901_vm0, %v5900_v1 }
 0x1bb   : > { %5312 = vmatprep.mubr.msk.bf16.mxu0 %vm5901_vm0, %v5900_v1 }
 0x1bc   : > { %5279 = vmatpush3.bf16.msra.mxu1 %v5738_v30 }
 0x1bd   : > { %5299 = vmatpush3.bf16.msra.mxu0 %v5739_v31  ;;  %5280 = vmatprep.subr.bf16.mxu1 %v5900_v1 }
 0x1be   : > { %5300 = vmatprep.subr.bf16.mxu0 %v5900_v1 }
 0x1c0   : > { %5281 = vmatpush3.bf16.msra.mxu1 %v5740_v32  ;;  %v5790_v32 = vld [vmem:[%s7025_s5 + $0x20] sm:$0xff]  }
 0x1c1   : > { %5301 = vmatpush3.bf16.msra.mxu0 %v5741_v33  ;;  %5282 = vmatprep.subr.bf16.mxu1 %v5900_v1 }
 0x1c2   : > { %5302 = vmatprep.subr.bf16.mxu0 %v5900_v1 }
 0x1c4   : > { %5283 = vmatpush3.bf16.msra.mxu1 %v5742_v34 }
 0x1c5   : > { %5303 = vmatpush3.bf16.msra.mxu0 %v5743_v35  ;;  %5284 = vmatprep.subr.bf16.mxu1 %v5900_v1  ;;  %v5791_v35 = vld [vmem:[%s7025_s5 + $0x28] sm:$0xff]  }
 0x1c6   : > { %5304 = vmatprep.subr.bf16.mxu0 %v5900_v1 }
 0x1c8   : > { %5285 = vmatpush3.bf16.msra.mxu1 %v5744_v36  ;;  %v5792_v36 = vld [vmem:[%s7025_s5 + $0x30] sm:$0xff]  }
 0x1c9   : > { %5305 = vmatpush3.bf16.msra.mxu0 %v5745_v37  ;;  %5286 = vmatprep.subr.bf16.mxu1 %v5900_v1  ;;  %v5793_v37 = vld [vmem:[%s7025_s5 + $0x38] sm:$0xff]  }
 0x1ca   : > { %5306 = vmatprep.subr.bf16.mxu0 %v5900_v1 }
 0x1cc   : > { %5287 = vmatpush3.bf16.msra.mxu1 %v5746_v38  ;;  %v5794_v38 = vld [vmem:[%s7027_s7 + $0x40] sm:$0xff]  }
 0x1cd   : > { %5307 = vmatpush3.bf16.msra.mxu0 %v5747_v39  ;;  %5288 = vmatprep.subr.bf16.mxu1 %v5900_v1 }
 0x1ce   : > { %5308 = vmatprep.subr.bf16.mxu0 %v5900_v1 }
 0x1d0   : > { %5289 = vmatpush3.bf16.msra.mxu1 %v5748_v40 }
 0x1d1   : > { %5309 = vmatpush3.bf16.msra.mxu0 %v5749_v41  ;;  %5290 = vmatprep.subr.bf16.mxu1 %v5900_v1 }
 0x1d2   : > { %5310 = vmatprep.subr.bf16.mxu0 %v5900_v1 }
 0x1d4   : > { %5291 = vmatpush3.bf16.msra.mxu1 %v5750_v42 }
 0x1d5   : > { %5311 = vmatpush3.bf16.msra.mxu0 %v5751_v43  ;;  %5316 = vmatprep.subr.bf16.mxu1 %v5900_v1 }
 0x1d6   : > { %5336 = vmatprep.subr.bf16.mxu0 %v5900_v1 }
 0x1d7   : > { %5293 = vmatmul.mubr.bf16.vlgmr.msra.gmra.mrb[24].mxu1 %v2048_v49 }
 0x1d8   : > { %5313 = vmatmul.mubr.bf16.vlgmr.msra.gmra.mrb[28].mxu0 %v2169_v51  ;;  %5317 = vmatpush3.bf16.msra.mxu1 %v5756_v48 }
 0x1d9   : > { %5337 = vmatpush3.bf16.msra.mxu0 %v5757_v50  ;;  %5318 = vmatprep.subr.bf16.mxu1 %v5900_v1 }
 0x1da   : > { %5338 = vmatprep.subr.bf16.mxu0 %v5900_v1  ;;  %5332 = vmatprep.mubr.msk.bf16.mxu1 %vm5901_vm0, %v5900_v1 }
 0x1db   : > { %5352 = vmatprep.mubr.msk.bf16.mxu0 %vm5901_vm0, %v5900_v1 }
 0x1dc   : > { %5319 = vmatpush3.bf16.msra.mxu1 %v5758_v52 }
 0x1dd   : > { %5339 = vmatpush3.bf16.msra.mxu0 %v5759_v53  ;;  %5320 = vmatprep.subr.bf16.mxu1 %v5900_v1 }
 0x1de   : > { %5340 = vmatprep.subr.bf16.mxu0 %v5900_v1 }
 0x1e0   : > { %5321 = vmatpush3.bf16.msra.mxu1 %v5760_v54 }
 0x1e1   : > { %5341 = vmatpush3.bf16.msra.mxu0 %v5761_v55  ;;  %5322 = vmatprep.subr.bf16.mxu1 %v5900_v1 }
 0x1e2   : > { %5342 = vmatprep.subr.bf16.mxu0 %v5900_v1 }
 0x1e4   : > { %5323 = vmatpush3.bf16.msra.mxu1 %v5762_v56 }
 0x1e5   : > { %5343 = vmatpush3.bf16.msra.mxu0 %v5763_v57  ;;  %5324 = vmatprep.subr.bf16.mxu1 %v5900_v1 }
 0x1e6   : > { %5344 = vmatprep.subr.bf16.mxu0 %v5900_v1 }
 0x1e8   : > { %5325 = vmatpush3.bf16.msra.mxu1 %v5764_v58 }
 0x1e9   : > { %5345 = vmatpush3.bf16.msra.mxu0 %v5765_v59  ;;  %5326 = vmatprep.subr.bf16.mxu1 %v5900_v1 }
 0x1ea   : > { %5346 = vmatprep.subr.bf16.mxu0 %v5900_v1 }
 0x1ec   : > { %5327 = vmatpush3.bf16.msra.mxu1 %v5766_v60 }
 0x1ed   : > { %5347 = vmatpush3.bf16.msra.mxu0 %v5767_v61  ;;  %5328 = vmatprep.subr.bf16.mxu1 %v5900_v1 }
 0x1ee   : > { %5348 = vmatprep.subr.bf16.mxu0 %v5900_v1 }
 0x1f0   : > { %5329 = vmatpush3.bf16.msra.mxu1 %v5768_v62 }
 0x1f1   : > { %5349 = vmatpush3.bf16.msra.mxu0 %v5769_v63  ;;  %5330 = vmatprep.subr.bf16.mxu1 %v5900_v1 }
 0x1f2   : > { %5350 = vmatprep.subr.bf16.mxu0 %v5900_v1 }
 0x1f4   : > { %5331 = vmatpush3.bf16.msra.mxu1 %v5770_v0 }
 0x1f5   : > { %5351 = vmatpush3.bf16.msra.mxu0 %v5771_v2  ;;  %5356 = vmatprep.subr.bf16.mxu1 %v5900_v1 }
 0x1f6   : > { %5376 = vmatprep.subr.bf16.mxu0 %v5900_v1 }
 0x1f7   : > { %5333 = vmatmul.mubr.bf16.vlgmr.msra.gmra.mrb[28].mxu1 %v2291_v8 }
 0x1f8   : > { %5353 = vmatmul.mubr.bf16.vlgmr.msra.gmra.mrb[32].mxu0 %v2412_v9  ;;  %5357 = vmatpush3.bf16.msra.mxu1 %v5776_v7 }
 0x1f9   : > { %5358 = vmatprep.subr.bf16.mxu1 %v5900_v1  ;;  %5372 = vmatprep.mubr.msk.bf16.mxu1 %vm5901_vm0, %v5900_v1 }
 0x1fa   : > { %5392 = vmatprep.mubr.msk.bf16.mxu0 %vm5901_vm0, %v5900_v1  ;;  %5377 = vmatpush3.bf16.msra.mxu0 %v5786_v20 }
 0x1fb   : > { %5378 = vmatprep.subr.bf16.mxu0 %v5900_v1 }
 0x1fc   : > { %5359 = vmatpush3.bf16.msra.mxu1 %v5777_v10 }
 0x1fd   : > { %5360 = vmatprep.subr.bf16.mxu1 %v5900_v1 }
 0x1fe   : > { %5379 = vmatpush3.bf16.msra.mxu0 %v5787_v21 }
 0x1ff   : > { %5380 = vmatprep.subr.bf16.mxu0 %v5900_v1 }
 0x200   : > { %5361 = vmatpush3.bf16.msra.mxu1 %v5778_v11 }
 0x201   : > { %5362 = vmatprep.subr.bf16.mxu1 %v5900_v1 }
 0x202   : > { %5381 = vmatpush3.bf16.msra.mxu0 %v5788_v22 }
 0x203   : > { %5382 = vmatprep.subr.bf16.mxu0 %v5900_v1 }
 0x204   : > { %5363 = vmatpush3.bf16.msra.mxu1 %v5779_v12 }
 0x205   : > { %5364 = vmatprep.subr.bf16.mxu1 %v5900_v1 }
 0x206   : > { %5383 = vmatpush3.bf16.msra.mxu0 %v5789_v23 }
 0x207   : > { %5384 = vmatprep.subr.bf16.mxu0 %v5900_v1 }
 0x208   : > { %5365 = vmatpush3.bf16.msra.mxu1 %v5780_v13  ;;  %v4531_v13 = vld [vmem:[%s7024_s4] ss:$0 sm:$0xff] }
 0x209   : > { %5366 = vmatprep.subr.bf16.mxu1 %v5900_v1 }
 0x20a   : > { %5385 = vmatpush3.bf16.msra.mxu0 %v5790_v32  ;;  %v5797_v32 = vld [vmem:[%s7027_s7 + $0x8] sm:$0xff]  }
 0x20b   : > { %5386 = vmatprep.subr.bf16.mxu0 %v5900_v1 }
 0x20c   : > { %5367 = vmatpush3.bf16.msra.mxu1 %v5781_v14 }
 0x20d   : > { %5368 = vmatprep.subr.bf16.mxu1 %v5900_v1 }
 0x20e   : > { %5387 = vmatpush3.bf16.msra.mxu0 %v5791_v35  ;;  %v5800_v35 = vld [vmem:[%s7027_s7 + $0x58] sm:$0xff]  }
 0x20f   : > { %5388 = vmatprep.subr.bf16.mxu0 %v5900_v1 }
 0x210   : > { %5369 = vmatpush3.bf16.msra.mxu1 %v5782_v15 }
 0x211   : > { %5370 = vmatprep.subr.bf16.mxu1 %v5900_v1 }
 0x212   : > { %5389 = vmatpush3.bf16.msra.mxu0 %v5792_v36  ;;  %v5801_v36 = vld [vmem:[%s7027_s7 + $0x18] sm:$0xff]  }
 0x213   : > { %5390 = vmatprep.subr.bf16.mxu0 %v5900_v1 }
 0x214   : > { %5371 = vmatpush3.bf16.msra.mxu1 %v5783_v16 }
 0x215   : > { %5396 = vmatprep.subr.bf16.mxu1 %v5900_v1 }
 0x216   : > { %5391 = vmatpush3.bf16.msra.mxu0 %v5793_v37  ;;  %v5802_v37 = vld [vmem:[%s7027_s7 + $0x60] sm:$0xff]  }
 0x217   : > { %5373 = vmatmul.mubr.bf16.vlgmr.msra.gmra.mrb[32].mxu1 %v2533_v19  ;;  %5416 = vmatprep.subr.bf16.mxu0 %v5900_v1 }
 0x218   : > { %5412 = vmatprep.mubr.msk.bf16.mxu1 %vm5901_vm0, %v5900_v1  ;;  %5397 = vmatpush3.bf16.msra.mxu1 %v5794_v38  ;;  %v5803_v38 = vld [vmem:[%s7027_s7 + $0x20] sm:$0xff]  }
 0x219   : > { %5398 = vmatprep.subr.bf16.mxu1 %v5900_v1 }
 0x26a   : > { %v1698_v24 = vpop.f32.mrb[16].mxu1 }
 0x26b   : > { %v1787_v25 = vpop.f32.mrb[20].mxu0  ;;  %v5214_v26 = vpop.f32.mrb[17].mxu1 }
 0x26c   : > { %v1788_v27 = vadd.f32 %v1787_v25, %v1698_v24  ;;  %v5234_v28 = vpop.f32.mrb[21].mxu0  ;;  %v1701_v29 = vpop.f32.mrb[18].mxu1 }
 0x26d   : > { %v1790_v30 = vpop.f32.mrb[22].mxu0  ;;  %v5215_v31 = vpop.f32.mrb[19].mxu1 }
 0x26e   : > { %v1791_v33 = vadd.f32 %v1790_v30, %v1701_v29  ;;  %v5235_v34 = vpop.f32.mrb[23].mxu0  ;;  %v5795_v29 = vld [vmem:[%s7027_s7] sm:$0xff]   ;;  %v5796_v31 = vld [vmem:[%s7027_s7 + $0x48] sm:$0xff]  }
 0x26f   : > { %5399 = vmatpush3.bf16.msra.mxu1 %v5796_v31  ;;  %v5799_v34 = vld [vmem:[%s7027_s7 + $0x10] sm:$0xff]  }
 0x270   : > { %5400 = vmatprep.subr.bf16.mxu1 %v5900_v1 }
 0x28a   : > { %v1906_v39 = vpop.f32.mrb[20].mxu1 }
 0x28b   : > { %v1913_v40 = vadd.f32 %v1906_v39, %v1788_v27  ;;  %v2027_v41 = vpop.f32.mrb[24].mxu0  ;;  %v5254_v42 = vpop.f32.mrb[21].mxu1  ;;  %v5804_v39 = vld [vmem:[%s7027_s7 + $0x68] sm:$0xff]  }
 0x28c   : > { %v5274_v43 = vpop.f32.mrb[25].mxu0  ;;  %v1909_v44 = vpop.f32.mrb[22].mxu1  ;;  %v5807_v42 = vld [vmem:[%s7027_s7 + $0x30] sm:$0xff]  }
 0x28d   : > { %v2034_v45 = vadd.f32 %v2027_v41, %v1913_v40  ;;  %v1914_v46 = vadd.f32 %v1909_v44, %v1791_v33  ;;  %v2030_v47 = vpop.f32.mrb[26].mxu0  ;;  %v5255_v48 = vpop.f32.mrb[23].mxu1  ;;  %v5798_v33 = vld [vmem:[%s7027_s7 + $0x50] sm:$0xff]   ;;  %v5805_v40 = vld [vmem:[%s7027_s7 + $0x28] sm:$0xff]   ;;  %v5808_v43 = vld [vmem:[%s7027_s7 + $0x78] sm:$0xff]  }
 0x28e   : > { %v5275_v49 = vpop.f32.mrb[27].mxu0  ;;  %5401 = vmatpush3.bf16.msra.mxu1 %v5798_v33  ;;  %v5806_v41 = vld [vmem:[%s7027_s7 + $0x70] sm:$0xff]   ;;  %v5809_v44 = vld [vmem:[%s7027_s7 + $0x38] sm:$0xff]   ;;  %v5834_v33 = vld [vmem:[%s7027_s7 + $0x100] sm:$0xff]  }
 0x28f   : > { %v2035_v50 = vadd.f32 %v2030_v47, %v1914_v46  ;;  %5402 = vmatprep.subr.bf16.mxu1 %v5900_v1  ;;  %v2788_v49 = vld [vmem:[#allocation2] sm:$0xf] }
 0x292   : > { %5403 = vmatpush3.bf16.msra.mxu1 %v5800_v35  ;;  %v5835_v35 = vld [vmem:[%s7027_s7 + $0x140] sm:$0xff]  }
 0x293   : > { %5404 = vmatprep.subr.bf16.mxu1 %v5900_v1 }
 0x296   : > { %5405 = vmatpush3.bf16.msra.mxu1 %v5802_v37  ;;  %v5836_v37 = vld [vmem:[%s7027_s7 + $0x108] sm:$0xff]  }
 0x297   : > { %5406 = vmatprep.subr.bf16.mxu1 %v5900_v1 }
 0x29a   : > { %5407 = vmatpush3.bf16.msra.mxu1 %v5804_v39  ;;  %v5838_v39 = vld [vmem:[%s7027_s7 + $0x110] sm:$0xff]  }
 0x29b   : > { %5408 = vmatprep.subr.bf16.mxu1 %v5900_v1 }
 0x29e   : > { %5409 = vmatpush3.bf16.msra.mxu1 %v5806_v41  ;;  %v5840_v41 = vld [vmem:[%s7027_s7 + $0x118] sm:$0xff]  }
 0x29f   : > { %5410 = vmatprep.subr.bf16.mxu1 %v5900_v1 }
 0x2a2   : > { %5411 = vmatpush3.bf16.msra.mxu1 %v5808_v43  ;;  %v5842_v43 = vld [vmem:[%s7027_s7 + $0x120] sm:$0xff]  }
 0x2a3   : > { %5436 = vmatprep.subr.bf16.mxu1 %v5900_v1 }
 0x2aa   : > { %v2148_v51 = vpop.f32.mrb[24].mxu1 }
 0x2ab   : > { %v2155_v52 = vadd.f32 %v2148_v51, %v2034_v45  ;;  %v2269_v53 = vpop.f32.mrb[28].mxu0  ;;  %v5294_v54 = vpop.f32.mrb[25].mxu1  ;;  %v4532_v45 = vld [vmem:[%s7026_s6] ss:$0 sm:$0xff] }
 0x2ac   : > { %v5314_v55 = vpop.f32.mrb[29].mxu0  ;;  %v2151_v56 = vpop.f32.mrb[26].mxu1 }
 0x2ad   : > { %v2276_v57 = vadd.f32 %v2269_v53, %v2155_v52  ;;  %v2156_v58 = vadd.f32 %v2151_v56, %v2035_v50  ;;  %v2272_v59 = vpop.f32.mrb[30].mxu0  ;;  %v5295_v60 = vpop.f32.mrb[27].mxu1  ;;  %v2789_v55 = vld [vmem:[#allocation2 + $0x4] sm:$0xf]  ;;  %v2790_v56 = vld [vmem:[#allocation2 + $0x8] sm:$0xf] }
 0x2ae   : > { %v5315_v61 = vpop.f32.mrb[31].mxu0  ;;  %v2791_v60 = vld [vmem:[#allocation2 + $0xc] sm:$0xf] }
 0x2af   : > { %v2277_v62 = vadd.f32 %v2272_v59, %v2156_v58 }
 0x2ca   : > { %v2391_v63 = vpop.f32.mrb[28].mxu1 }
 0x2cb   : > { %v2398_v0 = vadd.f32 %v2391_v63, %v2276_v57  ;;  %v2512_v2 = vpop.f32.mrb[32].mxu0  ;;  %v5334_v3 = vpop.f32.mrb[29].mxu1 }
 0x2cc   : > { %v5354_v4 = vpop.f32.mrb[33].mxu0  ;;  %v2394_v5 = vpop.f32.mrb[30].mxu1 }
 0x2cd   : > { %v2519_v6 = vadd.f32 %v2512_v2, %v2398_v0  ;;  %v2399_v7 = vadd.f32 %v2394_v5, %v2277_v62  ;;  %v2515_v8 = vpop.f32.mrb[34].mxu0  ;;  %v5335_v9 = vpop.f32.mrb[31].mxu1 }
 0x2ce   : > { %v5355_v10 = vpop.f32.mrb[35].mxu0  ;;  %v5814_v9 = vld [vmem:[%s7027_s7 + $0x80] sm:$0xff]  }
 0x2cf   : > { %v2520_v11 = vadd.f32 %v2515_v8, %v2399_v7 }
 0x2ea   : > { %v2633_v12 = vpop.f32.mrb[32].mxu1 }
 0x2eb   : > { %v2640_v14 = vadd.f32 %v2633_v12, %v2519_v6  ;;  %v5374_v15 = vpop.f32.mrb[33].mxu1 }
 0x2ec   : > { %v2636_v16 = vpop.f32.mrb[34].mxu1  ;;  %v5816_v15 = vld [vmem:[%s7027_s7 + $0x88] sm:$0xff]  }
 0x2ed   : > { %v2649_v17 = vadd.f32 %v4531_v13, %v2640_v14  ;;  %v2641_v18 = vadd.f32 %v2636_v16, %v2520_v11  ;;  %v5375_v19 = vpop.f32.mrb[35].mxu1  ;;  %v5817_v16 = vld [vmem:[%s7027_s7 + $0xc8] sm:$0xff]  }
 0x2ee   : > { %v5820_v19 = vld [vmem:[%s7027_s7 + $0x98] sm:$0xff]  }
 0x2ef   : > { %v2653_v20 = vcombine.high %v2649_v17, %v2649_v17  ;;  %v2650_v21 = vadd.f32 %v4531_v13, %v2641_v18  ;;  %v2657_v24 = vmax.f32 %v2649_v17, 0.0  ;;  %v5815_v13 = vld [vmem:[%s7027_s7 + $0xc0] sm:$0xff]   ;;  %v5818_v17 = vld [vmem:[%s7027_s7 + $0x90] sm:$0xff]  }
 0x2f0   : > { %v5819_v18 = vld [vmem:[%s7027_s7 + $0xd0] sm:$0xff]  }
 0x2f1   : > { %v2658_v22 = vmax.f32 %v2653_v20, 0.0  ;;  %v2654_v23 = vcombine.high %v2650_v21, %v2650_v21  ;;  %v2659_v25 = vmax.f32 %v2650_v21, 0.0  ;;  %v5821_v20 = vld [vmem:[%s7027_s7 + $0xd8] sm:$0xff]   ;;  %v5822_v21 = vld [vmem:[%s7027_s7 + $0xa0] sm:$0xff]  }
 0x2f3   : > { %v2660_v26 = vmax.f32 %v2654_v23, 0.0  ;;  %v2665_v27 = vcombine.low %v2657_v24, %v2658_v22  ;;  %v5823_v22 = vld [vmem:[%s7027_s7 + $0xe0] sm:$0xff]   ;;  %v5824_v23 = vld [vmem:[%s7027_s7 + $0xa8] sm:$0xff]  }
 0x2f4   : > { %v5825_v24 = vld [vmem:[%s7027_s7 + $0xe8] sm:$0xff]  }
 0x2f5   : > { %v2666_v28 = vcombine.low %v2659_v25, %v2660_v26  ;;  %v5826_v25 = vld [vmem:[%s7027_s7 + $0xb0] sm:$0xff]  }
 0x2f6   : > { %v5827_v26 = vld [vmem:[%s7027_s7 + $0xf0] sm:$0xff]  }
 0x2f7   : > { %v2669_v30 = vpack.c.bf16 %v2666_v28, %v2665_v27  ;;  %v5828_v27 = vld [vmem:[%s7027_s7 + $0xb8] sm:$0xff]  }
 0x2f8   : > { %v5829_v28 = vld [vmem:[%s7027_s7 + $0xf8] sm:$0xff]  }
 0x2f9   : > { %5393 = vmatmul.mubr.bf16.vlgmr.msra.gmra.mrb[36].mxu0 %v2669_v30 }
 0x2fa   : > { %5417 = vmatpush3.bf16.msra.mxu0 %v5795_v29  ;;  %5432 = vmatprep.mubr.msk.bf16.mxu0 %vm5901_vm0, %v5900_v1 }
 0x2fb   : > { %5418 = vmatprep.subr.bf16.mxu0 %v5900_v1 }
 0x2fe   : > { %5419 = vmatpush3.bf16.msra.mxu0 %v5797_v32 }
 0x2ff   : > { %5420 = vmatprep.subr.bf16.mxu0 %v5900_v1 }
 0x302   : > { %5421 = vmatpush3.bf16.msra.mxu0 %v5799_v34 }
 0x303   : > { %5422 = vmatprep.subr.bf16.mxu0 %v5900_v1 }
 0x306   : > { %5423 = vmatpush3.bf16.msra.mxu0 %v5801_v36 }
 0x307   : > { %5424 = vmatprep.subr.bf16.mxu0 %v5900_v1 }
 0x30a   : > { %5425 = vmatpush3.bf16.msra.mxu0 %v5803_v38  ;;  %v5837_v38 = vld [vmem:[%s7027_s7 + $0x148] sm:$0xff]  }
 0x30b   : > { %5426 = vmatprep.subr.bf16.mxu0 %v5900_v1 }
 0x30e   : > { %5427 = vmatpush3.bf16.msra.mxu0 %v5805_v40  ;;  %v5839_v40 = vld [vmem:[%s7027_s7 + $0x150] sm:$0xff]  }
 0x30f   : > { %5428 = vmatprep.subr.bf16.mxu0 %v5900_v1 }
 0x312   : > { %5429 = vmatpush3.bf16.msra.mxu0 %v5807_v42  ;;  %v5841_v42 = vld [vmem:[%s7027_s7 + $0x158] sm:$0xff]  }
 0x313   : > { %5430 = vmatprep.subr.bf16.mxu0 %v5900_v1 }
 0x316   : > { %5431 = vmatpush3.bf16.msra.mxu0 %v5809_v44  ;;  %v5843_v44 = vld [vmem:[%s7027_s7 + $0x160] sm:$0xff]  }
 0x317   : > { %5456 = vmatprep.subr.bf16.mxu0 %v5900_v1 }
 0x3cc   : > { %v2775_v46 = vpop.f32.mrb[36].mxu0 }
 0x3cd   : > { %v2776_v47 = vadd.f32 %v4532_v45, %v2775_v46  ;;  %v5394_v48 = vpop.f32.mrb[37].mxu0  ;;  %v5845_v46 = vld [vmem:[%s7027_s7 + $0x168] sm:$0xff]  }
 0x3ce   : > { %v2778_v50 = vpop.f32.mrb[38].mxu0  ;;  %v5847_v48 = vld [vmem:[%s7027_s7 + $0x170] sm:$0xff]  }
 0x3cf   : > { %v2784_v51 = vcombine.high %v2776_v47, %v2776_v47  ;;  %v2792_v52 = vadd.f32 %v2788_v49, %v2776_v47  ;;  %v2779_v53 = vadd.f32 %v4532_v45, %v2778_v50  ;;  %v5395_v54 = vpop.f32.mrb[39].mxu0  ;;  %v5844_v45 = vld [vmem:[%s7027_s7 + $0x128] sm:$0xff]   ;;  %v5846_v47 = vld [vmem:[%s7027_s7 + $0x130] sm:$0xff]   ;;  %v5848_v49 = vld [vmem:[%s7027_s7 + $0x138] sm:$0xff]  }
 0x3d0   : > { %v5849_v50 = vld [vmem:[%s7027_s7 + $0x178] sm:$0xff]  }
 0x3d1   : > { %v2793_v57 = vadd.f32 %v2789_v55, %v2784_v51  ;;  %2796 = vst [vmem:[#allocation2] sm:$0xf] %v2792_v52  ;;  %v2785_v58 = vcombine.high %v2779_v53, %v2779_v53  ;;  %v2794_v59 = vadd.f32 %v2790_v56, %v2779_v53  ;;  %v5854_v55 = vld [vmem:[%s7027_s7 + $0x180] sm:$0xff]  }
 0x3d3   : > { %2797 = vst [vmem:[#allocation2 + $0x4] sm:$0xf] %v2793_v57  ;;  %v2795_v61 = vadd.f32 %v2791_v60, %v2785_v58  ;;  %2798 = vst [vmem:[#allocation2 + $0x8] sm:$0xf] %v2794_v59  ;;  %v5855_v57 = vld [vmem:[%s7027_s7 + $0x1c0] sm:$0xff]   ;;  %v5856_v59 = vld [vmem:[%s7027_s7 + $0x188] sm:$0xff]  }
 0x3d4   : > { %v5857_v60 = vld [vmem:[%s7027_s7 + $0x1c8] sm:$0xff]  }
 0x3d5   : > { %2799 = vst [vmem:[#allocation2 + $0xc] sm:$0xf] %v2795_v61  ;;  %v5858_v61 = vld [vmem:[%s7027_s7 + $0x190] sm:$0xff]  }
 0x3d8   : > { %v2800_v62 = vld [vmem:[#allocation2] sm:$0xf] }
 0x3d9   : > { %v2804_v63 = vmax.f32 %v2800_v62, 0.0  ;;  %v5859_v62 = vld [vmem:[%s7027_s7 + $0x1d0] sm:$0xff]  }
 0x3da   : > { %v2801_v0 = vld [vmem:[#allocation2 + $0x4] sm:$0xf]  ;;  %v2802_v2 = vld [vmem:[#allocation2 + $0x8] sm:$0xf] }
 0x3db   : > { %v2805_v3 = vmax.f32 %v2801_v0, 0.0  ;;  %2808 = vst [vmem:[#allocation3 + $0x33] sm:$0xf] %v2804_v63  ;;  %v2806_v4 = vmax.f32 %v2802_v2, 0.0  ;;  %v5860_v63 = vld [vmem:[%s7027_s7 + $0x198] sm:$0xff]   ;;  %v5862_v2 = vld [vmem:[%s7027_s7 + $0x1a0] sm:$0xff]  }
 0x3dc   : > { %v2803_v5 = vld [vmem:[#allocation2 + $0xc] sm:$0xf]  ;;  %v5861_v0 = vld [vmem:[%s7027_s7 + $0x1d8] sm:$0xff]  }
 0x3dd   : > { %2809 = vst [vmem:[#allocation3 + $0x43] sm:$0xf] %v2805_v3  ;;  %v2807_v6 = vmax.f32 %v2803_v5, 0.0  ;;  %2810 = vst [vmem:[#allocation3 + $0x53] sm:$0xf] %v2806_v4  ;;  %v5863_v3 = vld [vmem:[%s7027_s7 + $0x1e0] sm:$0xff]  }
 0x3de   : > { %v5864_v4 = vld [vmem:[%s7027_s7 + $0x1a8] sm:$0xff]  }
 0x3df   : > { %2811 = vst [vmem:[#allocation3 + $0x63] sm:$0xf] %v2807_v6  ;;  %v5865_v5 = vld [vmem:[%s7027_s7 + $0x1e8] sm:$0xff]   ;;  %v5866_v6 = vld [vmem:[%s7027_s7 + $0x1b0] sm:$0xff]  }
 0x3e2   : > { %v5810_v7 = vld [vmem:[#allocation3 + $0x23] ss:$16 sps:$4 sm:$0xff]  }
 0x3e3   : > { %v5812_v8 = vld [vmem:[#allocation3 + $0x22] ss:$16 sps:$4 sm:$0xff]  }
 0x3e4   : > { %v5811_v10 = vld [vmem:[#allocation3 + $0x43] ss:$16 sps:$4 sm:$0xff]  }
 0x3e5   : > { %v5813_v11 = vld [vmem:[#allocation3 + $0x42] ss:$16 sps:$4 sm:$0xff]   ;;  %v2853_v12 = vpack.c.bf16 %v5811_v10, %v5810_v7 }
 0x3e6   : > { %v2824_v14 = vpack.c.bf16 %v5813_v11, %v5812_v8  ;;  %v5831_v29 = vld [vmem:[#allocation3 + $0x44] ss:$16 sps:$4 sm:$0xff]   ;;  %v5868_v8 = vld [vmem:[%s7027_s7 + $0x1b8] sm:$0xff]  }
 0x3e7   : > { %5413 = vmatmul.mubr.bf16.vlgmr.msra.gmra.mrb[36].mxu1 %v2853_v12  ;;  %v5833_v30 = vld [vmem:[#allocation3 + $0x52] ss:$16 sps:$4 sm:$0xff]  }
 0x3e8   : > { %5433 = vmatmul.mubr.bf16.vlgmr.msra.gmra.mrb[40].mxu0 %v2824_v14  ;;  %5437 = vmatpush3.bf16.msra.mxu1 %v5814_v9  ;;  %v5830_v31 = vld [vmem:[#allocation3 + $0x24] ss:$16 sps:$4 sm:$0xff]   ;;  %v5869_v9 = vld [vmem:[%s7027_s7 + $0x1f8] sm:$0xff]  }
 0x3e9   : > { %5457 = vmatpush3.bf16.msra.mxu0 %v5815_v13  ;;  %5438 = vmatprep.subr.bf16.mxu1 %v5900_v1  ;;  %v5832_v32 = vld [vmem:[#allocation3 + $0x32] ss:$16 sps:$4 sm:$0xff]   ;;  %v3061_v34 = vpack.c.bf16 %v5831_v29, %v5830_v31 }
 0x3ea   : > { %5458 = vmatprep.subr.bf16.mxu0 %v5900_v1  ;;  %5452 = vmatprep.mubr.msk.bf16.mxu1 %vm5901_vm0, %v5900_v1  ;;  %v3182_v36 = vpack.c.bf16 %v5833_v30, %v5832_v32  ;;  %v5851_v51 = vld [vmem:[#allocation3 + $0x53] ss:$16 sps:$4 sm:$0xff]   ;;  %v5887_v30 = vld [vmem:[%s7029_s9 + $0x18] sm:$0xff]  }
 0x3eb   : > { %5472 = vmatprep.mubr.msk.bf16.mxu0 %vm5901_vm0, %v5900_v1  ;;  %v5853_v52 = vld [vmem:[#allocation3 + $0x54] ss:$16 sps:$4 sm:$0xff]  }
 0x3ec   : > { %5439 = vmatpush3.bf16.msra.mxu1 %v5816_v15  ;;  %v5850_v53 = vld [vmem:[#allocation3 + $0x33] ss:$16 sps:$4 sm:$0xff]  }
 0x3ed   : > { %5459 = vmatpush3.bf16.msra.mxu0 %v5817_v16  ;;  %5440 = vmatprep.subr.bf16.mxu1 %v5900_v1  ;;  %v5852_v54 = vld [vmem:[#allocation3 + $0x34] ss:$16 sps:$4 sm:$0xff]   ;;  %v3303_v56 = vpack.c.bf16 %v5851_v51, %v5850_v53 }
 0x3ee   : > { %5460 = vmatprep.subr.bf16.mxu0 %v5900_v1  ;;  %v3424_v58 = vpack.c.bf16 %v5853_v52, %v5852_v54  ;;  %v5867_v7 = vld [vmem:[%s7027_s7 + $0x1f0] sm:$0xff]   ;;  %v5874_v14 = vld [vmem:[%s7027_s7 + $0x200] sm:$0xff]  }
 0x3ef   : > { %v5871_v10 = vld [vmem:[#allocation3 + $0x62] ss:$16 sps:$4 sm:$0xff]  }
 0x3f0   : > { %5441 = vmatpush3.bf16.msra.mxu1 %v5818_v17  ;;  %v5873_v11 = vld [vmem:[#allocation3 + $0x63] ss:$16 sps:$4 sm:$0xff]   ;;  %v5875_v17 = vld [vmem:[%s7027_s7 + $0x208] sm:$0xff]  }
 0x3f1   : > { %5461 = vmatpush3.bf16.msra.mxu0 %v5819_v18  ;;  %5442 = vmatprep.subr.bf16.mxu1 %v5900_v1  ;;  %v5870_v12 = vld [vmem:[#allocation3 + $0x42] ss:$16 sps:$4 sm:$0xff]  }
 0x3f2   : > { %5462 = vmatprep.subr.bf16.mxu0 %v5900_v1  ;;  %v5872_v13 = vld [vmem:[#allocation3 + $0x43] ss:$16 sps:$4 sm:$0xff]   ;;  %v3545_v15 = vpack.c.bf16 %v5871_v10, %v5870_v12 }
 0x3f3   : > { %v3666_v16 = vpack.c.bf16 %v5873_v11, %v5872_v13  ;;  %v5876_v18 = vld [vmem:[%s7027_s7 + $0x210] sm:$0xff]  }
 0x3f4   : > { %5443 = vmatpush3.bf16.msra.mxu1 %v5820_v19  ;;  %v5877_v19 = vld [vmem:[%s7027_s7 + $0x218] sm:$0xff]   ;;  %v5886_v29 = vld [vmem:[%s7029_s9 + $0x10] sm:$0xff]  }
 0x3f5   : > { %5463 = vmatpush3.bf16.msra.mxu0 %v5821_v20  ;;  %5444 = vmatprep.subr.bf16.mxu1 %v5900_v1  ;;  %v5878_v20 = vld [vmem:[%s7027_s7 + $0x220] sm:$0xff]  }
 0x3f6   : > { %5464 = vmatprep.subr.bf16.mxu0 %v5900_v1 }
 0x3f8   : > { %5445 = vmatpush3.bf16.msra.mxu1 %v5822_v21  ;;  %v5879_v21 = vld [vmem:[%s7027_s7 + $0x228] sm:$0xff]  }
 0x3f9   : > { %5465 = vmatpush3.bf16.msra.mxu0 %v5823_v22  ;;  %5446 = vmatprep.subr.bf16.mxu1 %v5900_v1  ;;  %v5880_v22 = vld [vmem:[%s7027_s7 + $0x230] sm:$0xff]  }
 0x3fa   : > { %5466 = vmatprep.subr.bf16.mxu0 %v5900_v1 }
 0x3fc   : > { %5447 = vmatpush3.bf16.msra.mxu1 %v5824_v23  ;;  %v5881_v23 = vld [vmem:[%s7027_s7 + $0x238] sm:$0xff]  }
 0x3fd   : > { %5467 = vmatpush3.bf16.msra.mxu0 %v5825_v24  ;;  %5448 = vmatprep.subr.bf16.mxu1 %v5900_v1  ;;  %v5883_v24 = vld [vmem:[#allocation3 + $0x64] ss:$16 sps:$4 sm:$0xff]  }
 0x3fe   : > { %5468 = vmatprep.subr.bf16.mxu0 %v5900_v1 }
 0x400   : > { %5449 = vmatpush3.bf16.msra.mxu1 %v5826_v25  ;;  %v5882_v25 = vld [vmem:[#allocation3 + $0x44] ss:$16 sps:$4 sm:$0xff]  }
 0x401   : > { %5469 = vmatpush3.bf16.msra.mxu0 %v5827_v26  ;;  %5450 = vmatprep.subr.bf16.mxu1 %v5900_v1  ;;  %v3787_v26 = vpack.c.bf16 %v5883_v24, %v5882_v25 }
 0x402   : > { %5470 = vmatprep.subr.bf16.mxu0 %v5900_v1 }
 0x404   : > { %5451 = vmatpush3.bf16.msra.mxu1 %v5828_v27  ;;  %v5884_v27 = vld [vmem:[%s7029_s9] sm:$0xff]  }
 0x405   : > { %5471 = vmatpush3.bf16.msra.mxu0 %v5829_v28  ;;  %5476 = vmatprep.subr.bf16.mxu1 %v5900_v1  ;;  %v5885_v28 = vld [vmem:[%s7029_s9 + $0x8] sm:$0xff]  }
 0x406   : > { %5496 = vmatprep.subr.bf16.mxu0 %v5900_v1 }
 0x407   : > { %5453 = vmatmul.mubr.bf16.vlgmr.msra.gmra.mrb[40].mxu1 %v3061_v34 }
 0x408   : > { %5473 = vmatmul.mubr.bf16.vlgmr.msra.gmra.mrb[44].mxu0 %v3182_v36  ;;  %5477 = vmatpush3.bf16.msra.mxu1 %v5834_v33 }
 0x409   : > { %5497 = vmatpush3.bf16.msra.mxu0 %v5835_v35  ;;  %5478 = vmatprep.subr.bf16.mxu1 %v5900_v1 }
 0x40a   : > { %5498 = vmatprep.subr.bf16.mxu0 %v5900_v1  ;;  %5492 = vmatprep.mubr.msk.bf16.mxu1 %vm5901_vm0, %v5900_v1 }
 0x40b   : > { %5512 = vmatprep.mubr.msk.bf16.mxu0 %vm5901_vm0, %v5900_v1 }
 0x40c   : > { %5479 = vmatpush3.bf16.msra.mxu1 %v5836_v37 }
 0x40d   : > { %5499 = vmatpush3.bf16.msra.mxu0 %v5837_v38  ;;  %5480 = vmatprep.subr.bf16.mxu1 %v5900_v1 }
 0x40e   : > { %5500 = vmatprep.subr.bf16.mxu0 %v5900_v1 }
 0x410   : > { %5481 = vmatpush3.bf16.msra.mxu1 %v5838_v39 }
 0x411   : > { %5501 = vmatpush3.bf16.msra.mxu0 %v5839_v40  ;;  %5482 = vmatprep.subr.bf16.mxu1 %v5900_v1 }
 0x412   : > { %5502 = vmatprep.subr.bf16.mxu0 %v5900_v1 }
 0x414   : > { %5483 = vmatpush3.bf16.msra.mxu1 %v5840_v41  ;;  %v5888_v41 = vld [vmem:[%s7029_s9 + $0x20] sm:$0xff]  }
 0x415   : > { %5503 = vmatpush3.bf16.msra.mxu0 %v5841_v42  ;;  %5484 = vmatprep.subr.bf16.mxu1 %v5900_v1  ;;  %v5889_v42 = vld [vmem:[%s7029_s9 + $0x28] sm:$0xff]  }
 0x416   : > { %5504 = vmatprep.subr.bf16.mxu0 %v5900_v1 }
 0x418   : > { %5485 = vmatpush3.bf16.msra.mxu1 %v5842_v43  ;;  %v5890_v43 = vld [vmem:[%s7029_s9 + $0x30] sm:$0xff]  }
 0x419   : > { %5505 = vmatpush3.bf16.msra.mxu0 %v5843_v44  ;;  %5486 = vmatprep.subr.bf16.mxu1 %v5900_v1  ;;  %v5891_v44 = vld [vmem:[%s7029_s9 + $0x38] sm:$0xff]  }
 0x41a   : > { %5506 = vmatprep.subr.bf16.mxu0 %v5900_v1 }
 0x41c   : > { %5487 = vmatpush3.bf16.msra.mxu1 %v5844_v45 }
 0x41d   : > { %5507 = vmatpush3.bf16.msra.mxu0 %v5845_v46  ;;  %5488 = vmatprep.subr.bf16.mxu1 %v5900_v1 }
 0x41e   : > { %5508 = vmatprep.subr.bf16.mxu0 %v5900_v1 }
 0x420   : > { %5489 = vmatpush3.bf16.msra.mxu1 %v5846_v47 }
 0x421   : > { %5509 = vmatpush3.bf16.msra.mxu0 %v5847_v48  ;;  %5490 = vmatprep.subr.bf16.mxu1 %v5900_v1 }
 0x422   : > { %5510 = vmatprep.subr.bf16.mxu0 %v5900_v1 }
 0x424   : > { %5491 = vmatpush3.bf16.msra.mxu1 %v5848_v49 }
 0x425   : > { %5511 = vmatpush3.bf16.msra.mxu0 %v5849_v50  ;;  %5516 = vmatprep.subr.bf16.mxu1 %v5900_v1 }
 0x426   : > { %5536 = vmatprep.subr.bf16.mxu0 %v5900_v1 }
 0x427   : > { %5493 = vmatmul.mubr.bf16.vlgmr.msra.gmra.mrb[44].mxu1 %v3303_v56 }
 0x428   : > { %5513 = vmatmul.mubr.bf16.vlgmr.msra.gmra.mrb[48].mxu0 %v3424_v58  ;;  %5517 = vmatpush3.bf16.msra.mxu1 %v5854_v55 }
 0x429   : > { %5537 = vmatpush3.bf16.msra.mxu0 %v5855_v57  ;;  %5518 = vmatprep.subr.bf16.mxu1 %v5900_v1 }
 0x42a   : > { %5538 = vmatprep.subr.bf16.mxu0 %v5900_v1  ;;  %5532 = vmatprep.mubr.msk.bf16.mxu1 %vm5901_vm0, %v5900_v1 }
 0x42b   : > { %5552 = vmatprep.mubr.msk.bf16.mxu0 %vm5901_vm0, %v5900_v1 }
 0x42c   : > { %5519 = vmatpush3.bf16.msra.mxu1 %v5856_v59 }
 0x42d   : > { %5539 = vmatpush3.bf16.msra.mxu0 %v5857_v60  ;;  %5520 = vmatprep.subr.bf16.mxu1 %v5900_v1 }
 0x42e   : > { %5540 = vmatprep.subr.bf16.mxu0 %v5900_v1 }
 0x430   : > { %5521 = vmatpush3.bf16.msra.mxu1 %v5858_v61 }
 0x431   : > { %5541 = vmatpush3.bf16.msra.mxu0 %v5859_v62  ;;  %5522 = vmatprep.subr.bf16.mxu1 %v5900_v1 }
 0x432   : > { %5542 = vmatprep.subr.bf16.mxu0 %v5900_v1 }
 0x434   : > { %5523 = vmatpush3.bf16.msra.mxu1 %v5860_v63 }
 0x435   : > { %5543 = vmatpush3.bf16.msra.mxu0 %v5861_v0  ;;  %5524 = vmatprep.subr.bf16.mxu1 %v5900_v1 }
 0x436   : > { %5544 = vmatprep.subr.bf16.mxu0 %v5900_v1 }
 0x438   : > { %5525 = vmatpush3.bf16.msra.mxu1 %v5862_v2 }
 0x439   : > { %5545 = vmatpush3.bf16.msra.mxu0 %v5863_v3  ;;  %5526 = vmatprep.subr.bf16.mxu1 %v5900_v1 }
 0x43a   : > { %5546 = vmatprep.subr.bf16.mxu0 %v5900_v1 }
 0x43c   : > { %5527 = vmatpush3.bf16.msra.mxu1 %v5864_v4 }
 0x43d   : > { %5547 = vmatpush3.bf16.msra.mxu0 %v5865_v5  ;;  %5528 = vmatprep.subr.bf16.mxu1 %v5900_v1 }
 0x43e   : > { %5548 = vmatprep.subr.bf16.mxu0 %v5900_v1 }
 0x440   : > { %5529 = vmatpush3.bf16.msra.mxu1 %v5866_v6 }
 0x441   : > { %5549 = vmatpush3.bf16.msra.mxu0 %v5867_v7  ;;  %5530 = vmatprep.subr.bf16.mxu1 %v5900_v1 }
 0x442   : > { %5550 = vmatprep.subr.bf16.mxu0 %v5900_v1 }
 0x444   : > { %5531 = vmatpush3.bf16.msra.mxu1 %v5868_v8 }
 0x445   : > { %5551 = vmatpush3.bf16.msra.mxu0 %v5869_v9  ;;  %5556 = vmatprep.subr.bf16.mxu1 %v5900_v1 }
 0x446   : > { %5576 = vmatprep.subr.bf16.mxu0 %v5900_v1 }
 0x447   : > { %5533 = vmatmul.mubr.bf16.vlgmr.msra.gmra.mrb[48].mxu1 %v3545_v15 }
 0x448   : > { %5553 = vmatmul.mubr.bf16.vlgmr.msra.gmra.mrb[52].mxu0 %v3666_v16  ;;  %5557 = vmatpush3.bf16.msra.mxu1 %v5874_v14 }
 0x449   : > { %5558 = vmatprep.subr.bf16.mxu1 %v5900_v1  ;;  %5572 = vmatprep.mubr.msk.bf16.mxu1 %vm5901_vm0, %v5900_v1 }
 0x44a   : > { %5592 = vmatprep.mubr.msk.bf16.mxu0 %vm5901_vm0, %v5900_v1  ;;  %5577 = vmatpush3.bf16.msra.mxu0 %v5884_v27 }
 0x44b   : > { %5578 = vmatprep.subr.bf16.mxu0 %v5900_v1 }
 0x44c   : > { %5559 = vmatpush3.bf16.msra.mxu1 %v5875_v17 }
 0x44d   : > { %5560 = vmatprep.subr.bf16.mxu1 %v5900_v1 }
 0x44e   : > { %5579 = vmatpush3.bf16.msra.mxu0 %v5885_v28 }
 0x44f   : > { %5580 = vmatprep.subr.bf16.mxu0 %v5900_v1 }
 0x450   : > { %5561 = vmatpush3.bf16.msra.mxu1 %v5876_v18  ;;  %v4741_v18 = vld [vmem:[%s7028_s8] ss:$0 sm:$0xff] }
 0x451   : > { %5562 = vmatprep.subr.bf16.mxu1 %v5900_v1 }
 0x452   : > { %5581 = vmatpush3.bf16.msra.mxu0 %v5886_v29 }
 0x453   : > { %5582 = vmatprep.subr.bf16.mxu0 %v5900_v1 }
 0x454   : > { %5563 = vmatpush3.bf16.msra.mxu1 %v5877_v19 }
 0x455   : > { %5564 = vmatprep.subr.bf16.mxu1 %v5900_v1 }
 0x456   : > { %5583 = vmatpush3.bf16.msra.mxu0 %v5887_v30 }
 0x457   : > { %5584 = vmatprep.subr.bf16.mxu0 %v5900_v1 }
 0x458   : > { %5565 = vmatpush3.bf16.msra.mxu1 %v5878_v20 }
 0x459   : > { %5566 = vmatprep.subr.bf16.mxu1 %v5900_v1 }
 0x45a   : > { %5585 = vmatpush3.bf16.msra.mxu0 %v5888_v41 }
 0x45b   : > { %5586 = vmatprep.subr.bf16.mxu0 %v5900_v1 }
 0x45c   : > { %5567 = vmatpush3.bf16.msra.mxu1 %v5879_v21 }
 0x45d   : > { %5568 = vmatprep.subr.bf16.mxu1 %v5900_v1 }
 0x45e   : > { %5587 = vmatpush3.bf16.msra.mxu0 %v5889_v42 }
 0x45f   : > { %5588 = vmatprep.subr.bf16.mxu0 %v5900_v1 }
 0x460   : > { %5569 = vmatpush3.bf16.msra.mxu1 %v5880_v22 }
 0x461   : > { %5570 = vmatprep.subr.bf16.mxu1 %v5900_v1 }
 0x462   : > { %5589 = vmatpush3.bf16.msra.mxu0 %v5890_v43 }
 0x463   : > { %5590 = vmatprep.subr.bf16.mxu0 %v5900_v1 }
 0x464   : > { %5571 = vmatpush3.bf16.msra.mxu1 %v5881_v23 }
 0x466   : > { %5591 = vmatpush3.bf16.msra.mxu0 %v5891_v44 }
 0x467   : > { %5573 = vmatmul.mubr.bf16.vlgmr.msra.gmra.mrb[52].mxu1 %v3787_v26 }
 0x4ba   : > { %v2953_v31 = vpop.f32.mrb[36].mxu1 }
 0x4bb   : > { %v3042_v32 = vpop.f32.mrb[40].mxu0  ;;  %v5414_v33 = vpop.f32.mrb[37].mxu1 }
 0x4bc   : > { %v3043_v34 = vadd.f32 %v3042_v32, %v2953_v31  ;;  %v5434_v35 = vpop.f32.mrb[41].mxu0  ;;  %v2956_v36 = vpop.f32.mrb[38].mxu1 }
 0x4bd   : > { %v3045_v37 = vpop.f32.mrb[42].mxu0  ;;  %v5415_v38 = vpop.f32.mrb[39].mxu1  ;;  %v4742_v35 = vld [vmem:[%s7030_s10] ss:$0 sm:$0xff] }
 0x4be   : > { %v3046_v39 = vadd.f32 %v3045_v37, %v2956_v36  ;;  %v5435_v40 = vpop.f32.mrb[43].mxu0 }
 0x4da   : > { %v3161_v45 = vpop.f32.mrb[40].mxu1 }
 0x4db   : > { %v3168_v46 = vadd.f32 %v3161_v45, %v3043_v34  ;;  %v3282_v47 = vpop.f32.mrb[44].mxu0  ;;  %v5454_v48 = vpop.f32.mrb[41].mxu1  ;;  %v4043_v45 = vld [vmem:[#allocation2 + $0x4] sm:$0xf] }
 0x4dc   : > { %v5474_v49 = vpop.f32.mrb[45].mxu0  ;;  %v3164_v50 = vpop.f32.mrb[42].mxu1 }
 0x4dd   : > { %v3289_v51 = vadd.f32 %v3282_v47, %v3168_v46  ;;  %v3169_v52 = vadd.f32 %v3164_v50, %v3046_v39  ;;  %v3285_v53 = vpop.f32.mrb[46].mxu0  ;;  %v5455_v54 = vpop.f32.mrb[43].mxu1  ;;  %v4042_v39 = vld [vmem:[#allocation2] sm:$0xf]  ;;  %v4044_v46 = vld [vmem:[#allocation2 + $0x8] sm:$0xf] }
 0x4de   : > { %v5475_v55 = vpop.f32.mrb[47].mxu0  ;;  %v4045_v50 = vld [vmem:[#allocation2 + $0xc] sm:$0xf] }
 0x4df   : > { %v3290_v56 = vadd.f32 %v3285_v53, %v3169_v52 }
 0x4fa   : > { %v3403_v57 = vpop.f32.mrb[44].mxu1 }
 0x4fb   : > { %v3410_v58 = vadd.f32 %v3403_v57, %v3289_v51  ;;  %v3524_v59 = vpop.f32.mrb[48].mxu0  ;;  %v5494_v60 = vpop.f32.mrb[45].mxu1 }
 0x4fc   : > { %v5514_v61 = vpop.f32.mrb[49].mxu0  ;;  %v3406_v62 = vpop.f32.mrb[46].mxu1 }
 0x4fd   : > { %v3531_v1 = vadd.f32 %v3524_v59, %v3410_v58  ;;  %v3411_v63 = vadd.f32 %v3406_v62, %v3290_v56  ;;  %v3527_v0 = vpop.f32.mrb[50].mxu0  ;;  %v5495_v2 = vpop.f32.mrb[47].mxu1 }
 0x4fe   : > { %v5515_v3 = vpop.f32.mrb[51].mxu0 }
 0x4ff   : > { %v3532_v4 = vadd.f32 %v3527_v0, %v3411_v63 }
 0x51a   : > { %v3645_v5 = vpop.f32.mrb[48].mxu1 }
 0x51b   : > { %v3652_v6 = vadd.f32 %v3645_v5, %v3531_v1  ;;  %v3766_v7 = vpop.f32.mrb[52].mxu0  ;;  %v5534_v8 = vpop.f32.mrb[49].mxu1 }
 0x51c   : > { %v5554_v9 = vpop.f32.mrb[53].mxu0  ;;  %v3648_v10 = vpop.f32.mrb[50].mxu1 }
 0x51d   : > { %v3773_v11 = vadd.f32 %v3766_v7, %v3652_v6  ;;  %v3653_v12 = vadd.f32 %v3648_v10, %v3532_v4  ;;  %v3769_v13 = vpop.f32.mrb[54].mxu0  ;;  %v5535_v14 = vpop.f32.mrb[51].mxu1 }
 0x51e   : > { %v5555_v15 = vpop.f32.mrb[55].mxu0 }
 0x51f   : > { %v3774_v16 = vadd.f32 %v3769_v13, %v3653_v12 }
 0x53a   : > { %v3887_v17 = vpop.f32.mrb[52].mxu1 }
 0x53b   : > { %v3894_v19 = vadd.f32 %v3887_v17, %v3773_v11  ;;  %v5574_v20 = vpop.f32.mrb[53].mxu1 }
 0x53c   : > { %v3890_v21 = vpop.f32.mrb[54].mxu1 }
 0x53d   : > { %v3903_v22 = vadd.f32 %v4741_v18, %v3894_v19  ;;  %v3895_v23 = vadd.f32 %v3890_v21, %v3774_v16  ;;  %v5575_v24 = vpop.f32.mrb[55].mxu1 }
 0x53f   : > { %v3907_v25 = vcombine.high %v3903_v22, %v3903_v22  ;;  %v3904_v26 = vadd.f32 %v4741_v18, %v3895_v23  ;;  %v3911_v29 = vmax.f32 %v3903_v22, 0.0 }
 0x541   : > { %v3912_v27 = vmax.f32 %v3907_v25, 0.0  ;;  %v3908_v28 = vcombine.high %v3904_v26, %v3904_v26  ;;  %v3913_v30 = vmax.f32 %v3904_v26, 0.0 }
 0x543   : > { %v3914_v31 = vmax.f32 %v3908_v28, 0.0  ;;  %v3919_v32 = vcombine.low %v3911_v29, %v3912_v27 }
 0x545   : > { %v3920_v33 = vcombine.low %v3913_v30, %v3914_v31 }
 0x547   : > { %v3923_v34 = vpack.c.bf16 %v3920_v33, %v3919_v32 }
 0x549   : > { %5593 = vmatmul.mubr.bf16.vlgmr.msra.gmra.mrb[56].mxu0 %v3923_v34 }
 0x61c   : > { %v4029_v36 = vpop.f32.mrb[56].mxu0 }
 0x61d   : > { %v4030_v37 = vadd.f32 %v4742_v35, %v4029_v36  ;;  %v5594_v38 = vpop.f32.mrb[57].mxu0 }
 0x61e   : > { %v4032_v40 = vpop.f32.mrb[58].mxu0 }
 0x61f   : > { %v4038_v41 = vcombine.high %v4030_v37, %v4030_v37  ;;  %v4046_v42 = vadd.f32 %v4042_v39, %v4030_v37  ;;  %v4033_v43 = vadd.f32 %v4742_v35, %v4032_v40  ;;  %v5595_v44 = vpop.f32.mrb[59].mxu0 }
 0x621   : > { %v4047_v47 = vadd.f32 %v4043_v45, %v4038_v41  ;;  %4050 = vst [vmem:[#allocation2] sm:$0xf] %v4046_v42  ;;  %v4039_v48 = vcombine.high %v4033_v43, %v4033_v43  ;;  %v4048_v49 = vadd.f32 %v4044_v46, %v4033_v43 }
 0x623   : > { %4051 = vst [vmem:[#allocation2 + $0x4] sm:$0xf] %v4047_v47  ;;  %v4049_v51 = vadd.f32 %v4045_v50, %v4039_v48  ;;  %4052 = vst [vmem:[#allocation2 + $0x8] sm:$0xf] %v4048_v49 }
 0x625   : > { %4053 = vst [vmem:[#allocation2 + $0xc] sm:$0xf] %v4049_v51 }
 0x628   : > { %v4054_v52 = vld [vmem:[#allocation2] sm:$0xf] }
 0x629   : > { %v4058_v53 = vpack.c.bf16 %v4054_v52, %v4054_v52 }
 0x62a   : > { %v4055_v54 = vld [vmem:[#allocation2 + $0x4] sm:$0xf]  ;;  %v4056_v55 = vld [vmem:[#allocation2 + $0x8] sm:$0xf] }
 0x62b   : > { %v4059_v56 = vpack.c.bf16 %v4055_v54, %v4055_v54  ;;  %4062 = vst [vmem:[%s386_s24] sm:$0x3] %v4058_v53  ;;  %v4060_v57 = vpack.c.bf16 %v4056_v55, %v4056_v55 }
 0x62c   : > { %v4057_v58 = vld [vmem:[#allocation2 + $0xc] sm:$0xf] }
 0x62d   : > { %4063 = vst [vmem:[%s386_s24 + $0x2] sm:$0x3] %v4059_v56  ;;  %v4061_v59 = vpack.c.bf16 %v4057_v58, %v4057_v58  ;;  %4064 = vst [vmem:[%s386_s24 + $0x4] sm:$0x3] %v4060_v57 }
 0x62f   : > { %4065 = vst [vmem:[%s386_s24 + $0x6] sm:$0x3] %v4061_v59 }
 0x630 PF: > { %s21_s17 = sadd.s32 1, %s5898_s17  }
 0x631   : > { %p18_p4 = scmp.ge.s32.totalorder %s21_s17, 4  }
 0x633   :  { %20 = sbr.rel (!%p18_p4) target bundleno = 1 (0x1), region = 123 }

// kernel: decoder_forward_pallas.4
= control target key start
LH: loop header
LB: loop body
LE: loop exit
PB: predicated region body
PF: predicated region fallthrough
CT: control target
= control target key end

     0   :  { %s7451_s21 = smov 0   ;;  %s8688_s0 = inlined_call_operand.vmem [shape: bf16[2,4,4,128], index: 0, kind: input, shape index: {}]   ;;  %s8689_s1 = inlined_call_operand.vmem [shape: bf16[8,4], index: 1, kind: input, shape index: {}]   ;;  %s8690_s2 = inlined_call_operand.vmem [shape: bf16[9,128,128], index: 2, kind: input, shape index: {}]   ;;  %s8691_s3 = inlined_call_operand.vmem [shape: f32[1,128], index: 3, kind: input, shape index: {}]   ;;  %s8692_s4 = inlined_call_operand.vmem [shape: bf16[9,128,128], index: 4, kind: input, shape index: {}]   ;;  %s8693_s5 = inlined_call_operand.vmem [shape: f32[1,128], index: 5, kind: input, shape index: {}]   ;;  %s8694_s6 = inlined_call_operand.vmem [shape: bf16[1,128,128], index: 6, kind: input, shape index: {}]   ;;  %s8695_s7 = inlined_call_operand.vmem [shape: f32[1,128], index: 7, kind: input, shape index: {}]   ;;  %s8696_s8 = inlined_call_operand.vmem [shape: bf16[9,128,128], index: 8, kind: input, shape index: {}]   ;;  %s8697_s9 = inlined_call_operand.vmem [shape: f32[1,128], index: 9, kind: input, shape index: {}]   ;;  %s8698_s10 = inlined_call_operand.vmem [shape: bf16[1,128,128], index: 10, kind: input, shape index: {}]   ;;  %s8699_s11 = inlined_call_operand.vmem [shape: f32[1,128], index: 11, kind: input, shape index: {}]   ;;  %s8700_s12 = inlined_call_operand.vmem [shape: bf16[2,8,8,128], index: 12, kind: output, shape index: {}]  }
   0x1 LB: > { %s5197_s22 = sadd.s32 4294967295, %s7382_s21   ;;  %p5201_p0 = scmp.ge.s32.totalorder %s7382_s21, 1  ;;  %s7382_s21 = sphi %s7451_s21, %s22_s21  }
   0x2   : > { %p362_p1 = scmp.lt.s32.totalorder %s7382_s21, 3 }
   0x4   : > { %p363_p2 = pnand %p5201_p0, %p362_p1 }
   0x5   : > { %p7461_p3 = scmp.lt.s32.totalorder (!%p363_p2), %s5197_s22, 1  ;;  %v7384_v0 = vmov (!%p363_p2), 0.0   ;;  %vm7385_vm0 = vmmov (!%p363_p2), 0   ;;  %vm473_vm1 = vcmask (!%p363_p2), 1041408   ;;  %v468_v2 = vld [vmem:[%s8689_s1] sm:$0xf] (!%p363_p2) }
   0x6   : > { %366 = sbr.rel (%p363_p2) target bundleno = 2054 (0x806), region = 68  ;;  %6218 = vmatprep.subr.bf16.mxu0 (!%p363_p2), %v7384_v0  ;;  %415 = vst [vmem:[#allocation3] sm:$0xff] (!%p363_p2), %v7384_v0  ;;  %416 = vst [vmem:[#allocation3 + $0x8] sm:$0x3f] (!%p363_p2), %v7384_v0  ;;  %6220 = vmatprep.mubr.msk.bf16.mxu0 (!%p363_p2), %vm7385_vm0, %v7384_v0  ;;  %vm469_vm2 = vcmask (!%p363_p2), 31744   ;;  %v7144_v10 = vld [vmem:[%s8690_s2 + $0x40] sm:$0xff] (!%p363_p2)  }
   0x7   : > { %417 = vst [vmem:[#allocation3 + $0x10] sm:$0xff] (!%p363_p2), %v7384_v0  ;;  %418 = vst [vmem:[#allocation3 + $0x18] sm:$0x3f] (!%p363_p2), %v7384_v0  ;;  %v7145_v11 = vld [vmem:[%s8690_s2 + $0x48] sm:$0xff] (!%p363_p2)   ;;  %v7146_v12 = vld [vmem:[%s8690_s2 + $0x50] sm:$0xff] (!%p363_p2)  }
   0x8   : > { %419 = vst [vmem:[#allocation3 + $0x20] sm:$0xff] (!%p363_p2), %v7384_v0  ;;  %420 = vst [vmem:[#allocation3 + $0x28] sm:$0x3f] (!%p363_p2), %v7384_v0  ;;  %v7147_v13 = vld [vmem:[%s8690_s2 + $0x58] sm:$0xff] (!%p363_p2)   ;;  %v7148_v14 = vld [vmem:[%s8690_s2 + $0x60] sm:$0xff] (!%p363_p2)  }
   0x9   : > { %422 = vst [vmem:[#allocation3 + $0xb0] sm:$0xff] (!%p363_p2), %v7384_v0  ;;  %423 = vst [vmem:[#allocation3 + $0xb8] sm:$0x3f] (!%p363_p2), %v7384_v0  ;;  %v7149_v15 = vld [vmem:[%s8690_s2 + $0x68] sm:$0xff] (!%p363_p2)   ;;  %v7150_v16 = vld [vmem:[%s8690_s2 + $0x70] sm:$0xff] (!%p363_p2)  }
   0xa   : > { %424 = vst [vmem:[#allocation3 + $0xc0] sm:$0xff] (!%p363_p2), %v7384_v0  ;;  %425 = vst [vmem:[#allocation3 + $0xc8] sm:$0x3f] (!%p363_p2), %v7384_v0  ;;  %v7151_v17 = vld [vmem:[%s8690_s2 + $0x78] sm:$0xff] (!%p363_p2)   ;;  %v7152_v18 = vld [vmem:[%s8690_s2] sm:$0xff] (!%p363_p2)  }
   0xb   : > { %426 = vst [vmem:[#allocation3 + $0xd0] sm:$0xff] (!%p363_p2), %v7384_v0  ;;  %427 = vst [vmem:[#allocation3 + $0xd8] sm:$0x3f] (!%p363_p2), %v7384_v0  ;;  %v7153_v28 = vld [vmem:[%s8690_s2 + $0x8] sm:$0xff] (!%p363_p2)   ;;  %v7154_v31 = vld [vmem:[%s8690_s2 + $0x10] sm:$0xff] (!%p363_p2)  }
   0xc   : > { %431 = vst [vmem:[#allocation3 + $0x30] sm:$0x7] (!%p363_p2), %v7384_v0  ;;  %432 = vst [vmem:[#allocation3 + $0x40] sm:$0x7] (!%p363_p2), %v7384_v0  ;;  %v7155_v35 = vld [vmem:[%s8690_s2 + $0x18] sm:$0xff] (!%p363_p2)   ;;  %v7156_v38 = vld [vmem:[%s8690_s2 + $0x20] sm:$0xff] (!%p363_p2)  }
   0xd   : > { %433 = vst [vmem:[#allocation3 + $0x50] sm:$0x7] %v7384_v0  ;;  %434 = vst [vmem:[#allocation3 + $0x60] sm:$0x7] %v7384_v0  ;;  %s8703_s22 = smov (!%p7461_p3, %s5197_s22), 1  ;;  %v7157_v44 = vld [vmem:[%s8690_s2 + $0x28] sm:$0xff]  }
   0xe   : > { %435 = vst [vmem:[#allocation3 + $0x70] sm:$0x7] %v7384_v0  ;;  %436 = vst [vmem:[#allocation3 + $0x80] sm:$0x7] %v7384_v0  ;;  %s5837_s24 = sshll.u32 %s8703_s22, 3  ;;  %v7158_v48 = vld [vmem:[%s8690_s2 + $0x30] sm:$0xff]  }
   0xf   : > { %437 = vst [vmem:[#allocation3 + $0x90] sm:$0x7] %v7384_v0  ;;  %438 = vst [vmem:[#allocation3 + $0xa0] sm:$0x7] %v7384_v0  ;;  %s408_s27 = scalar_lea.vmem %s8688_s0, %s5837_s24  ;;  %v700_v19 = vld [vmem:[#allocation3 + $0x23] sm:$0xff]  ;;  %v7159_v49 = vld [vmem:[%s8690_s2 + $0x38] sm:$0xff]  }
  0x10   : > { %445 = vst [vmem:[#allocation3 + $0x3b] sm:$0x7] %v7384_v0  ;;  %446 = vst [vmem:[#allocation3 + $0x4b] sm:$0x7] %v7384_v0  ;;  %v7160_v50 = vld [vmem:[%s8690_s2 + $0x80] sm:$0xff]   ;;  %v7161_v56 = vld [vmem:[%s8690_s2 + $0x88] sm:$0xff]  }
  0x11   : > { %447 = vst [vmem:[#allocation3 + $0x5b] sm:$0x7] %v7384_v0  ;;  %448 = vst [vmem:[#allocation3 + $0x6b] sm:$0x7] %v7384_v0  ;;  %v7162_v58 = vld [vmem:[%s8690_s2 + $0x90] sm:$0xff]   ;;  %s5838_s24 = sshll.u32 %s8703_s22, 5 }
  0x12   : > { %449 = vst [vmem:[#allocation3 + $0x7b] sm:$0x7] %v7384_v0  ;;  %450 = vst [vmem:[#allocation3 + $0x8b] sm:$0x7] %v7384_v0 }
  0x13   : > { %451 = vst [vmem:[#allocation3 + $0x9b] sm:$0x7] %v7384_v0  ;;  %452 = vst [vmem:[#allocation3 + $0xab] sm:$0x7] %v7384_v0 }
  0x14   : > { %428 = vst [vmem:[#allocation3] sm:$0x7] %v7384_v0  ;;  %429 = vst [vmem:[#allocation3 + $0x10] sm:$0x7] %v7384_v0 }
  0x15   : > { %430 = vst [vmem:[#allocation3 + $0x20] sm:$0x7] %v7384_v0  ;;  %439 = vst [vmem:[#allocation3 + $0xb0] sm:$0x7] %v7384_v0 }
  0x16   : > { %440 = vst [vmem:[#allocation3 + $0xc0] sm:$0x7] %v7384_v0  ;;  %441 = vst [vmem:[#allocation3 + $0xd0] sm:$0x7] %v7384_v0 }
  0x17   : > { %442 = vst [vmem:[#allocation3 + $0xb] sm:$0x7] %v7384_v0  ;;  %443 = vst [vmem:[#allocation3 + $0x1b] sm:$0x7] %v7384_v0 }
  0x18   : > { %444 = vst [vmem:[#allocation3 + $0x2b] sm:$0x7] %v7384_v0  ;;  %453 = vst [vmem:[#allocation3 + $0xbb] sm:$0x7] %v7384_v0 }
  0x19   : > { %454 = vst [vmem:[#allocation3 + $0xcb] sm:$0x7] %v7384_v0  ;;  %455 = vst [vmem:[#allocation3 + $0xdb] sm:$0x7] %v7384_v0 }
  0x1a   : > { %v7140_v1 = vld [vmem:[%s408_s27] ss:$0 sps:$4 sm:$0x33]   ;;  %v7141_v3 = vld [vmem:[%s408_s27 + $0x2] ss:$0 sps:$4 sm:$0x33]  }
  0x1b   : > { %v475_v4 = vsel %vm473_vm1, %v7140_v1, 0  ;;  %v7142_v5 = vld [vmem:[%s408_s27 + $0x4] ss:$0 sps:$4 sm:$0x33]   ;;  %v518_v7 = vsel %vm473_vm1, %v7141_v3, 0  ;;  %v7165_v3 = vld [vmem:[%s8690_s2 + $0xa8] sm:$0xff]  }
  0x1c   : > { %6219 = vmatpush3.bf16.msra.mxu0 %v475_v4  ;;  %v7143_v6 = vld [vmem:[%s408_s27 + $0x6] ss:$0 sps:$4 sm:$0x33]   ;;  %v561_v8 = vsel %vm473_vm1, %v7142_v5, 0  ;;  %v7166_v4 = vld [vmem:[%s8690_s2 + $0xb0] sm:$0xff]   ;;  %v7167_v5 = vld [vmem:[%s8690_s2 + $0xb8] sm:$0xff]   ;;  %s413_s27 = scalar_lea.vmem %s8700_s12, %s5838_s24 }
  0x1d   : > { %6224 = vmatprep.subr.bf16.mxu0 %v7384_v0  ;;  %v604_v9 = vsel %vm473_vm1, %v7143_v6, 0  ;;  %v672_v39 = vld [vmem:[#allocation3 + $0x22] sm:$0xff] }
  0x1e   : > { %v7168_v6 = vld [vmem:[%s8690_s2 + $0xc0] sm:$0xff]  }
  0x1f   : > { %6221 = vmatmul.mubr.msk.bf16.vlgmr.msra.gmra.mrb[0].mxu0 %vm469_vm2, %v468_v2  ;;  %v955_v61 = vld [vmem:[#allocation3 + $0x24] sm:$0xff] }
  0x20   : > { %6225 = vmatpush3.bf16.msra.mxu0 %v518_v7  ;;  %6226 = vmatprep.mubr.msk.bf16.mxu0 %vm7385_vm0, %v7384_v0 }
  0x21   : > { %6230 = vmatprep.subr.bf16.mxu0 %v7384_v0 }
  0x27   : > { %6227 = vmatmul.mubr.msk.bf16.vlgmr.msra.gmra.mrb[4].mxu0 %vm469_vm2, %v468_v2 }
  0x28   : > { %6231 = vmatpush3.bf16.msra.mxu0 %v561_v8  ;;  %6232 = vmatprep.mubr.msk.bf16.mxu0 %vm7385_vm0, %v7384_v0 }
  0x29   : > { %6236 = vmatprep.subr.bf16.mxu0 %v7384_v0 }
  0x2f   : > { %6233 = vmatmul.mubr.msk.bf16.vlgmr.msra.gmra.mrb[8].mxu0 %vm469_vm2, %v468_v2 }
  0x30   : > { %6237 = vmatpush3.bf16.msra.mxu0 %v604_v9  ;;  %6238 = vmatprep.mubr.msk.bf16.mxu0 %vm7385_vm0, %v7384_v0  ;;  %v7163_v0 = vld [vmem:[%s8690_s2 + $0x98] sm:$0xff]  }
  0x31   : > { %6242 = vmatprep.subr.bf16.mxu0 %v7144_v10 }
  0x37   : > { %6239 = vmatmul.mubr.msk.bf16.vlgmr.msra.gmra.mrb[12].mxu0 %vm469_vm2, %v468_v2  ;;  %v7164_v2 = vld [vmem:[%s8690_s2 + $0xa0] sm:$0xff]  }
  0x38   : > { %6243 = vmatpush3.bf16.msra.mxu0 %v7144_v10 }
  0x39   : > { %6244 = vmatprep.subr.bf16.mxu0 %v7145_v11 }
  0x3c   : > { %6245 = vmatpush3.bf16.msra.mxu0 %v7145_v11 }
  0x3d   : > { %6246 = vmatprep.subr.bf16.mxu0 %v7146_v12 }
  0x40   : > { %6247 = vmatpush3.bf16.msra.mxu0 %v7146_v12  ;;  %v7169_v12 = vld [vmem:[%s8690_s2 + $0xc8] sm:$0xff]  }
  0x41   : > { %6248 = vmatprep.subr.bf16.mxu0 %v7147_v13 }
  0x44   : > { %6249 = vmatpush3.bf16.msra.mxu0 %v7147_v13 }
  0x45   : > { %6250 = vmatprep.subr.bf16.mxu0 %v7148_v14 }
  0x48   : > { %6251 = vmatpush3.bf16.msra.mxu0 %v7148_v14  ;;  %v7170_v14 = vld [vmem:[%s8690_s2 + $0xd0] sm:$0xff]  }
  0x49   : > { %6252 = vmatprep.subr.bf16.mxu0 %v7149_v15 }
  0x4c   : > { %6253 = vmatpush3.bf16.msra.mxu0 %v7149_v15 }
  0x4d   : > { %6254 = vmatprep.subr.bf16.mxu0 %v7150_v16 }
  0x50   : > { %6255 = vmatpush3.bf16.msra.mxu0 %v7150_v16 }
  0x51   : > { %6256 = vmatprep.subr.bf16.mxu0 %v7151_v17 }
  0x54   : > { %6257 = vmatpush3.bf16.msra.mxu0 %v7151_v17 }
  0x55   : > { %6266 = vmatprep.subr.bf16.mxu0 %v7152_v18 }
  0xf2   : > { %v7561_v20 = vpop.f32.mrb[0].mxu0 }
  0xf3   : > { %663 = vst [vmem:[#allocation3 + $0x33] sm:$0xff] %v7561_v20  ;;  %664 = vst [vmem:[#allocation3 + $0x43] sm:$0xff] %v7561_v20  ;;  %v6222_v21 = vpop.f32.mrb[1].mxu0  ;;  %v708_v22 = vpack.c.bf16 %v7561_v20, %v700_v19 }
  0xf4   : > { %v514_v23 = vpop.f32.mrb[2].mxu0  ;;  %v7172_v21 = vld [vmem:[%s8690_s2 + $0xe0] sm:$0xff]  }
  0xf5   : > { %v6223_v24 = vpop.f32.mrb[3].mxu0  ;;  %6258 = vmatprep.mubr.bf16.mxu0 %v708_v22  ;;  %v7173_v22 = vld [vmem:[%s8690_s2 + $0xe8] sm:$0xff]   ;;  %v7174_v23 = vld [vmem:[%s8690_s2 + $0xf0] sm:$0xff]  }
  0xf6   : > { %v7175_v24 = vld [vmem:[%s8690_s2 + $0xf8] sm:$0xff]  }
  0xfa   : > { %v7566_v25 = vpop.f32.mrb[4].mxu0  ;;  %v7596_v40 = vld [vmem:[#allocation3 + $0x32] sm:$0xff]  ;;  %v674_v53 = vld [vmem:[#allocation3 + $0x42] sm:$0xff] }
  0xfb   : > { %665 = vst [vmem:[#allocation3 + $0x53] sm:$0xff] %v7566_v25  ;;  %666 = vst [vmem:[#allocation3 + $0x63] sm:$0xff] %v7566_v25  ;;  %v6228_v26 = vpop.f32.mrb[5].mxu0  ;;  %v7572_v27 = vpack.c.bf16 %v7566_v25, %v7561_v20  ;;  %v680_v46 = vpack.c.bf16 %v7596_v40, %v672_v39  ;;  %v7645_v62 = vld [vmem:[#allocation3 + $0x34] sm:$0xff]  ;;  %v7675_v9 = vld [vmem:[#allocation3 + $0x44] sm:$0xff]  ;;  %v1113_v19 = vpack.c.bf16 %v674_v53, %v7596_v40 }
  0xfc   : > { %v557_v29 = vpop.f32.mrb[6].mxu0  ;;  %v963_v1 = vpack.c.bf16 %v7645_v62, %v955_v61  ;;  %v7176_v26 = vld [vmem:[%s8690_s2 + $0x100] sm:$0xff]   ;;  %v7181_v39 = vld [vmem:[%s8690_s2 + $0x128] sm:$0xff]   ;;  %v7183_v40 = vld [vmem:[%s8690_s2 + $0x138] sm:$0xff]  }
  0xfd   : > { %v6229_v30 = vpop.f32.mrb[7].mxu0  ;;  %6259 = vmatmul.mubr.bf16.vlgmr.msra.gmra.mrb[16].mxu0 %v7572_v27  ;;  %v7177_v29 = vld [vmem:[%s8690_s2 + $0x108] sm:$0xff]  }
  0xfe   : > { %6267 = vmatpush3.bf16.msra.mxu0 %v7152_v18  ;;  %v7171_v18 = vld [vmem:[%s8690_s2 + $0xd8] sm:$0xff]   ;;  %v7193_v61 = vld [vmem:[%s8690_s2 + $0x188] sm:$0xff]  }
  0xff   : > { %6268 = vmatprep.subr.bf16.mxu0 %v7153_v28 }
 0x102   : > { %v7581_v32 = vpop.f32.mrb[8].mxu0  ;;  %6269 = vmatpush3.bf16.msra.mxu0 %v7153_v28  ;;  %v7620_v51 = vld [vmem:[#allocation3 + $0x52] sm:$0xff]  ;;  %v7627_v55 = vld [vmem:[#allocation3 + $0x62] sm:$0xff] }
 0x103   : > { %667 = vst [vmem:[#allocation3 + $0x73] sm:$0xff] %v7581_v32  ;;  %668 = vst [vmem:[#allocation3 + $0x83] sm:$0xff] %v7581_v32  ;;  %v6234_v33 = vpop.f32.mrb[9].mxu0  ;;  %6270 = vmatprep.subr.bf16.mxu0 %v7154_v31  ;;  %v7587_v34 = vpack.c.bf16 %v7581_v32, %v7566_v25  ;;  %v7625_v54 = vpack.c.bf16 %v7620_v51, %v674_v53  ;;  %v7671_v7 = vld [vmem:[#allocation3 + $0x54] sm:$0xff]  ;;  %v7681_v11 = vld [vmem:[#allocation3 + $0x64] sm:$0xff]  ;;  %v1114_v28 = vpack.c.bf16 %v7627_v55, %v7620_v51 }
 0x104   : > { %v600_v36 = vpop.f32.mrb[10].mxu0  ;;  %v7679_v10 = vpack.c.bf16 %v7671_v7, %v7675_v9  ;;  %v7188_v51 = vld [vmem:[%s8690_s2 + $0x160] sm:$0xff]   ;;  %v7189_v53 = vld [vmem:[%s8690_s2 + $0x168] sm:$0xff]  }
 0x105   : > { %v6235_v37 = vpop.f32.mrb[11].mxu0  ;;  %6262 = vmatprep.mubr.bf16.mxu0 %v7587_v34  ;;  %v7179_v36 = vld [vmem:[%s8690_s2 + $0x118] sm:$0xff]  }
 0x106   : > { %6271 = vmatpush3.bf16.msra.mxu0 %v7154_v31  ;;  %v7178_v31 = vld [vmem:[%s8690_s2 + $0x110] sm:$0xff]   ;;  %v1263_v37 = vpack.c.bf16 %v7561_v20, %v7561_v20 }
 0x107   : > { %6272 = vmatprep.subr.bf16.mxu0 %v7155_v35  ;;  %v7182_v20 = vld [vmem:[%s8690_s2 + $0x130] sm:$0xff]  }
 0x10a   : > { %v7598_v41 = vpop.f32.mrb[12].mxu0  ;;  %6273 = vmatpush3.bf16.msra.mxu0 %v7155_v35  ;;  %v7622_v52 = vld [vmem:[#allocation3 + $0x72] sm:$0xff]  ;;  %v7641_v59 = vld [vmem:[#allocation3 + $0x82] sm:$0xff] }
 0x10b   : > { %669 = vst [vmem:[#allocation3 + $0x93] sm:$0xff] %v7598_v41  ;;  %670 = vst [vmem:[#allocation3 + $0xa3] sm:$0xff] %v7598_v41  ;;  %v6240_v42 = vpop.f32.mrb[13].mxu0  ;;  %6274 = vmatprep.subr.bf16.mxu0 %v7156_v38  ;;  %v7604_v43 = vpack.c.bf16 %v7598_v41, %v7581_v32  ;;  %v7634_v57 = vpack.c.bf16 %v7622_v52, %v7627_v55  ;;  %v7673_v8 = vld [vmem:[#allocation3 + $0x74] sm:$0xff]  ;;  %v7695_v15 = vld [vmem:[#allocation3 + $0x84] sm:$0xff]  ;;  %v1115_v30 = vpack.c.bf16 %v7641_v59, %v7622_v52 }
 0x10c   : > { %v643_v45 = vpop.f32.mrb[14].mxu0  ;;  %v7688_v13 = vpack.c.bf16 %v7673_v8, %v7681_v11  ;;  %v7184_v42 = vld [vmem:[%s8690_s2 + $0x140] sm:$0xff]   ;;  %v7221_v52 = vld [vmem:[%s8692_s4 + $0xd0] sm:$0xff]   ;;  %v7223_v55 = vld [vmem:[%s8692_s4 + $0xd8] sm:$0xff]  }
 0x10d   : > { %v6241_v47 = vpop.f32.mrb[15].mxu0  ;;  %6263 = vmatmul.mubr.bf16.gmra.mrb[20].mxu0 %v7604_v43  ;;  %v7185_v45 = vld [vmem:[%s8690_s2 + $0x148] sm:$0xff]  }
 0x10e   : > { %6275 = vmatpush3.bf16.msra.mxu0 %v7156_v38  ;;  %6282 = vmatprep.mubr.bf16.mxu0 %v680_v46  ;;  %v7180_v38 = vld [vmem:[%s8690_s2 + $0x120] sm:$0xff]   ;;  %v1265_v46 = vpack.c.bf16 %v7581_v32, %v7581_v32  ;;  %v7186_v47 = vld [vmem:[%s8690_s2 + $0x150] sm:$0xff]   ;;  %v1413_v32 = vpack.c.bf16 %v7675_v9, %v7645_v62  ;;  %v1415_v62 = vpack.c.bf16 %v7695_v15, %v7673_v8  ;;  %v7201_v8 = vld [vmem:[%s8690_s2 + $0x1c8] sm:$0xff]  }
 0x10f   : > { %6276 = vmatprep.subr.bf16.mxu0 %v7157_v44  ;;  %v7202_v9 = vld [vmem:[%s8690_s2 + $0x1d0] sm:$0xff]  }
 0x112   : > { %6277 = vmatpush3.bf16.msra.mxu0 %v7157_v44  ;;  %v7643_v60 = vld [vmem:[#allocation3 + $0x92] sm:$0xff]  ;;  %v7733_v33 = vld [vmem:[#allocation3 + $0xa2] sm:$0xff]  ;;  %v1264_v44 = vpack.c.bf16 %v7566_v25, %v7566_v25  ;;  %v1266_v25 = vpack.c.bf16 %v7598_v41, %v7598_v41 }
 0x113   : > { %6278 = vmatprep.subr.bf16.mxu0 %v7158_v48  ;;  %v7649_v63 = vpack.c.bf16 %v7643_v60, %v7641_v59  ;;  %v7697_v16 = vld [vmem:[#allocation3 + $0x94] sm:$0xff]  ;;  %v1116_v35 = vpack.c.bf16 %v7733_v33, %v7643_v60  ;;  %v7192_v59 = vld [vmem:[%s8690_s2 + $0x180] sm:$0xff]   ;;  %v1414_v60 = vpack.c.bf16 %v7681_v11, %v7671_v7 }
 0x114   : > { %v7701_v17 = vpack.c.bf16 %v7697_v16, %v7695_v15  ;;  %v7200_v7 = vld [vmem:[%s8690_s2 + $0x1c0] sm:$0xff]   ;;  %v1563_v11 = vld [vmem:[#allocation3 + $0xb2] sm:$0xff] }
 0x115   : > { %v7206_v15 = vld [vmem:[%s8690_s2 + $0x1f0] sm:$0xff]  }
 0x116   : > { %6279 = vmatpush3.bf16.msra.mxu0 %v7158_v48  ;;  %v7187_v48 = vld [vmem:[%s8690_s2 + $0x158] sm:$0xff]  }
 0x117   : > { %6280 = vmatprep.subr.bf16.mxu0 %v7159_v49 }
 0x11a   : > { %6281 = vmatpush3.bf16.msra.mxu0 %v7159_v49  ;;  %v7217_v49 = vld [vmem:[%s8692_s4 + $0xc0] sm:$0xff]  }
 0x11b   : > { %6290 = vmatprep.subr.bf16.mxu0 %v7160_v50  ;;  %6530 = vmatprep.subr.bf16.mxu1 %v7217_v49 }
 0x11c   : > { %6531 = vmatpush3.bf16.msra.mxu1 %v7217_v49 }
 0x11d   : > { %6283 = vmatmul.mubr.bf16.vlgmr.msra.gmra.mrb[16].mxu0 %v7625_v54 }
 0x11e   : > { %6286 = vmatprep.mubr.bf16.mxu0 %v7634_v57  ;;  %6291 = vmatpush3.bf16.msra.mxu0 %v7160_v50  ;;  %v7219_v50 = vld [vmem:[%s8692_s4 + $0xc8] sm:$0xff]  }
 0x11f   : > { %6292 = vmatprep.subr.bf16.mxu0 %v7161_v56  ;;  %6532 = vmatprep.subr.bf16.mxu1 %v7219_v50 }
 0x120   : > { %6533 = vmatpush3.bf16.msra.mxu1 %v7219_v50 }
 0x121   : > { %6534 = vmatprep.subr.bf16.mxu1 %v7221_v52 }
 0x122   : > { %6293 = vmatpush3.bf16.msra.mxu0 %v7161_v56  ;;  %v7190_v56 = vld [vmem:[%s8690_s2 + $0x170] sm:$0xff]  }
 0x123   : > { %6294 = vmatprep.subr.bf16.mxu0 %v7162_v58 }
 0x124   : > { %6535 = vmatpush3.bf16.msra.mxu1 %v7221_v52 }
 0x125   : > { %6287 = vmatmul.mubr.bf16.gmra.mrb[20].mxu0 %v7649_v63  ;;  %6536 = vmatprep.subr.bf16.mxu1 %v7223_v55 }
 0x126   : > { %6295 = vmatpush3.bf16.msra.mxu0 %v7162_v58  ;;  %6306 = vmatprep.mubr.bf16.mxu0 %v963_v1  ;;  %v7191_v58 = vld [vmem:[%s8690_s2 + $0x178] sm:$0xff]   ;;  %v7811_v1 = vld [vmem:[#allocation3 + $0xa4] sm:$0xff] }
 0x127   : > { %6296 = vmatprep.subr.bf16.mxu0 %v7163_v0 }
 0x128   : > { %6537 = vmatpush3.bf16.msra.mxu1 %v7223_v55 }
 0x12a   : > { %6297 = vmatpush3.bf16.msra.mxu0 %v7163_v0  ;;  %v7194_v0 = vld [vmem:[%s8690_s2 + $0x190] sm:$0xff]  }
 0x12b   : > { %6298 = vmatprep.subr.bf16.mxu0 %v7164_v2 }
 0x12e   : > { %6299 = vmatpush3.bf16.msra.mxu0 %v7164_v2  ;;  %v1416_v2 = vpack.c.bf16 %v7811_v1, %v7697_v16  ;;  %v7208_v16 = vld [vmem:[%s8690_s2 + $0x200] sm:$0xff]  }
 0x12f   : > { %6300 = vmatprep.subr.bf16.mxu0 %v7165_v3 }
 0x132   : > { %6301 = vmatpush3.bf16.msra.mxu0 %v7165_v3  ;;  %v7195_v3 = vld [vmem:[%s8690_s2 + $0x198] sm:$0xff]  }
 0x133   : > { %6302 = vmatprep.subr.bf16.mxu0 %v7166_v4 }
 0x136   : > { %6303 = vmatpush3.bf16.msra.mxu0 %v7166_v4  ;;  %v7196_v4 = vld [vmem:[%s8690_s2 + $0x1a0] sm:$0xff]  }
 0x137   : > { %6304 = vmatprep.subr.bf16.mxu0 %v7167_v5 }
 0x13a   : > { %6305 = vmatpush3.bf16.msra.mxu0 %v7167_v5  ;;  %v7197_v5 = vld [vmem:[%s8690_s2 + $0x1a8] sm:$0xff]  }
 0x13b   : > { %6314 = vmatprep.subr.bf16.mxu0 %v7168_v6 }
 0x13d   : > { %6307 = vmatmul.mubr.bf16.vlgmr.msra.gmra.mrb[16].mxu0 %v7679_v10 }
 0x13e   : > { %6310 = vmatprep.mubr.bf16.mxu0 %v7688_v13  ;;  %6315 = vmatpush3.bf16.msra.mxu0 %v7168_v6  ;;  %v7198_v6 = vld [vmem:[%s8690_s2 + $0x1b0] sm:$0xff]  }
 0x13f   : > { %6316 = vmatprep.subr.bf16.mxu0 %v7169_v12 }
 0x142   : > { %6317 = vmatpush3.bf16.msra.mxu0 %v7169_v12  ;;  %v1567_v12 = vpack.c.bf16 %v1563_v11, %v7733_v33  ;;  %v7228_v33 = vld [vmem:[%s8692_s4 + $0x70] sm:$0xff]  }
 0x143   : > { %6318 = vmatprep.subr.bf16.mxu0 %v7170_v14 }
 0x145   : > { %6311 = vmatmul.mubr.bf16.gmra.mrb[20].mxu0 %v7701_v17 }
 0x146   : > { %6319 = vmatpush3.bf16.msra.mxu0 %v7170_v14  ;;  %6330 = vmatprep.mubr.bf16.mxu0 %v1113_v19  ;;  %v7203_v14 = vld [vmem:[%s8690_s2 + $0x1d8] sm:$0xff]   ;;  %v7210_v19 = vld [vmem:[%s8690_s2 + $0x210] sm:$0xff]  }
 0x147   : > { %6320 = vmatprep.subr.bf16.mxu0 %v7171_v18 }
 0x14a   : > { %6321 = vmatpush3.bf16.msra.mxu0 %v7171_v18  ;;  %v7209_v18 = vld [vmem:[%s8690_s2 + $0x208] sm:$0xff]  }
 0x14b   : > { %6322 = vmatprep.subr.bf16.mxu0 %v7172_v21 }
 0x14e   : > { %6323 = vmatpush3.bf16.msra.mxu0 %v7172_v21  ;;  %v1713_v21 = vld [vmem:[#allocation3 + $0xb3] sm:$0xff] }
 0x14f   : > { %6324 = vmatprep.subr.bf16.mxu0 %v7173_v22 }
 0x152   : > { %6325 = vmatpush3.bf16.msra.mxu0 %v7173_v22  ;;  %v1717_v22 = vpack.c.bf16 %v1713_v21, %v7598_v41  ;;  %v7213_v41 = vld [vmem:[%s8690_s2 + $0x228] sm:$0xff]  }
 0x153   : > { %6326 = vmatprep.subr.bf16.mxu0 %v7174_v23 }
 0x156   : > { %6327 = vmatpush3.bf16.msra.mxu0 %v7174_v23  ;;  %v7211_v23 = vld [vmem:[%s8690_s2 + $0x218] sm:$0xff]  }
 0x157   : > { %6328 = vmatprep.subr.bf16.mxu0 %v7175_v24 }
 0x15a   : > { %6329 = vmatpush3.bf16.msra.mxu0 %v7175_v24  ;;  %v7216_v24 = vld [vmem:[%s8692_s4 + $0x40] sm:$0xff]  }
 0x15b   : > { %6338 = vmatprep.subr.bf16.mxu0 %v7176_v26 }
 0x15d   : > { %6331 = vmatmul.mubr.bf16.vlgmr.msra.gmra.mrb[16].mxu0 %v1114_v28  ;;  %v7220_v28 = vld [vmem:[%s8692_s4 + $0x50] sm:$0xff]  }
 0x15e   : > { %6334 = vmatprep.mubr.bf16.mxu0 %v1115_v30  ;;  %6339 = vmatpush3.bf16.msra.mxu0 %v7176_v26  ;;  %v7218_v26 = vld [vmem:[%s8692_s4 + $0x48] sm:$0xff]  }
 0x15f   : > { %6340 = vmatprep.subr.bf16.mxu0 %v7177_v29 }
 0x162   : > { %6341 = vmatpush3.bf16.msra.mxu0 %v7177_v29  ;;  %v1863_v29 = vld [vmem:[#allocation3 + $0xb4] sm:$0xff] }
 0x163   : > { %6342 = vmatprep.subr.bf16.mxu0 %v7178_v31  ;;  %v1867_v30 = vpack.c.bf16 %v1863_v29, %v7811_v1 }
 0x165   : > { %6335 = vmatmul.mubr.bf16.gmra.mrb[20].mxu0 %v1116_v35  ;;  %v7225_v35 = vld [vmem:[%s8692_s4 + $0xe0] sm:$0xff]  }
 0x166   : > { %6343 = vmatpush3.bf16.msra.mxu0 %v7178_v31  ;;  %6354 = vmatprep.mubr.bf16.mxu0 %v1263_v37  ;;  %v7222_v31 = vld [vmem:[%s8692_s4 + $0x58] sm:$0xff]   ;;  %v7227_v37 = vld [vmem:[%s8692_s4 + $0xe8] sm:$0xff]  }
 0x167   : > { %6344 = vmatprep.subr.bf16.mxu0 %v7179_v36  ;;  %6538 = vmatprep.subr.bf16.mxu1 %v7225_v35 }
 0x168   : > { %6539 = vmatpush3.bf16.msra.mxu1 %v7225_v35  ;;  %v7244_v35 = vld [vmem:[%s8692_s4 + $0x30] sm:$0xff]  }
 0x169   : > { %6540 = vmatprep.subr.bf16.mxu1 %v7227_v37 }
 0x16a   : > { %6345 = vmatpush3.bf16.msra.mxu0 %v7179_v36  ;;  %v7230_v36 = vld [vmem:[%s8692_s4 + $0x78] sm:$0xff]  }
 0x16b   : > { %6346 = vmatprep.subr.bf16.mxu0 %v7180_v38 }
 0x16c   : > { %6541 = vmatpush3.bf16.msra.mxu1 %v7227_v37  ;;  %v7246_v37 = vld [vmem:[%s8692_s4 + $0x38] sm:$0xff]  }
 0x16e   : > { %6347 = vmatpush3.bf16.msra.mxu0 %v7180_v38  ;;  %v2081_v38 = vld [vmem:[#allocation3 + $0x3] sm:$0xff] }
 0x16f   : > { %6348 = vmatprep.subr.bf16.mxu0 %v7181_v39 }
 0x172   : > { %6349 = vmatpush3.bf16.msra.mxu0 %v7181_v39  ;;  %v2082_v39 = vld [vmem:[#allocation3 + $0x13] sm:$0xff] }
 0x173   : > { %6350 = vmatprep.subr.bf16.mxu0 %v7182_v20 }
 0x176   : > { %6351 = vmatpush3.bf16.msra.mxu0 %v7182_v20  ;;  %v2089_v20 = vpack.c.bf16 %v2082_v39, %v2081_v38  ;;  %v7243_v38 = vld [vmem:[%s8692_s4 + $0x128] sm:$0xff]   ;;  %v7248_v39 = vld [vmem:[%s8692_s4 + $0x80] sm:$0xff]  }
 0x177   : > { %6352 = vmatprep.subr.bf16.mxu0 %v7183_v40 }
 0x17a   : > { %6353 = vmatpush3.bf16.msra.mxu0 %v7183_v40  ;;  %v7232_v40 = vld [vmem:[%s8692_s4] sm:$0xff]  }
 0x17b   : > { %6362 = vmatprep.subr.bf16.mxu0 %v7184_v42 }
 0x17d   : > { %6355 = vmatmul.mubr.bf16.vlgmr.msra.gmra.mrb[16].mxu0 %v1264_v44  ;;  %v7231_v44 = vld [vmem:[%s8692_s4 + $0xf8] sm:$0xff]  }
 0x17e   : > { %6358 = vmatprep.mubr.bf16.mxu0 %v1265_v46  ;;  %6363 = vmatpush3.bf16.msra.mxu0 %v7184_v42  ;;  %v7229_v42 = vld [vmem:[%s8692_s4 + $0xf0] sm:$0xff]   ;;  %v5414_v46 = vld [vmem:[%s8691_s3] ss:$0 sm:$0xff] }
 0x17f   : > { %6364 = vmatprep.subr.bf16.mxu0 %v7185_v45  ;;  %6542 = vmatprep.subr.bf16.mxu1 %v7229_v42 }
 0x180   : > { %6543 = vmatpush3.bf16.msra.mxu1 %v7229_v42 }
 0x181   : > { %6544 = vmatprep.subr.bf16.mxu1 %v7231_v44 }
 0x182   : > { %6365 = vmatpush3.bf16.msra.mxu0 %v7185_v45  ;;  %v7932_v45 = vld [vmem:[%s8692_s4 + $0x100] sm:$0xff]  }
 0x183   : > { %6366 = vmatprep.subr.bf16.mxu0 %v7186_v47 }
 0x184   : > { %6545 = vmatpush3.bf16.msra.mxu1 %v7231_v44 }
 0x185   : > { %6359 = vmatmul.mubr.bf16.gmra.mrb[20].mxu0 %v1266_v25  ;;  %6554 = vmatprep.subr.bf16.mxu1 %v7932_v45 }
 0x186   : > { %6367 = vmatpush3.bf16.msra.mxu0 %v7186_v47  ;;  %6378 = vmatprep.mubr.bf16.mxu0 %v1413_v32 }
 0x187   : > { %6368 = vmatprep.subr.bf16.mxu0 %v7187_v48 }
 0x18a   : > { %6369 = vmatpush3.bf16.msra.mxu0 %v7187_v48 }
 0x18b   : > { %6370 = vmatprep.subr.bf16.mxu0 %v7188_v51 }
 0x18e   : > { %6371 = vmatpush3.bf16.msra.mxu0 %v7188_v51 }
 0x18f   : > { %6372 = vmatprep.subr.bf16.mxu0 %v7189_v53 }
 0x192   : > { %6373 = vmatpush3.bf16.msra.mxu0 %v7189_v53  ;;  %v2083_v53 = vld [vmem:[#allocation3 + $0x23] sm:$0xff] }
 0x193   : > { %6374 = vmatprep.subr.bf16.mxu0 %v7190_v56 }
 0x196   : > { %6375 = vmatpush3.bf16.msra.mxu0 %v7190_v56 }
 0x197   : > { %6376 = vmatprep.subr.bf16.mxu0 %v7191_v58 }
 0x19a   : > { %6377 = vmatpush3.bf16.msra.mxu0 %v7191_v58 }
 0x19b   : > { %6386 = vmatprep.subr.bf16.mxu0 %v7192_v59 }
 0x19d   : > { %6379 = vmatmul.mubr.bf16.vlgmr.msra.gmra.mrb[16].mxu0 %v1414_v60 }
 0x19e   : > { %6382 = vmatprep.mubr.bf16.mxu0 %v1415_v62  ;;  %6387 = vmatpush3.bf16.msra.mxu0 %v7192_v59 }
 0x19f   : > { %6388 = vmatprep.subr.bf16.mxu0 %v7193_v61 }
 0x1a2   : > { %6389 = vmatpush3.bf16.msra.mxu0 %v7193_v61  ;;  %v7234_v61 = vld [vmem:[%s8692_s4 + $0x8] sm:$0xff]  }
 0x1a3   : > { %6390 = vmatprep.subr.bf16.mxu0 %v7194_v0 }
 0x1a5   : > { %6383 = vmatmul.mubr.bf16.gmra.mrb[20].mxu0 %v1416_v2 }
 0x1a6   : > { %6391 = vmatpush3.bf16.msra.mxu0 %v7194_v0  ;;  %6402 = vmatprep.mubr.bf16.mxu0 %v7625_v54  ;;  %v7199_v54 = vld [vmem:[%s8690_s2 + $0x1b8] sm:$0xff]  }
 0x1a7   : > { %6392 = vmatprep.subr.bf16.mxu0 %v7195_v3 }
 0x1aa   : > { %6393 = vmatpush3.bf16.msra.mxu0 %v7195_v3 }
 0x1ab   : > { %6394 = vmatprep.subr.bf16.mxu0 %v7196_v4 }
 0x1ae   : > { %6395 = vmatpush3.bf16.msra.mxu0 %v7196_v4 }
 0x1af   : > { %6396 = vmatprep.subr.bf16.mxu0 %v7197_v5 }
 0x1b2   : > { %6397 = vmatpush3.bf16.msra.mxu0 %v7197_v5  ;;  %v7236_v5 = vld [vmem:[%s8692_s4 + $0x10] sm:$0xff]  }
 0x1b3   : > { %6398 = vmatprep.subr.bf16.mxu0 %v7198_v6 }
 0x1b6   : > { %6399 = vmatpush3.bf16.msra.mxu0 %v7198_v6  ;;  %v2053_v6 = vld [vmem:[#allocation3] sm:$0xff] }
 0x1b7   : > { %6400 = vmatprep.subr.bf16.mxu0 %v7199_v54 }
 0x1ba   : > { %6401 = vmatpush3.bf16.msra.mxu0 %v7199_v54  ;;  %v2054_v54 = vld [vmem:[#allocation3 + $0x10] sm:$0xff] }
 0x1bb   : > { %6410 = vmatprep.subr.bf16.mxu0 %v7200_v7 }
 0x1bd   : > { %6403 = vmatmul.mubr.bf16.vlgmr.msra.gmra.mrb[16].mxu0 %v7634_v57  ;;  %v7204_v57 = vld [vmem:[%s8690_s2 + $0x1e0] sm:$0xff]  }
 0x1be   : > { %6406 = vmatprep.mubr.bf16.mxu0 %v7649_v63  ;;  %6411 = vmatpush3.bf16.msra.mxu0 %v7200_v7  ;;  %v7205_v63 = vld [vmem:[%s8690_s2 + $0x1e8] sm:$0xff]  }
 0x1bf   : > { %6412 = vmatprep.subr.bf16.mxu0 %v7201_v8 }
 0x1c2   : > { %6413 = vmatpush3.bf16.msra.mxu0 %v7201_v8 }
 0x1c3   : > { %6414 = vmatprep.subr.bf16.mxu0 %v7202_v9 }
 0x1c5   : > { %6407 = vmatmul.mubr.bf16.gmra.mrb[20].mxu0 %v1567_v12 }
 0x1c6   : > { %6415 = vmatpush3.bf16.msra.mxu0 %v7202_v9  ;;  %6426 = vmatprep.mubr.bf16.mxu0 %v7572_v27  ;;  %v7207_v27 = vld [vmem:[%s8690_s2 + $0x1f8] sm:$0xff]  }
 0x1c7   : > { %6416 = vmatprep.subr.bf16.mxu0 %v7203_v14 }
 0x1ca   : > { %6417 = vmatpush3.bf16.msra.mxu0 %v7203_v14 }
 0x1cb   : > { %6418 = vmatprep.subr.bf16.mxu0 %v7204_v57 }
 0x1ce   : > { %6419 = vmatpush3.bf16.msra.mxu0 %v7204_v57  ;;  %v2061_v57 = vpack.c.bf16 %v2054_v54, %v2053_v6  ;;  %v7255_v6 = vld [vmem:[%s8692_s4 + $0x158] sm:$0xff]  }
 0x1cf   : > { %6420 = vmatprep.subr.bf16.mxu0 %v7205_v63 }
 0x1d2   : > { %6421 = vmatpush3.bf16.msra.mxu0 %v7205_v63 }
 0x1d3   : > { %6422 = vmatprep.subr.bf16.mxu0 %v7206_v15 }
 0x1d6   : > { %6423 = vmatpush3.bf16.msra.mxu0 %v7206_v15 }
 0x1d7   : > { %6424 = vmatprep.subr.bf16.mxu0 %v7207_v27 }
 0x1da   : > { %6425 = vmatpush3.bf16.msra.mxu0 %v7207_v27 }
 0x1db   : > { %6434 = vmatprep.subr.bf16.mxu0 %v7208_v16 }
 0x1dd   : > { %6427 = vmatmul.mubr.bf16.vlgmr.msra.gmra.mrb[16].mxu0 %v7587_v34  ;;  %v7212_v34 = vld [vmem:[%s8690_s2 + $0x220] sm:$0xff]  }
 0x1de   : > { %6430 = vmatprep.mubr.bf16.mxu0 %v7604_v43  ;;  %6435 = vmatpush3.bf16.msra.mxu0 %v7208_v16  ;;  %v7214_v43 = vld [vmem:[%s8690_s2 + $0x230] sm:$0xff]   ;;  %v7238_v16 = vld [vmem:[%s8692_s4 + $0x18] sm:$0xff]  }
 0x1df   : > { %6436 = vmatprep.subr.bf16.mxu0 %v7209_v18 }
 0x1e2   : > { %6437 = vmatpush3.bf16.msra.mxu0 %v7209_v18 }
 0x1e3   : > { %6438 = vmatprep.subr.bf16.mxu0 %v7210_v19 }
 0x1e5   : > { %6431 = vmatmul.mubr.bf16.gmra.mrb[20].mxu0 %v1717_v22 }
 0x1e6   : > { %6439 = vmatpush3.bf16.msra.mxu0 %v7210_v19  ;;  %6450 = vmatprep.mubr.bf16.mxu0 %v7679_v10  ;;  %v7215_v10 = vld [vmem:[%s8690_s2 + $0x238] sm:$0xff]  }
 0x1e7   : > { %6440 = vmatprep.subr.bf16.mxu0 %v7211_v23 }
 0x1ea   : > { %6441 = vmatpush3.bf16.msra.mxu0 %v7211_v23 }
 0x1eb   : > { %6442 = vmatprep.subr.bf16.mxu0 %v7212_v34 }
 0x1ee   : > { %6443 = vmatpush3.bf16.msra.mxu0 %v7212_v34  ;;  %v7235_v34 = vld [vmem:[%s8692_s4 + $0x108] sm:$0xff]  }
 0x1ef   : > { %6444 = vmatprep.subr.bf16.mxu0 %v7213_v41 }
 0x1f2   : > { %6445 = vmatpush3.bf16.msra.mxu0 %v7213_v41 }
 0x1f3   : > { %6446 = vmatprep.subr.bf16.mxu0 %v7214_v43 }
 0x1f6   : > { %6447 = vmatpush3.bf16.msra.mxu0 %v7214_v43  ;;  %v7240_v43 = vld [vmem:[%s8692_s4 + $0x20] sm:$0xff]  }
 0x1f7   : > { %6448 = vmatprep.subr.bf16.mxu0 %v7215_v10 }
 0x1fa   : > { %6449 = vmatpush3.bf16.msra.mxu0 %v7215_v10  ;;  %v7237_v10 = vld [vmem:[%s8692_s4 + $0x110] sm:$0xff]  }
 0x1fb   : > { %6458 = vmatprep.subr.bf16.mxu0 %v7216_v24 }
 0x1fd   : > { %6451 = vmatmul.mubr.bf16.vlgmr.msra.gmra.mrb[16].mxu0 %v7688_v13  ;;  %v7224_v13 = vld [vmem:[%s8692_s4 + $0x60] sm:$0xff]  }
 0x1fe   : > { %6454 = vmatprep.mubr.bf16.mxu0 %v7701_v17  ;;  %6459 = vmatpush3.bf16.msra.mxu0 %v7216_v24  ;;  %v7226_v17 = vld [vmem:[%s8692_s4 + $0x68] sm:$0xff]  }
 0x1ff   : > { %6460 = vmatprep.subr.bf16.mxu0 %v7218_v26 }
 0x202   : > { %6461 = vmatpush3.bf16.msra.mxu0 %v7218_v26  ;;  %v7242_v26 = vld [vmem:[%s8692_s4 + $0x28] sm:$0xff]  }
 0x203   : > { %6462 = vmatprep.subr.bf16.mxu0 %v7220_v28 }
 0x205   : > { %6455 = vmatmul.mubr.bf16.gmra.mrb[20].mxu0 %v1867_v30 }
 0x206   : > { %6463 = vmatpush3.bf16.msra.mxu0 %v7220_v28  ;;  %6474 = vmatprep.mubr.bf16.mxu0 %v2089_v20  ;;  %v2055_v20 = vld [vmem:[#allocation3 + $0x20] sm:$0xff] }
 0x207   : > { %6464 = vmatprep.subr.bf16.mxu0 %v7222_v31 }
 0x20a   : > { %6465 = vmatpush3.bf16.msra.mxu0 %v7222_v31 }
 0x20b   : > { %6466 = vmatprep.subr.bf16.mxu0 %v7224_v13 }
 0x20e   : > { %6467 = vmatpush3.bf16.msra.mxu0 %v7224_v13 }
 0x20f   : > { %6468 = vmatprep.subr.bf16.mxu0 %v7226_v17 }
 0x212   : > { %6469 = vmatpush3.bf16.msra.mxu0 %v7226_v17  ;;  %v7239_v17 = vld [vmem:[%s8692_s4 + $0x118] sm:$0xff]  }
 0x213   : > { %6470 = vmatprep.subr.bf16.mxu0 %v7228_v33 }
 0x216   : > { %6471 = vmatpush3.bf16.msra.mxu0 %v7228_v33 }
 0x217   : > { %6472 = vmatprep.subr.bf16.mxu0 %v7230_v36 }
 0x21a   : > { %6473 = vmatpush3.bf16.msra.mxu0 %v7230_v36  ;;  %v7241_v36 = vld [vmem:[%s8692_s4 + $0x120] sm:$0xff]  }
 0x21b   : > { %6482 = vmatprep.subr.bf16.mxu0 %v7232_v40 }
 0x2d0   : > { %v6452_v47 = vpop.f32.mrb[16].mxu0 }
 0x2d1   : > { %v7938_v25 = vadd.f32 %v6452_v47, %v5414_v46  ;;  %v1967_v48 = vpop.f32.mrb[17].mxu0  ;;  %v2336_v47 = vld [vmem:[#allocation3 + $0x6] sm:$0xff] }
 0x2d2   : > { %v7940_v32 = vadd.f32 %v5414_v46, %v1967_v48  ;;  %v6453_v49 = vpop.f32.mrb[18].mxu0  ;;  %v2337_v48 = vld [vmem:[#allocation3 + $0x16] sm:$0xff] }
 0x2d3   : > { %v7943_v50 = vmax.f32 %v7938_v25, 0.0  ;;  %v7945_v51 = vadd.f32 %v6453_v49, %v5414_v46  ;;  %v1970_v52 = vpop.f32.mrb[19].mxu0  ;;  %v7252_v49 = vld [vmem:[%s8692_s4 + $0x90] sm:$0xff]  }
 0x2d4   : > { %v7948_v55 = vmax.f32 %v7940_v32, 0.0  ;;  %v7950_v56 = vadd.f32 %v5414_v46, %v1970_v52  ;;  %v7249_v52 = vld [vmem:[%s8692_s4 + $0x140] sm:$0xff]  }
 0x2d5   : > { %2047 = vst [vmem:[#allocation3 + $0x53] sm:$0xff] %v7943_v50  ;;  %v7954_v58 = vmax.f32 %v7945_v51, 0.0 }
 0x2d6   : > { %2045 = vst [vmem:[#allocation3 + $0x33] sm:$0xff] %v7948_v55  ;;  %v7958_v59 = vmax.f32 %v7950_v56, 0.0  ;;  %v2090_v60 = vpack.c.bf16 %v7948_v55, %v2083_v53  ;;  %v2344_v53 = vpack.c.bf16 %v2337_v48, %v2336_v47  ;;  %v7273_v47 = vld [vmem:[%s8692_s4 + $0x1c8] sm:$0xff]  }
 0x2d7   : > { %2048 = vst [vmem:[#allocation3 + $0x63] sm:$0xff] %v7954_v58 }
 0x2d8   : > { %2046 = vst [vmem:[#allocation3 + $0x43] sm:$0xff] %v7958_v59  ;;  %v6456_v62 = vpop.f32.mrb[20].mxu0  ;;  %6475 = vmatmul.mubr.bf16.vlgmr.msra.gmra.mrb[24].mxu0 %v2090_v60  ;;  %v2091_v0 = vpack.c.bf16 %v7943_v50, %v7958_v59  ;;  %v2644_v33 = vpack.c.bf16 %v7958_v59, %v7948_v55  ;;  %v7254_v59 = vld [vmem:[%s8692_s4 + $0x98] sm:$0xff]   ;;  %v2645_v60 = vpack.c.bf16 %v7954_v58, %v7943_v50  ;;  %v7253_v50 = vld [vmem:[%s8692_s4 + $0x150] sm:$0xff]  }
 0x2d9   : > { %v7968_v1 = vadd.f32 %v6456_v62, %v5414_v46  ;;  %v1983_v2 = vpop.f32.mrb[21].mxu0  ;;  %6483 = vmatpush3.bf16.msra.mxu0 %v7232_v40  ;;  %v7245_v40 = vld [vmem:[%s8692_s4 + $0x130] sm:$0xff]  }
 0x2da   : > { %v7970_v3 = vadd.f32 %v5414_v46, %v1983_v2  ;;  %v6457_v4 = vpop.f32.mrb[22].mxu0  ;;  %6478 = vmatprep.mubr.bf16.mxu0 %v2091_v0  ;;  %6484 = vmatprep.subr.bf16.mxu0 %v7234_v61  ;;  %v7256_v0 = vld [vmem:[%s8692_s4 + $0xa0] sm:$0xff]   ;;  %v7258_v2 = vld [vmem:[%s8692_s4 + $0xa8] sm:$0xff]  }
 0x2db   : > { %v7976_v7 = vmax.f32 %v7968_v1, 0.0  ;;  %v7978_v8 = vadd.f32 %v6457_v4, %v5414_v46  ;;  %v1986_v9 = vpop.f32.mrb[23].mxu0 }
 0x2dc   : > { %v7981_v11 = vmax.f32 %v7970_v3, 0.0  ;;  %v7983_v12 = vadd.f32 %v5414_v46, %v1986_v9  ;;  %v2488_v22 = vld [vmem:[#allocation3 + $0x50] sm:$0xff]  ;;  %v7247_v46 = vld [vmem:[%s8692_s4 + $0x138] sm:$0xff]  }
 0x2dd   : > { %2051 = vst [vmem:[#allocation3 + $0x93] sm:$0xff] %v7976_v7  ;;  %v7987_v14 = vmax.f32 %v7978_v8, 0.0  ;;  %6485 = vmatpush3.bf16.msra.mxu0 %v7234_v61  ;;  %v2486_v18 = vld [vmem:[#allocation3 + $0x30] sm:$0xff]  ;;  %v7251_v61 = vld [vmem:[%s8692_s4 + $0x148] sm:$0xff]  }
 0x2de   : > { %2049 = vst [vmem:[#allocation3 + $0x73] sm:$0xff] %v7981_v11  ;;  %v7991_v63 = vmax.f32 %v7983_v12, 0.0  ;;  %v7993_v15 = vld [vmem:[#allocation3 + $0x60] sm:$0xff]  ;;  %6486 = vmatprep.subr.bf16.mxu0 %v7236_v5  ;;  %v7997_v27 = vpack.c.bf16 %v7981_v11, %v7954_v58  ;;  %v2062_v42 = vpack.c.bf16 %v2486_v18, %v2055_v20  ;;  %v7260_v9 = vld [vmem:[%s8692_s4 + $0xb0] sm:$0xff]   ;;  %v7269_v20 = vld [vmem:[%s8692_s4 + $0x1a8] sm:$0xff]  }
 0x2df   : > { %2052 = vst [vmem:[#allocation3 + $0xa3] sm:$0xff] %v7987_v14  ;;  %v2487_v19 = vld [vmem:[#allocation3 + $0x40] sm:$0xff]  ;;  %v2495_v23 = vpack.c.bf16 %v7993_v15, %v2488_v22  ;;  %v2647_v4 = vpack.c.bf16 %v7987_v14, %v7976_v7 }
 0x2e0   : > { %2050 = vst [vmem:[#allocation3 + $0x83] sm:$0xff] %v7991_v63  ;;  %v2494_v21 = vpack.c.bf16 %v2487_v19, %v2486_v18  ;;  %6479 = vmatmul.mubr.bf16.gmra.mrb[28].mxu0 %v7997_v27  ;;  %v3096_v41 = vpack.c.bf16 %v7976_v7, %v7991_v63  ;;  %v2063_v44 = vpack.c.bf16 %v2488_v22, %v2487_v19  ;;  %v2787_v58 = vld [vmem:[#allocation3 + $0x46] sm:$0xff]  ;;  %v7261_v18 = vld [vmem:[%s8692_s4 + $0x170] sm:$0xff]  }
 0x2e1   : > { %6487 = vmatpush3.bf16.msra.mxu0 %v7236_v5  ;;  %6498 = vmatprep.mubr.bf16.mxu0 %v2061_v57  ;;  %v2646_v62 = vpack.c.bf16 %v7991_v63, %v7981_v11  ;;  %v2786_v5 = vld [vmem:[#allocation3 + $0x36] sm:$0xff]  ;;  %v7257_v11 = vld [vmem:[%s8692_s4 + $0x160] sm:$0xff]   ;;  %v7285_v63 = vld [vmem:[%s8692_s4 + $0x228] sm:$0xff]  }
 0x2e2   : > { %6546 = vmatprep.mubr.bf16.mxu1 %v2494_v21  ;;  %6488 = vmatprep.subr.bf16.mxu0 %v7238_v16  ;;  %v2794_v54 = vpack.c.bf16 %v2787_v58, %v2786_v5  ;;  %v7262_v57 = vld [vmem:[%s8692_s4 + $0xb8] sm:$0xff]   ;;  %v7284_v7 = vld [vmem:[%s8692_s4 + $0x220] sm:$0xff]  }
 0x2e3   : > { %6547 = vmatmul.mubr.bf16.vlgmr.msra.gmra.mrb[0].mxu1 %v2495_v23  ;;  %v2341_v21 = vld [vmem:[#allocation3 + $0x56] sm:$0xff] }
 0x2e4   : > { %6555 = vmatpush3.bf16.msra.mxu1 %v7932_v45  ;;  %v8026_v31 = vld [vmem:[#allocation3 + $0x90] sm:$0xff]  ;;  %v7250_v45 = vld [vmem:[%s8692_s4 + $0x88] sm:$0xff]   ;;  %v2346_v22 = vpack.c.bf16 %v2341_v21, %v2787_v58  ;;  %v7263_v23 = vld [vmem:[%s8692_s4 + $0x178] sm:$0xff]  }
 0x2e5   : > { %6556 = vmatprep.subr.bf16.mxu1 %v7235_v34  ;;  %6489 = vmatpush3.bf16.msra.mxu0 %v7238_v16  ;;  %v2490_v28 = vld [vmem:[#allocation3 + $0x70] sm:$0xff]  ;;  %v2338_v16 = vld [vmem:[#allocation3 + $0x26] sm:$0xff] }
 0x2e6   : > { %v8018_v24 = vld [vmem:[#allocation3 + $0xa0] sm:$0xff]  ;;  %6490 = vmatprep.subr.bf16.mxu0 %v7240_v43  ;;  %v8066_v55 = vpack.c.bf16 %v2490_v28, %v7993_v15  ;;  %v7259_v15 = vld [vmem:[%s8692_s4 + $0x168] sm:$0xff]   ;;  %v2345_v19 = vpack.c.bf16 %v2786_v5, %v2338_v16  ;;  %v3094_v58 = vld [vmem:[#allocation3 + $0xd3] sm:$0xff] }
 0x2e7   : > { %v8023_v29 = vld [vmem:[#allocation3 + $0x80] sm:$0xff]  ;;  %v2497_v13 = vpack.c.bf16 %v8018_v24, %v8026_v31 }
 0x2e8   : > { %6557 = vmatpush3.bf16.msra.mxu1 %v7235_v34  ;;  %v2496_v30 = vpack.c.bf16 %v8023_v29, %v2490_v28  ;;  %v2790_v34 = vld [vmem:[#allocation3 + $0x76] sm:$0xff]  ;;  %v7288_v5 = vld [vmem:[%s8694_s6] sm:$0xff]  }
 0x2e9   : > { %6558 = vmatprep.subr.bf16.mxu1 %v7237_v10  ;;  %6491 = vmatpush3.bf16.msra.mxu0 %v7240_v43  ;;  %v7264_v43 = vld [vmem:[%s8692_s4 + $0x180] sm:$0xff]  }
 0x2ea   : > { %6550 = vmatprep.mubr.bf16.mxu1 %v2496_v30  ;;  %6492 = vmatprep.subr.bf16.mxu0 %v7242_v26 }
 0x2eb   : > { %6551 = vmatmul.mubr.bf16.gmra.mrb[4].mxu1 %v2497_v13  ;;  %v7265_v13 = vld [vmem:[%s8692_s4 + $0x188] sm:$0xff]  }
 0x2ec   : > { %6559 = vmatpush3.bf16.msra.mxu1 %v7237_v10  ;;  %6570 = vmatprep.mubr.bf16.mxu1 %v2644_v33  ;;  %v2789_v10 = vld [vmem:[#allocation3 + $0x66] sm:$0xff]  ;;  %v7266_v33 = vld [vmem:[%s8692_s4 + $0x190] sm:$0xff]  }
 0x2ed   : > { %6560 = vmatprep.subr.bf16.mxu1 %v7239_v17  ;;  %6493 = vmatpush3.bf16.msra.mxu0 %v7242_v26  ;;  %v8114_v26 = vld [vmem:[#allocation3 + $0x86] sm:$0xff]  ;;  %v8116_v28 = vpack.c.bf16 %v2790_v34, %v2789_v10  ;;  %v2795_v30 = vpack.c.bf16 %v2789_v10, %v2341_v21  ;;  %v3244_v21 = vld [vmem:[#allocation3 + $0xd6] sm:$0xff] }
 0x2ee   : > { %6494 = vmatprep.subr.bf16.mxu0 %v7244_v35  ;;  %v7296_v10 = vld [vmem:[%s8696_s8 + $0x40] sm:$0xff]  }
 0x2f0   : > { %6561 = vmatpush3.bf16.msra.mxu1 %v7239_v17  ;;  %v2796_v17 = vpack.c.bf16 %v8114_v26, %v2790_v34  ;;  %v7294_v34 = vld [vmem:[%s8694_s6 + $0x30] sm:$0xff]  }
 0x2f1   : > { %6562 = vmatprep.subr.bf16.mxu1 %v7241_v36  ;;  %6495 = vmatpush3.bf16.msra.mxu0 %v7244_v35  ;;  %v8126_v35 = vld [vmem:[#allocation3 + $0xa6] sm:$0xff] }
 0x2f2   : > { %6496 = vmatprep.subr.bf16.mxu0 %v7246_v37 }
 0x2f4   : > { %6563 = vmatpush3.bf16.msra.mxu1 %v7241_v36  ;;  %v8128_v36 = vld [vmem:[#allocation3 + $0x96] sm:$0xff] }
 0x2f5   : > { %6564 = vmatprep.subr.bf16.mxu1 %v7243_v38  ;;  %6497 = vmatpush3.bf16.msra.mxu0 %v7246_v37  ;;  %v2797_v37 = vpack.c.bf16 %v8126_v35, %v8128_v36 }
 0x2f6   : > { %6506 = vmatprep.subr.bf16.mxu0 %v7248_v39 }
 0x2f8   : > { %6565 = vmatpush3.bf16.msra.mxu1 %v7243_v38  ;;  %6499 = vmatmul.mubr.bf16.vlgmr.msra.gmra.mrb[24].mxu0 %v2062_v42  ;;  %v7267_v38 = vld [vmem:[%s8692_s4 + $0x198] sm:$0xff]  }
 0x2f9   : > { %6566 = vmatprep.subr.bf16.mxu1 %v7245_v40  ;;  %6502 = vmatprep.mubr.bf16.mxu0 %v2063_v44  ;;  %v7271_v42 = vld [vmem:[%s8692_s4 + $0x1b8] sm:$0xff]   ;;  %v7272_v44 = vld [vmem:[%s8692_s4 + $0x1c0] sm:$0xff]  }
 0x2fa   : > { %6507 = vmatpush3.bf16.msra.mxu0 %v7248_v39  ;;  %v7268_v39 = vld [vmem:[%s8692_s4 + $0x1a0] sm:$0xff]  }
 0x2fb   : > { %6508 = vmatprep.subr.bf16.mxu0 %v7250_v45 }
 0x2fc   : > { %6567 = vmatpush3.bf16.msra.mxu1 %v7245_v40  ;;  %v7270_v40 = vld [vmem:[%s8692_s4 + $0x1b0] sm:$0xff]  }
 0x2fd   : > { %6568 = vmatprep.subr.bf16.mxu1 %v7247_v46 }
 0x2fe   : > { %6509 = vmatpush3.bf16.msra.mxu0 %v7250_v45  ;;  %v2942_v45 = vld [vmem:[#allocation3 + $0xb0] sm:$0xff] }
 0x2ff   : > { %6510 = vmatprep.subr.bf16.mxu0 %v7252_v49  ;;  %v2947_v48 = vpack.c.bf16 %v2942_v45, %v8018_v24  ;;  %v7276_v24 = vld [vmem:[%s8692_s4 + $0x1e0] sm:$0xff]  }
 0x300   : > { %6569 = vmatpush3.bf16.msra.mxu1 %v7247_v46  ;;  %6503 = vmatmul.mubr.bf16.gmra.mrb[28].mxu0 %v8066_v55  ;;  %v2946_v46 = vpack.c.bf16 %v8026_v31, %v8023_v29  ;;  %v7275_v29 = vld [vmem:[%s8692_s4 + $0x1d8] sm:$0xff]   ;;  %v7277_v31 = vld [vmem:[%s8692_s4 + $0x1e8] sm:$0xff]  }
 0x301   : > { %6578 = vmatprep.subr.bf16.mxu1 %v7249_v52  ;;  %6522 = vmatprep.mubr.bf16.mxu0 %v2344_v53  ;;  %v7274_v53 = vld [vmem:[%s8692_s4 + $0x1d0] sm:$0xff]  }
 0x302   : > { %6511 = vmatpush3.bf16.msra.mxu0 %v7252_v49  ;;  %v2943_v49 = vld [vmem:[#allocation3 + $0xc0] sm:$0xff] }
 0x303   : > { %6571 = vmatmul.mubr.bf16.vlgmr.msra.gmra.mrb[0].mxu1 %v2645_v60  ;;  %6512 = vmatprep.subr.bf16.mxu0 %v7254_v59  ;;  %v7280_v60 = vld [vmem:[%s8692_s4 + $0x200] sm:$0xff]  }
 0x304   : > { %6574 = vmatprep.mubr.bf16.mxu1 %v2646_v62  ;;  %6579 = vmatpush3.bf16.msra.mxu1 %v7249_v52  ;;  %v2944_v52 = vld [vmem:[#allocation3 + $0xd0] sm:$0xff]  ;;  %v7281_v62 = vld [vmem:[%s8692_s4 + $0x208] sm:$0xff]  }
 0x305   : > { %6580 = vmatprep.subr.bf16.mxu1 %v7251_v61 }
 0x306   : > { %6513 = vmatpush3.bf16.msra.mxu0 %v7254_v59  ;;  %v7278_v59 = vld [vmem:[%s8692_s4 + $0x1f0] sm:$0xff]  }
 0x307   : > { %6514 = vmatprep.subr.bf16.mxu0 %v7256_v0 }
 0x308   : > { %6581 = vmatpush3.bf16.msra.mxu1 %v7251_v61  ;;  %v3092_v61 = vld [vmem:[#allocation3 + $0xb3] sm:$0xff] }
 0x309   : > { %6582 = vmatprep.subr.bf16.mxu1 %v7253_v50 }
 0x30a   : > { %6515 = vmatpush3.bf16.msra.mxu0 %v7256_v0  ;;  %v3097_v0 = vpack.c.bf16 %v3092_v61, %v7987_v14  ;;  %v7283_v14 = vld [vmem:[%s8692_s4 + $0x218] sm:$0xff]  }
 0x30b   : > { %6575 = vmatmul.mubr.bf16.gmra.mrb[4].mxu1 %v2647_v4  ;;  %6516 = vmatprep.subr.bf16.mxu0 %v7258_v2 }
 0x30c   : > { %6583 = vmatpush3.bf16.msra.mxu1 %v7253_v50  ;;  %6594 = vmatprep.mubr.bf16.mxu1 %v2794_v54  ;;  %v3093_v50 = vld [vmem:[#allocation3 + $0xc3] sm:$0xff]  ;;  %v7287_v54 = vld [vmem:[%s8692_s4 + $0x238] sm:$0xff]  }
 0x30d   : > { %6584 = vmatprep.subr.bf16.mxu1 %v7255_v6  ;;  %v3098_v4 = vpack.c.bf16 %v3094_v58, %v3093_v50 }
 0x30e   : > { %6517 = vmatpush3.bf16.msra.mxu0 %v7258_v2  ;;  %v7282_v2 = vld [vmem:[%s8692_s4 + $0x210] sm:$0xff]  }
 0x30f   : > { %6518 = vmatprep.subr.bf16.mxu0 %v7260_v9 }
 0x310   : > { %6585 = vmatpush3.bf16.msra.mxu1 %v7255_v6  ;;  %v7289_v6 = vld [vmem:[%s8694_s6 + $0x8] sm:$0xff]  }
 0x311   : > { %6586 = vmatprep.subr.bf16.mxu1 %v7257_v11 }
 0x312   : > { %6519 = vmatpush3.bf16.msra.mxu0 %v7260_v9  ;;  %v7290_v9 = vld [vmem:[%s8694_s6 + $0x10] sm:$0xff]  }
 0x313   : > { %6520 = vmatprep.subr.bf16.mxu0 %v7262_v57 }
 0x314   : > { %6587 = vmatpush3.bf16.msra.mxu1 %v7257_v11  ;;  %v3242_v11 = vld [vmem:[#allocation3 + $0xb6] sm:$0xff] }
 0x315   : > { %6588 = vmatprep.subr.bf16.mxu1 %v7259_v15  ;;  %v3247_v16 = vpack.c.bf16 %v3242_v11, %v8126_v35  ;;  %v7299_v35 = vld [vmem:[%s8696_s8 + $0x58] sm:$0xff]  }
 0x316   : > { %6521 = vmatpush3.bf16.msra.mxu0 %v7262_v57  ;;  %v7291_v57 = vld [vmem:[%s8694_s6 + $0x18] sm:$0xff]  }
 0x317   : > { %6674 = vmatprep.subr.bf16.mxu0 %v7288_v5 }
 0x318   : > { %6589 = vmatpush3.bf16.msra.mxu1 %v7259_v15  ;;  %v3246_v15 = vpack.c.bf16 %v8128_v36, %v8114_v26  ;;  %v7297_v26 = vld [vmem:[%s8696_s8 + $0x48] sm:$0xff]  }
 0x319   : > { %6590 = vmatprep.subr.bf16.mxu1 %v7261_v18  ;;  %6523 = vmatmul.mubr.bf16.vlgmr.msra.gmra.mrb[24].mxu0 %v2345_v19  ;;  %v3243_v19 = vld [vmem:[#allocation3 + $0xc6] sm:$0xff] }
 0x31a   : > { %6526 = vmatprep.mubr.bf16.mxu0 %v2346_v22  ;;  %6675 = vmatpush3.bf16.msra.mxu0 %v7288_v5  ;;  %v3248_v22 = vpack.c.bf16 %v3244_v21, %v3243_v19  ;;  %v7301_v19 = vld [vmem:[%s8696_s8 + $0x68] sm:$0xff]   ;;  %v7302_v21 = vld [vmem:[%s8696_s8 + $0x70] sm:$0xff]  }
 0x31b   : > { %6676 = vmatprep.subr.bf16.mxu0 %v7289_v6 }
 0x31c   : > { %6591 = vmatpush3.bf16.msra.mxu1 %v7261_v18  ;;  %v7292_v18 = vld [vmem:[%s8694_s6 + $0x20] sm:$0xff]  }
 0x31d   : > { %6592 = vmatprep.subr.bf16.mxu1 %v7263_v23 }
 0x31e   : > { %6677 = vmatpush3.bf16.msra.mxu0 %v7289_v6 }
 0x31f   : > { %6678 = vmatprep.subr.bf16.mxu0 %v7290_v9 }
 0x320   : > { %6593 = vmatpush3.bf16.msra.mxu1 %v7263_v23  ;;  %v7293_v23 = vld [vmem:[%s8694_s6 + $0x28] sm:$0xff]  }
 0x321   : > { %6602 = vmatprep.subr.bf16.mxu1 %v7264_v43  ;;  %6527 = vmatmul.mubr.bf16.gmra.mrb[28].mxu0 %v8116_v28 }
 0x322   : > { %6679 = vmatpush3.bf16.msra.mxu0 %v7290_v9 }
 0x323   : > { %6595 = vmatmul.mubr.bf16.vlgmr.msra.gmra.mrb[0].mxu1 %v2795_v30  ;;  %6680 = vmatprep.subr.bf16.mxu0 %v7291_v57 }
 0x324   : > { %6598 = vmatprep.mubr.bf16.mxu1 %v2796_v17  ;;  %6603 = vmatpush3.bf16.msra.mxu1 %v7264_v43  ;;  %v7295_v43 = vld [vmem:[%s8694_s6 + $0x38] sm:$0xff]  }
 0x325   : > { %6604 = vmatprep.subr.bf16.mxu1 %v7265_v13 }
 0x326   : > { %6681 = vmatpush3.bf16.msra.mxu0 %v7291_v57 }
 0x327   : > { %6682 = vmatprep.subr.bf16.mxu0 %v7292_v18 }
 0x328   : > { %6605 = vmatpush3.bf16.msra.mxu1 %v7265_v13 }
 0x329   : > { %6606 = vmatprep.subr.bf16.mxu1 %v7266_v33 }
 0x32a   : > { %6683 = vmatpush3.bf16.msra.mxu0 %v7292_v18  ;;  %v7300_v18 = vld [vmem:[%s8696_s8 + $0x60] sm:$0xff]  }
 0x32b   : > { %6599 = vmatmul.mubr.bf16.gmra.mrb[4].mxu1 %v2797_v37  ;;  %6684 = vmatprep.subr.bf16.mxu0 %v7293_v23 }
 0x32c   : > { %6607 = vmatpush3.bf16.msra.mxu1 %v7266_v33  ;;  %6618 = vmatprep.mubr.bf16.mxu1 %v8066_v55  ;;  %v2948_v55 = vpack.c.bf16 %v2944_v52, %v2943_v49  ;;  %v7298_v33 = vld [vmem:[%s8696_s8 + $0x50] sm:$0xff]  }
 0x32d   : > { %6608 = vmatprep.subr.bf16.mxu1 %v7267_v38 }
 0x32e   : > { %6685 = vmatpush3.bf16.msra.mxu0 %v7293_v23  ;;  %v7304_v23 = vld [vmem:[%s8696_s8] sm:$0xff]  }
 0x32f   : > { %6686 = vmatprep.subr.bf16.mxu0 %v7294_v34 }
 0x330   : > { %6609 = vmatpush3.bf16.msra.mxu1 %v7267_v38 }
 0x331   : > { %6610 = vmatprep.subr.bf16.mxu1 %v7268_v39 }
 0x332   : > { %6687 = vmatpush3.bf16.msra.mxu0 %v7294_v34  ;;  %v5616_v34 = vld [vmem:[%s8695_s7] ss:$0 sm:$0xff] }
 0x333   : > { %6688 = vmatprep.subr.bf16.mxu0 %v7295_v43 }
 0x334   : > { %6611 = vmatpush3.bf16.msra.mxu1 %v7268_v39 }
 0x335   : > { %6612 = vmatprep.subr.bf16.mxu1 %v7269_v20 }
 0x336   : > { %6689 = vmatpush3.bf16.msra.mxu0 %v7295_v43 }
 0x338   : > { %6613 = vmatpush3.bf16.msra.mxu1 %v7269_v20 }
 0x339   : > { %6614 = vmatprep.subr.bf16.mxu1 %v7270_v40 }
 0x33c   : > { %6615 = vmatpush3.bf16.msra.mxu1 %v7270_v40  ;;  %v5615_v40 = vld [vmem:[%s8693_s5] ss:$0 sm:$0xff] }
 0x33d   : > { %6616 = vmatprep.subr.bf16.mxu1 %v7271_v42 }
 0x340   : > { %6617 = vmatpush3.bf16.msra.mxu1 %v7271_v42 }
 0x341   : > { %6626 = vmatprep.subr.bf16.mxu1 %v7272_v44 }
 0x343   : > { %6619 = vmatmul.mubr.bf16.vlgmr.msra.gmra.mrb[0].mxu1 %v2946_v46 }
 0x344   : > { %6622 = vmatprep.mubr.bf16.mxu1 %v2947_v48  ;;  %6627 = vmatpush3.bf16.msra.mxu1 %v7272_v44 }
 0x345   : > { %6628 = vmatprep.subr.bf16.mxu1 %v7273_v47 }
 0x348   : > { %6629 = vmatpush3.bf16.msra.mxu1 %v7273_v47 }
 0x349   : > { %6630 = vmatprep.subr.bf16.mxu1 %v7274_v53 }
 0x34b   : > { %6623 = vmatmul.mubr.bf16.gmra.mrb[4].mxu1 %v2948_v55 }
 0x34c   : > { %6631 = vmatpush3.bf16.msra.mxu1 %v7274_v53  ;;  %6642 = vmatprep.mubr.bf16.mxu1 %v7997_v27  ;;  %v7279_v27 = vld [vmem:[%s8692_s4 + $0x1f8] sm:$0xff]  }
 0x34d   : > { %6632 = vmatprep.subr.bf16.mxu1 %v7275_v29 }
 0x350   : > { %6633 = vmatpush3.bf16.msra.mxu1 %v7275_v29 }
 0x351   : > { %6634 = vmatprep.subr.bf16.mxu1 %v7276_v24 }
 0x354   : > { %6635 = vmatpush3.bf16.msra.mxu1 %v7276_v24 }
 0x355   : > { %6636 = vmatprep.subr.bf16.mxu1 %v7277_v31 }
 0x358   : > { %6637 = vmatpush3.bf16.msra.mxu1 %v7277_v31 }
 0x359   : > { %6638 = vmatprep.subr.bf16.mxu1 %v7278_v59 }
 0x35c   : > { %6639 = vmatpush3.bf16.msra.mxu1 %v7278_v59 }
 0x35d   : > { %6640 = vmatprep.subr.bf16.mxu1 %v7279_v27 }
 0x360   : > { %6641 = vmatpush3.bf16.msra.mxu1 %v7279_v27 }
 0x361   : > { %6650 = vmatprep.subr.bf16.mxu1 %v7280_v60 }
 0x363   : > { %6643 = vmatmul.mubr.bf16.vlgmr.msra.gmra.mrb[0].mxu1 %v3096_v41  ;;  %v7286_v41 = vld [vmem:[%s8692_s4 + $0x230] sm:$0xff]  }
 0x364   : > { %6646 = vmatprep.mubr.bf16.mxu1 %v3097_v0  ;;  %6651 = vmatpush3.bf16.msra.mxu1 %v7280_v60 }
 0x365   : > { %6652 = vmatprep.subr.bf16.mxu1 %v7281_v62 }
 0x368   : > { %6653 = vmatpush3.bf16.msra.mxu1 %v7281_v62 }
 0x369   : > { %6654 = vmatprep.subr.bf16.mxu1 %v7282_v2 }
 0x36b   : > { %6647 = vmatmul.mubr.bf16.gmra.mrb[4].mxu1 %v3098_v4 }
 0x36c   : > { %6655 = vmatpush3.bf16.msra.mxu1 %v7282_v2  ;;  %6666 = vmatprep.mubr.bf16.mxu1 %v8116_v28 }
 0x36d   : > { %6656 = vmatprep.subr.bf16.mxu1 %v7283_v14 }
 0x370   : > { %6657 = vmatpush3.bf16.msra.mxu1 %v7283_v14 }
 0x371   : > { %6658 = vmatprep.subr.bf16.mxu1 %v7284_v7 }
 0x374   : > { %6659 = vmatpush3.bf16.msra.mxu1 %v7284_v7 }
 0x375   : > { %6660 = vmatprep.subr.bf16.mxu1 %v7285_v63 }
 0x378   : > { %6661 = vmatpush3.bf16.msra.mxu1 %v7285_v63 }
 0x379   : > { %6662 = vmatprep.subr.bf16.mxu1 %v7286_v41 }
 0x37c   : > { %6663 = vmatpush3.bf16.msra.mxu1 %v7286_v41 }
 0x37d   : > { %6664 = vmatprep.subr.bf16.mxu1 %v7287_v54 }
 0x380   : > { %6665 = vmatpush3.bf16.msra.mxu1 %v7287_v54 }
 0x381   : > { %6698 = vmatprep.subr.bf16.mxu1 %v7296_v10 }
 0x383   : > { %6667 = vmatmul.mubr.bf16.vlgmr.msra.gmra.mrb[0].mxu1 %v3246_v15 }
 0x384   : > { %6670 = vmatprep.mubr.bf16.mxu1 %v3247_v16  ;;  %6699 = vmatpush3.bf16.msra.mxu1 %v7296_v10 }
 0x385   : > { %6700 = vmatprep.subr.bf16.mxu1 %v7297_v26 }
 0x388   : > { %6701 = vmatpush3.bf16.msra.mxu1 %v7297_v26 }
 0x389   : > { %6702 = vmatprep.subr.bf16.mxu1 %v7298_v33 }
 0x38b   : > { %6671 = vmatmul.mubr.bf16.gmra.mrb[4].mxu1 %v3248_v22  ;;  %v7303_v22 = vld [vmem:[%s8696_s8 + $0x78] sm:$0xff]  }
 0x38c   : > { %6703 = vmatpush3.bf16.msra.mxu1 %v7298_v33 }
 0x38d   : > { %6704 = vmatprep.subr.bf16.mxu1 %v7299_v35 }
 0x390   : > { %6705 = vmatpush3.bf16.msra.mxu1 %v7299_v35 }
 0x391   : > { %6706 = vmatprep.subr.bf16.mxu1 %v7300_v18 }
 0x394   : > { %6707 = vmatpush3.bf16.msra.mxu1 %v7300_v18  ;;  %v7310_v18 = vld [vmem:[%s8696_s8 + $0x30] sm:$0xff]  }
 0x395   : > { %6708 = vmatprep.subr.bf16.mxu1 %v7301_v19 }
 0x398   : > { %6709 = vmatpush3.bf16.msra.mxu1 %v7301_v19  ;;  %v7311_v19 = vld [vmem:[%s8696_s8 + $0x38] sm:$0xff]  }
 0x399   : > { %6710 = vmatprep.subr.bf16.mxu1 %v7302_v21 }
 0x39c   : > { %6711 = vmatpush3.bf16.msra.mxu1 %v7302_v21  ;;  %v7312_v21 = vld [vmem:[%s8696_s8 + $0x80] sm:$0xff]  }
 0x39d   : > { %6712 = vmatprep.subr.bf16.mxu1 %v7303_v22 }
 0x3a0   : > { %6713 = vmatpush3.bf16.msra.mxu1 %v7303_v22 }
 0x3a1   : > { %6722 = vmatprep.subr.bf16.mxu1 %v7304_v23 }
 0x3ec   : > { %v6524_v28 = vpop.f32.mrb[24].mxu0 }
 0x3ed   : > { %v2447_v30 = vpop.f32.mrb[25].mxu0 }
 0x3ee   : > { %v6525_v13 = vpop.f32.mrb[26].mxu0 }
 0x3ef   : > { %v2450_v17 = vpop.f32.mrb[27].mxu0 }
 0x3f4   : > { %v6528_v36 = vpop.f32.mrb[28].mxu0 }
 0x3f5   : > { %v2463_v37 = vpop.f32.mrb[29].mxu0 }
 0x3f6   : > { %v6529_v38 = vpop.f32.mrb[30].mxu0 }
 0x3f7   : > { %v2466_v39 = vpop.f32.mrb[31].mxu0 }
 0x456   : > { %v6668_v20 = vpop.f32.mrb[0].mxu1 }
 0x457   : > { %v6938_v42 = vadd.f32 %v6668_v20, %v6524_v28  ;;  %v3348_v44 = vpop.f32.mrb[1].mxu1 }
 0x458   : > { %v6939_v45 = vadd.f32 %v3348_v44, %v2447_v30  ;;  %v6669_v46 = vpop.f32.mrb[2].mxu1 }
 0x459   : > { %v3396_v47 = vadd.f32 %v6938_v42, %v5615_v40  ;;  %v6940_v48 = vadd.f32 %v6669_v46, %v6525_v13  ;;  %v3351_v49 = vpop.f32.mrb[3].mxu1 }
 0x45a   : > { %v3394_v52 = vadd.f32 %v6939_v45, %v5615_v40  ;;  %v6941_v53 = vadd.f32 %v3351_v49, %v2450_v17  ;;  %v7305_v49 = vld [vmem:[%s8696_s8 + $0x8] sm:$0xff]  }
 0x45b   : > { %v3397_v55 = vadd.f32 %v6940_v48, %v5615_v40  ;;  %v3404_v24 = vmax.f32 %v3396_v47, 0.0 }
 0x45c   : > { %v3395_v29 = vadd.f32 %v6941_v53, %v5615_v40  ;;  %v3402_v59 = vmax.f32 %v3394_v52, 0.0 }
 0x45d   : > { %v3405_v31 = vmax.f32 %v3397_v55, 0.0 }
 0x45e   : > { %v3403_v27 = vmax.f32 %v3395_v29, 0.0  ;;  %v6672_v60 = vpop.f32.mrb[4].mxu1 }
 0x45f   : > { %v3411_v61 = vpack.c.bf16 %v3405_v31, %v3404_v24  ;;  %v6942_v62 = vadd.f32 %v6672_v60, %v6528_v36  ;;  %v3364_v0 = vpop.f32.mrb[5].mxu1 }
 0x460   : > { %v6943_v50 = vadd.f32 %v3364_v0, %v2463_v37  ;;  %v6673_v58 = vpop.f32.mrb[6].mxu1  ;;  %v3410_v2 = vpack.c.bf16 %v3403_v27, %v3402_v59 }
 0x461   : > { %v3400_v4 = vadd.f32 %v6942_v62, %v5615_v40  ;;  %v6944_v14 = vadd.f32 %v6673_v58, %v6529_v38  ;;  %v3367_v7 = vpop.f32.mrb[7].mxu1  ;;  %v3598_v62 = vld [vmem:[#allocation3 + $0x22] sm:$0xff] }
 0x462   : > { %v3398_v63 = vadd.f32 %v6943_v50, %v5615_v40  ;;  %v6945_v41 = vadd.f32 %v3367_v7, %v2466_v39  ;;  %6690 = vmatprep.mubr.bf16.mxu0 %v3410_v2  ;;  %v3626_v39 = vld [vmem:[#allocation3 + $0x23] sm:$0xff] }
 0x463   : > { %v3401_v5 = vadd.f32 %v6944_v14, %v5615_v40  ;;  %6691 = vmatmul.mubr.bf16.vlgmr.msra.gmra.mrb[32].mxu0 %v3411_v61  ;;  %v3408_v54 = vmax.f32 %v3400_v4, 0.0 }
 0x464   : > { %v3399_v6 = vadd.f32 %v6945_v41, %v5615_v40  ;;  %v3406_v11 = vmax.f32 %v3398_v63, 0.0  ;;  %v7307_v63 = vld [vmem:[%s8696_s8 + $0x18] sm:$0xff]  }
 0x465   : > { %v3409_v9 = vmax.f32 %v3401_v5, 0.0 }
 0x466   : > { %v3407_v57 = vmax.f32 %v3399_v6, 0.0 }
 0x467   : > { %v3413_v15 = vpack.c.bf16 %v3409_v9, %v3408_v54  ;;  %v7308_v9 = vld [vmem:[%s8696_s8 + $0x20] sm:$0xff]  }
 0x468   : > { %v3412_v16 = vpack.c.bf16 %v3407_v57, %v3406_v11 }
 0x46a   : > { %6694 = vmatprep.mubr.bf16.mxu0 %v3412_v16 }
 0x46b   : > { %6695 = vmatmul.mubr.bf16.gmra.mrb[36].mxu0 %v3413_v15  ;;  %v7309_v15 = vld [vmem:[%s8696_s8 + $0x28] sm:$0xff]  }
 0x536   : > { %v6692_v43 = vpop.f32.mrb[32].mxu0 }
 0x537   : > { %v3528_v10 = vadd.f32 %v6692_v43, %v5616_v34  ;;  %v3519_v26 = vpop.f32.mrb[33].mxu0 }
 0x538   : > { %v3520_v28 = vadd.f32 %v5616_v34, %v3519_v26  ;;  %v6693_v30 = vpop.f32.mrb[34].mxu0  ;;  %v7313_v26 = vld [vmem:[%s8696_s8 + $0x88] sm:$0xff]  }
 0x539   : > { %v8266_v13 = vadd.f32 %v3528_v10, %v7938_v25  ;;  %v3531_v17 = vadd.f32 %v6693_v30, %v5616_v34  ;;  %v3522_v33 = vpop.f32.mrb[35].mxu0  ;;  %v7314_v30 = vld [vmem:[%s8696_s8 + $0x90] sm:$0xff]  }
 0x53a   : > { %v8269_v35 = vadd.f32 %v3520_v28, %v7940_v32  ;;  %v3523_v36 = vadd.f32 %v5616_v34, %v3522_v33  ;;  %v3881_v33 = vld [vmem:[#allocation3 + $0x24] sm:$0xff] }
 0x53b   : > { %v8272_v37 = vmax.f32 %v8266_v13, 0.0  ;;  %v8275_v38 = vadd.f32 %v3531_v17, %v7945_v51 }
 0x53c   : > { %v8278_v20 = vmax.f32 %v8269_v35, 0.0  ;;  %v8281_v40 = vadd.f32 %v3523_v36, %v7950_v56 }
 0x53d   : > { %3592 = vst [vmem:[#allocation3 + $0x53] sm:$0xff] %v8272_v37  ;;  %v8285_v25 = vmax.f32 %v8275_v38, 0.0 }
 0x53e   : > { %3590 = vst [vmem:[#allocation3 + $0x33] sm:$0xff] %v8278_v20  ;;  %v8289_v32 = vmax.f32 %v8281_v40, 0.0  ;;  %v6696_v42 = vpop.f32.mrb[36].mxu0  ;;  %v3634_v51 = vpack.c.bf16 %v8278_v20, %v3626_v39 }
 0x53f   : > { %3593 = vst [vmem:[#allocation3 + $0x63] sm:$0xff] %v8285_v25  ;;  %v3544_v44 = vadd.f32 %v6696_v42, %v5616_v34  ;;  %v3535_v45 = vpop.f32.mrb[37].mxu0  ;;  %v4190_v56 = vpack.c.bf16 %v8285_v25, %v8272_v37  ;;  %v7315_v42 = vld [vmem:[%s8696_s8 + $0x98] sm:$0xff]  }
 0x540   : > { %3591 = vst [vmem:[#allocation3 + $0x43] sm:$0xff] %v8289_v32  ;;  %v3536_v46 = vadd.f32 %v5616_v34, %v3535_v45  ;;  %v6697_v47 = vpop.f32.mrb[38].mxu0  ;;  %6714 = vmatprep.mubr.bf16.mxu1 %v3634_v51  ;;  %v8298_v48 = vpack.c.bf16 %v8272_v37, %v8289_v32  ;;  %v4189_v52 = vpack.c.bf16 %v8289_v32, %v8278_v20  ;;  %v7317_v45 = vld [vmem:[%s8696_s8 + $0xa8] sm:$0xff]   ;;  %v7335_v20 = vld [vmem:[%s8696_s8 + $0x138] sm:$0xff]   ;;  %v7336_v32 = vld [vmem:[%s8696_s8 + $0x140] sm:$0xff]  }
 0x541   : > { %v8306_v53 = vadd.f32 %v3544_v44, %v7968_v1  ;;  %v3547_v55 = vadd.f32 %v6697_v47, %v5616_v34  ;;  %v3538_v29 = vpop.f32.mrb[39].mxu0  ;;  %v7316_v44 = vld [vmem:[%s8696_s8 + $0xa0] sm:$0xff]   ;;  %v7319_v47 = vld [vmem:[%s8696_s8 + $0xb8] sm:$0xff]  }
 0x542   : > { %v8309_v24 = vadd.f32 %v3536_v46, %v7970_v3  ;;  %v3539_v31 = vadd.f32 %v5616_v34, %v3538_v29  ;;  %6715 = vmatmul.mubr.bf16.vlgmr.msra.gmra.mrb[8].mxu1 %v8298_v48  ;;  %v7306_v3 = vld [vmem:[%s8696_s8 + $0x10] sm:$0xff]   ;;  %v7321_v29 = vld [vmem:[%s8696_s8 + $0xc8] sm:$0xff]   ;;  %v7368_v37 = vld [vmem:[%s8698_s10] sm:$0xff]  }
 0x543   : > { %v8313_v59 = vmax.f32 %v8306_v53, 0.0  ;;  %v8316_v27 = vadd.f32 %v3547_v55, %v7978_v8  ;;  %6723 = vmatpush3.bf16.msra.mxu1 %v7304_v23  ;;  %v7318_v46 = vld [vmem:[%s8696_s8 + $0xb0] sm:$0xff]   ;;  %6914 = vmatprep.subr.bf16.mxu0 %v7368_v37 }
 0x544   : > { %v8319_v60 = vmax.f32 %v8309_v24, 0.0  ;;  %v8322_v1 = vadd.f32 %v3539_v31, %v7983_v12  ;;  %6724 = vmatprep.subr.bf16.mxu1 %v7305_v49  ;;  %v8341_v50 = vld [vmem:[#allocation3 + $0x54] sm:$0xff]  ;;  %6915 = vmatpush3.bf16.msra.mxu0 %v7368_v37 }
 0x545   : > { %3596 = vst [vmem:[#allocation3 + $0x93] sm:$0xff] %v8313_v59  ;;  %v8329_v61 = vmax.f32 %v8316_v27, 0.0  ;;  %v8339_v0 = vld [vmem:[#allocation3 + $0x32] sm:$0xff] }
 0x546   : > { %3594 = vst [vmem:[#allocation3 + $0x73] sm:$0xff] %v8319_v60  ;;  %v8333_v8 = vmax.f32 %v8322_v1, 0.0  ;;  %v8337_v12 = vpack.c.bf16 %v8319_v60, %v8285_v25  ;;  %v8343_v58 = vld [vmem:[#allocation3 + $0x64] sm:$0xff]  ;;  %v8361_v41 = vld [vmem:[#allocation3 + $0x34] sm:$0xff]  ;;  %v3606_v5 = vpack.c.bf16 %v8339_v0, %v3598_v62 }
 0x547   : > { %3597 = vst [vmem:[#allocation3 + $0xa3] sm:$0xff] %v8329_v61  ;;  %6725 = vmatpush3.bf16.msra.mxu1 %v7305_v49  ;;  %v8346_v2 = vld [vmem:[#allocation3 + $0x44] sm:$0xff]  ;;  %v4192_v4 = vpack.c.bf16 %v8329_v61, %v8313_v59  ;;  %v4340_v14 = vpack.c.bf16 %v8343_v58, %v8341_v50  ;;  %v8392_v34 = vld [vmem:[#allocation3 + $0x52] sm:$0xff]  ;;  %v3889_v51 = vpack.c.bf16 %v8361_v41, %v3881_v33 }
 0x548   : > { %3595 = vst [vmem:[#allocation3 + $0x83] sm:$0xff] %v8333_v8  ;;  %6718 = vmatprep.mubr.bf16.mxu1 %v8337_v12  ;;  %6726 = vmatprep.subr.bf16.mxu1 %v7306_v3  ;;  %v8356_v7 = vpack.c.bf16 %v8313_v59, %v8333_v8  ;;  %v4191_v6 = vpack.c.bf16 %v8333_v8, %v8319_v60  ;;  %v3600_v22 = vld [vmem:[#allocation3 + $0x42] sm:$0xff]  ;;  %v7330_v33 = vld [vmem:[%s8696_s8 + $0x110] sm:$0xff]   ;;  %v7371_v8 = vld [vmem:[%s8698_s10 + $0x18] sm:$0xff]  }
 0x549   : > { %v4339_v54 = vpack.c.bf16 %v8346_v2, %v8361_v41  ;;  %v8395_v43 = vpack.c.bf16 %v8392_v34, %v3600_v22  ;;  %v8397_v10 = vld [vmem:[#allocation3 + $0x62] sm:$0xff]  ;;  %v8441_v55 = vpack.c.bf16 %v8341_v50, %v8346_v2  ;;  %v7370_v59 = vld [vmem:[%s8698_s10 + $0x10] sm:$0xff]   ;;  %v7343_v41 = vld [vmem:[%s8696_s8 + $0x178] sm:$0xff]  }
 0x54a   : > { %6719 = vmatmul.mubr.bf16.gmra.mrb[12].mxu1 %v8356_v7  ;;  %v7320_v49 = vld [vmem:[%s8696_s8 + $0xc0] sm:$0xff]   ;;  %v7369_v25 = vld [vmem:[%s8698_s10 + $0x8] sm:$0xff]   ;;  %v7342_v2 = vld [vmem:[%s8696_s8 + $0x170] sm:$0xff]  }
 0x54b   : > { %6727 = vmatpush3.bf16.msra.mxu1 %v7306_v3  ;;  %6738 = vmatprep.mubr.bf16.mxu1 %v3606_v5  ;;  %v7322_v3 = vld [vmem:[%s8696_s8 + $0xd0] sm:$0xff]   ;;  %v7323_v5 = vld [vmem:[%s8696_s8 + $0xd8] sm:$0xff]   ;;  %v7341_v60 = vld [vmem:[%s8696_s8 + $0x168] sm:$0xff]  }
 0x54c   : > { %6728 = vmatprep.subr.bf16.mxu1 %v7307_v63  ;;  %v8413_v36 = vld [vmem:[#allocation3 + $0x92] sm:$0xff]  ;;  %6916 = vmatprep.subr.bf16.mxu0 %v7369_v25 }
 0x54d   : > { %v8372_v11 = vld [vmem:[#allocation3 + $0x74] sm:$0xff]  ;;  %6917 = vmatpush3.bf16.msra.mxu0 %v7369_v25 }
 0x54e   : > { %v8390_v23 = vld [vmem:[#allocation3 + $0x72] sm:$0xff]  ;;  %v8448_v31 = vpack.c.bf16 %v8372_v11, %v8343_v58  ;;  %6918 = vmatprep.subr.bf16.mxu0 %v7370_v59  ;;  %v7348_v58 = vld [vmem:[%s8696_s8 + $0x1a0] sm:$0xff]  }
 0x54f   : > { %6729 = vmatpush3.bf16.msra.mxu1 %v7307_v63  ;;  %v8374_v57 = vld [vmem:[#allocation3 + $0x84] sm:$0xff]  ;;  %v8404_v28 = vpack.c.bf16 %v8390_v23, %v8397_v10  ;;  %v8455_v62 = vld [vmem:[#allocation3 + $0x94] sm:$0xff] }
 0x550   : > { %6730 = vmatprep.subr.bf16.mxu1 %v7308_v9  ;;  %v4341_v16 = vpack.c.bf16 %v8374_v57, %v8372_v11  ;;  %v8411_v17 = vld [vmem:[#allocation3 + $0x82] sm:$0xff]  ;;  %v8459_v63 = vpack.c.bf16 %v8455_v62, %v8374_v57  ;;  %v7347_v50 = vld [vmem:[%s8696_s8 + $0x198] sm:$0xff]   ;;  %v7350_v11 = vld [vmem:[%s8696_s8 + $0x1b0] sm:$0xff]  }
 0x551   : > { %v8417_v39 = vpack.c.bf16 %v8413_v36, %v8411_v17  ;;  %6919 = vmatpush3.bf16.msra.mxu0 %v7370_v59  ;;  %v7351_v57 = vld [vmem:[%s8696_s8 + $0x1b8] sm:$0xff]  }
 0x552   : > { %6920 = vmatprep.subr.bf16.mxu0 %v7371_v8 }
 0x553   : > { %6731 = vmatpush3.bf16.msra.mxu1 %v7308_v9  ;;  %v4039_v9 = vpack.c.bf16 %v3600_v22, %v8339_v0  ;;  %v7326_v0 = vld [vmem:[%s8696_s8 + $0xf0] sm:$0xff]   ;;  %v4040_v22 = vpack.c.bf16 %v8397_v10, %v8392_v34  ;;  %v7331_v10 = vld [vmem:[%s8696_s8 + $0x118] sm:$0xff]  }
 0x554   : > { %6732 = vmatprep.subr.bf16.mxu1 %v7309_v15 }
 0x555   : > { %6921 = vmatpush3.bf16.msra.mxu0 %v7371_v8 }
 0x557   : > { %6733 = vmatpush3.bf16.msra.mxu1 %v7309_v15  ;;  %v7324_v15 = vld [vmem:[%s8696_s8 + $0xe0] sm:$0xff]  }
 0x558   : > { %6734 = vmatprep.subr.bf16.mxu1 %v7310_v18 }
 0x55b   : > { %6735 = vmatpush3.bf16.msra.mxu1 %v7310_v18  ;;  %v7325_v18 = vld [vmem:[%s8696_s8 + $0xe8] sm:$0xff]  }
 0x55c   : > { %6736 = vmatprep.subr.bf16.mxu1 %v7311_v19 }
 0x55f   : > { %6737 = vmatpush3.bf16.msra.mxu1 %v7311_v19  ;;  %v7327_v19 = vld [vmem:[%s8696_s8 + $0xf8] sm:$0xff]  }
 0x560   : > { %6746 = vmatprep.subr.bf16.mxu1 %v7312_v21 }
 0x562   : > { %6739 = vmatmul.mubr.bf16.vlgmr.msra.gmra.mrb[8].mxu1 %v8395_v43 }
 0x563   : > { %6742 = vmatprep.mubr.bf16.mxu1 %v8404_v28  ;;  %6747 = vmatpush3.bf16.msra.mxu1 %v7312_v21  ;;  %v7328_v21 = vld [vmem:[%s8696_s8 + $0x100] sm:$0xff]  }
 0x564   : > { %6748 = vmatprep.subr.bf16.mxu1 %v7313_v26 }
 0x567   : > { %6749 = vmatpush3.bf16.msra.mxu1 %v7313_v26  ;;  %v7329_v26 = vld [vmem:[%s8696_s8 + $0x108] sm:$0xff]  }
 0x568   : > { %6750 = vmatprep.subr.bf16.mxu1 %v7314_v30 }
 0x56a   : > { %6743 = vmatmul.mubr.bf16.gmra.mrb[12].mxu1 %v8417_v39 }
 0x56b   : > { %6751 = vmatpush3.bf16.msra.mxu1 %v7314_v30  ;;  %6762 = vmatprep.mubr.bf16.mxu1 %v3889_v51  ;;  %v4041_v30 = vpack.c.bf16 %v8411_v17, %v8390_v23  ;;  %v7332_v23 = vld [vmem:[%s8696_s8 + $0x120] sm:$0xff]   ;;  %v7333_v17 = vld [vmem:[%s8696_s8 + $0x128] sm:$0xff]   ;;  %v7338_v51 = vld [vmem:[%s8696_s8 + $0x150] sm:$0xff]  }
 0x56c   : > { %6752 = vmatprep.subr.bf16.mxu1 %v7315_v42 }
 0x56f   : > { %6753 = vmatpush3.bf16.msra.mxu1 %v7315_v42  ;;  %v8491_v42 = vld [vmem:[#allocation3 + $0xa2] sm:$0xff] }
 0x570   : > { %6754 = vmatprep.subr.bf16.mxu1 %v7316_v44  ;;  %v4042_v34 = vpack.c.bf16 %v8491_v42, %v8413_v36  ;;  %v7334_v36 = vld [vmem:[%s8696_s8 + $0x130] sm:$0xff]  }
 0x573   : > { %6755 = vmatpush3.bf16.msra.mxu1 %v7316_v44  ;;  %v7339_v44 = vld [vmem:[%s8696_s8 + $0x158] sm:$0xff]  }
 0x574   : > { %6756 = vmatprep.subr.bf16.mxu1 %v7317_v45 }
 0x577   : > { %6757 = vmatpush3.bf16.msra.mxu1 %v7317_v45  ;;  %v7345_v45 = vld [vmem:[%s8696_s8 + $0x188] sm:$0xff]  }
 0x578   : > { %6758 = vmatprep.subr.bf16.mxu1 %v7318_v46 }
 0x57b   : > { %6759 = vmatpush3.bf16.msra.mxu1 %v7318_v46  ;;  %v7346_v46 = vld [vmem:[%s8696_s8 + $0x190] sm:$0xff]  }
 0x57c   : > { %6760 = vmatprep.subr.bf16.mxu1 %v7319_v47 }
 0x57f   : > { %6761 = vmatpush3.bf16.msra.mxu1 %v7319_v47  ;;  %v8582_v47 = vld [vmem:[#allocation3 + $0xa4] sm:$0xff] }
 0x580   : > { %6770 = vmatprep.subr.bf16.mxu1 %v7320_v49 }
 0x582   : > { %6763 = vmatmul.mubr.bf16.vlgmr.msra.gmra.mrb[8].mxu1 %v8441_v55 }
 0x583   : > { %6766 = vmatprep.mubr.bf16.mxu1 %v8448_v31  ;;  %6771 = vmatpush3.bf16.msra.mxu1 %v7320_v49  ;;  %v4342_v49 = vpack.c.bf16 %v8582_v47, %v8455_v62 }
 0x584   : > { %6772 = vmatprep.subr.bf16.mxu1 %v7321_v29 }
 0x587   : > { %6773 = vmatpush3.bf16.msra.mxu1 %v7321_v29  ;;  %v7354_v29 = vld [vmem:[%s8696_s8 + $0x1d0] sm:$0xff]  }
 0x588   : > { %6774 = vmatprep.subr.bf16.mxu1 %v7322_v3 }
 0x58a   : > { %6767 = vmatmul.mubr.bf16.gmra.mrb[12].mxu1 %v8459_v63 }
 0x58b   : > { %6775 = vmatpush3.bf16.msra.mxu1 %v7322_v3  ;;  %6786 = vmatprep.mubr.bf16.mxu1 %v4039_v9  ;;  %v4488_v3 = vld [vmem:[#allocation3 + $0xb2] sm:$0xff] }
 0x58c   : > { %6776 = vmatprep.subr.bf16.mxu1 %v7323_v5  ;;  %v4492_v62 = vpack.c.bf16 %v4488_v3, %v8491_v42  ;;  %v7358_v9 = vld [vmem:[%s8696_s8 + $0x1f0] sm:$0xff]   ;;  %v7375_v42 = vld [vmem:[%s8698_s10 + $0x38] sm:$0xff]  }
 0x58f   : > { %6777 = vmatpush3.bf16.msra.mxu1 %v7323_v5  ;;  %v7355_v5 = vld [vmem:[%s8696_s8 + $0x1d8] sm:$0xff]  }
 0x590   : > { %6778 = vmatprep.subr.bf16.mxu1 %v7324_v15 }
 0x593   : > { %6779 = vmatpush3.bf16.msra.mxu1 %v7324_v15  ;;  %v7360_v15 = vld [vmem:[%s8696_s8 + $0x200] sm:$0xff]  }
 0x594   : > { %6780 = vmatprep.subr.bf16.mxu1 %v7325_v18 }
 0x597   : > { %6781 = vmatpush3.bf16.msra.mxu1 %v7325_v18  ;;  %v7361_v18 = vld [vmem:[%s8696_s8 + $0x208] sm:$0xff]  }
 0x598   : > { %6782 = vmatprep.subr.bf16.mxu1 %v7326_v0 }
 0x59b   : > { %6783 = vmatpush3.bf16.msra.mxu1 %v7326_v0  ;;  %v7362_v0 = vld [vmem:[%s8696_s8 + $0x210] sm:$0xff]  }
 0x59c   : > { %6784 = vmatprep.subr.bf16.mxu1 %v7327_v19 }
 0x59f   : > { %6785 = vmatpush3.bf16.msra.mxu1 %v7327_v19  ;;  %v4638_v19 = vld [vmem:[#allocation3 + $0xb3] sm:$0xff] }
 0x5a0   : > { %6794 = vmatprep.subr.bf16.mxu1 %v7328_v21 }
 0x5a2   : > { %6787 = vmatmul.mubr.bf16.vlgmr.msra.gmra.mrb[8].mxu1 %v4040_v22  ;;  %v7363_v22 = vld [vmem:[%s8696_s8 + $0x218] sm:$0xff]  }
 0x5a3   : > { %6790 = vmatprep.mubr.bf16.mxu1 %v4041_v30  ;;  %6795 = vmatpush3.bf16.msra.mxu1 %v7328_v21  ;;  %v4642_v21 = vpack.c.bf16 %v4638_v19, %v8329_v61  ;;  %v7365_v61 = vld [vmem:[%s8696_s8 + $0x228] sm:$0xff]  }
 0x5a4   : > { %6796 = vmatprep.subr.bf16.mxu1 %v7329_v26 }
 0x5a7   : > { %6797 = vmatpush3.bf16.msra.mxu1 %v7329_v26  ;;  %v4788_v26 = vld [vmem:[#allocation3 + $0xb4] sm:$0xff] }
 0x5a8   : > { %6798 = vmatprep.subr.bf16.mxu1 %v7330_v33  ;;  %v4792_v30 = vpack.c.bf16 %v4788_v26, %v8582_v47 }
 0x5aa   : > { %6791 = vmatmul.mubr.bf16.gmra.mrb[12].mxu1 %v4042_v34 }
 0x5ab   : > { %6799 = vmatpush3.bf16.msra.mxu1 %v7330_v33  ;;  %6810 = vmatprep.mubr.bf16.mxu1 %v4189_v52  ;;  %v7337_v52 = vld [vmem:[%s8696_s8 + $0x148] sm:$0xff]   ;;  %v7374_v33 = vld [vmem:[%s8698_s10 + $0x30] sm:$0xff]  }
 0x5ac   : > { %6800 = vmatprep.subr.bf16.mxu1 %v7331_v10 }
 0x5af   : > { %6801 = vmatpush3.bf16.msra.mxu1 %v7331_v10 }
 0x5b0   : > { %6802 = vmatprep.subr.bf16.mxu1 %v7332_v23 }
 0x5b3   : > { %6803 = vmatpush3.bf16.msra.mxu1 %v7332_v23 }
 0x5b4   : > { %6804 = vmatprep.subr.bf16.mxu1 %v7333_v17 }
 0x5b7   : > { %6805 = vmatpush3.bf16.msra.mxu1 %v7333_v17 }
 0x5b8   : > { %6806 = vmatprep.subr.bf16.mxu1 %v7334_v36 }
 0x5bb   : > { %6807 = vmatpush3.bf16.msra.mxu1 %v7334_v36 }
 0x5bc   : > { %6808 = vmatprep.subr.bf16.mxu1 %v7335_v20 }
 0x5bf   : > { %6809 = vmatpush3.bf16.msra.mxu1 %v7335_v20 }
 0x5c0   : > { %6818 = vmatprep.subr.bf16.mxu1 %v7336_v32 }
 0x5c2   : > { %6811 = vmatmul.mubr.bf16.vlgmr.msra.gmra.mrb[8].mxu1 %v4190_v56  ;;  %v7340_v56 = vld [vmem:[%s8696_s8 + $0x160] sm:$0xff]  }
 0x5c3   : > { %6814 = vmatprep.mubr.bf16.mxu1 %v4191_v6  ;;  %6819 = vmatpush3.bf16.msra.mxu1 %v7336_v32  ;;  %v7373_v6 = vld [vmem:[%s8698_s10 + $0x28] sm:$0xff]  }
 0x5c4   : > { %6820 = vmatprep.subr.bf16.mxu1 %v7337_v52 }
 0x5c7   : > { %6821 = vmatpush3.bf16.msra.mxu1 %v7337_v52 }
 0x5c8   : > { %6822 = vmatprep.subr.bf16.mxu1 %v7338_v51 }
 0x5ca   : > { %6815 = vmatmul.mubr.bf16.gmra.mrb[12].mxu1 %v4192_v4  ;;  %v7372_v4 = vld [vmem:[%s8698_s10 + $0x20] sm:$0xff]  }
 0x5cb   : > { %6823 = vmatpush3.bf16.msra.mxu1 %v7338_v51  ;;  %6834 = vmatprep.mubr.bf16.mxu1 %v4339_v54  ;;  %v7344_v54 = vld [vmem:[%s8696_s8 + $0x180] sm:$0xff]  }
 0x5cc   : > { %6824 = vmatprep.subr.bf16.mxu1 %v7339_v44  ;;  %6922 = vmatprep.subr.bf16.mxu0 %v7372_v4 }
 0x5cd   : > { %6923 = vmatpush3.bf16.msra.mxu0 %v7372_v4 }
 0x5ce   : > { %6924 = vmatprep.subr.bf16.mxu0 %v7373_v6 }
 0x5cf   : > { %6825 = vmatpush3.bf16.msra.mxu1 %v7339_v44 }
 0x5d0   : > { %6826 = vmatprep.subr.bf16.mxu1 %v7340_v56 }
 0x5d1   : > { %6925 = vmatpush3.bf16.msra.mxu0 %v7373_v6 }
 0x5d2   : > { %6926 = vmatprep.subr.bf16.mxu0 %v7374_v33 }
 0x5d3   : > { %6827 = vmatpush3.bf16.msra.mxu1 %v7340_v56 }
 0x5d4   : > { %6828 = vmatprep.subr.bf16.mxu1 %v7341_v60 }
 0x5d5   : > { %6927 = vmatpush3.bf16.msra.mxu0 %v7374_v33 }
 0x5d6   : > { %6928 = vmatprep.subr.bf16.mxu0 %v7375_v42 }
 0x5d7   : > { %6829 = vmatpush3.bf16.msra.mxu1 %v7341_v60 }
 0x5d8   : > { %6830 = vmatprep.subr.bf16.mxu1 %v7342_v2 }
 0x5d9   : > { %6929 = vmatpush3.bf16.msra.mxu0 %v7375_v42 }
 0x5db   : > { %6831 = vmatpush3.bf16.msra.mxu1 %v7342_v2 }
 0x5dc   : > { %6832 = vmatprep.subr.bf16.mxu1 %v7343_v41 }
 0x5df   : > { %6833 = vmatpush3.bf16.msra.mxu1 %v7343_v41 }
 0x5e0   : > { %6842 = vmatprep.subr.bf16.mxu1 %v7344_v54 }
 0x5e2   : > { %6835 = vmatmul.mubr.bf16.vlgmr.msra.gmra.mrb[8].mxu1 %v4340_v14  ;;  %v7349_v14 = vld [vmem:[%s8696_s8 + $0x1a8] sm:$0xff]  }
 0x5e3   : > { %6838 = vmatprep.mubr.bf16.mxu1 %v4341_v16  ;;  %6843 = vmatpush3.bf16.msra.mxu1 %v7344_v54  ;;  %v7352_v16 = vld [vmem:[%s8696_s8 + $0x1c0] sm:$0xff]  }
 0x5e4   : > { %6844 = vmatprep.subr.bf16.mxu1 %v7345_v45 }
 0x5e7   : > { %6845 = vmatpush3.bf16.msra.mxu1 %v7345_v45 }
 0x5e8   : > { %6846 = vmatprep.subr.bf16.mxu1 %v7346_v46 }
 0x5ea   : > { %6839 = vmatmul.mubr.bf16.gmra.mrb[12].mxu1 %v4342_v49 }
 0x5eb   : > { %6847 = vmatpush3.bf16.msra.mxu1 %v7346_v46  ;;  %6858 = vmatprep.mubr.bf16.mxu1 %v8395_v43  ;;  %v7353_v43 = vld [vmem:[%s8696_s8 + $0x1c8] sm:$0xff]  }
 0x5ec   : > { %6848 = vmatprep.subr.bf16.mxu1 %v7347_v50 }
 0x5ef   : > { %6849 = vmatpush3.bf16.msra.mxu1 %v7347_v50 }
 0x5f0   : > { %6850 = vmatprep.subr.bf16.mxu1 %v7348_v58 }
 0x5f3   : > { %6851 = vmatpush3.bf16.msra.mxu1 %v7348_v58 }
 0x5f4   : > { %6852 = vmatprep.subr.bf16.mxu1 %v7349_v14 }
 0x5f7   : > { %6853 = vmatpush3.bf16.msra.mxu1 %v7349_v14  ;;  %v5826_v14 = vld [vmem:[%s8699_s11] ss:$0 sm:$0xff] }
 0x5f8   : > { %6854 = vmatprep.subr.bf16.mxu1 %v7350_v11 }
 0x5fb   : > { %6855 = vmatpush3.bf16.msra.mxu1 %v7350_v11 }
 0x5fc   : > { %6856 = vmatprep.subr.bf16.mxu1 %v7351_v57 }
 0x5ff   : > { %6857 = vmatpush3.bf16.msra.mxu1 %v7351_v57 }
 0x600   : > { %6866 = vmatprep.subr.bf16.mxu1 %v7352_v16 }
 0x602   : > { %6859 = vmatmul.mubr.bf16.vlgmr.msra.gmra.mrb[8].mxu1 %v8404_v28  ;;  %v7356_v28 = vld [vmem:[%s8696_s8 + $0x1e0] sm:$0xff]  }
 0x603   : > { %6862 = vmatprep.mubr.bf16.mxu1 %v8417_v39  ;;  %6867 = vmatpush3.bf16.msra.mxu1 %v7352_v16  ;;  %v7357_v39 = vld [vmem:[%s8696_s8 + $0x1e8] sm:$0xff]  }
 0x604   : > { %6868 = vmatprep.subr.bf16.mxu1 %v7353_v43 }
 0x607   : > { %6869 = vmatpush3.bf16.msra.mxu1 %v7353_v43 }
 0x608   : > { %6870 = vmatprep.subr.bf16.mxu1 %v7354_v29 }
 0x60a   : > { %6863 = vmatmul.mubr.bf16.gmra.mrb[12].mxu1 %v4492_v62 }
 0x60b   : > { %6871 = vmatpush3.bf16.msra.mxu1 %v7354_v29  ;;  %6882 = vmatprep.mubr.bf16.mxu1 %v8298_v48  ;;  %v7359_v48 = vld [vmem:[%s8696_s8 + $0x1f8] sm:$0xff]  }
 0x60c   : > { %6872 = vmatprep.subr.bf16.mxu1 %v7355_v5 }
 0x60f   : > { %6873 = vmatpush3.bf16.msra.mxu1 %v7355_v5 }
 0x610   : > { %6874 = vmatprep.subr.bf16.mxu1 %v7356_v28 }
 0x613   : > { %6875 = vmatpush3.bf16.msra.mxu1 %v7356_v28 }
 0x614   : > { %6876 = vmatprep.subr.bf16.mxu1 %v7357_v39 }
 0x617   : > { %6877 = vmatpush3.bf16.msra.mxu1 %v7357_v39 }
 0x618   : > { %6878 = vmatprep.subr.bf16.mxu1 %v7358_v9 }
 0x61b   : > { %6879 = vmatpush3.bf16.msra.mxu1 %v7358_v9 }
 0x61c   : > { %6880 = vmatprep.subr.bf16.mxu1 %v7359_v48 }
 0x61f   : > { %6881 = vmatpush3.bf16.msra.mxu1 %v7359_v48 }
 0x620   : > { %6890 = vmatprep.subr.bf16.mxu1 %v7360_v15 }
 0x622   : > { %6883 = vmatmul.mubr.bf16.vlgmr.msra.gmra.mrb[8].mxu1 %v8337_v12  ;;  %v7364_v12 = vld [vmem:[%s8696_s8 + $0x220] sm:$0xff]  }
 0x623   : > { %6886 = vmatprep.mubr.bf16.mxu1 %v8356_v7  ;;  %6891 = vmatpush3.bf16.msra.mxu1 %v7360_v15  ;;  %v7366_v7 = vld [vmem:[%s8696_s8 + $0x230] sm:$0xff]  }
 0x624   : > { %6892 = vmatprep.subr.bf16.mxu1 %v7361_v18 }
 0x627   : > { %6893 = vmatpush3.bf16.msra.mxu1 %v7361_v18 }
 0x628   : > { %6894 = vmatprep.subr.bf16.mxu1 %v7362_v0 }
 0x62a   : > { %6887 = vmatmul.mubr.bf16.gmra.mrb[12].mxu1 %v4642_v21 }
 0x62b   : > { %6895 = vmatpush3.bf16.msra.mxu1 %v7362_v0  ;;  %6906 = vmatprep.mubr.bf16.mxu1 %v8441_v55  ;;  %v7367_v55 = vld [vmem:[%s8696_s8 + $0x238] sm:$0xff]  }
 0x62c   : > { %6896 = vmatprep.subr.bf16.mxu1 %v7363_v22 }
 0x62f   : > { %6897 = vmatpush3.bf16.msra.mxu1 %v7363_v22 }
 0x630   : > { %6898 = vmatprep.subr.bf16.mxu1 %v7364_v12 }
 0x633   : > { %6899 = vmatpush3.bf16.msra.mxu1 %v7364_v12 }
 0x634   : > { %6900 = vmatprep.subr.bf16.mxu1 %v7365_v61 }
 0x637   : > { %6901 = vmatpush3.bf16.msra.mxu1 %v7365_v61 }
 0x638   : > { %6902 = vmatprep.subr.bf16.mxu1 %v7366_v7 }
 0x63b   : > { %6903 = vmatpush3.bf16.msra.mxu1 %v7366_v7 }
 0x63c   : > { %6904 = vmatprep.subr.bf16.mxu1 %v7367_v55 }
 0x63f   : > { %6905 = vmatpush3.bf16.msra.mxu1 %v7367_v55 }
 0x642   : > { %6907 = vmatmul.mubr.bf16.vlgmr.msra.gmra.mrb[8].mxu1 %v8448_v31  ;;  %v5825_v31 = vld [vmem:[%s8697_s9] ss:$0 sm:$0xff] }
 0x643   : > { %6910 = vmatprep.mubr.bf16.mxu1 %v8459_v63 }
 0x64a   : > { %6911 = vmatmul.mubr.bf16.gmra.mrb[12].mxu1 %v4792_v30 }
 0x715   : > { %v6908_v63 = vpop.f32.mrb[8].mxu1 }
 0x716   : > { %v4940_v34 = vadd.f32 %v6908_v63, %v5825_v31  ;;  %v4892_v10 = vpop.f32.mrb[9].mxu1 }
 0x717   : > { %v4938_v23 = vadd.f32 %v5825_v31, %v4892_v10  ;;  %v6909_v17 = vpop.f32.mrb[10].mxu1 }
 0x718   : > { %v4941_v36 = vadd.f32 %v6909_v17, %v5825_v31  ;;  %v4895_v20 = vpop.f32.mrb[11].mxu1  ;;  %v4948_v52 = vmax.f32 %v4940_v34, 0.0 }
 0x719   : > { %v4939_v32 = vadd.f32 %v5825_v31, %v4895_v20  ;;  %v4946_v44 = vmax.f32 %v4938_v23, 0.0 }
 0x71a   : > { %v4949_v51 = vmax.f32 %v4941_v36, 0.0 }
 0x71b   : > { %v4947_v37 = vmax.f32 %v4939_v32, 0.0 }
 0x71c   : > { %v4955_v25 = vpack.c.bf16 %v4949_v51, %v4948_v52 }
 0x71d   : > { %v4954_v56 = vpack.c.bf16 %v4947_v37, %v4946_v44  ;;  %v6912_v59 = vpop.f32.mrb[12].mxu1 }
 0x71e   : > { %v4944_v60 = vadd.f32 %v6912_v59, %v5825_v31  ;;  %v4908_v8 = vpop.f32.mrb[13].mxu1 }
 0x71f   : > { %v4942_v2 = vadd.f32 %v5825_v31, %v4908_v8  ;;  %v6913_v4 = vpop.f32.mrb[14].mxu1  ;;  %6930 = vmatprep.mubr.bf16.mxu0 %v4954_v56 }
 0x720   : > { %v4945_v41 = vadd.f32 %v6913_v4, %v5825_v31  ;;  %v4911_v6 = vpop.f32.mrb[15].mxu1  ;;  %6931 = vmatmul.mubr.bf16.vlgmr.msra.gmra.mrb[40].mxu0 %v4955_v25  ;;  %v4952_v45 = vmax.f32 %v4944_v60, 0.0 }
 0x721   : > { %v4943_v54 = vadd.f32 %v5825_v31, %v4911_v6  ;;  %v4950_v47 = vmax.f32 %v4942_v2, 0.0 }
 0x722   : > { %v4953_v46 = vmax.f32 %v4945_v41, 0.0 }
 0x723   : > { %v4951_v49 = vmax.f32 %v4943_v54, 0.0 }
 0x724   : > { %v4957_v50 = vpack.c.bf16 %v4953_v46, %v4952_v45 }
 0x725   : > { %v4956_v58 = vpack.c.bf16 %v4951_v49, %v4950_v47 }
 0x727   : > { %6934 = vmatprep.mubr.bf16.mxu0 %v4956_v58 }
 0x728   : > { %6935 = vmatmul.mubr.bf16.gmra.mrb[44].mxu0 %v4957_v50 }
 0x7f3   : > { %v6932_v11 = vpop.f32.mrb[40].mxu0 }
 0x7f4   : > { %v5072_v57 = vadd.f32 %v6932_v11, %v5826_v14  ;;  %v5063_v16 = vpop.f32.mrb[41].mxu0 }
 0x7f5   : > { %v5064_v43 = vadd.f32 %v5826_v14, %v5063_v16  ;;  %v6933_v29 = vpop.f32.mrb[42].mxu0 }
 0x7f6   : > { %v5075_v3 = vadd.f32 %v6933_v29, %v5826_v14  ;;  %v5066_v62 = vpop.f32.mrb[43].mxu0  ;;  %v5104_v28 = vadd.f32 %v5072_v57, %v8266_v13 }
 0x7f7   : > { %v5067_v5 = vadd.f32 %v5826_v14, %v5066_v62  ;;  %v5102_v9 = vadd.f32 %v5064_v43, %v8269_v35 }
 0x7f8   : > { %v5105_v39 = vadd.f32 %v5075_v3, %v8275_v38 }
 0x7f9   : > { %v5103_v48 = vadd.f32 %v5067_v5, %v8281_v40 }
 0x7fa   : > { %v5847_v15 = vpack.c.bf16 %v5105_v39, %v5104_v28 }
 0x7fb   : > { %v5842_v18 = vpack.c.bf16 %v5103_v48, %v5102_v9  ;;  %v6936_v0 = vpop.f32.mrb[44].mxu0 }
 0x7fc   : > { %5859 = vst [vmem:[%s413_s27 + $0x8] sm:$0xff] %v5847_v15   ;;  %v5088_v19 = vadd.f32 %v6936_v0, %v5826_v14  ;;  %v5079_v21 = vpop.f32.mrb[45].mxu0 }
 0x7fd   : > { %5843 = vst [vmem:[%s413_s27] sm:$0xff] %v5842_v18   ;;  %v5080_v22 = vadd.f32 %v5826_v14, %v5079_v21  ;;  %v6937_v12 = vpop.f32.mrb[46].mxu0 }
 0x7fe   : > { %v5091_v13 = vadd.f32 %v6937_v12, %v5826_v14  ;;  %v5082_v61 = vpop.f32.mrb[47].mxu0  ;;  %v5108_v35 = vadd.f32 %v5088_v19, %v8306_v53 }
 0x7ff   : > { %v5083_v38 = vadd.f32 %v5826_v14, %v5082_v61  ;;  %v5106_v55 = vadd.f32 %v5080_v22, %v8309_v24 }
 0x800   : > { %v5109_v7 = vadd.f32 %v5091_v13, %v8316_v27 }
 0x801   : > { %v5107_v40 = vadd.f32 %v5083_v38, %v8322_v1 }
 0x802   : > { %v5857_v26 = vpack.c.bf16 %v5109_v7, %v5108_v35 }
 0x803   : > { %v5852_v30 = vpack.c.bf16 %v5107_v40, %v5106_v55 }
 0x804   : > { %5861 = vst [vmem:[%s413_s27 + $0x18] sm:$0xff] %v5857_v26  }
 0x805   : > { %5860 = vst [vmem:[%s413_s27 + $0x10] sm:$0xff] %v5852_v30  }
 0x806 PF: > { %s22_s21 = sadd.s32 1, %s7382_s21  }
 0x807   : > { %p19_p4 = scmp.ge.s32.totalorder %s22_s21, 4  }
 0x809   :  { %21 = sbr.rel (!%p19_p4) target bundleno = 1 (0x1), region = 127 }

// kernel: decoder_forward_pallas.5
= control target key start
LH: loop header
LB: loop body
LE: loop exit
PB: predicated region body
PF: predicated region fallthrough
CT: control target
= control target key end

     0   :  { %s13121_s27 = smov 0   ;;  %s14736_s0 = inlined_call_operand.vmem [shape: bf16[2,8,8,128], index: 0, kind: input, shape index: {}]   ;;  %s14737_s1 = inlined_call_operand.vmem [shape: bf16[16,8], index: 1, kind: input, shape index: {}]   ;;  %s14738_s2 = inlined_call_operand.vmem [shape: bf16[9,128,128], index: 2, kind: input, shape index: {}]   ;;  %s14739_s3 = inlined_call_operand.vmem [shape: f32[1,128], index: 3, kind: input, shape index: {}]   ;;  %s14740_s4 = inlined_call_operand.vmem [shape: bf16[9,128,128], index: 4, kind: input, shape index: {}]   ;;  %s14741_s5 = inlined_call_operand.vmem [shape: f32[1,128], index: 5, kind: input, shape index: {}]   ;;  %s14742_s6 = inlined_call_operand.vmem [shape: bf16[9,128,128], index: 6, kind: input, shape index: {}]   ;;  %s14743_s7 = inlined_call_operand.vmem [shape: f32[1,128], index: 7, kind: input, shape index: {}]   ;;  %s14744_s8 = inlined_call_operand.vmem [shape: f32[2,16,16,128], index: 8, kind: output, shape index: {}]  }
   0x1 LB: > { %s9395_s28 = sadd.s32 4294967295, %s13072_s27   ;;  %p9399_p0 = scmp.ge.s32.totalorder %s13072_s27, 1  ;;  %s13072_s27 = sphi %s13121_s27, %s18_s27  }
   0x2   : > { %p262_p1 = scmp.lt.s32.totalorder %s13072_s27, 3 }
   0x4   : > { %p263_p2 = pnand %p9399_p0, %p262_p1 }
   0x5   : > { %p13131_p3 = scmp.lt.s32.totalorder (!%p263_p2), %s9395_s28, 1  ;;  %v13074_v0 = vmov (!%p263_p2), 0.0   ;;  %vm13075_vm0 = vmmov (!%p263_p2), 0   ;;  %vm385_vm1 = vcmask (!%p263_p2), 1043456   ;;  %v12831_v5 = vld [vmem:[%s14737_s1] sm:$0xff] (!%p263_p2)   ;;  %vm381_vm2 = vcmask (!%p263_p2), 64512  }
   0x6   : > { %266 = sbr.rel (%p263_p2) target bundleno = 2205 (0x89d), region = 52  ;;  %10692 = vmatprep.subr.bf16.mxu0 (!%p263_p2), %v13074_v0  ;;  %307 = vst [vmem:[#allocation3] sm:$0xff] (!%p263_p2), %v13074_v0  ;;  %308 = vst [vmem:[#allocation3 + $0x8] sm:$0xff] (!%p263_p2), %v13074_v0  ;;  %10694 = vmatprep.mubr.msk.bf16.mxu0 (!%p263_p2), %vm13075_vm0, %v13074_v0  ;;  %v12839_v18 = vld [vmem:[%s14738_s2 + $0x40] sm:$0xff] (!%p263_p2)   ;;  %v12842_v20 = vld [vmem:[%s14738_s2 + $0x108] sm:$0xff] (!%p263_p2)  }
   0x7   : > { %309 = vst [vmem:[#allocation3 + $0x10] sm:$0x3] (!%p263_p2), %v13074_v0  ;;  %311 = vst [vmem:[#allocation3 + $0x198] sm:$0xff] (!%p263_p2), %v13074_v0  ;;  %10698 = vmatprep.subr.bf16.mxu1 (!%p263_p2), %v13074_v0  ;;  %10700 = vmatprep.mubr.msk.bf16.mxu1 (!%p263_p2), %vm13075_vm0, %v13074_v0  ;;  %v12840_v19 = vld [vmem:[%s14738_s2 + $0x100] sm:$0xff] (!%p263_p2)   ;;  %v12841_v21 = vld [vmem:[%s14738_s2 + $0x48] sm:$0xff] (!%p263_p2)  }
   0x8   : > { %312 = vst [vmem:[#allocation3 + $0x1a0] sm:$0xff] (!%p263_p2), %v13074_v0  ;;  %313 = vst [vmem:[#allocation3 + $0x1a8] sm:$0x3] (!%p263_p2), %v13074_v0  ;;  %v12844_v22 = vld [vmem:[%s14738_s2 + $0x110] sm:$0xff] (!%p263_p2)   ;;  %v12846_v24 = vld [vmem:[%s14738_s2 + $0x118] sm:$0xff] (!%p263_p2)  }
   0x9   : > { %315 = vst [vmem:[#allocation3 + $0x18] sm:$0x1] (!%p263_p2), %v13074_v0  ;;  %316 = vst [vmem:[#allocation3 + $0x30] sm:$0x1] (!%p263_p2), %v13074_v0  ;;  %v12843_v23 = vld [vmem:[%s14738_s2 + $0x50] sm:$0xff] (!%p263_p2)   ;;  %v12845_v25 = vld [vmem:[%s14738_s2 + $0x58] sm:$0xff] (!%p263_p2)  }
   0xa   : > { %317 = vst [vmem:[#allocation3 + $0x48] sm:$0x1] (!%p263_p2), %v13074_v0  ;;  %318 = vst [vmem:[#allocation3 + $0x60] sm:$0x1] (!%p263_p2), %v13074_v0  ;;  %v12848_v26 = vld [vmem:[%s14738_s2 + $0x120] sm:$0xff] (!%p263_p2)   ;;  %v12849_v28 = vld [vmem:[%s14738_s2 + $0x68] sm:$0xff] (!%p263_p2)  }
   0xb   : > { %319 = vst [vmem:[#allocation3 + $0x78] sm:$0x1] (!%p263_p2), %v13074_v0  ;;  %320 = vst [vmem:[#allocation3 + $0x90] sm:$0x1] (!%p263_p2), %v13074_v0  ;;  %v12847_v27 = vld [vmem:[%s14738_s2 + $0x60] sm:$0xff] (!%p263_p2)   ;;  %v12850_v29 = vld [vmem:[%s14738_s2 + $0x128] sm:$0xff] (!%p263_p2)  }
   0xc   : > { %321 = vst [vmem:[#allocation3 + $0xa8] sm:$0x1] (!%p263_p2), %v13074_v0  ;;  %322 = vst [vmem:[#allocation3 + $0xc0] sm:$0x1] (!%p263_p2), %v13074_v0  ;;  %v12851_v30 = vld [vmem:[%s14738_s2 + $0x70] sm:$0xff] (!%p263_p2)   ;;  %v12853_v32 = vld [vmem:[%s14738_s2 + $0x78] sm:$0xff] (!%p263_p2)  }
   0xd   : > { %323 = vst [vmem:[#allocation3 + $0xd8] sm:$0x1] %v13074_v0  ;;  %324 = vst [vmem:[#allocation3 + $0xf0] sm:$0x1] %v13074_v0  ;;  %s14747_s28 = smov (!%p13131_p3, %s9395_s28), 1  ;;  %v12852_v31 = vld [vmem:[%s14738_s2 + $0x130] sm:$0xff]  }
   0xe   : > { %325 = vst [vmem:[#allocation3 + $0x108] sm:$0x1] %v13074_v0  ;;  %326 = vst [vmem:[#allocation3 + $0x120] sm:$0x1] %v13074_v0  ;;  %s10026_s30 = sshll.u32 %s14747_s28, 5  ;;  %v12854_v33 = vld [vmem:[%s14738_s2 + $0x138] sm:$0xff]  }
   0xf   : > { %327 = vst [vmem:[#allocation3 + $0x138] sm:$0x1] %v13074_v0  ;;  %328 = vst [vmem:[#allocation3 + $0x150] sm:$0x1] %v13074_v0  ;;  %s300_s11 = scalar_lea.vmem %s14736_s0, %s10026_s30  ;;  %v899_v34 = vld [vmem:[#allocation3 + $0x1] sm:$0xff]  ;;  %v900_v35 = vld [vmem:[#allocation3 + $0x9] sm:$0xff] }
  0x10   : > { %329 = vst [vmem:[#allocation3 + $0x168] sm:$0x1] %v13074_v0  ;;  %330 = vst [vmem:[#allocation3 + $0x180] sm:$0x1] %v13074_v0  ;;  %v12830_v1 = vld [vmem:[%s300_s11] ss:$0 sps:$4 sm:$0xff]   ;;  %v931_v36 = vpack.c.bf16 %v900_v35, %v899_v34 }
  0x11   : > { %333 = vst [vmem:[#allocation3 + $0x29] sm:$0x1] %v13074_v0  ;;  %334 = vst [vmem:[#allocation3 + $0x41] sm:$0x1] %v13074_v0  ;;  %v12832_v2 = vld [vmem:[%s300_s11 + $0x4] ss:$0 sps:$4 sm:$0xff]  }
  0x12   : > { %335 = vst [vmem:[#allocation3 + $0x59] sm:$0x1] %v13074_v0  ;;  %336 = vst [vmem:[#allocation3 + $0x71] sm:$0x1] %v13074_v0  ;;  %v12833_v3 = vld [vmem:[%s300_s11 + $0x8] ss:$0 sps:$4 sm:$0xff]  }
  0x13   : > { %337 = vst [vmem:[#allocation3 + $0x89] sm:$0x1] %v13074_v0  ;;  %338 = vst [vmem:[#allocation3 + $0xa1] sm:$0x1] %v13074_v0  ;;  %v387_v4 = vsel %vm385_vm1, %v12830_v1, 0  ;;  %v431_v7 = vsel %vm385_vm1, %v12832_v2, 0 }
  0x14   : > { %339 = vst [vmem:[#allocation3 + $0xb9] sm:$0x1] %v13074_v0  ;;  %340 = vst [vmem:[#allocation3 + $0xd1] sm:$0x1] %v13074_v0  ;;  %v12834_v6 = vld [vmem:[%s300_s11 + $0xc] ss:$0 sps:$4 sm:$0xff]   ;;  %10693 = vmatpush3.bf16.msra.mxu0 %v387_v4  ;;  %10699 = vmatpush3.bf16.msra.mxu1 %v431_v7 }
  0x15   : > { %341 = vst [vmem:[#allocation3 + $0xe9] sm:$0x1] %v13074_v0  ;;  %342 = vst [vmem:[#allocation3 + $0x101] sm:$0x1] %v13074_v0  ;;  %v12835_v8 = vld [vmem:[%s300_s11 + $0x10] ss:$0 sps:$4 sm:$0xff]   ;;  %10704 = vmatprep.subr.bf16.mxu0 %v13074_v0  ;;  %10710 = vmatprep.subr.bf16.mxu1 %v13074_v0 }
  0x16   : > { %343 = vst [vmem:[#allocation3 + $0x119] sm:$0x1] %v13074_v0  ;;  %344 = vst [vmem:[#allocation3 + $0x131] sm:$0x1] %v13074_v0  ;;  %v475_v9 = vsel %vm385_vm1, %v12833_v3, 0  ;;  %v519_v11 = vsel %vm385_vm1, %v12834_v6, 0 }
  0x17   : > { %345 = vst [vmem:[#allocation3 + $0x149] sm:$0x1] %v13074_v0  ;;  %346 = vst [vmem:[#allocation3 + $0x161] sm:$0x1] %v13074_v0  ;;  %v12836_v10 = vld [vmem:[%s300_s11 + $0x14] ss:$0 sps:$4 sm:$0xff]   ;;  %10695 = vmatmul.mubr.msk.bf16.vlgmr.msra.gmra.mrb[0].mxu0 %vm381_vm2, %v12831_v5  ;;  %10701 = vmatmul.mubr.msk.bf16.vlgmr.msra.gmra.mrb[0].mxu1 %vm381_vm2, %v12831_v5 }
  0x18   : > { %347 = vst [vmem:[#allocation3 + $0x179] sm:$0x1] %v13074_v0  ;;  %348 = vst [vmem:[#allocation3 + $0x191] sm:$0x1] %v13074_v0  ;;  %v12837_v12 = vld [vmem:[%s300_s11 + $0x18] ss:$0 sps:$4 sm:$0xff]   ;;  %10705 = vmatpush3.bf16.msra.mxu0 %v475_v9  ;;  %10706 = vmatprep.mubr.msk.bf16.mxu0 %vm13075_vm0, %v13074_v0 }
  0x19   : > { %314 = vst [vmem:[#allocation3] sm:$0x1] %v13074_v0  ;;  %331 = vst [vmem:[#allocation3 + $0x198] sm:$0x1] %v13074_v0  ;;  %v12838_v13 = vld [vmem:[%s300_s11 + $0x1c] ss:$0 sps:$4 sm:$0xff]   ;;  %10711 = vmatpush3.bf16.msra.mxu1 %v519_v11  ;;  %10712 = vmatprep.mubr.msk.bf16.mxu1 %vm13075_vm0, %v13074_v0 }
  0x1a   : > { %332 = vst [vmem:[#allocation3 + $0x11] sm:$0x1] %v13074_v0  ;;  %349 = vst [vmem:[#allocation3 + $0x1a9] sm:$0x1] %v13074_v0  ;;  %v563_v14 = vsel %vm385_vm1, %v12835_v8, 0  ;;  %v607_v15 = vsel %vm385_vm1, %v12836_v10, 0  ;;  %10716 = vmatprep.subr.bf16.mxu0 %v13074_v0  ;;  %10722 = vmatprep.subr.bf16.mxu1 %v13074_v0 }
  0x1b   : > { %v651_v16 = vsel %vm385_vm1, %v12837_v12, 0  ;;  %v695_v17 = vsel %vm385_vm1, %v12838_v13, 0  ;;  %v12856_v37 = vld [vmem:[%s14738_s2 + $0x140] sm:$0xff]   ;;  %v12858_v47 = vld [vmem:[%s14738_s2 + $0x8] sm:$0xff]   ;;  %v12861_v51 = vld [vmem:[%s14738_s2 + $0x10] sm:$0xff]   ;;  %s10027_s26 = sshll.u32 %s14747_s28, 8 }
  0x1c   : > { %v12855_v38 = vld [vmem:[%s14738_s2] sm:$0xff]   ;;  %v12857_v50 = vld [vmem:[%s14738_s2 + $0x148] sm:$0xff]   ;;  %v12859_v55 = vld [vmem:[%s14738_s2 + $0x150] sm:$0xff]   ;;  %s14667_s11 = scalar_lea.vmem %s14744_s8, %s10027_s26 }
  0x1d   : > { %v12864_v61 = vld [vmem:[%s14738_s2 + $0x18] sm:$0xff]   ;;  %v12867_v1 = vld [vmem:[%s14738_s2 + $0x20] sm:$0xff]   ;;  %v12869_v11 = vld [vmem:[%s14738_s2 + $0x28] sm:$0xff]  }
  0x1e   : > { %v12862_v3 = vld [vmem:[%s14738_s2 + $0x160] sm:$0xff]  }
  0x1f   : > { %10707 = vmatmul.mubr.msk.bf16.vlgmr.msra.gmra.mrb[4].mxu0 %vm381_vm2, %v12831_v5  ;;  %10713 = vmatmul.mubr.msk.bf16.vlgmr.msra.gmra.mrb[4].mxu1 %vm381_vm2, %v12831_v5 }
  0x20   : > { %10717 = vmatpush3.bf16.msra.mxu0 %v563_v14  ;;  %10718 = vmatprep.mubr.msk.bf16.mxu0 %vm13075_vm0, %v13074_v0  ;;  %v12863_v14 = vld [vmem:[%s14738_s2 + $0x168] sm:$0xff]  }
  0x21   : > { %10723 = vmatpush3.bf16.msra.mxu1 %v607_v15  ;;  %10724 = vmatprep.mubr.msk.bf16.mxu1 %vm13075_vm0, %v13074_v0  ;;  %v12871_v15 = vld [vmem:[%s14738_s2 + $0x30] sm:$0xff]  }
  0x22   : > { %10728 = vmatprep.subr.bf16.mxu0 %v13074_v0  ;;  %10734 = vmatprep.subr.bf16.mxu1 %v13074_v0 }
  0x27   : > { %10719 = vmatmul.mubr.msk.bf16.vlgmr.msra.gmra.mrb[8].mxu0 %vm381_vm2, %v12831_v5  ;;  %10725 = vmatmul.mubr.msk.bf16.vlgmr.msra.gmra.mrb[8].mxu1 %vm381_vm2, %v12831_v5 }
  0x28   : > { %10729 = vmatpush3.bf16.msra.mxu0 %v651_v16  ;;  %10730 = vmatprep.mubr.msk.bf16.mxu0 %vm13075_vm0, %v13074_v0 }
  0x29   : > { %10735 = vmatpush3.bf16.msra.mxu1 %v695_v17  ;;  %10736 = vmatprep.mubr.msk.bf16.mxu1 %vm13075_vm0, %v13074_v0  ;;  %v12860_v0 = vld [vmem:[%s14738_s2 + $0x158] sm:$0xff]   ;;  %v12865_v17 = vld [vmem:[%s14738_s2 + $0x170] sm:$0xff]  }
  0x2a   : > { %10740 = vmatprep.subr.bf16.mxu1 %v12839_v18  ;;  %10932 = vmatprep.subr.bf16.mxu0 %v12840_v19 }
  0x2f   : > { %10731 = vmatmul.mubr.msk.bf16.vlgmr.msra.gmra.mrb[12].mxu0 %vm381_vm2, %v12831_v5  ;;  %10737 = vmatmul.mubr.msk.bf16.vlgmr.msra.gmra.mrb[12].mxu1 %vm381_vm2, %v12831_v5 }
  0x30   : > { %10933 = vmatpush3.bf16.msra.mxu0 %v12840_v19  ;;  %10741 = vmatpush3.bf16.msra.mxu1 %v12839_v18 }
  0x31   : > { %10934 = vmatprep.subr.bf16.mxu0 %v12842_v20  ;;  %10742 = vmatprep.subr.bf16.mxu1 %v12841_v21 }
  0x32   : > { %10756 = vmatprep.mubr.bf16.mxu1 %v931_v36 }
  0x34   : > { %10935 = vmatpush3.bf16.msra.mxu0 %v12842_v20  ;;  %10743 = vmatpush3.bf16.msra.mxu1 %v12841_v21 }
  0x35   : > { %10936 = vmatprep.subr.bf16.mxu0 %v12844_v22  ;;  %10744 = vmatprep.subr.bf16.mxu1 %v12843_v23 }
  0x38   : > { %10937 = vmatpush3.bf16.msra.mxu0 %v12844_v22  ;;  %10745 = vmatpush3.bf16.msra.mxu1 %v12843_v23 }
  0x39   : > { %10938 = vmatprep.subr.bf16.mxu0 %v12846_v24  ;;  %10746 = vmatprep.subr.bf16.mxu1 %v12845_v25 }
  0x3c   : > { %10939 = vmatpush3.bf16.msra.mxu0 %v12846_v24  ;;  %10747 = vmatpush3.bf16.msra.mxu1 %v12845_v25 }
  0x3d   : > { %10940 = vmatprep.subr.bf16.mxu0 %v12848_v26  ;;  %10748 = vmatprep.subr.bf16.mxu1 %v12847_v27 }
  0x40   : > { %10941 = vmatpush3.bf16.msra.mxu0 %v12848_v26  ;;  %10749 = vmatpush3.bf16.msra.mxu1 %v12847_v27  ;;  %v12873_v27 = vld [vmem:[%s14738_s2 + $0x38] sm:$0xff]  }
  0x41   : > { %10750 = vmatprep.subr.bf16.mxu1 %v12849_v28  ;;  %10942 = vmatprep.subr.bf16.mxu0 %v12850_v29 }
  0x44   : > { %10751 = vmatpush3.bf16.msra.mxu1 %v12849_v28  ;;  %10943 = vmatpush3.bf16.msra.mxu0 %v12850_v29 }
  0x45   : > { %10752 = vmatprep.subr.bf16.mxu1 %v12851_v30  ;;  %10944 = vmatprep.subr.bf16.mxu0 %v12852_v31 }
  0x48   : > { %10753 = vmatpush3.bf16.msra.mxu1 %v12851_v30  ;;  %10945 = vmatpush3.bf16.msra.mxu0 %v12852_v31  ;;  %v12866_v30 = vld [vmem:[%s14738_s2 + $0x178] sm:$0xff]  }
  0x49   : > { %10754 = vmatprep.subr.bf16.mxu1 %v12853_v32  ;;  %10946 = vmatprep.subr.bf16.mxu0 %v12854_v33 }
  0x4c   : > { %10755 = vmatpush3.bf16.msra.mxu1 %v12853_v32  ;;  %10947 = vmatpush3.bf16.msra.mxu0 %v12854_v33  ;;  %v13353_v32 = vld [vmem:[%s14738_s2 + $0x80] sm:$0xff]  }
  0x4d   : > { %10980 = vmatprep.subr.bf16.mxu0 %v12856_v37  ;;  %10788 = vmatprep.subr.bf16.mxu1 %v12855_v38  ;;  %v12868_v33 = vld [vmem:[%s14738_s2 + $0x180] sm:$0xff]  }
  0xea   : > { %v423_v39 = vpop.f32.mrb[0].mxu0  ;;  %v467_v41 = vpop.f32.mrb[0].mxu1 }
  0xeb   : > { %803 = vst [vmem:[#allocation3 + $0x19] sm:$0xff] %v423_v39  ;;  %805 = vst [vmem:[#allocation3 + $0x31] sm:$0xff] %v423_v39  ;;  %v10696_v40 = vpop.f32.mrb[1].mxu0  ;;  %v10702_v43 = vpop.f32.mrb[1].mxu1 }
  0xec   : > { %v426_v42 = vpop.f32.mrb[2].mxu0  ;;  %807 = vst [vmem:[#allocation3 + $0x49] sm:$0xff] %v467_v41  ;;  %809 = vst [vmem:[#allocation3 + $0x61] sm:$0xff] %v467_v41  ;;  %v470_v45 = vpop.f32.mrb[2].mxu1 }
  0xed   : > { %804 = vst [vmem:[#allocation3 + $0x21] sm:$0xff] %v426_v42  ;;  %806 = vst [vmem:[#allocation3 + $0x39] sm:$0xff] %v426_v42  ;;  %v10697_v44 = vpop.f32.mrb[3].mxu0  ;;  %v932_v46 = vpack.c.bf16 %v426_v42, %v423_v39  ;;  %v10703_v48 = vpop.f32.mrb[3].mxu1  ;;  %v2028_v49 = vpack.c.bf16 %v470_v45, %v467_v41  ;;  %v12870_v39 = vld [vmem:[%s14738_s2 + $0x188] sm:$0xff]   ;;  %v12872_v41 = vld [vmem:[%s14738_s2 + $0x190] sm:$0xff]  }
  0xee   : > { %808 = vst [vmem:[#allocation3 + $0x51] sm:$0xff] %v470_v45  ;;  %810 = vst [vmem:[#allocation3 + $0x69] sm:$0xff] %v470_v45 }
  0xef   : > { %10757 = vmatmul.mubr.bf16.vlgmr.msra.gmra.mrb[16].mxu1 %v932_v46  ;;  %10948 = vmatprep.mubr.bf16.mxu0 %v932_v46 }
  0xf0   : > { %10760 = vmatprep.mubr.bf16.mxu1 %v932_v46  ;;  %10789 = vmatpush3.bf16.msra.mxu1 %v12855_v38 }
  0xf1   : > { %10949 = vmatmul.mubr.bf16.vlgmr.msra.gmra.mrb[16].mxu0 %v932_v46  ;;  %10790 = vmatprep.subr.bf16.mxu1 %v12858_v47 }
  0xf2   : > { %v511_v52 = vpop.f32.mrb[4].mxu0  ;;  %10981 = vmatpush3.bf16.msra.mxu0 %v12856_v37  ;;  %10952 = vmatprep.mubr.bf16.mxu0 %v2028_v49  ;;  %v555_v54 = vpop.f32.mrb[4].mxu1 }
  0xf3   : > { %811 = vst [vmem:[#allocation3 + $0x79] sm:$0xff] %v511_v52  ;;  %813 = vst [vmem:[#allocation3 + $0x91] sm:$0xff] %v511_v52  ;;  %v10708_v53 = vpop.f32.mrb[5].mxu0  ;;  %10982 = vmatprep.subr.bf16.mxu0 %v12857_v50  ;;  %v10714_v57 = vpop.f32.mrb[5].mxu1 }
  0xf4   : > { %v514_v56 = vpop.f32.mrb[6].mxu0  ;;  %815 = vst [vmem:[#allocation3 + $0xa9] sm:$0xff] %v555_v54  ;;  %817 = vst [vmem:[#allocation3 + $0xc1] sm:$0xff] %v555_v54  ;;  %10791 = vmatpush3.bf16.msra.mxu1 %v12858_v47  ;;  %v558_v59 = vpop.f32.mrb[6].mxu1  ;;  %v2300_v22 = vld [vmem:[#allocation3 + $0x1a] sm:$0xff]  ;;  %v2301_v23 = vld [vmem:[#allocation3 + $0x22] sm:$0xff] }
  0xf5   : > { %812 = vst [vmem:[#allocation3 + $0x81] sm:$0xff] %v514_v56  ;;  %814 = vst [vmem:[#allocation3 + $0x99] sm:$0xff] %v514_v56  ;;  %v10709_v58 = vpop.f32.mrb[7].mxu0  ;;  %v2030_v60 = vpack.c.bf16 %v514_v56, %v511_v52  ;;  %10792 = vmatprep.subr.bf16.mxu1 %v12861_v51  ;;  %v10715_v62 = vpop.f32.mrb[7].mxu1  ;;  %v13299_v63 = vpack.c.bf16 %v558_v59, %v555_v54  ;;  %v13347_v31 = vpack.c.bf16 %v2301_v23, %v2300_v22  ;;  %v2302_v34 = vld [vmem:[#allocation3 + $0x32] sm:$0xff]  ;;  %v2303_v35 = vld [vmem:[#allocation3 + $0x3a] sm:$0xff] }
  0xf6   : > { %10983 = vmatpush3.bf16.msra.mxu0 %v12857_v50  ;;  %816 = vst [vmem:[#allocation3 + $0xb1] sm:$0xff] %v558_v59  ;;  %818 = vst [vmem:[#allocation3 + $0xc9] sm:$0xff] %v558_v59  ;;  %v2304_v36 = vld [vmem:[#allocation3 + $0x4a] sm:$0xff]  ;;  %v2305_v37 = vld [vmem:[#allocation3 + $0x52] sm:$0xff]  ;;  %v13361_v38 = vpack.c.bf16 %v2303_v35, %v2302_v34 }
  0xf7   : > { %10761 = vmatmul.mubr.bf16.gmra.mrb[20].mxu1 %v2028_v49  ;;  %10984 = vmatprep.subr.bf16.mxu0 %v12859_v55  ;;  %v13367_v40 = vpack.c.bf16 %v2305_v37, %v2304_v36  ;;  %v2306_v42 = vld [vmem:[#allocation3 + $0x62] sm:$0xff]  ;;  %v2307_v43 = vld [vmem:[#allocation3 + $0x6a] sm:$0xff]  ;;  %v12874_v47 = vld [vmem:[%s14738_s2 + $0x198] sm:$0xff]  }
  0xf8   : > { %10764 = vmatprep.mubr.bf16.mxu1 %v2028_v49  ;;  %10793 = vmatpush3.bf16.msra.mxu1 %v12861_v51  ;;  %v13375_v46 = vpack.c.bf16 %v2307_v43, %v2306_v42  ;;  %v835_v57 = vld [vmem:[#allocation3] sm:$0xff]  ;;  %v12880_v58 = vld [vmem:[%s14738_s2 + $0x1b0] sm:$0xff]   ;;  %v844_v22 = vld [vmem:[#allocation3 + $0x68] sm:$0xff] }
  0xf9   : > { %10953 = vmatmul.mubr.bf16.gmra.mrb[20].mxu0 %v2028_v49  ;;  %10794 = vmatprep.subr.bf16.mxu1 %v12864_v61  ;;  %v12876_v49 = vld [vmem:[%s14738_s2 + $0x1a0] sm:$0xff]  }
  0xfa   : > { %10985 = vmatpush3.bf16.msra.mxu0 %v12859_v55  ;;  %10956 = vmatprep.mubr.bf16.mxu0 %v2030_v60  ;;  %v599_v2 = vpop.f32.mrb[8].mxu0  ;;  %v643_v5 = vpop.f32.mrb[8].mxu1  ;;  %v12878_v55 = vld [vmem:[%s14738_s2 + $0x1a8] sm:$0xff]   ;;  %v845_v34 = vld [vmem:[#allocation3 + $0x78] sm:$0xff]  ;;  %v847_v36 = vld [vmem:[#allocation3 + $0x90] sm:$0xff] }
  0xfb   : > { %10986 = vmatprep.subr.bf16.mxu0 %v12860_v0  ;;  %819 = vst [vmem:[#allocation3 + $0xd9] sm:$0xff] %v599_v2  ;;  %821 = vst [vmem:[#allocation3 + $0xf1] sm:$0xff] %v599_v2  ;;  %v10720_v4 = vpop.f32.mrb[9].mxu0  ;;  %v10726_v7 = vpop.f32.mrb[9].mxu1 }
  0xfc   : > { %v602_v6 = vpop.f32.mrb[10].mxu0  ;;  %823 = vst [vmem:[#allocation3 + $0x109] sm:$0xff] %v643_v5  ;;  %825 = vst [vmem:[#allocation3 + $0x121] sm:$0xff] %v643_v5  ;;  %10795 = vmatpush3.bf16.msra.mxu1 %v12864_v61  ;;  %v646_v9 = vpop.f32.mrb[10].mxu1  ;;  %v2308_v44 = vld [vmem:[#allocation3 + $0x7a] sm:$0xff]  ;;  %v2309_v45 = vld [vmem:[#allocation3 + $0x82] sm:$0xff] }
  0xfd   : > { %820 = vst [vmem:[#allocation3 + $0xe1] sm:$0xff] %v602_v6  ;;  %822 = vst [vmem:[#allocation3 + $0xf9] sm:$0xff] %v602_v6  ;;  %v10721_v8 = vpop.f32.mrb[11].mxu0  ;;  %v13310_v10 = vpack.c.bf16 %v602_v6, %v599_v2  ;;  %10796 = vmatprep.subr.bf16.mxu1 %v12867_v1  ;;  %v10727_v12 = vpop.f32.mrb[11].mxu1  ;;  %v13315_v13 = vpack.c.bf16 %v646_v9, %v643_v5  ;;  %v13381_v48 = vpack.c.bf16 %v2309_v45, %v2308_v44  ;;  %v2310_v50 = vld [vmem:[#allocation3 + $0x92] sm:$0xff]  ;;  %v2311_v51 = vld [vmem:[#allocation3 + $0x9a] sm:$0xff] }
  0xfe   : > { %10987 = vmatpush3.bf16.msra.mxu0 %v12860_v0  ;;  %824 = vst [vmem:[#allocation3 + $0x111] sm:$0xff] %v646_v9  ;;  %826 = vst [vmem:[#allocation3 + $0x129] sm:$0xff] %v646_v9  ;;  %v2312_v52 = vld [vmem:[#allocation3 + $0xaa] sm:$0xff]  ;;  %v2313_v53 = vld [vmem:[#allocation3 + $0xb2] sm:$0xff]  ;;  %v13389_v54 = vpack.c.bf16 %v2311_v51, %v2310_v50 }
  0xff   : > { %10765 = vmatmul.mubr.bf16.gmra.mrb[24].mxu1 %v2030_v60  ;;  %10988 = vmatprep.subr.bf16.mxu0 %v12862_v3  ;;  %v13395_v56 = vpack.c.bf16 %v2313_v53, %v2312_v52  ;;  %v2314_v59 = vld [vmem:[#allocation3 + $0xc2] sm:$0xff]  ;;  %v12882_v2 = vld [vmem:[%s14738_s2 + $0x1b8] sm:$0xff]   ;;  %v839_v12 = vld [vmem:[#allocation3 + $0x30] sm:$0xff] }
 0x100   : > { %10768 = vmatprep.mubr.bf16.mxu1 %v2030_v60  ;;  %10797 = vmatpush3.bf16.msra.mxu1 %v12867_v1  ;;  %v13402_v61 = vld [vmem:[#allocation3 + $0x8] sm:$0xff]  ;;  %v838_v4 = vld [vmem:[#allocation3 + $0x20] sm:$0xff]  ;;  %v840_v5 = vld [vmem:[#allocation3 + $0x38] sm:$0xff] }
 0x101   : > { %10957 = vmatmul.mubr.bf16.gmra.mrb[24].mxu0 %v2030_v60  ;;  %10798 = vmatprep.subr.bf16.mxu1 %v12869_v11  ;;  %v2315_v60 = vld [vmem:[#allocation3 + $0xca] sm:$0xff]  ;;  %v867_v62 = vpack.c.bf16 %v13402_v61, %v835_v57  ;;  %v13423_v7 = vld [vmem:[%s14738_s2 + $0x1c0] sm:$0xff]   ;;  %v837_v8 = vld [vmem:[#allocation3 + $0x18] sm:$0xff] }
 0x102   : > { %10989 = vmatpush3.bf16.msra.mxu0 %v12862_v3  ;;  %10960 = vmatprep.mubr.bf16.mxu0 %v13299_v63  ;;  %v687_v16 = vpop.f32.mrb[12].mxu0  ;;  %v13327_v19 = vpop.f32.mrb[12].mxu1  ;;  %v13408_v1 = vpack.c.bf16 %v2315_v60, %v2314_v59  ;;  %v12877_v6 = vld [vmem:[%s14738_s2 + $0x88] sm:$0xff]   ;;  %v846_v35 = vld [vmem:[#allocation3 + $0x80] sm:$0xff]  ;;  %v848_v37 = vld [vmem:[#allocation3 + $0x98] sm:$0xff] }
 0x103   : > { %10990 = vmatprep.subr.bf16.mxu0 %v12863_v14  ;;  %827 = vst [vmem:[#allocation3 + $0x139] sm:$0xff] %v687_v16  ;;  %829 = vst [vmem:[#allocation3 + $0x151] sm:$0xff] %v687_v16  ;;  %v10732_v18 = vpop.f32.mrb[13].mxu0  ;;  %v10738_v21 = vpop.f32.mrb[13].mxu1  ;;  %v13460_v42 = vpack.c.bf16 %v846_v35, %v845_v34  ;;  %v12885_v45 = vld [vmem:[%s14738_s2 + $0xa8] sm:$0xff]   ;;  %v12887_v51 = vld [vmem:[%s14738_s2 + $0xb0] sm:$0xff]  }
 0x104   : > { %v690_v20 = vpop.f32.mrb[14].mxu0  ;;  %831 = vst [vmem:[#allocation3 + $0x169] sm:$0xff] %v13327_v19  ;;  %833 = vst [vmem:[#allocation3 + $0x181] sm:$0xff] %v13327_v19  ;;  %10799 = vmatpush3.bf16.msra.mxu1 %v12869_v11  ;;  %v13331_v25 = vpop.f32.mrb[14].mxu1  ;;  %v2317_v0 = vld [vmem:[#allocation3 + $0xe2] sm:$0xff]  ;;  %v2318_v9 = vld [vmem:[#allocation3 + $0xf2] sm:$0xff]  ;;  %v13425_v11 = vpack.c.bf16 %v838_v4, %v837_v8 }
 0x105   : > { %828 = vst [vmem:[#allocation3 + $0x141] sm:$0xff] %v690_v20  ;;  %830 = vst [vmem:[#allocation3 + $0x159] sm:$0xff] %v690_v20  ;;  %v10733_v24 = vpop.f32.mrb[15].mxu0  ;;  %v13333_v26 = vpack.c.bf16 %v690_v20, %v687_v16  ;;  %10800 = vmatprep.subr.bf16.mxu1 %v12871_v15  ;;  %v10739_v28 = vpop.f32.mrb[15].mxu1  ;;  %v946_v29 = vpack.c.bf16 %v13331_v25, %v13327_v19  ;;  %v12879_v18 = vld [vmem:[%s14738_s2 + $0x90] sm:$0xff]   ;;  %v841_v19 = vld [vmem:[#allocation3 + $0x48] sm:$0xff] }
 0x106   : > { %10991 = vmatpush3.bf16.msra.mxu0 %v12863_v14  ;;  %832 = vst [vmem:[#allocation3 + $0x171] sm:$0xff] %v13331_v25  ;;  %834 = vst [vmem:[#allocation3 + $0x189] sm:$0xff] %v13331_v25  ;;  %v2321_v14 = vld [vmem:[#allocation3 + $0x112] sm:$0xff]  ;;  %v843_v21 = vld [vmem:[#allocation3 + $0x60] sm:$0xff] }
 0x107   : > { %10769 = vmatmul.mubr.bf16.gmra.mrb[28].mxu1 %v13299_v63  ;;  %10992 = vmatprep.subr.bf16.mxu0 %v12865_v17  ;;  %v842_v20 = vld [vmem:[#allocation3 + $0x50] sm:$0xff]  ;;  %v2322_v23 = vld [vmem:[#allocation3 + $0x122] sm:$0xff]  ;;  %v12881_v28 = vld [vmem:[%s14738_s2 + $0x98] sm:$0xff]  }
 0x108   : > { %10772 = vmatprep.mubr.bf16.mxu1 %v13299_v63  ;;  %10801 = vmatpush3.bf16.msra.mxu1 %v12871_v15  ;;  %v13427_v15 = vpack.c.bf16 %v840_v5, %v839_v12  ;;  %v2323_v24 = vld [vmem:[#allocation3 + $0x12a] sm:$0xff]  ;;  %v13442_v25 = vpack.c.bf16 %v842_v20, %v841_v19  ;;  %v853_v4 = vld [vmem:[#allocation3 + $0xd8] sm:$0xff]  ;;  %v854_v5 = vld [vmem:[#allocation3 + $0xe0] sm:$0xff] }
 0x109   : > { %10961 = vmatmul.mubr.bf16.gmra.mrb[28].mxu0 %v13299_v63  ;;  %10802 = vmatprep.subr.bf16.mxu1 %v12873_v27  ;;  %v2316_v63 = vld [vmem:[#allocation3 + $0xda] sm:$0xff]  ;;  %v849_v52 = vld [vmem:[#allocation3 + $0xa8] sm:$0xff]  ;;  %v850_v53 = vld [vmem:[#allocation3 + $0xb0] sm:$0xff] }
 0x10a   : > { %10993 = vmatpush3.bf16.msra.mxu0 %v12865_v17  ;;  %10996 = vmatprep.mubr.bf16.mxu0 %v13347_v31  ;;  %v13413_v3 = vpack.c.bf16 %v2317_v0, %v2316_v63  ;;  %v852_v57 = vld [vmem:[#allocation3 + $0xc8] sm:$0xff]  ;;  %v13478_v60 = vpack.c.bf16 %v850_v53, %v849_v52  ;;  %v856_v8 = vld [vmem:[#allocation3 + $0xf8] sm:$0xff]  ;;  %v12888_v20 = vld [vmem:[%s14738_s2 + $0x1d0] sm:$0xff]  }
 0x10b   : > { %10994 = vmatprep.subr.bf16.mxu0 %v12866_v30  ;;  %v12886_v12 = vld [vmem:[%s14738_s2 + $0x1c8] sm:$0xff]   ;;  %v12900_v52 = vld [vmem:[%s14738_s2 + $0x200] sm:$0xff]  }
 0x10c   : > { %10803 = vmatpush3.bf16.msra.mxu1 %v12873_v27  ;;  %v2325_v27 = vld [vmem:[#allocation3 + $0x142] sm:$0xff] }
 0x10d   : > { %10836 = vmatprep.subr.bf16.mxu1 %v13353_v32  ;;  %v2328_v43 = vld [vmem:[#allocation3 + $0x16a] sm:$0xff]  ;;  %v2329_v44 = vld [vmem:[#allocation3 + $0x172] sm:$0xff] }
 0x10e   : > { %10995 = vmatpush3.bf16.msra.mxu0 %v12866_v30  ;;  %v13450_v30 = vpack.c.bf16 %v2323_v24, %v2322_v23  ;;  %v13471_v50 = vpack.c.bf16 %v2329_v44, %v2328_v43  ;;  %v2331_v59 = vld [vmem:[#allocation3 + $0x18a] sm:$0xff]  ;;  %v861_v23 = vld [vmem:[#allocation3 + $0x138] sm:$0xff]  ;;  %v862_v24 = vld [vmem:[#allocation3 + $0x140] sm:$0xff] }
 0x10f   : > { %10773 = vmatmul.mubr.bf16.gmra.mrb[32].mxu1 %v13310_v10  ;;  %11028 = vmatprep.subr.bf16.mxu0 %v12868_v33  ;;  %v860_v19 = vld [vmem:[#allocation3 + $0x128] sm:$0xff]  ;;  %v12896_v43 = vld [vmem:[%s14738_s2 + $0x1f0] sm:$0xff]  }
 0x110   : > { %10776 = vmatprep.mubr.bf16.mxu1 %v13310_v10  ;;  %v2319_v10 = vld [vmem:[#allocation3 + $0xfa] sm:$0xff]  ;;  %v12894_v35 = vld [vmem:[%s14738_s2 + $0x1e8] sm:$0xff]  }
 0x111   : > { %10997 = vmatmul.mubr.bf16.vlgmr.msra.gmra.mrb[16].mxu0 %v13361_v38  ;;  %v13430_v16 = vpack.c.bf16 %v2319_v10, %v2318_v9  ;;  %v13493_v9 = vpack.c.bf16 %v854_v5, %v853_v4  ;;  %v12893_v53 = vld [vmem:[%s14738_s2 + $0xc8] sm:$0xff]  }
 0x112   : > { %11029 = vmatpush3.bf16.msra.mxu0 %v12868_v33  ;;  %11000 = vmatprep.mubr.bf16.mxu0 %v13367_v40  ;;  %v12883_v33 = vld [vmem:[%s14738_s2 + $0xa0] sm:$0xff]   ;;  %v2915_v5 = vld [vmem:[#allocation3 + $0x49] sm:$0xff] }
 0x113   : > { %11030 = vmatprep.subr.bf16.mxu0 %v12870_v39 }
 0x116   : > { %11031 = vmatpush3.bf16.msra.mxu0 %v12870_v39  ;;  %v2326_v39 = vld [vmem:[#allocation3 + $0x152] sm:$0xff] }
 0x117   : > { %10777 = vmatmul.mubr.bf16.gmra.mrb[36].mxu1 %v13315_v13  ;;  %11032 = vmatprep.subr.bf16.mxu0 %v12872_v41 }
 0x118   : > { %10780 = vmatprep.mubr.bf16.mxu1 %v13315_v13  ;;  %v2320_v13 = vld [vmem:[#allocation3 + $0x10a] sm:$0xff] }
 0x119   : > { %11001 = vmatmul.mubr.bf16.gmra.mrb[20].mxu0 %v13375_v46  ;;  %v13435_v17 = vpack.c.bf16 %v2321_v14, %v2320_v13  ;;  %v857_v13 = vld [vmem:[#allocation3 + $0x108] sm:$0xff]  ;;  %v858_v14 = vld [vmem:[#allocation3 + $0x110] sm:$0xff] }
 0x11a   : > { %11004 = vmatprep.mubr.bf16.mxu0 %v13381_v48  ;;  %11033 = vmatpush3.bf16.msra.mxu0 %v12872_v41  ;;  %v2327_v41 = vld [vmem:[#allocation3 + $0x15a] sm:$0xff] }
 0x11b   : > { %11034 = vmatprep.subr.bf16.mxu0 %v12874_v47 }
 0x11e   : > { %11035 = vmatpush3.bf16.msra.mxu0 %v12874_v47  ;;  %v13465_v47 = vpack.c.bf16 %v848_v37, %v847_v36  ;;  %v1382_v36 = vld [vmem:[#allocation3 + $0x2] sm:$0xff]  ;;  %v1383_v37 = vld [vmem:[#allocation3 + $0xa] sm:$0xff] }
 0x11f   : > { %10781 = vmatmul.mubr.bf16.gmra.mrb[40].mxu1 %v13333_v26  ;;  %11036 = vmatprep.subr.bf16.mxu0 %v12876_v49  ;;  %v1414_v44 = vpack.c.bf16 %v1383_v37, %v1382_v36  ;;  %v12909_v37 = vld [vmem:[%s14738_s2 + $0x230] sm:$0xff]  }
 0x120   : > { %10784 = vmatprep.mubr.bf16.mxu1 %v13333_v26  ;;  %v2324_v26 = vld [vmem:[#allocation3 + $0x13a] sm:$0xff] }
 0x121   : > { %11005 = vmatmul.mubr.bf16.gmra.mrb[24].mxu0 %v13389_v54 }
 0x122   : > { %11008 = vmatprep.mubr.bf16.mxu0 %v13395_v56  ;;  %11037 = vmatpush3.bf16.msra.mxu0 %v12876_v49  ;;  %v13468_v49 = vpack.c.bf16 %v2327_v41, %v2326_v39  ;;  %v865_v39 = vld [vmem:[#allocation3 + $0x168] sm:$0xff]  ;;  %v866_v41 = vld [vmem:[#allocation3 + $0x170] sm:$0xff] }
 0x123   : > { %11038 = vmatprep.subr.bf16.mxu0 %v12878_v55 }
 0x126   : > { %11039 = vmatpush3.bf16.msra.mxu0 %v12878_v55  ;;  %v851_v55 = vld [vmem:[#allocation3 + $0xc0] sm:$0xff] }
 0x127   : > { %10785 = vmatmul.mubr.bf16.gmra.mrb[44].mxu1 %v946_v29  ;;  %11040 = vmatprep.subr.bf16.mxu0 %v12880_v58  ;;  %v13447_v29 = vpack.c.bf16 %v844_v22, %v843_v21  ;;  %v13483_v63 = vpack.c.bf16 %v852_v57, %v851_v55  ;;  %v13509_v21 = vpack.c.bf16 %v858_v14, %v857_v13  ;;  %v12895_v55 = vld [vmem:[%s14738_s2 + $0xd0] sm:$0xff]   ;;  %v2635_v57 = vld [vmem:[#allocation3 + $0x180] sm:$0xff] }
 0x128   : > { %10804 = vmatprep.mubr.bf16.mxu1 %v867_v62  ;;  %v12889_v62 = vld [vmem:[%s14738_s2 + $0xb8] sm:$0xff]   ;;  %v12904_v14 = vld [vmem:[%s14738_s2 + $0x210] sm:$0xff]  }
 0x129   : > { %11009 = vmatmul.mubr.bf16.gmra.mrb[28].mxu0 %v13408_v1 }
 0x12a   : > { %11012 = vmatprep.mubr.bf16.mxu0 %v13413_v3  ;;  %11041 = vmatpush3.bf16.msra.mxu0 %v12880_v58  ;;  %v2330_v58 = vld [vmem:[#allocation3 + $0x182] sm:$0xff] }
 0x12b   : > { %11042 = vmatprep.subr.bf16.mxu0 %v12882_v2  ;;  %v2347_v0 = vpack.c.bf16 %v2331_v59, %v2330_v58  ;;  %v2636_v58 = vld [vmem:[#allocation3 + $0x188] sm:$0xff]  ;;  %v12903_v59 = vld [vmem:[%s14738_s2 + $0xf0] sm:$0xff]  }
 0x12e   : > { %11043 = vmatpush3.bf16.msra.mxu0 %v12882_v2  ;;  %v13490_v2 = vld [vmem:[%s14738_s2 + $0xc0] sm:$0xff]  }
 0x12f   : > { %10805 = vmatmul.mubr.bf16.vlgmr.msra.gmra.mrb[16].mxu1 %v13425_v11  ;;  %11076 = vmatprep.subr.bf16.mxu0 %v13423_v7 }
 0x130   : > { %10808 = vmatprep.mubr.bf16.mxu1 %v13427_v15  ;;  %10837 = vmatpush3.bf16.msra.mxu1 %v13353_v32  ;;  %v13453_v32 = vpack.c.bf16 %v2325_v27, %v2324_v26  ;;  %v863_v26 = vld [vmem:[#allocation3 + $0x150] sm:$0xff]  ;;  %v864_v27 = vld [vmem:[#allocation3 + $0x158] sm:$0xff] }
 0x131   : > { %11013 = vmatmul.mubr.bf16.gmra.mrb[32].mxu0 %v13430_v16  ;;  %10838 = vmatprep.subr.bf16.mxu1 %v12877_v6  ;;  %v13525_v34 = vpack.c.bf16 %v864_v27, %v863_v26  ;;  %v2923_v26 = vld [vmem:[#allocation3 + $0xa9] sm:$0xff]  ;;  %v2924_v27 = vld [vmem:[#allocation3 + $0xb1] sm:$0xff] }
 0x132   : > { %11016 = vmatprep.mubr.bf16.mxu0 %v13435_v17 }
 0x134   : > { %10839 = vmatpush3.bf16.msra.mxu1 %v12877_v6  ;;  %v855_v6 = vld [vmem:[#allocation3 + $0xf0] sm:$0xff] }
 0x135   : > { %10840 = vmatprep.subr.bf16.mxu1 %v12879_v18  ;;  %v13496_v10 = vpack.c.bf16 %v856_v8, %v855_v6  ;;  %v2916_v6 = vld [vmem:[#allocation3 + $0x51] sm:$0xff]  ;;  %v2918_v8 = vld [vmem:[#allocation3 + $0x69] sm:$0xff] }
 0x137   : > { %10809 = vmatmul.mubr.bf16.gmra.mrb[20].mxu1 %v13442_v25 }
 0x138   : > { %10812 = vmatprep.mubr.bf16.mxu1 %v13447_v29  ;;  %10841 = vmatpush3.bf16.msra.mxu1 %v12879_v18  ;;  %v859_v18 = vld [vmem:[#allocation3 + $0x120] sm:$0xff] }
 0x139   : > { %11017 = vmatmul.mubr.bf16.gmra.mrb[36].mxu0 %v13450_v30  ;;  %10842 = vmatprep.subr.bf16.mxu1 %v12881_v28  ;;  %v13511_v22 = vpack.c.bf16 %v860_v19, %v859_v18  ;;  %v2919_v18 = vld [vmem:[#allocation3 + $0x79] sm:$0xff]  ;;  %v2920_v19 = vld [vmem:[#allocation3 + $0x81] sm:$0xff] }
 0x13a   : > { %11020 = vmatprep.mubr.bf16.mxu0 %v13453_v32 }
 0x13c   : > { %10843 = vmatpush3.bf16.msra.mxu1 %v12881_v28  ;;  %v12892_v28 = vld [vmem:[%s14738_s2 + $0x1e0] sm:$0xff]  }
 0x13d   : > { %10844 = vmatprep.subr.bf16.mxu1 %v12883_v33 }
 0x13f   : > { %10813 = vmatmul.mubr.bf16.gmra.mrb[24].mxu1 %v13460_v42 }
 0x140   : > { %10816 = vmatprep.mubr.bf16.mxu1 %v13465_v47  ;;  %10845 = vmatpush3.bf16.msra.mxu1 %v12883_v33  ;;  %v13523_v33 = vpack.c.bf16 %v862_v24, %v861_v23  ;;  %v12907_v24 = vld [vmem:[%s14738_s2 + $0x220] sm:$0xff]  }
 0x141   : > { %11021 = vmatmul.mubr.bf16.gmra.mrb[40].mxu0 %v13468_v49  ;;  %10846 = vmatprep.subr.bf16.mxu1 %v12885_v45 }
 0x142   : > { %11024 = vmatprep.mubr.bf16.mxu0 %v13471_v50 }
 0x144   : > { %10847 = vmatpush3.bf16.msra.mxu1 %v12885_v45  ;;  %v13537_v45 = vpack.c.bf16 %v866_v41, %v865_v39  ;;  %v2927_v39 = vld [vmem:[#allocation3 + $0xd9] sm:$0xff]  ;;  %v2928_v41 = vld [vmem:[#allocation3 + $0xe1] sm:$0xff] }
 0x145   : > { %10848 = vmatprep.subr.bf16.mxu1 %v12887_v51 }
 0x147   : > { %10817 = vmatmul.mubr.bf16.gmra.mrb[28].mxu1 %v13478_v60 }
 0x148   : > { %10820 = vmatprep.mubr.bf16.mxu1 %v13483_v63  ;;  %10849 = vmatpush3.bf16.msra.mxu1 %v12887_v51  ;;  %v12898_v51 = vld [vmem:[%s14738_s2 + $0x1f8] sm:$0xff]  }
 0x149   : > { %11025 = vmatmul.mubr.bf16.gmra.mrb[44].mxu0 %v2347_v0  ;;  %10850 = vmatprep.subr.bf16.mxu1 %v12889_v62 }
 0x14a   : > { %11044 = vmatprep.mubr.bf16.mxu0 %v13427_v15 }
 0x14c   : > { %10851 = vmatpush3.bf16.msra.mxu1 %v12889_v62  ;;  %v2637_v62 = vld [vmem:[#allocation3 + $0x198] sm:$0xff] }
 0x14d   : > { %10884 = vmatprep.subr.bf16.mxu1 %v13490_v2  ;;  %v2654_v0 = vpack.c.bf16 %v13402_v61, %v2637_v62  ;;  %v2917_v61 = vld [vmem:[#allocation3 + $0x61] sm:$0xff] }
 0x14e   : > { %v2947_v13 = vpack.c.bf16 %v2918_v8, %v2917_v61  ;;  %v2943_v61 = vld [vmem:[#allocation3 + $0x199] sm:$0xff]  ;;  %v2944_v8 = vld [vmem:[#allocation3 + $0x1a1] sm:$0xff] }
 0x14f   : > { %10821 = vmatmul.mubr.bf16.gmra.mrb[32].mxu1 %v13493_v9 }
 0x150   : > { %10824 = vmatprep.mubr.bf16.mxu1 %v13496_v10 }
 0x151   : > { %11045 = vmatmul.mubr.bf16.vlgmr.msra.gmra.mrb[16].mxu0 %v13442_v25 }
 0x152   : > { %11077 = vmatpush3.bf16.msra.mxu0 %v13423_v7  ;;  %11048 = vmatprep.mubr.bf16.mxu0 %v13447_v29  ;;  %v12890_v7 = vld [vmem:[%s14738_s2 + $0x1d8] sm:$0xff]  }
 0x153   : > { %11078 = vmatprep.subr.bf16.mxu0 %v12886_v12 }
 0x156   : > { %11079 = vmatpush3.bf16.msra.mxu0 %v12886_v12  ;;  %v13590_v12 = vld [vmem:[%s14738_s2 + $0x100] sm:$0xff]  }
 0x157   : > { %10825 = vmatmul.mubr.bf16.gmra.mrb[36].mxu1 %v13509_v21  ;;  %11080 = vmatprep.subr.bf16.mxu0 %v12888_v20 }
 0x158   : > { %10828 = vmatprep.mubr.bf16.mxu1 %v13511_v22 }
 0x159   : > { %11049 = vmatmul.mubr.bf16.gmra.mrb[20].mxu0 %v13460_v42 }
 0x15a   : > { %11052 = vmatprep.mubr.bf16.mxu0 %v13465_v47  ;;  %11081 = vmatpush3.bf16.msra.mxu0 %v12888_v20  ;;  %v2921_v20 = vld [vmem:[#allocation3 + $0x91] sm:$0xff] }
 0x15b   : > { %11082 = vmatprep.subr.bf16.mxu0 %v12890_v7 }
 0x15e   : > { %11083 = vmatpush3.bf16.msra.mxu0 %v12890_v7  ;;  %v2948_v7 = vpack.c.bf16 %v2920_v19, %v2919_v18  ;;  %v3222_v18 = vld [vmem:[#allocation3 + $0x52] sm:$0xff]  ;;  %v3223_v19 = vld [vmem:[#allocation3 + $0x62] sm:$0xff] }
 0x15f   : > { %10829 = vmatmul.mubr.bf16.gmra.mrb[40].mxu1 %v13523_v33  ;;  %11084 = vmatprep.subr.bf16.mxu0 %v12892_v28 }
 0x160   : > { %10832 = vmatprep.mubr.bf16.mxu1 %v13525_v34 }
 0x161   : > { %11053 = vmatmul.mubr.bf16.gmra.mrb[24].mxu0 %v13478_v60 }
 0x162   : > { %11056 = vmatprep.mubr.bf16.mxu0 %v13483_v63  ;;  %11085 = vmatpush3.bf16.msra.mxu0 %v12892_v28  ;;  %v2926_v28 = vld [vmem:[#allocation3 + $0xc9] sm:$0xff] }
 0x163   : > { %11086 = vmatprep.subr.bf16.mxu0 %v12894_v35 }
 0x166   : > { %11087 = vmatpush3.bf16.msra.mxu0 %v12894_v35  ;;  %v2950_v35 = vpack.c.bf16 %v2924_v27, %v2923_v26  ;;  %v3229_v27 = vld [vmem:[#allocation3 + $0xaa] sm:$0xff] }
 0x167   : > { %10833 = vmatmul.mubr.bf16.gmra.mrb[44].mxu1 %v13537_v45  ;;  %11088 = vmatprep.subr.bf16.mxu0 %v12896_v43 }
 0x168   : > { %10852 = vmatprep.mubr.bf16.mxu1 %v1414_v44  ;;  %v13618_v44 = vpack.c.bf16 %v2928_v41, %v2927_v39  ;;  %v3237_v41 = vld [vmem:[#allocation3 + $0x10a] sm:$0xff] }
 0x169   : > { %11057 = vmatmul.mubr.bf16.gmra.mrb[28].mxu0 %v13493_v9 }
 0x16a   : > { %11060 = vmatprep.mubr.bf16.mxu0 %v13496_v10  ;;  %11089 = vmatpush3.bf16.msra.mxu0 %v12896_v43  ;;  %v2930_v43 = vld [vmem:[#allocation3 + $0xf9] sm:$0xff] }
 0x16b   : > { %11090 = vmatprep.subr.bf16.mxu0 %v12898_v51 }
 0x16e   : > { %11091 = vmatpush3.bf16.msra.mxu0 %v12898_v51 }
 0x16f   : > { %10853 = vmatmul.mubr.bf16.vlgmr.msra.gmra.mrb[16].mxu1 %v13347_v31  ;;  %11124 = vmatprep.subr.bf16.mxu0 %v12900_v52  ;;  %v12897_v31 = vld [vmem:[%s14738_s2 + $0xd8] sm:$0xff]  }
 0x170   : > { %10856 = vmatprep.mubr.bf16.mxu1 %v13361_v38  ;;  %10885 = vmatpush3.bf16.msra.mxu1 %v13490_v2  ;;  %v12899_v38 = vld [vmem:[%s14738_s2 + $0xe0] sm:$0xff]  }
 0x171   : > { %11061 = vmatmul.mubr.bf16.gmra.mrb[32].mxu0 %v13509_v21  ;;  %10886 = vmatprep.subr.bf16.mxu1 %v12893_v53  ;;  %v2914_v2 = vld [vmem:[#allocation3 + $0x39] sm:$0xff] }
 0x172   : > { %11064 = vmatprep.mubr.bf16.mxu0 %v13511_v22 }
 0x174   : > { %10887 = vmatpush3.bf16.msra.mxu1 %v12893_v53  ;;  %v2932_v53 = vld [vmem:[#allocation3 + $0x111] sm:$0xff] }
 0x175   : > { %10888 = vmatprep.subr.bf16.mxu1 %v12895_v55 }
 0x177   : > { %10857 = vmatmul.mubr.bf16.gmra.mrb[20].mxu1 %v13367_v40  ;;  %v12901_v40 = vld [vmem:[%s14738_s2 + $0xe8] sm:$0xff]  }
 0x178   : > { %10860 = vmatprep.mubr.bf16.mxu1 %v13375_v46  ;;  %10889 = vmatpush3.bf16.msra.mxu1 %v12895_v55  ;;  %v13574_v46 = vpack.c.bf16 %v2636_v58, %v2635_v57  ;;  %v2934_v55 = vld [vmem:[#allocation3 + $0x129] sm:$0xff]  ;;  %v2935_v57 = vld [vmem:[#allocation3 + $0x139] sm:$0xff]  ;;  %v2937_v58 = vld [vmem:[#allocation3 + $0x151] sm:$0xff] }
 0x179   : > { %11065 = vmatmul.mubr.bf16.gmra.mrb[36].mxu0 %v13523_v33  ;;  %10890 = vmatprep.subr.bf16.mxu1 %v12897_v31 }
 0x17a   : > { %11068 = vmatprep.mubr.bf16.mxu0 %v13525_v34 }
 0x17c   : > { %10891 = vmatpush3.bf16.msra.mxu1 %v12897_v31 }
 0x17d   : > { %10892 = vmatprep.subr.bf16.mxu1 %v12899_v38 }
 0x17f   : > { %10861 = vmatmul.mubr.bf16.gmra.mrb[24].mxu1 %v13381_v48  ;;  %v12905_v48 = vld [vmem:[%s14738_s2 + $0xf8] sm:$0xff]  }
 0x180   : > { %10864 = vmatprep.mubr.bf16.mxu1 %v13389_v54  ;;  %10893 = vmatpush3.bf16.msra.mxu1 %v12899_v38  ;;  %v2913_v54 = vld [vmem:[#allocation3 + $0x31] sm:$0xff]  ;;  %v13057_v38 = vld [vmem:[%s14738_s2 + $0x108] sm:$0xff]  }
 0x181   : > { %11069 = vmatmul.mubr.bf16.gmra.mrb[40].mxu0 %v13537_v45  ;;  %10894 = vmatprep.subr.bf16.mxu1 %v12901_v40  ;;  %v2945_v4 = vpack.c.bf16 %v2914_v2, %v2913_v54  ;;  %v2939_v2 = vld [vmem:[#allocation3 + $0x169] sm:$0xff] }
 0x182   : > { %11072 = vmatprep.mubr.bf16.mxu0 %v13574_v46  ;;  %v2942_v54 = vld [vmem:[#allocation3 + $0x189] sm:$0xff] }
 0x184   : > { %10895 = vmatpush3.bf16.msra.mxu1 %v12901_v40  ;;  %v2938_v40 = vld [vmem:[#allocation3 + $0x159] sm:$0xff] }
 0x185   : > { %10896 = vmatprep.subr.bf16.mxu1 %v12903_v59  ;;  %v13647_v62 = vpack.c.bf16 %v2938_v40, %v2937_v58  ;;  %v3249_v40 = vld [vmem:[#allocation3 + $0x19a] sm:$0xff] }
 0x187   : > { %10865 = vmatmul.mubr.bf16.gmra.mrb[28].mxu1 %v13395_v56  ;;  %v2946_v56 = vpack.c.bf16 %v2916_v6, %v2915_v5  ;;  %v13061_v6 = vld [vmem:[%s14738_s2 + $0x128] sm:$0xff]  }
 0x188   : > { %10868 = vmatprep.mubr.bf16.mxu1 %v13408_v1  ;;  %10897 = vmatpush3.bf16.msra.mxu1 %v12903_v59  ;;  %v12902_v1 = vld [vmem:[%s14738_s2 + $0x208] sm:$0xff]  }
 0x189   : > { %11073 = vmatmul.mubr.bf16.gmra.mrb[44].mxu0 %v2654_v0  ;;  %10898 = vmatprep.subr.bf16.mxu1 %v12905_v48  ;;  %v13059_v0 = vld [vmem:[%s14738_s2 + $0x118] sm:$0xff]  }
 0x18a   : > { %11092 = vmatprep.mubr.bf16.mxu0 %v2945_v4 }
 0x18c   : > { %10899 = vmatpush3.bf16.msra.mxu1 %v12905_v48  ;;  %v2940_v48 = vld [vmem:[#allocation3 + $0x171] sm:$0xff] }
 0x18d   : > { %12036 = vmatprep.subr.bf16.mxu1 %v13590_v12  ;;  %v13658_v4 = vpack.c.bf16 %v2940_v48, %v2939_v2  ;;  %v12914_v2 = vld [vmem:[%s14740_s4 + $0x58] sm:$0xff]   ;;  %v12915_v48 = vld [vmem:[%s14740_s4 + $0x60] sm:$0xff]  }
 0x18f   : > { %10869 = vmatmul.mubr.bf16.gmra.mrb[32].mxu1 %v13413_v3  ;;  %v2922_v3 = vld [vmem:[#allocation3 + $0x99] sm:$0xff] }
 0x190   : > { %10872 = vmatprep.mubr.bf16.mxu1 %v13430_v16  ;;  %v12906_v16 = vld [vmem:[%s14738_s2 + $0x218] sm:$0xff]   ;;  %v2949_v23 = vpack.c.bf16 %v2922_v3, %v2921_v20  ;;  %v3224_v20 = vld [vmem:[#allocation3 + $0x6a] sm:$0xff] }
 0x191   : > { %11093 = vmatmul.mubr.bf16.vlgmr.msra.gmra.mrb[16].mxu0 %v2946_v56  ;;  %v3220_v56 = vld [vmem:[#allocation3 + $0x3a] sm:$0xff] }
 0x192   : > { %11125 = vmatpush3.bf16.msra.mxu0 %v12900_v52  ;;  %11096 = vmatprep.mubr.bf16.mxu0 %v2947_v13  ;;  %v2931_v52 = vld [vmem:[#allocation3 + $0x109] sm:$0xff]  ;;  %v13063_v13 = vld [vmem:[%s14738_s2 + $0x138] sm:$0xff]  }
 0x193   : > { %11126 = vmatprep.subr.bf16.mxu0 %v12902_v1  ;;  %v13629_v31 = vpack.c.bf16 %v2932_v53, %v2931_v52  ;;  %v3241_v52 = vld [vmem:[#allocation3 + $0x13a] sm:$0xff]  ;;  %v3243_v53 = vld [vmem:[#allocation3 + $0x152] sm:$0xff] }
 0x196   : > { %11127 = vmatpush3.bf16.msra.mxu0 %v12902_v1 }
 0x197   : > { %10873 = vmatmul.mubr.bf16.gmra.mrb[36].mxu1 %v13435_v17  ;;  %11128 = vmatprep.subr.bf16.mxu0 %v12904_v14  ;;  %v2925_v17 = vld [vmem:[#allocation3 + $0xc1] sm:$0xff] }
 0x198   : > { %10876 = vmatprep.mubr.bf16.mxu1 %v13450_v30  ;;  %v12908_v30 = vld [vmem:[%s14738_s2 + $0x228] sm:$0xff]   ;;  %v2951_v36 = vpack.c.bf16 %v2926_v28, %v2925_v17 }
 0x199   : > { %11097 = vmatmul.mubr.bf16.gmra.mrb[20].mxu0 %v2948_v7  ;;  %v3226_v7 = vld [vmem:[#allocation3 + $0x82] sm:$0xff]  ;;  %v3232_v28 = vld [vmem:[#allocation3 + $0xca] sm:$0xff] }
 0x19a   : > { %11100 = vmatprep.mubr.bf16.mxu0 %v2949_v23  ;;  %11129 = vmatpush3.bf16.msra.mxu0 %v12904_v14  ;;  %v3221_v14 = vld [vmem:[#allocation3 + $0x4a] sm:$0xff]  ;;  %v3228_v23 = vld [vmem:[#allocation3 + $0x9a] sm:$0xff]  ;;  %v3231_v17 = vld [vmem:[#allocation3 + $0xc2] sm:$0xff] }
 0x19b   : > { %11130 = vmatprep.subr.bf16.mxu0 %v12906_v16  ;;  %v3252_v3 = vpack.c.bf16 %v3222_v18, %v3221_v14 }
 0x19e   : > { %11131 = vmatpush3.bf16.msra.mxu0 %v12906_v16  ;;  %v3227_v16 = vld [vmem:[#allocation3 + $0x92] sm:$0xff] }
 0x19f   : > { %10877 = vmatmul.mubr.bf16.gmra.mrb[40].mxu1 %v13453_v32  ;;  %11132 = vmatprep.subr.bf16.mxu0 %v12907_v24  ;;  %v2929_v32 = vld [vmem:[#allocation3 + $0xf1] sm:$0xff]  ;;  %v3255_v26 = vpack.c.bf16 %v3228_v23, %v3227_v16 }
 0x1a0   : > { %10880 = vmatprep.mubr.bf16.mxu1 %v13468_v49  ;;  %v12910_v49 = vld [vmem:[%s14738_s2 + $0x238] sm:$0xff]   ;;  %v13624_v51 = vpack.c.bf16 %v2930_v43, %v2929_v32  ;;  %v3239_v32 = vld [vmem:[#allocation3 + $0x122] sm:$0xff]  ;;  %v3240_v43 = vld [vmem:[#allocation3 + $0x12a] sm:$0xff] }
 0x1a1   : > { %11101 = vmatmul.mubr.bf16.gmra.mrb[24].mxu0 %v2950_v35  ;;  %v3257_v35 = vpack.c.bf16 %v3232_v28, %v3231_v17 }
 0x1a2   : > { %11104 = vmatprep.mubr.bf16.mxu0 %v2951_v36  ;;  %11133 = vmatpush3.bf16.msra.mxu0 %v12907_v24  ;;  %v3235_v36 = vld [vmem:[#allocation3 + $0xf2] sm:$0xff] }
 0x1a3   : > { %11134 = vmatprep.subr.bf16.mxu0 %v12908_v30 }
 0x1a6   : > { %11135 = vmatpush3.bf16.msra.mxu0 %v12908_v30  ;;  %v3233_v30 = vld [vmem:[#allocation3 + $0xda] sm:$0xff] }
 0x1a7   : > { %10881 = vmatmul.mubr.bf16.gmra.mrb[44].mxu1 %v13471_v50  ;;  %11136 = vmatprep.subr.bf16.mxu0 %v12909_v37  ;;  %v2933_v50 = vld [vmem:[#allocation3 + $0x121] sm:$0xff] }
 0x1a8   : > { %10900 = vmatprep.mubr.bf16.mxu1 %v13425_v11  ;;  %v13633_v11 = vpack.c.bf16 %v2934_v55, %v2933_v50  ;;  %v3244_v50 = vld [vmem:[#allocation3 + $0x15a] sm:$0xff] }
 0x1a9   : > { %11105 = vmatmul.mubr.bf16.gmra.mrb[28].mxu0 %v13618_v44  ;;  %v3263_v55 = vpack.c.bf16 %v3244_v50, %v3243_v53 }
 0x1aa   : > { %11108 = vmatprep.mubr.bf16.mxu0 %v13624_v51  ;;  %11137 = vmatpush3.bf16.msra.mxu0 %v12909_v37  ;;  %v3236_v37 = vld [vmem:[#allocation3 + $0xfa] sm:$0xff] }
 0x1ab   : > { %11138 = vmatprep.subr.bf16.mxu0 %v12910_v49  ;;  %v3259_v39 = vpack.c.bf16 %v3236_v37, %v3235_v36 }
 0x1ae   : > { %11139 = vmatpush3.bf16.msra.mxu0 %v12910_v49  ;;  %v3261_v49 = vpack.c.bf16 %v3240_v43, %v3239_v32 }
 0x1af   : > { %10901 = vmatmul.mubr.bf16.vlgmr.msra.gmra.mrb[16].mxu1 %v13427_v15  ;;  %v2936_v15 = vld [vmem:[#allocation3 + $0x141] sm:$0xff] }
 0x1b0   : > { %10904 = vmatprep.mubr.bf16.mxu1 %v13442_v25  ;;  %12044 = vmatpush3.bf16.msra.mxu1 %v13590_v12  ;;  %v13058_v25 = vld [vmem:[%s14738_s2 + $0x110] sm:$0xff]   ;;  %v13644_v59 = vpack.c.bf16 %v2936_v15, %v2935_v57  ;;  %v3247_v57 = vld [vmem:[#allocation3 + $0x182] sm:$0xff] }
 0x1b1   : > { %11109 = vmatmul.mubr.bf16.gmra.mrb[32].mxu0 %v13629_v31  ;;  %12037 = vmatprep.subr.bf16.mxu1 %v13057_v38  ;;  %v3219_v12 = vld [vmem:[#allocation3 + $0x32] sm:$0xff]  ;;  %v3248_v15 = vld [vmem:[#allocation3 + $0x18a] sm:$0xff] }
 0x1b2   : > { %11112 = vmatprep.mubr.bf16.mxu0 %v13633_v11  ;;  %v3251_v1 = vpack.c.bf16 %v3220_v56, %v3219_v12  ;;  %v3265_v58 = vpack.c.bf16 %v3248_v15, %v3247_v57 }
 0x1b4   : > { %12045 = vmatpush3.bf16.msra.mxu1 %v13057_v38  ;;  %v3245_v38 = vld [vmem:[#allocation3 + $0x16a] sm:$0xff] }
 0x1b5   : > { %12038 = vmatprep.subr.bf16.mxu1 %v13058_v25 }
 0x1b7   : > { %10905 = vmatmul.mubr.bf16.gmra.mrb[20].mxu1 %v13447_v29  ;;  %v2941_v29 = vld [vmem:[#allocation3 + $0x181] sm:$0xff] }
 0x1b8   : > { %10908 = vmatprep.mubr.bf16.mxu1 %v13460_v42  ;;  %12046 = vmatpush3.bf16.msra.mxu1 %v13058_v25  ;;  %v13060_v42 = vld [vmem:[%s14738_s2 + $0x120] sm:$0xff]   ;;  %v13661_v5 = vpack.c.bf16 %v2942_v54, %v2941_v29  ;;  %v12916_v29 = vld [vmem:[%s14740_s4 + $0x68] sm:$0xff]   ;;  %v12917_v54 = vld [vmem:[%s14740_s4 + $0x70] sm:$0xff]  }
 0x1b9   : > { %11113 = vmatmul.mubr.bf16.gmra.mrb[36].mxu0 %v13644_v59  ;;  %12039 = vmatprep.subr.bf16.mxu1 %v13059_v0 }
 0x1ba   : > { %11116 = vmatprep.mubr.bf16.mxu0 %v13647_v62 }
 0x1bc   : > { %12047 = vmatpush3.bf16.msra.mxu1 %v13059_v0  ;;  %v12913_v0 = vld [vmem:[%s14740_s4 + $0x50] sm:$0xff]  }
 0x1bd   : > { %12040 = vmatprep.subr.bf16.mxu1 %v13060_v42 }
 0x1bf   : > { %10909 = vmatmul.mubr.bf16.gmra.mrb[24].mxu1 %v13465_v47  ;;  %v2960_v47 = vpack.c.bf16 %v2944_v8, %v2943_v61 }
 0x1c0   : > { %10912 = vmatprep.mubr.bf16.mxu1 %v13478_v60  ;;  %12048 = vmatpush3.bf16.msra.mxu1 %v13060_v42  ;;  %v13062_v60 = vld [vmem:[%s14738_s2 + $0x130] sm:$0xff]   ;;  %v12918_v42 = vld [vmem:[%s14740_s4 + $0x78] sm:$0xff]  }
 0x1c1   : > { %11117 = vmatmul.mubr.bf16.gmra.mrb[40].mxu0 %v13658_v4  ;;  %12041 = vmatprep.subr.bf16.mxu1 %v13061_v6 }
 0x1c2   : > { %11120 = vmatprep.mubr.bf16.mxu0 %v13661_v5 }
 0x1c4   : > { %12049 = vmatpush3.bf16.msra.mxu1 %v13061_v6  ;;  %v12919_v6 = vld [vmem:[%s14740_s4] sm:$0xff]  }
 0x1c5   : > { %12042 = vmatprep.subr.bf16.mxu1 %v13062_v60 }
 0x1c7   : > { %10913 = vmatmul.mubr.bf16.gmra.mrb[28].mxu1 %v13483_v63  ;;  %v3253_v63 = vpack.c.bf16 %v3224_v20, %v3223_v19 }
 0x1c8   : > { %10916 = vmatprep.mubr.bf16.mxu1 %v13493_v9  ;;  %12050 = vmatpush3.bf16.msra.mxu1 %v13062_v60  ;;  %v3225_v9 = vld [vmem:[#allocation3 + $0x7a] sm:$0xff] }
 0x1c9   : > { %11121 = vmatmul.mubr.bf16.gmra.mrb[44].mxu0 %v2960_v47  ;;  %12043 = vmatprep.subr.bf16.mxu1 %v13063_v13  ;;  %v3254_v24 = vpack.c.bf16 %v3226_v7, %v3225_v9 }
 0x1ca   : > { %11140 = vmatprep.mubr.bf16.mxu0 %v3251_v1 }
 0x1cc   : > { %12051 = vmatpush3.bf16.msra.mxu1 %v13063_v13 }
 0x1cf   : > { %10917 = vmatmul.mubr.bf16.gmra.mrb[32].mxu1 %v13496_v10  ;;  %v3230_v10 = vld [vmem:[#allocation3 + $0xb2] sm:$0xff] }
 0x1d0   : > { %10920 = vmatprep.mubr.bf16.mxu1 %v13509_v21  ;;  %v3256_v21 = vpack.c.bf16 %v3230_v10, %v3229_v27 }
 0x1d1   : > { %11141 = vmatmul.mubr.bf16.vlgmr.msra.gmra.mrb[16].mxu0 %v3252_v3 }
 0x1d2   : > { %11144 = vmatprep.mubr.bf16.mxu0 %v3253_v63 }
 0x1d7   : > { %10921 = vmatmul.mubr.bf16.gmra.mrb[36].mxu1 %v13511_v22  ;;  %v3234_v22 = vld [vmem:[#allocation3 + $0xe2] sm:$0xff] }
 0x1d8   : > { %10924 = vmatprep.mubr.bf16.mxu1 %v13523_v33  ;;  %v3258_v33 = vpack.c.bf16 %v3234_v22, %v3233_v30 }
 0x1d9   : > { %11145 = vmatmul.mubr.bf16.gmra.mrb[20].mxu0 %v3254_v24  ;;  %v13731_v24 = vld [vmem:[%s14739_s3] ss:$0 sm:$0xff] }
 0x1da   : > { %11148 = vmatprep.mubr.bf16.mxu0 %v3255_v26 }
 0x1df   : > { %10925 = vmatmul.mubr.bf16.gmra.mrb[40].mxu1 %v13525_v34  ;;  %v3238_v34 = vld [vmem:[#allocation3 + $0x112] sm:$0xff] }
 0x1e0   : > { %10928 = vmatprep.mubr.bf16.mxu1 %v13537_v45  ;;  %v3260_v45 = vpack.c.bf16 %v3238_v34, %v3237_v41  ;;  %v12920_v34 = vld [vmem:[%s14740_s4 + $0x8] sm:$0xff]  }
 0x1e1   : > { %11149 = vmatmul.mubr.bf16.gmra.mrb[24].mxu0 %v3256_v21 }
 0x1e2   : > { %11152 = vmatprep.mubr.bf16.mxu0 %v3257_v35 }
 0x1e7   : > { %10929 = vmatmul.mubr.bf16.gmra.mrb[44].mxu1 %v13574_v46  ;;  %v3242_v46 = vld [vmem:[#allocation3 + $0x142] sm:$0xff] }
 0x1e8   : > { %10964 = vmatprep.mubr.bf16.mxu1 %v13618_v44  ;;  %v3262_v44 = vpack.c.bf16 %v3242_v46, %v3241_v52 }
 0x1e9   : > { %11153 = vmatmul.mubr.bf16.gmra.mrb[28].mxu0 %v3258_v33 }
 0x1ea   : > { %11156 = vmatprep.mubr.bf16.mxu0 %v3259_v39 }
 0x1ef   : > { %10965 = vmatmul.mubr.bf16.vlgmr.msra.gmra.mrb[32].mxu1 %v13624_v51  ;;  %v3246_v51 = vld [vmem:[#allocation3 + $0x172] sm:$0xff] }
 0x1f0   : > { %10968 = vmatprep.mubr.bf16.mxu1 %v13629_v31  ;;  %v3264_v31 = vpack.c.bf16 %v3246_v51, %v3245_v38 }
 0x1f1   : > { %11157 = vmatmul.mubr.bf16.gmra.mrb[32].mxu0 %v3260_v45 }
 0x1f2   : > { %11160 = vmatprep.mubr.bf16.mxu0 %v3261_v49 }
 0x1f7   : > { %10969 = vmatmul.mubr.bf16.gmra.mrb[36].mxu1 %v13633_v11  ;;  %v3250_v11 = vld [vmem:[#allocation3 + $0x1a2] sm:$0xff] }
 0x1f8   : > { %10972 = vmatprep.mubr.bf16.mxu1 %v13644_v59  ;;  %v3266_v25 = vpack.c.bf16 %v3250_v11, %v3249_v40  ;;  %v12911_v59 = vld [vmem:[%s14740_s4 + $0x40] sm:$0xff]  }
 0x1f9   : > { %11161 = vmatmul.mubr.bf16.gmra.mrb[36].mxu0 %v3262_v44  ;;  %11172 = vmatprep.subr.bf16.mxu1 %v12911_v59 }
 0x1fa   : > { %11164 = vmatprep.mubr.bf16.mxu0 %v3263_v55  ;;  %11173 = vmatpush3.bf16.msra.mxu1 %v12911_v59  ;;  %v12921_v55 = vld [vmem:[%s14740_s4 + $0x10] sm:$0xff]  }
 0x1ff   : > { %10973 = vmatmul.mubr.bf16.gmra.mrb[40].mxu1 %v13647_v62  ;;  %v12912_v62 = vld [vmem:[%s14740_s4 + $0x48] sm:$0xff]  }
 0x200   : > { %10976 = vmatprep.mubr.bf16.mxu1 %v13658_v4  ;;  %11174 = vmatprep.subr.bf16.mxu1 %v12912_v62  ;;  %v3724_v4 = vld [vmem:[#allocation3 + $0x1] sm:$0xff] }
 0x201   : > { %11165 = vmatmul.mubr.bf16.gmra.mrb[40].mxu0 %v3264_v31  ;;  %11175 = vmatpush3.bf16.msra.mxu1 %v12912_v62 }
 0x202   : > { %11168 = vmatprep.mubr.bf16.mxu0 %v3265_v58  ;;  %11176 = vmatprep.subr.bf16.mxu1 %v12913_v0  ;;  %v12922_v58 = vld [vmem:[%s14740_s4 + $0x18] sm:$0xff]  }
 0x205   : > { %11177 = vmatpush3.bf16.msra.mxu1 %v12913_v0 }
 0x206   : > { %11178 = vmatprep.subr.bf16.mxu1 %v12914_v2 }
 0x207   : > { %10977 = vmatmul.mubr.bf16.gmra.mrb[44].mxu1 %v13661_v5  ;;  %v3725_v5 = vld [vmem:[#allocation3 + $0x9] sm:$0xff] }
 0x208   : > { %v3756_v61 = vpack.c.bf16 %v3725_v5, %v3724_v4 }
 0x209   : > { %11169 = vmatmul.mubr.bf16.gmra.mrb[44].mxu0 %v3266_v25  ;;  %11179 = vmatpush3.bf16.msra.mxu1 %v12914_v2 }
 0x20a   : > { %11180 = vmatprep.subr.bf16.mxu1 %v12915_v48  ;;  %11188 = vmatprep.mubr.bf16.mxu1 %v3756_v61 }
 0x20d   : > { %11181 = vmatpush3.bf16.msra.mxu1 %v12915_v48 }
 0x20e   : > { %11182 = vmatprep.subr.bf16.mxu1 %v12916_v29 }
 0x211   : > { %11183 = vmatpush3.bf16.msra.mxu1 %v12916_v29 }
 0x212   : > { %11184 = vmatprep.subr.bf16.mxu1 %v12917_v54 }
 0x215   : > { %11185 = vmatpush3.bf16.msra.mxu1 %v12917_v54  ;;  %v12923_v54 = vld [vmem:[%s14740_s4 + $0x20] sm:$0xff]  }
 0x216   : > { %11186 = vmatprep.subr.bf16.mxu1 %v12918_v42 }
 0x219   : > { %11187 = vmatpush3.bf16.msra.mxu1 %v12918_v42 }
 0x21a   : > { %11220 = vmatprep.subr.bf16.mxu1 %v12919_v6 }
 0x282   : > { %v10902_v8 = vpop.f32.mrb[16].mxu1 }
 0x283   : > { %v1835_v47 = vpop.f32.mrb[17].mxu1 }
 0x284   : > { %v10903_v12 = vpop.f32.mrb[18].mxu1 }
 0x285   : > { %v1838_v56 = vpop.f32.mrb[19].mxu1 }
 0x28a   : > { %v10906_v60 = vpop.f32.mrb[20].mxu1 }
 0x28b   : > { %v1851_v1 = vpop.f32.mrb[21].mxu1 }
 0x28c   : > { %v10907_v13 = vpop.f32.mrb[22].mxu1 }
 0x28d   : > { %v1854_v14 = vpop.f32.mrb[23].mxu1 }
 0x292   : > { %v10910_v18 = vpop.f32.mrb[24].mxu1 }
 0x293   : > { %v1867_v19 = vpop.f32.mrb[25].mxu1 }
 0x294   : > { %v10911_v20 = vpop.f32.mrb[26].mxu1 }
 0x295   : > { %v13718_v3 = vpop.f32.mrb[27].mxu1 }
 0x29a   : > { %v13720_v63 = vpop.f32.mrb[28].mxu1 }
 0x29b   : > { %v13722_v9 = vpop.f32.mrb[29].mxu1 }
 0x29c   : > { %v13724_v7 = vpop.f32.mrb[30].mxu1 }
 0x29d   : > { %v13726_v16 = vpop.f32.mrb[31].mxu1 }
 0x2a4   : > { %v11142_v23 = vpop.f32.mrb[16].mxu0 }
 0x2a5   : > { %v12052_v26 = vadd.f32 %v11142_v23, %v10902_v8  ;;  %v3366_v27 = vpop.f32.mrb[17].mxu0  ;;  %v12924_v8 = vld [vmem:[%s14740_s4 + $0x28] sm:$0xff]  }
 0x2a6   : > { %v12053_v10 = vadd.f32 %v3366_v27, %v1835_v47  ;;  %v11143_v17 = vpop.f32.mrb[18].mxu0 }
 0x2a7   : > { %v3534_v28 = vadd.f32 %v12052_v26, %v13731_v24  ;;  %v12054_v21 = vadd.f32 %v11143_v17, %v10903_v12  ;;  %v3369_v35 = vpop.f32.mrb[19].mxu0 }
 0x2a8   : > { %v3532_v30 = vadd.f32 %v12053_v10, %v13731_v24  ;;  %v12055_v22 = vadd.f32 %v3369_v35, %v1838_v56  ;;  %v12926_v10 = vld [vmem:[%s14740_s4 + $0x38] sm:$0xff]  }
 0x2a9   : > { %3630 = vst [vmem:[#allocation3 + $0x31] sm:$0xff] %v3534_v28  ;;  %v3535_v36 = vadd.f32 %v12054_v21, %v13731_v24 }
 0x2aa   : > { %3628 = vst [vmem:[#allocation3 + $0x19] sm:$0xff] %v3532_v30  ;;  %v3533_v37 = vadd.f32 %v12055_v22, %v13731_v24 }
 0x2ab   : > { %3631 = vst [vmem:[#allocation3 + $0x39] sm:$0xff] %v3535_v36  ;;  %v3758_v33 = vpack.c.bf16 %v3535_v36, %v3534_v28 }
 0x2ac   : > { %3629 = vst [vmem:[#allocation3 + $0x21] sm:$0xff] %v3533_v37  ;;  %v11146_v39 = vpop.f32.mrb[20].mxu0  ;;  %v3757_v41 = vpack.c.bf16 %v3533_v37, %v3532_v30 }
 0x2ad   : > { %v12056_v32 = vadd.f32 %v11146_v39, %v10906_v60  ;;  %v3382_v43 = vpop.f32.mrb[21].mxu0 }
 0x2ae   : > { %v12057_v45 = vadd.f32 %v3382_v43, %v1851_v1  ;;  %v11147_v49 = vpop.f32.mrb[22].mxu0  ;;  %11189 = vmatmul.mubr.bf16.vlgmr.msra.gmra.mrb[48].mxu1 %v3757_v41  ;;  %v13784_v41 = vld [vmem:[%s14740_s4 + $0x80] sm:$0xff]  }
 0x2af   : > { %v3538_v52 = vadd.f32 %v12056_v32, %v13731_v24  ;;  %v12058_v46 = vadd.f32 %v11147_v49, %v10907_v13  ;;  %v3385_v53 = vpop.f32.mrb[23].mxu0  ;;  %11221 = vmatpush3.bf16.msra.mxu1 %v12919_v6  ;;  %11192 = vmatprep.mubr.bf16.mxu1 %v3758_v33 }
 0x2b0   : > { %v3536_v50 = vadd.f32 %v12057_v45, %v13731_v24  ;;  %v12059_v44 = vadd.f32 %v3385_v53, %v1854_v14  ;;  %11222 = vmatprep.subr.bf16.mxu1 %v12920_v34 }
 0x2b1   : > { %3634 = vst [vmem:[#allocation3 + $0x61] sm:$0xff] %v3538_v52  ;;  %v3539_v38 = vadd.f32 %v12058_v46, %v13731_v24 }
 0x2b2   : > { %3632 = vst [vmem:[#allocation3 + $0x49] sm:$0xff] %v3536_v50  ;;  %v3537_v51 = vadd.f32 %v12059_v44, %v13731_v24 }
 0x2b3   : > { %3635 = vst [vmem:[#allocation3 + $0x69] sm:$0xff] %v3539_v38  ;;  %11223 = vmatpush3.bf16.msra.mxu1 %v12920_v34  ;;  %v3760_v57 = vpack.c.bf16 %v3539_v38, %v3538_v52 }
 0x2b4   : > { %3633 = vst [vmem:[#allocation3 + $0x51] sm:$0xff] %v3537_v51  ;;  %v11150_v15 = vpop.f32.mrb[24].mxu0  ;;  %v3759_v31 = vpack.c.bf16 %v3537_v51, %v3536_v50  ;;  %11224 = vmatprep.subr.bf16.mxu1 %v12921_v55 }
 0x2b5   : > { %v12060_v40 = vadd.f32 %v11150_v15, %v10910_v18  ;;  %v3398_v11 = vpop.f32.mrb[25].mxu0 }
 0x2b6   : > { %v12061_v25 = vadd.f32 %v3398_v11, %v1867_v19  ;;  %v11151_v59 = vpop.f32.mrb[26].mxu0  ;;  %11193 = vmatmul.mubr.bf16.gmra.mrb[52].mxu1 %v3759_v31 }
 0x2b7   : > { %v3542_v62 = vadd.f32 %v12060_v40, %v13731_v24  ;;  %v12062_v0 = vadd.f32 %v11151_v59, %v10911_v20  ;;  %v3401_v2 = vpop.f32.mrb[27].mxu0  ;;  %11196 = vmatprep.mubr.bf16.mxu1 %v3760_v57  ;;  %11225 = vmatpush3.bf16.msra.mxu1 %v12921_v55  ;;  %v12925_v20 = vld [vmem:[%s14740_s4 + $0x30] sm:$0xff]  }
 0x2b8   : > { %v3540_v48 = vadd.f32 %v12061_v25, %v13731_v24  ;;  %v12063_v29 = vadd.f32 %v3401_v2, %v13718_v3  ;;  %11226 = vmatprep.subr.bf16.mxu1 %v12922_v58 }
 0x2b9   : > { %3638 = vst [vmem:[#allocation3 + $0x91] sm:$0xff] %v3542_v62  ;;  %v3543_v42 = vadd.f32 %v12062_v0, %v13731_v24 }
 0x2ba   : > { %3636 = vst [vmem:[#allocation3 + $0x79] sm:$0xff] %v3540_v48  ;;  %v3541_v4 = vadd.f32 %v12063_v29, %v13731_v24 }
 0x2bb   : > { %3639 = vst [vmem:[#allocation3 + $0x99] sm:$0xff] %v3543_v42  ;;  %v3762_v5 = vpack.c.bf16 %v3543_v42, %v3542_v62  ;;  %11227 = vmatpush3.bf16.msra.mxu1 %v12922_v58 }
 0x2bc   : > { %3637 = vst [vmem:[#allocation3 + $0x81] sm:$0xff] %v3541_v4  ;;  %v11154_v6 = vpop.f32.mrb[28].mxu0  ;;  %v3761_v61 = vpack.c.bf16 %v3541_v4, %v3540_v48  ;;  %11228 = vmatprep.subr.bf16.mxu1 %v12923_v54 }
 0x2bd   : > { %v12064_v47 = vadd.f32 %v11154_v6, %v13720_v63  ;;  %v3414_v12 = vpop.f32.mrb[29].mxu0 }
 0x2be   : > { %v12065_v56 = vadd.f32 %v3414_v12, %v13722_v9  ;;  %v11155_v60 = vpop.f32.mrb[30].mxu0  ;;  %11197 = vmatmul.mubr.bf16.gmra.mrb[56].mxu1 %v3761_v61 }
 0x2bf   : > { %v3546_v1 = vadd.f32 %v12064_v47, %v13731_v24  ;;  %v12066_v13 = vadd.f32 %v11155_v60, %v13724_v7  ;;  %v3417_v14 = vpop.f32.mrb[31].mxu0  ;;  %11200 = vmatprep.mubr.bf16.mxu1 %v3762_v5  ;;  %11229 = vmatpush3.bf16.msra.mxu1 %v12923_v54 }
 0x2c0   : > { %v3544_v18 = vadd.f32 %v12065_v56, %v13731_v24  ;;  %v12067_v19 = vadd.f32 %v3417_v14, %v13726_v16  ;;  %11230 = vmatprep.subr.bf16.mxu1 %v12924_v8 }
 0x2c1   : > { %3642 = vst [vmem:[#allocation3 + $0xc1] sm:$0xff] %v3546_v1  ;;  %v3547_v3 = vadd.f32 %v12066_v13, %v13731_v24 }
 0x2c2   : > { %3640 = vst [vmem:[#allocation3 + $0xa9] sm:$0xff] %v3544_v18  ;;  %v13772_v63 = vadd.f32 %v12067_v19, %v13731_v24  ;;  %v10966_v9 = vpop.f32.mrb[32].mxu1 }
 0x2c3   : > { %3643 = vst [vmem:[#allocation3 + $0xc9] sm:$0xff] %v3547_v3  ;;  %v2205_v7 = vpop.f32.mrb[33].mxu1  ;;  %v3764_v23 = vpack.c.bf16 %v3547_v3, %v3546_v1  ;;  %11231 = vmatpush3.bf16.msra.mxu1 %v12924_v8 }
 0x2c4   : > { %3641 = vst [vmem:[#allocation3 + $0xb1] sm:$0xff] %v13772_v63  ;;  %v11158_v16 = vpop.f32.mrb[32].mxu0  ;;  %v10967_v26 = vpop.f32.mrb[34].mxu1  ;;  %v3763_v27 = vpack.c.bf16 %v13772_v63, %v3544_v18  ;;  %11232 = vmatprep.subr.bf16.mxu1 %v12925_v20 }
 0x2c5   : > { %v12068_v17 = vadd.f32 %v11158_v16, %v10966_v9  ;;  %v3430_v28 = vpop.f32.mrb[33].mxu0  ;;  %v2208_v21 = vpop.f32.mrb[35].mxu1 }
 0x2c6   : > { %v12069_v35 = vadd.f32 %v3430_v28, %v2205_v7  ;;  %v11159_v30 = vpop.f32.mrb[34].mxu0  ;;  %11201 = vmatmul.mubr.bf16.gmra.mrb[60].mxu1 %v3763_v27 }
 0x2c7   : > { %v3550_v22 = vadd.f32 %v12068_v17, %v13731_v24  ;;  %v12070_v36 = vadd.f32 %v11159_v30, %v10967_v26  ;;  %v3433_v37 = vpop.f32.mrb[35].mxu0  ;;  %11204 = vmatprep.mubr.bf16.mxu1 %v3764_v23  ;;  %11233 = vmatpush3.bf16.msra.mxu1 %v12925_v20 }
 0x2c8   : > { %v3548_v33 = vadd.f32 %v12069_v35, %v13731_v24  ;;  %v12071_v39 = vadd.f32 %v3433_v37, %v2208_v21  ;;  %11234 = vmatprep.subr.bf16.mxu1 %v12926_v10  ;;  %v3660_v35 = vld [vmem:[#allocation3] sm:$0xff] }
 0x2c9   : > { %3646 = vst [vmem:[#allocation3 + $0xf1] sm:$0xff] %v3550_v22  ;;  %v13787_v34 = vadd.f32 %v12070_v36, %v13731_v24  ;;  %v13826_v36 = vld [vmem:[#allocation3 + $0x8] sm:$0xff] }
 0x2ca   : > { %3644 = vst [vmem:[#allocation3 + $0xd9] sm:$0xff] %v3548_v33  ;;  %v3549_v32 = vadd.f32 %v12071_v39, %v13731_v24  ;;  %v10970_v43 = vpop.f32.mrb[36].mxu1  ;;  %v3692_v37 = vpack.c.bf16 %v13826_v36, %v3660_v35 }
 0x2cb   : > { %3647 = vst [vmem:[#allocation3 + $0xf9] sm:$0xff] %v13787_v34  ;;  %v2221_v45 = vpop.f32.mrb[37].mxu1  ;;  %v3766_v49 = vpack.c.bf16 %v13787_v34, %v3550_v22  ;;  %11235 = vmatpush3.bf16.msra.mxu1 %v12926_v10 }
 0x2cc   : > { %3645 = vst [vmem:[#allocation3 + $0xe1] sm:$0xff] %v3549_v32  ;;  %v11162_v52 = vpop.f32.mrb[36].mxu0  ;;  %v10971_v46 = vpop.f32.mrb[38].mxu1  ;;  %v13792_v53 = vpack.c.bf16 %v3549_v32, %v3548_v33  ;;  %11268 = vmatprep.subr.bf16.mxu1 %v13784_v41  ;;  %v3663_v32 = vld [vmem:[#allocation3 + $0x20] sm:$0xff] }
 0x2cd   : > { %v12072_v50 = vadd.f32 %v11162_v52, %v10970_v43  ;;  %v3446_v44 = vpop.f32.mrb[37].mxu0  ;;  %v2224_v55 = vpop.f32.mrb[39].mxu1  ;;  %v3665_v43 = vld [vmem:[#allocation3 + $0x38] sm:$0xff]  ;;  %v12928_v52 = vld [vmem:[%s14740_s4 + $0x88] sm:$0xff]  }
 0x2ce   : > { %v12073_v38 = vadd.f32 %v3446_v44, %v2221_v45  ;;  %v11163_v51 = vpop.f32.mrb[38].mxu0  ;;  %11205 = vmatmul.mubr.bf16.gmra.mrb[64].mxu1 %v13792_v53  ;;  %v3662_v45 = vld [vmem:[#allocation3 + $0x18] sm:$0xff]  ;;  %v3667_v44 = vld [vmem:[#allocation3 + $0x50] sm:$0xff] }
 0x2cf   : > { %v3554_v57 = vadd.f32 %v12072_v50, %v13731_v24  ;;  %v12074_v15 = vadd.f32 %v11163_v51, %v10971_v46  ;;  %v3449_v31 = vpop.f32.mrb[39].mxu0  ;;  %11208 = vmatprep.mubr.bf16.mxu1 %v3766_v49  ;;  %v13834_v49 = vpack.c.bf16 %v3663_v32, %v3662_v45  ;;  %v12929_v50 = vld [vmem:[%s14740_s4 + $0x90] sm:$0xff]  }
 0x2d0   : > { %v3552_v58 = vadd.f32 %v12073_v38, %v13731_v24  ;;  %v12075_v40 = vadd.f32 %v3449_v31, %v2224_v55  ;;  %v3669_v55 = vld [vmem:[#allocation3 + $0x68] sm:$0xff]  ;;  %v12931_v31 = vld [vmem:[%s14740_s4 + $0xa0] sm:$0xff]  }
 0x2d1   : > { %3650 = vst [vmem:[#allocation3 + $0x121] sm:$0xff] %v3554_v57  ;;  %v3555_v11 = vadd.f32 %v12074_v15, %v13731_v24  ;;  %v3666_v38 = vld [vmem:[#allocation3 + $0x48] sm:$0xff]  ;;  %v12930_v15 = vld [vmem:[%s14740_s4 + $0x98] sm:$0xff]  }
 0x2d2   : > { %3648 = vst [vmem:[#allocation3 + $0x109] sm:$0xff] %v3552_v58  ;;  %v3553_v25 = vadd.f32 %v12075_v40, %v13731_v24  ;;  %v10974_v59 = vpop.f32.mrb[40].mxu1  ;;  %v13847_v51 = vpack.c.bf16 %v3667_v44, %v3666_v38  ;;  %v3673_v40 = vld [vmem:[#allocation3 + $0x98] sm:$0xff] }
 0x2d3   : > { %3651 = vst [vmem:[#allocation3 + $0x129] sm:$0xff] %v3555_v11  ;;  %v2237_v62 = vpop.f32.mrb[41].mxu1  ;;  %v13800_v0 = vpack.c.bf16 %v3555_v11, %v3554_v57  ;;  %v3668_v57 = vld [vmem:[#allocation3 + $0x60] sm:$0xff]  ;;  %v3670_v11 = vld [vmem:[#allocation3 + $0x78] sm:$0xff] }
 0x2d4   : > { %3649 = vst [vmem:[#allocation3 + $0x111] sm:$0xff] %v3553_v25  ;;  %v11166_v2 = vpop.f32.mrb[40].mxu0  ;;  %v10975_v48 = vpop.f32.mrb[42].mxu1  ;;  %v13802_v29 = vpack.c.bf16 %v3553_v25, %v3552_v58  ;;  %v3671_v58 = vld [vmem:[#allocation3 + $0x80] sm:$0xff]  ;;  %v4211_v44 = vld [vmem:[#allocation3 + $0x32] sm:$0xff] }
 0x2d5   : > { %v12076_v54 = vadd.f32 %v11166_v2, %v10974_v59  ;;  %v3462_v42 = vpop.f32.mrb[41].mxu0  ;;  %v2240_v4 = vpop.f32.mrb[43].mxu1  ;;  %v13859_v25 = vpack.c.bf16 %v3671_v58, %v3670_v11  ;;  %v3672_v59 = vld [vmem:[#allocation3 + $0x90] sm:$0xff]  ;;  %v4215_v11 = vld [vmem:[#allocation3 + $0x62] sm:$0xff] }
 0x2d6   : > { %v12077_v5 = vadd.f32 %v3462_v42, %v2237_v62  ;;  %v11167_v6 = vpop.f32.mrb[42].mxu0  ;;  %11209 = vmatmul.mubr.bf16.gmra.mrb[68].mxu1 %v13802_v29  ;;  %v12932_v62 = vld [vmem:[%s14740_s4 + $0xa8] sm:$0xff]   ;;  %v13864_v2 = vpack.c.bf16 %v3673_v40, %v3672_v59  ;;  %v4214_v40 = vld [vmem:[#allocation3 + $0x52] sm:$0xff] }
 0x2d7   : > { %v3558_v61 = vadd.f32 %v12076_v54, %v13731_v24  ;;  %v12078_v8 = vadd.f32 %v11167_v6, %v10975_v48  ;;  %v3465_v47 = vpop.f32.mrb[43].mxu0  ;;  %11212 = vmatprep.mubr.bf16.mxu1 %v13800_v0  ;;  %v12933_v48 = vld [vmem:[%s14740_s4 + $0xb0] sm:$0xff]   ;;  %v3677_v42 = vld [vmem:[#allocation3 + $0xc8] sm:$0xff]  ;;  %v3676_v6 = vld [vmem:[#allocation3 + $0xc0] sm:$0xff] }
 0x2d8   : > { %v3556_v12 = vadd.f32 %v12077_v5, %v13731_v24  ;;  %v12079_v56 = vadd.f32 %v3465_v47, %v2240_v4  ;;  %v3675_v54 = vld [vmem:[#allocation3 + $0xb0] sm:$0xff]  ;;  %v3674_v4 = vld [vmem:[#allocation3 + $0xa8] sm:$0xff]  ;;  %v12935_v47 = vld [vmem:[%s14740_s4 + $0xc0] sm:$0xff]  }
 0x2d9   : > { %3654 = vst [vmem:[#allocation3 + $0x151] sm:$0xff] %v3558_v61  ;;  %v3559_v60 = vadd.f32 %v12078_v8, %v13731_v24  ;;  %v13871_v5 = vpack.c.bf16 %v3675_v54, %v3674_v4  ;;  %v13876_v8 = vpack.c.bf16 %v3677_v42, %v3676_v6  ;;  %v4213_v58 = vld [vmem:[#allocation3 + $0x4a] sm:$0xff]  ;;  %v12939_v42 = vld [vmem:[%s14740_s4 + $0xe0] sm:$0xff]  }
 0x2da   : > { %3652 = vst [vmem:[#allocation3 + $0x139] sm:$0xff] %v3556_v12  ;;  %v3557_v1 = vadd.f32 %v12079_v56, %v13731_v24  ;;  %v10978_v13 = vpop.f32.mrb[44].mxu1  ;;  %v3681_v56 = vld [vmem:[#allocation3 + $0xf8] sm:$0xff]  ;;  %v4216_v59 = vld [vmem:[#allocation3 + $0x6a] sm:$0xff]  ;;  %v4218_v6 = vld [vmem:[#allocation3 + $0x82] sm:$0xff] }
 0x2db   : > { %3655 = vst [vmem:[#allocation3 + $0x159] sm:$0xff] %v3559_v60  ;;  %v2253_v14 = vpop.f32.mrb[45].mxu1  ;;  %v13810_v18 = vpack.c.bf16 %v3559_v60, %v3558_v61  ;;  %v12934_v61 = vld [vmem:[%s14740_s4 + $0xb8] sm:$0xff]   ;;  %v13921_v54 = vpack.c.bf16 %v4216_v59, %v4215_v11 }
 0x2dc   : > { %3653 = vst [vmem:[#allocation3 + $0x141] sm:$0xff] %v3557_v1  ;;  %v11170_v19 = vpop.f32.mrb[44].mxu0  ;;  %v10979_v20 = vpop.f32.mrb[46].mxu1  ;;  %v13812_v3 = vpack.c.bf16 %v3557_v1, %v3556_v12  ;;  %v3679_v12 = vld [vmem:[#allocation3 + $0xe0] sm:$0xff]  ;;  %v3678_v60 = vld [vmem:[#allocation3 + $0xd8] sm:$0xff] }
 0x2dd   : > { %v12080_v9 = vadd.f32 %v11170_v19, %v10978_v13  ;;  %v3478_v7 = vpop.f32.mrb[45].mxu0  ;;  %v2256_v23 = vpop.f32.mrb[47].mxu1  ;;  %v13883_v1 = vpack.c.bf16 %v3679_v12, %v3678_v60  ;;  %v3680_v13 = vld [vmem:[#allocation3 + $0xf0] sm:$0xff]  ;;  %v4217_v4 = vld [vmem:[#allocation3 + $0x7a] sm:$0xff] }
 0x2de   : > { %v12081_v16 = vadd.f32 %v3478_v7, %v2253_v14  ;;  %v11171_v26 = vpop.f32.mrb[46].mxu0  ;;  %11213 = vmatmul.mubr.bf16.gmra.mrb[72].mxu1 %v13812_v3  ;;  %v13885_v14 = vpack.c.bf16 %v3681_v56, %v3680_v13  ;;  %v3683_v19 = vld [vmem:[#allocation3 + $0x110] sm:$0xff]  ;;  %v13928_v12 = vpack.c.bf16 %v4218_v6, %v4217_v4  ;;  %v12940_v56 = vld [vmem:[%s14740_s4 + $0xe8] sm:$0xff]  }
 0x2df   : > { %v13816_v27 = vadd.f32 %v12080_v9, %v13731_v24  ;;  %v12082_v10 = vadd.f32 %v11171_v26, %v10979_v20  ;;  %v3481_v17 = vpop.f32.mrb[47].mxu0  ;;  %11216 = vmatprep.mubr.bf16.mxu1 %v13810_v18  ;;  %v3685_v20 = vld [vmem:[#allocation3 + $0x128] sm:$0xff]  ;;  %v12941_v13 = vld [vmem:[%s14740_s4 + $0xf0] sm:$0xff]  }
 0x2e0   : > { %v3560_v28 = vadd.f32 %v12081_v16, %v13731_v24  ;;  %v12083_v21 = vadd.f32 %v3481_v17, %v2256_v23  ;;  %v3682_v9 = vld [vmem:[#allocation3 + $0x108] sm:$0xff]  ;;  %v3684_v23 = vld [vmem:[#allocation3 + $0x120] sm:$0xff] }
 0x2e1   : > { %3658 = vst [vmem:[#allocation3 + $0x181] sm:$0xff] %v13816_v27  ;;  %v13822_v30 = vadd.f32 %v12082_v10, %v13731_v24  ;;  %v13889_v7 = vpack.c.bf16 %v3683_v19, %v3682_v9  ;;  %v13891_v16 = vpack.c.bf16 %v3685_v20, %v3684_v23  ;;  %v3686_v17 = vld [vmem:[#allocation3 + $0x138] sm:$0xff]  ;;  %v4221_v19 = vld [vmem:[#allocation3 + $0xaa] sm:$0xff]  ;;  %v4223_v9 = vld [vmem:[#allocation3 + $0xc2] sm:$0xff] }
 0x2e2   : > { %3656 = vst [vmem:[#allocation3 + $0x169] sm:$0xff] %v3560_v28  ;;  %v3561_v22 = vadd.f32 %v12083_v21, %v13731_v24  ;;  %v3664_v24 = vld [vmem:[#allocation3 + $0x30] sm:$0xff]  ;;  %v3689_v10 = vld [vmem:[#allocation3 + $0x158] sm:$0xff] }
 0x2e3   : > { %3659 = vst [vmem:[#allocation3 + $0x189] sm:$0xff] %v13822_v30  ;;  %v4866_v33 = vpack.c.bf16 %v13822_v30, %v13816_v27  ;;  %v13839_v46 = vpack.c.bf16 %v3665_v43, %v3664_v24  ;;  %v3687_v26 = vld [vmem:[#allocation3 + $0x140] sm:$0xff]  ;;  %v3688_v21 = vld [vmem:[#allocation3 + $0x150] sm:$0xff]  ;;  %v12966_v27 = vld [vmem:[%s14740_s4 + $0x1b8] sm:$0xff]  }
 0x2e4   : > { %3657 = vst [vmem:[#allocation3 + $0x171] sm:$0xff] %v3561_v22  ;;  %v13831_v39 = vpack.c.bf16 %v3561_v22, %v3560_v28  ;;  %v13895_v28 = vpack.c.bf16 %v3687_v26, %v3686_v17  ;;  %v13897_v35 = vpack.c.bf16 %v3689_v10, %v3688_v21  ;;  %v4207_v22 = vld [vmem:[#allocation3 + $0x2] sm:$0xff]  ;;  %v4222_v20 = vld [vmem:[#allocation3 + $0xb2] sm:$0xff]  ;;  %v4224_v23 = vld [vmem:[#allocation3 + $0xca] sm:$0xff] }
 0x2e5   : > { %v13940_v26 = vpack.c.bf16 %v4222_v20, %v4221_v19  ;;  %v12942_v10 = vld [vmem:[%s14740_s4 + $0xf8] sm:$0xff]   ;;  %v13945_v17 = vpack.c.bf16 %v4224_v23, %v4223_v9  ;;  %v12943_v21 = vld [vmem:[%s14740_s4 + $0x100] sm:$0xff]   ;;  %v12948_v20 = vld [vmem:[%s14740_s4 + $0x128] sm:$0xff]  }
 0x2e6   : > { %11217 = vmatmul.mubr.bf16.gmra.mrb[76].mxu1 %v13831_v39  ;;  %v4234_v11 = vld [vmem:[#allocation3 + $0x142] sm:$0xff]  ;;  %v4235_v59 = vld [vmem:[#allocation3 + $0x152] sm:$0xff] }
 0x2e7   : > { %11236 = vmatprep.mubr.bf16.mxu1 %v3692_v37  ;;  %v4208_v37 = vld [vmem:[#allocation3 + $0xa] sm:$0xff]  ;;  %v12947_v19 = vld [vmem:[%s14740_s4 + $0x120] sm:$0xff]   ;;  %v12950_v23 = vld [vmem:[%s14740_s4 + $0x138] sm:$0xff]  }
 0x2e8   : > { %v4239_v45 = vpack.c.bf16 %v4208_v37, %v4207_v22  ;;  %v4225_v22 = vld [vmem:[#allocation3 + $0xda] sm:$0xff]  ;;  %v4226_v37 = vld [vmem:[#allocation3 + $0xe2] sm:$0xff]  ;;  %v12949_v9 = vld [vmem:[%s14740_s4 + $0x130] sm:$0xff]  }
 0x2e9   : > { %v3690_v43 = vld [vmem:[#allocation3 + $0x168] sm:$0xff]  ;;  %v12967_v30 = vld [vmem:[%s14740_s4 + $0x1c0] sm:$0xff]  }
 0x2eb   : > { %v3691_v32 = vld [vmem:[#allocation3 + $0x170] sm:$0xff] }
 0x2ec   : > { %v13901_v24 = vpack.c.bf16 %v3691_v32, %v3690_v43  ;;  %v4227_v32 = vld [vmem:[#allocation3 + $0xf2] sm:$0xff]  ;;  %v4228_v43 = vld [vmem:[#allocation3 + $0xfa] sm:$0xff]  ;;  %v4237_v6 = vld [vmem:[#allocation3 + $0x16a] sm:$0xff] }
 0x2ee   : > { %11237 = vmatmul.mubr.bf16.vlgmr.msra.gmra.mrb[48].mxu1 %v13834_v49 }
 0x2ef   : > { %11269 = vmatpush3.bf16.msra.mxu1 %v13784_v41  ;;  %11240 = vmatprep.mubr.bf16.mxu1 %v13839_v46  ;;  %v13852_v41 = vpack.c.bf16 %v3669_v55, %v3668_v57  ;;  %v4212_v55 = vld [vmem:[#allocation3 + $0x3a] sm:$0xff]  ;;  %v12936_v57 = vld [vmem:[%s14740_s4 + $0xc8] sm:$0xff]  }
 0x2f0   : > { %11270 = vmatprep.subr.bf16.mxu1 %v12928_v52 }
 0x2f3   : > { %11271 = vmatpush3.bf16.msra.mxu1 %v12928_v52  ;;  %v4209_v52 = vld [vmem:[#allocation3 + $0x1a] sm:$0xff] }
 0x2f4   : > { %11272 = vmatprep.subr.bf16.mxu1 %v12929_v50 }
 0x2f6   : > { %11241 = vmatmul.mubr.bf16.gmra.mrb[52].mxu1 %v13847_v51 }
 0x2f7   : > { %11244 = vmatprep.mubr.bf16.mxu1 %v13852_v41  ;;  %11273 = vmatpush3.bf16.msra.mxu1 %v12929_v50  ;;  %v4210_v50 = vld [vmem:[#allocation3 + $0x22] sm:$0xff] }
 0x2f8   : > { %11274 = vmatprep.subr.bf16.mxu1 %v12930_v15  ;;  %v13904_v38 = vpack.c.bf16 %v4210_v50, %v4209_v52  ;;  %v13954_v52 = vpack.c.bf16 %v4228_v43, %v4227_v32  ;;  %v4229_v50 = vld [vmem:[#allocation3 + $0x10a] sm:$0xff]  ;;  %v4819_v43 = vld [vmem:[#allocation3 + $0x19] sm:$0xff] }
 0x2fb   : > { %11275 = vmatpush3.bf16.msra.mxu1 %v12930_v15  ;;  %v13909_v15 = vpack.c.bf16 %v4212_v55, %v4211_v44  ;;  %v4230_v44 = vld [vmem:[#allocation3 + $0x112] sm:$0xff]  ;;  %v4231_v55 = vld [vmem:[#allocation3 + $0x122] sm:$0xff] }
 0x2fc   : > { %11276 = vmatprep.subr.bf16.mxu1 %v12931_v31 }
 0x2fe   : > { %11245 = vmatmul.mubr.bf16.gmra.mrb[56].mxu1 %v13859_v25 }
 0x2ff   : > { %11248 = vmatprep.mubr.bf16.mxu1 %v13864_v2  ;;  %11277 = vmatpush3.bf16.msra.mxu1 %v12931_v31  ;;  %v12937_v31 = vld [vmem:[%s14740_s4 + $0xd0] sm:$0xff]  }
 0x300   : > { %11278 = vmatprep.subr.bf16.mxu1 %v12932_v62 }
 0x303   : > { %11279 = vmatpush3.bf16.msra.mxu1 %v12932_v62  ;;  %v13916_v62 = vpack.c.bf16 %v4214_v40, %v4213_v58  ;;  %v4233_v40 = vld [vmem:[#allocation3 + $0x13a] sm:$0xff] }
 0x304   : > { %11280 = vmatprep.subr.bf16.mxu1 %v12933_v48 }
 0x306   : > { %11249 = vmatmul.mubr.bf16.gmra.mrb[60].mxu1 %v13871_v5 }
 0x307   : > { %11252 = vmatprep.mubr.bf16.mxu1 %v13876_v8  ;;  %11281 = vmatpush3.bf16.msra.mxu1 %v12933_v48  ;;  %v12938_v48 = vld [vmem:[%s14740_s4 + $0xd8] sm:$0xff]  }
 0x308   : > { %11282 = vmatprep.subr.bf16.mxu1 %v12934_v61 }
 0x30b   : > { %11283 = vmatpush3.bf16.msra.mxu1 %v12934_v61  ;;  %v4219_v61 = vld [vmem:[#allocation3 + $0x92] sm:$0xff] }
 0x30c   : > { %11316 = vmatprep.subr.bf16.mxu1 %v12935_v47 }
 0x30e   : > { %11253 = vmatmul.mubr.bf16.gmra.mrb[64].mxu1 %v13883_v1 }
 0x30f   : > { %11256 = vmatprep.mubr.bf16.mxu1 %v13885_v14 }
 0x316   : > { %11257 = vmatmul.mubr.bf16.gmra.mrb[68].mxu1 %v13889_v7 }
 0x317   : > { %11260 = vmatprep.mubr.bf16.mxu1 %v13891_v16 }
 0x31e   : > { %11261 = vmatmul.mubr.bf16.gmra.mrb[72].mxu1 %v13895_v28 }
 0x31f   : > { %11264 = vmatprep.mubr.bf16.mxu1 %v13897_v35 }
 0x326   : > { %11265 = vmatmul.mubr.bf16.gmra.mrb[76].mxu1 %v13901_v24 }
 0x327   : > { %11284 = vmatprep.mubr.bf16.mxu1 %v4239_v45  ;;  %v13952_v45 = vpack.c.bf16 %v4226_v37, %v4225_v22  ;;  %v4820_v22 = vld [vmem:[#allocation3 + $0x21] sm:$0xff] }
 0x328   : > { %v4543_v37 = vld [vmem:[#allocation3 + $0x180] sm:$0xff] }
 0x32e   : > { %11285 = vmatmul.mubr.bf16.vlgmr.msra.gmra.mrb[48].mxu1 %v13904_v38 }
 0x32f   : > { %11317 = vmatpush3.bf16.msra.mxu1 %v12935_v47  ;;  %11288 = vmatprep.mubr.bf16.mxu1 %v13909_v15  ;;  %v4220_v47 = vld [vmem:[#allocation3 + $0x9a] sm:$0xff] }
 0x330   : > { %11318 = vmatprep.subr.bf16.mxu1 %v12936_v57  ;;  %v13933_v60 = vpack.c.bf16 %v4220_v47, %v4219_v61  ;;  %v4238_v61 = vld [vmem:[#allocation3 + $0x172] sm:$0xff] }
 0x331   : > { %v13970_v47 = vpack.c.bf16 %v4238_v61, %v4237_v6  ;;  %v12953_v6 = vld [vmem:[%s14740_s4 + $0x150] sm:$0xff]  }
 0x332   : > { %v4826_v61 = vld [vmem:[#allocation3 + $0x69] sm:$0xff] }
 0x333   : > { %11319 = vmatpush3.bf16.msra.mxu1 %v12936_v57  ;;  %v4232_v57 = vld [vmem:[#allocation3 + $0x12a] sm:$0xff] }
 0x334   : > { %11320 = vmatprep.subr.bf16.mxu1 %v12937_v31  ;;  %v13960_v58 = vpack.c.bf16 %v4232_v57, %v4231_v55  ;;  %v4824_v55 = vld [vmem:[#allocation3 + $0x51] sm:$0xff] }
 0x335   : > { %v4821_v57 = vld [vmem:[#allocation3 + $0x31] sm:$0xff] }
 0x336   : > { %11289 = vmatmul.mubr.bf16.gmra.mrb[52].mxu1 %v13916_v62 }
 0x337   : > { %11292 = vmatprep.mubr.bf16.mxu1 %v13921_v54  ;;  %11321 = vmatpush3.bf16.msra.mxu1 %v12937_v31  ;;  %v13958_v31 = vpack.c.bf16 %v4230_v44, %v4229_v50  ;;  %v4851_v50 = vpack.c.bf16 %v4820_v22, %v4819_v43  ;;  %v4822_v44 = vld [vmem:[#allocation3 + $0x39] sm:$0xff]  ;;  %v4829_v22 = vld [vmem:[#allocation3 + $0x91] sm:$0xff]  ;;  %v12956_v43 = vld [vmem:[%s14740_s4 + $0x168] sm:$0xff]  }
 0x338   : > { %11322 = vmatprep.subr.bf16.mxu1 %v12938_v48 }
 0x33b   : > { %11323 = vmatpush3.bf16.msra.mxu1 %v12938_v48  ;;  %v4236_v48 = vld [vmem:[#allocation3 + $0x15a] sm:$0xff] }
 0x33c   : > { %11324 = vmatprep.subr.bf16.mxu1 %v12939_v42  ;;  %v13966_v4 = vpack.c.bf16 %v4236_v48, %v4235_v59  ;;  %v12952_v59 = vld [vmem:[%s14740_s4 + $0x148] sm:$0xff]  }
 0x33e   : > { %11293 = vmatmul.mubr.bf16.gmra.mrb[56].mxu1 %v13928_v12 }
 0x33f   : > { %11296 = vmatprep.mubr.bf16.mxu1 %v13933_v60  ;;  %11325 = vmatpush3.bf16.msra.mxu1 %v12939_v42  ;;  %v13964_v42 = vpack.c.bf16 %v4234_v11, %v4233_v40  ;;  %v14015_v40 = vpack.c.bf16 %v4822_v44, %v4821_v57  ;;  %v4823_v11 = vld [vmem:[#allocation3 + $0x49] sm:$0xff]  ;;  %v4833_v57 = vld [vmem:[#allocation3 + $0xc1] sm:$0xff] }
 0x340   : > { %11326 = vmatprep.subr.bf16.mxu1 %v12940_v56  ;;  %v14020_v48 = vpack.c.bf16 %v4824_v55, %v4823_v11  ;;  %v12957_v44 = vld [vmem:[%s14740_s4 + $0x170] sm:$0xff]  }
 0x341   : > { %v4834_v55 = vld [vmem:[#allocation3 + $0xc9] sm:$0xff] }
 0x342   : > { %v14052_v11 = vpack.c.bf16 %v4834_v55, %v4833_v57  ;;  %v5765_v55 = vld [vmem:[#allocation3 + $0x181] sm:$0xff] }
 0x343   : > { %11327 = vmatpush3.bf16.msra.mxu1 %v12940_v56  ;;  %v12944_v56 = vld [vmem:[%s14740_s4 + $0x108] sm:$0xff]  }
 0x344   : > { %11328 = vmatprep.subr.bf16.mxu1 %v12941_v13 }
 0x346   : > { %11297 = vmatmul.mubr.bf16.gmra.mrb[60].mxu1 %v13940_v26 }
 0x347   : > { %11300 = vmatprep.mubr.bf16.mxu1 %v13945_v17  ;;  %11329 = vmatpush3.bf16.msra.mxu1 %v12941_v13  ;;  %v12945_v13 = vld [vmem:[%s14740_s4 + $0x110] sm:$0xff]  }
 0x348   : > { %11330 = vmatprep.subr.bf16.mxu1 %v12942_v10 }
 0x34b   : > { %11331 = vmatpush3.bf16.msra.mxu1 %v12942_v10  ;;  %v12951_v10 = vld [vmem:[%s14740_s4 + $0x140] sm:$0xff]  }
 0x34c   : > { %11364 = vmatprep.subr.bf16.mxu1 %v12943_v21 }
 0x34e   : > { %11301 = vmatmul.mubr.bf16.gmra.mrb[64].mxu1 %v13952_v45 }
 0x34f   : > { %11304 = vmatprep.mubr.bf16.mxu1 %v13954_v52 }
 0x356   : > { %11305 = vmatmul.mubr.bf16.gmra.mrb[68].mxu1 %v13958_v31 }
 0x357   : > { %11308 = vmatprep.mubr.bf16.mxu1 %v13960_v58 }
 0x35e   : > { %11309 = vmatmul.mubr.bf16.gmra.mrb[72].mxu1 %v13964_v42 }
 0x35f   : > { %11312 = vmatprep.mubr.bf16.mxu1 %v13966_v4 }
 0x366   : > { %11313 = vmatmul.mubr.bf16.gmra.mrb[76].mxu1 %v13970_v47 }
 0x367   : > { %11332 = vmatprep.mubr.bf16.mxu1 %v13834_v49  ;;  %v12946_v49 = vld [vmem:[%s14740_s4 + $0x118] sm:$0xff]  }
 0x36e   : > { %11333 = vmatmul.mubr.bf16.vlgmr.msra.gmra.mrb[48].mxu1 %v13839_v46 }
 0x36f   : > { %11365 = vmatpush3.bf16.msra.mxu1 %v12943_v21  ;;  %11336 = vmatprep.mubr.bf16.mxu1 %v13847_v51  ;;  %v4544_v21 = vld [vmem:[#allocation3 + $0x188] sm:$0xff] }
 0x370   : > { %11366 = vmatprep.subr.bf16.mxu1 %v12944_v56  ;;  %v14012_v32 = vpack.c.bf16 %v4544_v21, %v4543_v37  ;;  %v14039_v21 = vld [vmem:[#allocation3 + $0xa9] sm:$0xff] }
 0x373   : > { %11367 = vmatpush3.bf16.msra.mxu1 %v12944_v56  ;;  %v4828_v56 = vld [vmem:[#allocation3 + $0x81] sm:$0xff] }
 0x374   : > { %11368 = vmatprep.subr.bf16.mxu1 %v12945_v13 }
 0x376   : > { %11337 = vmatmul.mubr.bf16.gmra.mrb[52].mxu1 %v13852_v41 }
 0x377   : > { %11340 = vmatprep.mubr.bf16.mxu1 %v13859_v25  ;;  %11369 = vmatpush3.bf16.msra.mxu1 %v12945_v13  ;;  %v4825_v13 = vld [vmem:[#allocation3 + $0x61] sm:$0xff] }
 0x378   : > { %11370 = vmatprep.subr.bf16.mxu1 %v12946_v49 }
 0x37b   : > { %11371 = vmatpush3.bf16.msra.mxu1 %v12946_v49  ;;  %v14027_v49 = vpack.c.bf16 %v4826_v61, %v4825_v13 }
 0x37c   : > { %11372 = vmatprep.subr.bf16.mxu1 %v12947_v19 }
 0x37e   : > { %11341 = vmatmul.mubr.bf16.gmra.mrb[56].mxu1 %v13864_v2 }
 0x37f   : > { %11344 = vmatprep.mubr.bf16.mxu1 %v13871_v5  ;;  %11373 = vmatpush3.bf16.msra.mxu1 %v12947_v19  ;;  %v4827_v19 = vld [vmem:[#allocation3 + $0x79] sm:$0xff] }
 0x380   : > { %11374 = vmatprep.subr.bf16.mxu1 %v12948_v20 }
 0x383   : > { %11375 = vmatpush3.bf16.msra.mxu1 %v12948_v20  ;;  %v12954_v20 = vld [vmem:[%s14740_s4 + $0x158] sm:$0xff]  }
 0x384   : > { %11376 = vmatprep.subr.bf16.mxu1 %v12949_v9 }
 0x386   : > { %11345 = vmatmul.mubr.bf16.gmra.mrb[60].mxu1 %v13876_v8 }
 0x387   : > { %11348 = vmatprep.mubr.bf16.mxu1 %v13883_v1  ;;  %11377 = vmatpush3.bf16.msra.mxu1 %v12949_v9  ;;  %v14032_v9 = vpack.c.bf16 %v4828_v56, %v4827_v19  ;;  %v5755_v56 = vld [vmem:[#allocation3 + $0x109] sm:$0xff] }
 0x388   : > { %11378 = vmatprep.subr.bf16.mxu1 %v12950_v23 }
 0x38b   : > { %11379 = vmatpush3.bf16.msra.mxu1 %v12950_v23  ;;  %v12955_v23 = vld [vmem:[%s14740_s4 + $0x160] sm:$0xff]  }
 0x38c   : > { %11412 = vmatprep.subr.bf16.mxu1 %v12951_v10 }
 0x38e   : > { %11349 = vmatmul.mubr.bf16.gmra.mrb[64].mxu1 %v13885_v14 }
 0x38f   : > { %11352 = vmatprep.mubr.bf16.mxu1 %v13889_v7 }
 0x396   : > { %11353 = vmatmul.mubr.bf16.gmra.mrb[68].mxu1 %v13891_v16 }
 0x397   : > { %11356 = vmatprep.mubr.bf16.mxu1 %v13895_v28 }
 0x39e   : > { %11357 = vmatmul.mubr.bf16.gmra.mrb[72].mxu1 %v13897_v35 }
 0x39f   : > { %11360 = vmatprep.mubr.bf16.mxu1 %v13901_v24 }
 0x3a6   : > { %11361 = vmatmul.mubr.bf16.gmra.mrb[76].mxu1 %v14012_v32 }
 0x3a7   : > { %11380 = vmatprep.mubr.bf16.mxu1 %v4851_v50  ;;  %v4857_v50 = vpack.c.bf16 %v13772_v63, %v14039_v21  ;;  %v12959_v63 = vld [vmem:[%s14740_s4 + $0x180] sm:$0xff]  }
 0x3ae   : > { %11381 = vmatmul.mubr.bf16.vlgmr.msra.gmra.mrb[48].mxu1 %v14015_v40 }
 0x3af   : > { %11413 = vmatpush3.bf16.msra.mxu1 %v12951_v10  ;;  %11384 = vmatprep.mubr.bf16.mxu1 %v14020_v48  ;;  %v4830_v10 = vld [vmem:[#allocation3 + $0x99] sm:$0xff] }
 0x3b0   : > { %11414 = vmatprep.subr.bf16.mxu1 %v12952_v59  ;;  %v14041_v37 = vpack.c.bf16 %v4830_v10, %v4829_v22 }
 0x3b3   : > { %11415 = vmatpush3.bf16.msra.mxu1 %v12952_v59  ;;  %v12958_v59 = vld [vmem:[%s14740_s4 + $0x178] sm:$0xff]  }
 0x3b4   : > { %11416 = vmatprep.subr.bf16.mxu1 %v12953_v6 }
 0x3b6   : > { %11385 = vmatmul.mubr.bf16.gmra.mrb[52].mxu1 %v14027_v49 }
 0x3b7   : > { %11388 = vmatprep.mubr.bf16.mxu1 %v14032_v9  ;;  %11417 = vmatpush3.bf16.msra.mxu1 %v12953_v6  ;;  %v14062_v6 = vld [vmem:[#allocation3 + $0xf1] sm:$0xff] }
 0x3b8   : > { %11418 = vmatprep.subr.bf16.mxu1 %v12954_v20  ;;  %v4860_v61 = vpack.c.bf16 %v13787_v34, %v14062_v6  ;;  %v12960_v34 = vld [vmem:[%s14740_s4 + $0x188] sm:$0xff]  }
 0x3bb   : > { %11419 = vmatpush3.bf16.msra.mxu1 %v12954_v20  ;;  %v5760_v20 = vld [vmem:[#allocation3 + $0x141] sm:$0xff] }
 0x3bc   : > { %11420 = vmatprep.subr.bf16.mxu1 %v12955_v23 }
 0x3be   : > { %11389 = vmatmul.mubr.bf16.gmra.mrb[56].mxu1 %v14041_v37 }
 0x3bf   : > { %11392 = vmatprep.mubr.bf16.mxu1 %v4857_v50  ;;  %11421 = vmatpush3.bf16.msra.mxu1 %v12955_v23  ;;  %v5759_v23 = vld [vmem:[#allocation3 + $0x139] sm:$0xff]  ;;  %v5763_v50 = vld [vmem:[#allocation3 + $0x169] sm:$0xff] }
 0x3c0   : > { %11422 = vmatprep.subr.bf16.mxu1 %v12956_v43  ;;  %v5780_v10 = vpack.c.bf16 %v5760_v20, %v5759_v23  ;;  %v6581_v20 = vld [vmem:[#allocation3 + $0x9] sm:$0xff]  ;;  %v14216_v23 = vld [vmem:[%s14741_s5] ss:$0 sm:$0xff] }
 0x3c3   : > { %11423 = vmatpush3.bf16.msra.mxu1 %v12956_v43  ;;  %v5766_v43 = vld [vmem:[#allocation3 + $0x189] sm:$0xff] }
 0x3c4   : > { %11424 = vmatprep.subr.bf16.mxu1 %v12957_v44  ;;  %v5783_v57 = vpack.c.bf16 %v5766_v43, %v5765_v55 }
 0x3c6   : > { %11393 = vmatmul.mubr.bf16.gmra.mrb[60].mxu1 %v14052_v11 }
 0x3c7   : > { %11396 = vmatprep.mubr.bf16.mxu1 %v13792_v53  ;;  %11425 = vmatpush3.bf16.msra.mxu1 %v12957_v44  ;;  %v12961_v53 = vld [vmem:[%s14740_s4 + $0x190] sm:$0xff]  }
 0x3c8   : > { %11426 = vmatprep.subr.bf16.mxu1 %v12958_v59 }
 0x3cb   : > { %11427 = vmatpush3.bf16.msra.mxu1 %v12958_v59  ;;  %v5768_v59 = vld [vmem:[#allocation3 + $0x1a1] sm:$0xff] }
 0x3cc   : > { %11460 = vmatprep.subr.bf16.mxu1 %v12959_v63 }
 0x3ce   : > { %11397 = vmatmul.mubr.bf16.gmra.mrb[64].mxu1 %v4860_v61  ;;  %v6044_v61 = vld [vmem:[#allocation3 + $0x3a] sm:$0xff] }
 0x3cf   : > { %11400 = vmatprep.mubr.bf16.mxu1 %v13802_v29  ;;  %v12963_v29 = vld [vmem:[%s14740_s4 + $0x1a0] sm:$0xff]  }
 0x3d6   : > { %11401 = vmatmul.mubr.bf16.gmra.mrb[68].mxu1 %v13800_v0  ;;  %v12962_v0 = vld [vmem:[%s14740_s4 + $0x198] sm:$0xff]  }
 0x3d7   : > { %11404 = vmatprep.mubr.bf16.mxu1 %v13812_v3  ;;  %v12965_v3 = vld [vmem:[%s14740_s4 + $0x1b0] sm:$0xff]  }
 0x3de   : > { %11405 = vmatmul.mubr.bf16.gmra.mrb[72].mxu1 %v13810_v18  ;;  %v12964_v18 = vld [vmem:[%s14740_s4 + $0x1a8] sm:$0xff]  }
 0x3df   : > { %11408 = vmatprep.mubr.bf16.mxu1 %v13831_v39  ;;  %v5156_v39 = vld [vmem:[#allocation3 + $0x18a] sm:$0xff] }
 0x3e6   : > { %11409 = vmatmul.mubr.bf16.gmra.mrb[76].mxu1 %v4866_v33  ;;  %v5155_v33 = vld [vmem:[#allocation3 + $0x182] sm:$0xff] }
 0x3e7   : > { %11428 = vmatprep.mubr.bf16.mxu1 %v13904_v38  ;;  %v14113_v38 = vpack.c.bf16 %v5156_v39, %v5155_v33  ;;  %v6050_v33 = vld [vmem:[#allocation3 + $0x82] sm:$0xff]  ;;  %v6051_v39 = vld [vmem:[#allocation3 + $0x92] sm:$0xff] }
 0x3ee   : > { %11429 = vmatmul.mubr.bf16.vlgmr.msra.gmra.mrb[48].mxu1 %v13909_v15  ;;  %v12968_v15 = vld [vmem:[%s14740_s4 + $0x1c8] sm:$0xff]  }
 0x3ef   : > { %11461 = vmatpush3.bf16.msra.mxu1 %v12959_v63  ;;  %11432 = vmatprep.mubr.bf16.mxu1 %v13916_v62  ;;  %v12969_v62 = vld [vmem:[%s14740_s4 + $0x1d0] sm:$0xff]  }
 0x3f0   : > { %11462 = vmatprep.subr.bf16.mxu1 %v12960_v34 }
 0x3f3   : > { %11463 = vmatpush3.bf16.msra.mxu1 %v12960_v34 }
 0x3f4   : > { %11464 = vmatprep.subr.bf16.mxu1 %v12961_v53 }
 0x3f6   : > { %11433 = vmatmul.mubr.bf16.gmra.mrb[52].mxu1 %v13921_v54  ;;  %v12978_v54 = vld [vmem:[%s14740_s4 + $0x218] sm:$0xff]  }
 0x3f7   : > { %11436 = vmatprep.mubr.bf16.mxu1 %v13928_v12  ;;  %11465 = vmatpush3.bf16.msra.mxu1 %v12961_v53  ;;  %v12988_v12 = vld [vmem:[%s14742_s6 + $0x68] sm:$0xff]  }
 0x3f8   : > { %11466 = vmatprep.subr.bf16.mxu1 %v12962_v0  ;;  %v6045_v53 = vld [vmem:[#allocation3 + $0x4a] sm:$0xff] }
 0x3fb   : > { %11467 = vmatpush3.bf16.msra.mxu1 %v12962_v0  ;;  %v6046_v0 = vld [vmem:[#allocation3 + $0x52] sm:$0xff] }
 0x3fc   : > { %11468 = vmatprep.subr.bf16.mxu1 %v12963_v29 }
 0x3fe   : > { %11437 = vmatmul.mubr.bf16.gmra.mrb[56].mxu1 %v13933_v60  ;;  %v12979_v60 = vld [vmem:[%s14740_s4 + $0x220] sm:$0xff]  }
 0x3ff   : > { %11440 = vmatprep.mubr.bf16.mxu1 %v13940_v26  ;;  %11469 = vmatpush3.bf16.msra.mxu1 %v12963_v29  ;;  %v5748_v26 = vld [vmem:[#allocation3 + $0xb1] sm:$0xff]  ;;  %v6047_v29 = vld [vmem:[#allocation3 + $0x62] sm:$0xff] }
 0x400   : > { %11470 = vmatprep.subr.bf16.mxu1 %v12964_v18 }
 0x403   : > { %11471 = vmatpush3.bf16.msra.mxu1 %v12964_v18  ;;  %v6048_v18 = vld [vmem:[#allocation3 + $0x6a] sm:$0xff] }
 0x404   : > { %11472 = vmatprep.subr.bf16.mxu1 %v12965_v3 }
 0x406   : > { %11441 = vmatmul.mubr.bf16.gmra.mrb[60].mxu1 %v13945_v17  ;;  %v5774_v17 = vpack.c.bf16 %v5748_v26, %v14039_v21  ;;  %v5761_v21 = vld [vmem:[#allocation3 + $0x151] sm:$0xff] }
 0x407   : > { %11444 = vmatprep.mubr.bf16.mxu1 %v13952_v45  ;;  %11473 = vmatpush3.bf16.msra.mxu1 %v12965_v3  ;;  %v12980_v45 = vld [vmem:[%s14740_s4 + $0x228] sm:$0xff]   ;;  %v6076_v3 = vpack.c.bf16 %v6046_v0, %v6045_v53 }
 0x408   : > { %11474 = vmatprep.subr.bf16.mxu1 %v12966_v27  ;;  %v12992_v53 = vld [vmem:[%s14742_s6 + $0x8] sm:$0xff]  }
 0x40b   : > { %11475 = vmatpush3.bf16.msra.mxu1 %v12966_v27  ;;  %v6077_v27 = vpack.c.bf16 %v6048_v18, %v6047_v29 }
 0x40c   : > { %11508 = vmatprep.subr.bf16.mxu1 %v12967_v30 }
 0x40e   : > { %11445 = vmatmul.mubr.bf16.gmra.mrb[64].mxu1 %v13954_v52  ;;  %v12981_v52 = vld [vmem:[%s14740_s4 + $0x230] sm:$0xff]  }
 0x40f   : > { %11448 = vmatprep.mubr.bf16.mxu1 %v13958_v31  ;;  %v5752_v31 = vld [vmem:[#allocation3 + $0xe1] sm:$0xff] }
 0x416   : > { %11449 = vmatmul.mubr.bf16.gmra.mrb[68].mxu1 %v13960_v58  ;;  %v5754_v58 = vld [vmem:[#allocation3 + $0xf9] sm:$0xff] }
 0x417   : > { %11452 = vmatprep.mubr.bf16.mxu1 %v13964_v42  ;;  %v5751_v42 = vld [vmem:[#allocation3 + $0xd9] sm:$0xff] }
 0x41e   : > { %11453 = vmatmul.mubr.bf16.gmra.mrb[72].mxu1 %v13966_v4  ;;  %v5776_v4 = vpack.c.bf16 %v5752_v31, %v5751_v42  ;;  %v6068_v31 = vld [vmem:[#allocation3 + $0x15a] sm:$0xff] }
 0x41f   : > { %11456 = vmatprep.mubr.bf16.mxu1 %v13970_v47  ;;  %v12982_v47 = vld [vmem:[%s14740_s4 + $0x238] sm:$0xff]  }
 0x426   : > { %11457 = vmatmul.mubr.bf16.gmra.mrb[76].mxu1 %v14113_v38 }
 0x427   : > { %11476 = vmatprep.mubr.bf16.mxu1 %v13839_v46  ;;  %v12970_v46 = vld [vmem:[%s14740_s4 + $0x1d8] sm:$0xff]  }
 0x42e   : > { %11477 = vmatmul.mubr.bf16.vlgmr.msra.gmra.mrb[48].mxu1 %v13847_v51  ;;  %v12971_v51 = vld [vmem:[%s14740_s4 + $0x1e0] sm:$0xff]  }
 0x42f   : > { %11509 = vmatpush3.bf16.msra.mxu1 %v12967_v30  ;;  %11480 = vmatprep.mubr.bf16.mxu1 %v13852_v41  ;;  %v12972_v41 = vld [vmem:[%s14740_s4 + $0x1e8] sm:$0xff]   ;;  %v6049_v30 = vld [vmem:[#allocation3 + $0x7a] sm:$0xff] }
 0x430   : > { %11510 = vmatprep.subr.bf16.mxu1 %v12968_v15 }
 0x433   : > { %11511 = vmatpush3.bf16.msra.mxu1 %v12968_v15  ;;  %v6052_v15 = vld [vmem:[#allocation3 + $0x9a] sm:$0xff] }
 0x434   : > { %11512 = vmatprep.subr.bf16.mxu1 %v12969_v62 }
 0x436   : > { %11481 = vmatmul.mubr.bf16.gmra.mrb[52].mxu1 %v13859_v25  ;;  %v12973_v25 = vld [vmem:[%s14740_s4 + $0x1f0] sm:$0xff]  }
 0x437   : > { %11484 = vmatprep.mubr.bf16.mxu1 %v13864_v2  ;;  %11513 = vmatpush3.bf16.msra.mxu1 %v12969_v62  ;;  %v12974_v2 = vld [vmem:[%s14740_s4 + $0x1f8] sm:$0xff]   ;;  %v6078_v62 = vpack.c.bf16 %v6050_v33, %v6049_v30 }
 0x438   : > { %11514 = vmatprep.subr.bf16.mxu1 %v12970_v46 }
 0x43b   : > { %11515 = vmatpush3.bf16.msra.mxu1 %v12970_v46  ;;  %v6079_v46 = vpack.c.bf16 %v6052_v15, %v6051_v39 }
 0x43c   : > { %11516 = vmatprep.subr.bf16.mxu1 %v12971_v51 }
 0x43e   : > { %11485 = vmatmul.mubr.bf16.gmra.mrb[56].mxu1 %v13871_v5  ;;  %v12975_v5 = vld [vmem:[%s14740_s4 + $0x200] sm:$0xff]  }
 0x43f   : > { %11488 = vmatprep.mubr.bf16.mxu1 %v13876_v8  ;;  %11517 = vmatpush3.bf16.msra.mxu1 %v12971_v51  ;;  %v5461_v8 = vld [vmem:[#allocation3 + $0x198] sm:$0xff]  ;;  %v6053_v51 = vld [vmem:[#allocation3 + $0xaa] sm:$0xff] }
 0x440   : > { %11518 = vmatprep.subr.bf16.mxu1 %v12972_v41 }
 0x443   : > { %11519 = vmatpush3.bf16.msra.mxu1 %v12972_v41  ;;  %v6054_v41 = vld [vmem:[#allocation3 + $0xb2] sm:$0xff] }
 0x444   : > { %11520 = vmatprep.subr.bf16.mxu1 %v12973_v25 }
 0x446   : > { %11489 = vmatmul.mubr.bf16.gmra.mrb[60].mxu1 %v13883_v1  ;;  %v5478_v1 = vpack.c.bf16 %v13826_v36, %v5461_v8  ;;  %v12976_v36 = vld [vmem:[%s14740_s4 + $0x208] sm:$0xff]  }
 0x447   : > { %11492 = vmatprep.mubr.bf16.mxu1 %v13885_v14  ;;  %11521 = vmatpush3.bf16.msra.mxu1 %v12973_v25  ;;  %v12983_v14 = vld [vmem:[%s14742_s6 + $0x40] sm:$0xff]  }
 0x448   : > { %11522 = vmatprep.subr.bf16.mxu1 %v12974_v2  ;;  %11604 = vmatprep.subr.bf16.mxu0 %v12983_v14  ;;  %v6055_v25 = vld [vmem:[#allocation3 + $0xc2] sm:$0xff] }
 0x449   : > { %11605 = vmatpush3.bf16.msra.mxu0 %v12983_v14  ;;  %v6058_v14 = vld [vmem:[#allocation3 + $0xe2] sm:$0xff] }
 0x44b   : > { %11523 = vmatpush3.bf16.msra.mxu1 %v12974_v2  ;;  %v6056_v2 = vld [vmem:[#allocation3 + $0xca] sm:$0xff] }
 0x44c   : > { %11556 = vmatprep.subr.bf16.mxu1 %v12975_v5  ;;  %v6081_v8 = vpack.c.bf16 %v6056_v2, %v6055_v25 }
 0x44e   : > { %11493 = vmatmul.mubr.bf16.gmra.mrb[64].mxu1 %v13889_v7  ;;  %v12984_v7 = vld [vmem:[%s14742_s6 + $0x48] sm:$0xff]  }
 0x44f   : > { %11496 = vmatprep.mubr.bf16.mxu1 %v13891_v16  ;;  %11606 = vmatprep.subr.bf16.mxu0 %v12984_v7  ;;  %v12985_v16 = vld [vmem:[%s14742_s6 + $0x50] sm:$0xff]  }
 0x450   : > { %11607 = vmatpush3.bf16.msra.mxu0 %v12984_v7  ;;  %v6059_v7 = vld [vmem:[#allocation3 + $0xf2] sm:$0xff] }
 0x451   : > { %11608 = vmatprep.subr.bf16.mxu0 %v12985_v16 }
 0x454   : > { %11609 = vmatpush3.bf16.msra.mxu0 %v12985_v16  ;;  %v6060_v16 = vld [vmem:[#allocation3 + $0xfa] sm:$0xff] }
 0x456   : > { %11497 = vmatmul.mubr.bf16.gmra.mrb[68].mxu1 %v13895_v28  ;;  %v12986_v28 = vld [vmem:[%s14742_s6 + $0x58] sm:$0xff]  }
 0x457   : > { %11500 = vmatprep.mubr.bf16.mxu1 %v13897_v35  ;;  %v12977_v35 = vld [vmem:[%s14740_s4 + $0x210] sm:$0xff]   ;;  %11610 = vmatprep.subr.bf16.mxu0 %v12986_v28 }
 0x458   : > { %11611 = vmatpush3.bf16.msra.mxu0 %v12986_v28  ;;  %v6083_v28 = vpack.c.bf16 %v6060_v16, %v6059_v7 }
 0x45e   : > { %11501 = vmatmul.mubr.bf16.gmra.mrb[72].mxu1 %v13901_v24  ;;  %v12987_v24 = vld [vmem:[%s14742_s6 + $0x60] sm:$0xff]  }
 0x45f   : > { %11504 = vmatprep.mubr.bf16.mxu1 %v14012_v32  ;;  %11612 = vmatprep.subr.bf16.mxu0 %v12987_v24  ;;  %v5777_v32 = vpack.c.bf16 %v5754_v58, %v14062_v6  ;;  %v6043_v6 = vld [vmem:[#allocation3 + $0x32] sm:$0xff] }
 0x460   : > { %11613 = vmatpush3.bf16.msra.mxu0 %v12987_v24  ;;  %v6075_v34 = vpack.c.bf16 %v6044_v61, %v6043_v6  ;;  %v6062_v24 = vld [vmem:[#allocation3 + $0x112] sm:$0xff] }
 0x461   : > { %11614 = vmatprep.subr.bf16.mxu0 %v12988_v12 }
 0x464   : > { %11615 = vmatpush3.bf16.msra.mxu0 %v12988_v12  ;;  %v6064_v12 = vld [vmem:[#allocation3 + $0x12a] sm:$0xff] }
 0x466   : > { %11505 = vmatmul.mubr.bf16.gmra.mrb[76].mxu1 %v5478_v1  ;;  %v6057_v1 = vld [vmem:[#allocation3 + $0xda] sm:$0xff] }
 0x467   : > { %11524 = vmatprep.mubr.bf16.mxu1 %v14015_v40  ;;  %v5756_v40 = vld [vmem:[#allocation3 + $0x111] sm:$0xff] }
 0x468   : > { %v5778_v13 = vpack.c.bf16 %v5756_v40, %v5755_v56  ;;  %v6073_v40 = vld [vmem:[#allocation3 + $0x19a] sm:$0xff] }
 0x46e   : > { %11525 = vmatmul.mubr.bf16.vlgmr.msra.gmra.mrb[48].mxu1 %v14020_v48  ;;  %v5758_v48 = vld [vmem:[#allocation3 + $0x129] sm:$0xff] }
 0x46f   : > { %11557 = vmatpush3.bf16.msra.mxu1 %v12975_v5  ;;  %11528 = vmatprep.mubr.bf16.mxu1 %v14027_v49  ;;  %v5757_v49 = vld [vmem:[#allocation3 + $0x121] sm:$0xff]  ;;  %v6080_v5 = vpack.c.bf16 %v6054_v41, %v6053_v51 }
 0x470   : > { %11558 = vmatprep.subr.bf16.mxu1 %v12976_v36  ;;  %v5779_v19 = vpack.c.bf16 %v5758_v48, %v5757_v49  ;;  %v6074_v48 = vld [vmem:[#allocation3 + $0x1a2] sm:$0xff]  ;;  %v12990_v49 = vld [vmem:[%s14742_s6 + $0x78] sm:$0xff]  }
 0x471   : > { %v6090_v56 = vpack.c.bf16 %v6074_v48, %v6073_v40 }
 0x473   : > { %11559 = vmatpush3.bf16.msra.mxu1 %v12976_v36  ;;  %v6082_v36 = vpack.c.bf16 %v6058_v14, %v6057_v1 }
 0x474   : > { %11560 = vmatprep.subr.bf16.mxu1 %v12977_v35 }
 0x476   : > { %11529 = vmatmul.mubr.bf16.gmra.mrb[52].mxu1 %v14032_v9  ;;  %v5762_v9 = vld [vmem:[#allocation3 + $0x159] sm:$0xff] }
 0x477   : > { %11532 = vmatprep.mubr.bf16.mxu1 %v14041_v37  ;;  %11561 = vmatpush3.bf16.msra.mxu1 %v12977_v35  ;;  %v5781_v22 = vpack.c.bf16 %v5762_v9, %v5761_v21  ;;  %v5764_v37 = vld [vmem:[#allocation3 + $0x171] sm:$0xff] }
 0x478   : > { %11562 = vmatprep.subr.bf16.mxu1 %v12978_v54  ;;  %v5782_v44 = vpack.c.bf16 %v5764_v37, %v5763_v50  ;;  %v6061_v35 = vld [vmem:[#allocation3 + $0x10a] sm:$0xff] }
 0x47b   : > { %11563 = vmatpush3.bf16.msra.mxu1 %v12978_v54  ;;  %v6063_v54 = vld [vmem:[#allocation3 + $0x122] sm:$0xff] }
 0x47c   : > { %11564 = vmatprep.subr.bf16.mxu1 %v12979_v60  ;;  %v6085_v26 = vpack.c.bf16 %v6064_v12, %v6063_v54  ;;  %v12995_v54 = vld [vmem:[%s14742_s6 + $0x20] sm:$0xff]  }
 0x47e   : > { %11533 = vmatmul.mubr.bf16.gmra.mrb[56].mxu1 %v5774_v17  ;;  %v6065_v17 = vld [vmem:[#allocation3 + $0x13a] sm:$0xff] }
 0x47f   : > { %11536 = vmatprep.mubr.bf16.mxu1 %v14052_v11  ;;  %11565 = vmatpush3.bf16.msra.mxu1 %v12979_v60  ;;  %v5767_v11 = vld [vmem:[#allocation3 + $0x199] sm:$0xff]  ;;  %v6084_v60 = vpack.c.bf16 %v6062_v24, %v6061_v35 }
 0x480   : > { %11566 = vmatprep.subr.bf16.mxu1 %v12980_v45  ;;  %v5784_v63 = vpack.c.bf16 %v5768_v59, %v5767_v11 }
 0x483   : > { %11567 = vmatpush3.bf16.msra.mxu1 %v12980_v45  ;;  %v6066_v45 = vld [vmem:[#allocation3 + $0x142] sm:$0xff] }
 0x484   : > { %11568 = vmatprep.subr.bf16.mxu1 %v12981_v52  ;;  %v6086_v58 = vpack.c.bf16 %v6066_v45, %v6065_v17 }
 0x486   : > { %11537 = vmatmul.mubr.bf16.gmra.mrb[60].mxu1 %v5776_v4  ;;  %v6069_v4 = vld [vmem:[#allocation3 + $0x16a] sm:$0xff] }
 0x487   : > { %11540 = vmatprep.mubr.bf16.mxu1 %v5777_v32  ;;  %11569 = vmatpush3.bf16.msra.mxu1 %v12981_v52  ;;  %v6067_v52 = vld [vmem:[#allocation3 + $0x152] sm:$0xff] }
 0x488   : > { %11570 = vmatprep.subr.bf16.mxu1 %v12982_v47  ;;  %v6087_v42 = vpack.c.bf16 %v6068_v31, %v6067_v52  ;;  %v12996_v52 = vld [vmem:[%s14742_s6 + $0x28] sm:$0xff]  }
 0x48b   : > { %11571 = vmatpush3.bf16.msra.mxu1 %v12982_v47  ;;  %v6070_v47 = vld [vmem:[#allocation3 + $0x172] sm:$0xff] }
 0x48c   : > { %v6088_v32 = vpack.c.bf16 %v6070_v47, %v6069_v4 }
 0x48e   : > { %11541 = vmatmul.mubr.bf16.gmra.mrb[64].mxu1 %v5778_v13  ;;  %v12989_v13 = vld [vmem:[%s14742_s6 + $0x70] sm:$0xff]  }
 0x48f   : > { %11544 = vmatprep.mubr.bf16.mxu1 %v5779_v19  ;;  %11616 = vmatprep.subr.bf16.mxu0 %v12989_v13  ;;  %v6580_v19 = vld [vmem:[#allocation3 + $0x1] sm:$0xff] }
 0x490   : > { %11617 = vmatpush3.bf16.msra.mxu0 %v12989_v13  ;;  %v6612_v9 = vpack.c.bf16 %v6581_v20, %v6580_v19  ;;  %v12997_v13 = vld [vmem:[%s14742_s6 + $0x30] sm:$0xff]  }
 0x491   : > { %11618 = vmatprep.subr.bf16.mxu0 %v12990_v49 }
 0x492   : > { %11620 = vmatprep.mubr.bf16.mxu0 %v6612_v9 }
 0x494   : > { %11619 = vmatpush3.bf16.msra.mxu0 %v12990_v49 }
 0x496   : > { %11545 = vmatmul.mubr.bf16.gmra.mrb[68].mxu1 %v5780_v10 }
 0x497   : > { %11548 = vmatprep.mubr.bf16.mxu1 %v5781_v22 }
 0x49e   : > { %11549 = vmatmul.mubr.bf16.gmra.mrb[72].mxu1 %v5782_v44 }
 0x49f   : > { %11552 = vmatprep.mubr.bf16.mxu1 %v5783_v57 }
 0x4a6   : > { %11553 = vmatmul.mubr.bf16.gmra.mrb[76].mxu1 %v5784_v63 }
 0x4a7   : > { %11572 = vmatprep.mubr.bf16.mxu1 %v6075_v34 }
 0x4ae   : > { %11573 = vmatmul.mubr.bf16.vlgmr.msra.gmra.mrb[48].mxu1 %v6076_v3 }
 0x4af   : > { %11576 = vmatprep.mubr.bf16.mxu1 %v6077_v27 }
 0x4b6   : > { %11577 = vmatmul.mubr.bf16.gmra.mrb[52].mxu1 %v6078_v62  ;;  %v12993_v62 = vld [vmem:[%s14742_s6 + $0x10] sm:$0xff]  }
 0x4b7   : > { %11580 = vmatprep.mubr.bf16.mxu1 %v6079_v46 }
 0x4be   : > { %11581 = vmatmul.mubr.bf16.gmra.mrb[56].mxu1 %v6080_v5  ;;  %v12994_v5 = vld [vmem:[%s14742_s6 + $0x18] sm:$0xff]  }
 0x4bf   : > { %11584 = vmatprep.mubr.bf16.mxu1 %v6081_v8 }
 0x4c6   : > { %11585 = vmatmul.mubr.bf16.gmra.mrb[60].mxu1 %v6082_v36 }
 0x4c7   : > { %11588 = vmatprep.mubr.bf16.mxu1 %v6083_v28 }
 0x4ce   : > { %11589 = vmatmul.mubr.bf16.gmra.mrb[64].mxu1 %v6084_v60 }
 0x4cf   : > { %11592 = vmatprep.mubr.bf16.mxu1 %v6085_v26 }
 0x4d6   : > { %11593 = vmatmul.mubr.bf16.gmra.mrb[68].mxu1 %v6086_v58 }
 0x4d7   : > { %11596 = vmatprep.mubr.bf16.mxu1 %v6087_v42 }
 0x4de   : > { %11597 = vmatmul.mubr.bf16.gmra.mrb[72].mxu1 %v6088_v32 }
 0x4df   : > { %11600 = vmatprep.mubr.bf16.mxu1 %v14113_v38  ;;  %v12991_v38 = vld [vmem:[%s14742_s6] sm:$0xff]  }
 0x4e0   : > { %11652 = vmatprep.subr.bf16.mxu0 %v12991_v38 }
 0x4e6   : > { %11601 = vmatmul.mubr.bf16.gmra.mrb[76].mxu1 %v6090_v56 }
 0x581   : > { %v11574_v10 = vpop.f32.mrb[48].mxu1 }
 0x582   : > { %v6358_v21 = vadd.f32 %v11574_v10, %v14216_v23  ;;  %v6190_v22 = vpop.f32.mrb[49].mxu1  ;;  %v12998_v10 = vld [vmem:[%s14742_s6 + $0x38] sm:$0xff]  }
 0x583   : > { %v6356_v37 = vadd.f32 %v14216_v23, %v6190_v22  ;;  %v11575_v43 = vpop.f32.mrb[50].mxu1 }
 0x584   : > { %v6390_v50 = vmax.f32 %v6358_v21, 0.0  ;;  %v6359_v44 = vadd.f32 %v11575_v43, %v14216_v23  ;;  %v6193_v55 = vpop.f32.mrb[51].mxu1 }
 0x585   : > { %v6388_v57 = vmax.f32 %v6356_v37, 0.0  ;;  %v6357_v11 = vadd.f32 %v14216_v23, %v6193_v55 }
 0x586   : > { %6486 = vst [vmem:[#allocation3 + $0x31] sm:$0xff] %v6390_v50  ;;  %v6391_v59 = vmax.f32 %v6359_v44, 0.0 }
 0x587   : > { %6484 = vst [vmem:[#allocation3 + $0x19] sm:$0xff] %v6388_v57  ;;  %v6389_v63 = vmax.f32 %v6357_v11, 0.0 }
 0x588   : > { %6487 = vst [vmem:[#allocation3 + $0x39] sm:$0xff] %v6391_v59  ;;  %v6614_v6 = vpack.c.bf16 %v6391_v59, %v6390_v50  ;;  %v14273_v59 = vld [vmem:[%s14742_s6 + $0x80] sm:$0xff]  }
 0x589   : > { %6485 = vst [vmem:[#allocation3 + $0x21] sm:$0xff] %v6389_v63  ;;  %v11578_v61 = vpop.f32.mrb[52].mxu1  ;;  %v6613_v34 = vpack.c.bf16 %v6389_v63, %v6388_v57 }
 0x58a   : > { %v6362_v0 = vadd.f32 %v11578_v61, %v14216_v23  ;;  %v6206_v29 = vpop.f32.mrb[53].mxu1 }
 0x58b   : > { %v6360_v18 = vadd.f32 %v14216_v23, %v6206_v29  ;;  %v11579_v3 = vpop.f32.mrb[54].mxu1  ;;  %11621 = vmatmul.mubr.bf16.vlgmr.msra.gmra.mrb[48].mxu0 %v6613_v34 }
 0x58c   : > { %v6394_v27 = vmax.f32 %v6362_v0, 0.0  ;;  %v6363_v30 = vadd.f32 %v11579_v3, %v14216_v23  ;;  %v6209_v33 = vpop.f32.mrb[55].mxu1  ;;  %11653 = vmatpush3.bf16.msra.mxu0 %v12991_v38  ;;  %11624 = vmatprep.mubr.bf16.mxu0 %v6614_v6 }
 0x58d   : > { %v6392_v39 = vmax.f32 %v6360_v18, 0.0  ;;  %v6361_v15 = vadd.f32 %v14216_v23, %v6209_v33  ;;  %11654 = vmatprep.subr.bf16.mxu0 %v12992_v53 }
 0x58e   : > { %6490 = vst [vmem:[#allocation3 + $0x61] sm:$0xff] %v6394_v27  ;;  %v6395_v46 = vmax.f32 %v6363_v30, 0.0 }
 0x58f   : > { %6488 = vst [vmem:[#allocation3 + $0x49] sm:$0xff] %v6392_v39  ;;  %v6393_v51 = vmax.f32 %v6361_v15, 0.0 }
 0x590   : > { %6491 = vst [vmem:[#allocation3 + $0x69] sm:$0xff] %v6395_v46  ;;  %11655 = vmatpush3.bf16.msra.mxu0 %v12992_v53  ;;  %v6616_v41 = vpack.c.bf16 %v6395_v46, %v6394_v27 }
 0x591   : > { %6489 = vst [vmem:[#allocation3 + $0x51] sm:$0xff] %v6393_v51  ;;  %v11582_v25 = vpop.f32.mrb[56].mxu1  ;;  %v6615_v2 = vpack.c.bf16 %v6393_v51, %v6392_v39  ;;  %11656 = vmatprep.subr.bf16.mxu0 %v12993_v62 }
 0x592   : > { %v6366_v8 = vadd.f32 %v11582_v25, %v14216_v23  ;;  %v6222_v1 = vpop.f32.mrb[57].mxu1 }
 0x593   : > { %v6364_v14 = vadd.f32 %v14216_v23, %v6222_v1  ;;  %v11583_v7 = vpop.f32.mrb[58].mxu1  ;;  %11625 = vmatmul.mubr.bf16.gmra.mrb[52].mxu0 %v6615_v2 }
 0x594   : > { %v6398_v16 = vmax.f32 %v6366_v8, 0.0  ;;  %v6367_v36 = vadd.f32 %v11583_v7, %v14216_v23  ;;  %v6225_v28 = vpop.f32.mrb[59].mxu1  ;;  %11628 = vmatprep.mubr.bf16.mxu0 %v6616_v41  ;;  %11657 = vmatpush3.bf16.msra.mxu0 %v12993_v62 }
 0x595   : > { %v6396_v35 = vmax.f32 %v6364_v14, 0.0  ;;  %v6365_v24 = vadd.f32 %v14216_v23, %v6225_v28  ;;  %11658 = vmatprep.subr.bf16.mxu0 %v12994_v5 }
 0x596   : > { %6494 = vst [vmem:[#allocation3 + $0x91] sm:$0xff] %v6398_v16  ;;  %v6399_v12 = vmax.f32 %v6367_v36, 0.0 }
 0x597   : > { %6492 = vst [vmem:[#allocation3 + $0x79] sm:$0xff] %v6396_v35  ;;  %v14242_v60 = vmax.f32 %v6365_v24, 0.0 }
 0x598   : > { %6495 = vst [vmem:[#allocation3 + $0x99] sm:$0xff] %v6399_v12  ;;  %v6618_v26 = vpack.c.bf16 %v6399_v12, %v6398_v16  ;;  %11659 = vmatpush3.bf16.msra.mxu0 %v12994_v5 }
 0x599   : > { %6493 = vst [vmem:[#allocation3 + $0x81] sm:$0xff] %v14242_v60  ;;  %v11586_v17 = vpop.f32.mrb[60].mxu1  ;;  %v6617_v45 = vpack.c.bf16 %v14242_v60, %v6396_v35  ;;  %11660 = vmatprep.subr.bf16.mxu0 %v12995_v54 }
 0x59a   : > { %v6370_v31 = vadd.f32 %v11586_v17, %v14216_v23  ;;  %v6238_v58 = vpop.f32.mrb[61].mxu1 }
 0x59b   : > { %v6368_v42 = vadd.f32 %v14216_v23, %v6238_v58  ;;  %v11587_v4 = vpop.f32.mrb[62].mxu1  ;;  %11629 = vmatmul.mubr.bf16.gmra.mrb[56].mxu0 %v6617_v45 }
 0x59c   : > { %v6402_v47 = vmax.f32 %v6370_v31, 0.0  ;;  %v6371_v32 = vadd.f32 %v11587_v4, %v14216_v23  ;;  %v6241_v40 = vpop.f32.mrb[63].mxu1  ;;  %11632 = vmatprep.mubr.bf16.mxu0 %v6618_v26  ;;  %11661 = vmatpush3.bf16.msra.mxu0 %v12995_v54 }
 0x59d   : > { %v6400_v48 = vmax.f32 %v6368_v42, 0.0  ;;  %v6369_v56 = vadd.f32 %v14216_v23, %v6241_v40  ;;  %11662 = vmatprep.subr.bf16.mxu0 %v12996_v52  ;;  %v6516_v40 = vld [vmem:[#allocation3] sm:$0xff] }
 0x59e   : > { %6498 = vst [vmem:[#allocation3 + $0xc1] sm:$0xff] %v6402_v47  ;;  %v14256_v49 = vmax.f32 %v6371_v32, 0.0 }
 0x59f   : > { %6496 = vst [vmem:[#allocation3 + $0xa9] sm:$0xff] %v6400_v48  ;;  %v6401_v19 = vmax.f32 %v6369_v56, 0.0 }
 0x5a0   : > { %6499 = vst [vmem:[#allocation3 + $0xc9] sm:$0xff] %v14256_v49  ;;  %v6620_v20 = vpack.c.bf16 %v14256_v49, %v6402_v47  ;;  %11663 = vmatpush3.bf16.msra.mxu0 %v12996_v52 }
 0x5a1   : > { %6497 = vst [vmem:[#allocation3 + $0xb1] sm:$0xff] %v6401_v19  ;;  %v11590_v38 = vpop.f32.mrb[64].mxu1  ;;  %v14260_v9 = vpack.c.bf16 %v6401_v19, %v6400_v48  ;;  %11664 = vmatprep.subr.bf16.mxu0 %v12997_v13 }
 0x5a2   : > { %v6374_v21 = vadd.f32 %v11590_v38, %v14216_v23  ;;  %v6254_v22 = vpop.f32.mrb[65].mxu1 }
 0x5a3   : > { %v6372_v37 = vadd.f32 %v14216_v23, %v6254_v22  ;;  %v11591_v43 = vpop.f32.mrb[66].mxu1  ;;  %11633 = vmatmul.mubr.bf16.gmra.mrb[60].mxu0 %v14260_v9 }
 0x5a4   : > { %v6406_v50 = vmax.f32 %v6374_v21, 0.0  ;;  %v6375_v44 = vadd.f32 %v11591_v43, %v14216_v23  ;;  %v6257_v55 = vpop.f32.mrb[67].mxu1  ;;  %11636 = vmatprep.mubr.bf16.mxu0 %v6620_v20  ;;  %11665 = vmatpush3.bf16.msra.mxu0 %v12997_v13  ;;  %v14306_v13 = vld [vmem:[#allocation3 + $0x8] sm:$0xff]  ;;  %v6518_v21 = vld [vmem:[#allocation3 + $0x18] sm:$0xff] }
 0x5a5   : > { %v6404_v57 = vmax.f32 %v6372_v37, 0.0  ;;  %v6373_v11 = vadd.f32 %v14216_v23, %v6257_v55  ;;  %11666 = vmatprep.subr.bf16.mxu0 %v12998_v10  ;;  %v6548_v19 = vpack.c.bf16 %v14306_v13, %v6516_v40  ;;  %v6520_v37 = vld [vmem:[#allocation3 + $0x30] sm:$0xff]  ;;  %v13000_v43 = vld [vmem:[%s14742_s6 + $0x88] sm:$0xff]  }
 0x5a6   : > { %6502 = vst [vmem:[#allocation3 + $0xf1] sm:$0xff] %v6406_v50  ;;  %v6407_v63 = vmax.f32 %v6375_v44, 0.0  ;;  %v13001_v44 = vld [vmem:[%s14742_s6 + $0x90] sm:$0xff]  }
 0x5a7   : > { %6500 = vst [vmem:[#allocation3 + $0xd9] sm:$0xff] %v6404_v57  ;;  %v6405_v6 = vmax.f32 %v6373_v11, 0.0  ;;  %v6523_v55 = vld [vmem:[#allocation3 + $0x50] sm:$0xff]  ;;  %v6522_v11 = vld [vmem:[#allocation3 + $0x48] sm:$0xff] }
 0x5a8   : > { %6503 = vst [vmem:[#allocation3 + $0xf9] sm:$0xff] %v6407_v63  ;;  %v14275_v61 = vpack.c.bf16 %v6407_v63, %v6406_v50  ;;  %11667 = vmatpush3.bf16.msra.mxu0 %v12998_v10  ;;  %v6519_v10 = vld [vmem:[#allocation3 + $0x20] sm:$0xff]  ;;  %v14327_v63 = vpack.c.bf16 %v6523_v55, %v6522_v11  ;;  %v7067_v55 = vld [vmem:[#allocation3 + $0x32] sm:$0xff] }
 0x5a9   : > { %6501 = vst [vmem:[#allocation3 + $0xe1] sm:$0xff] %v6405_v6  ;;  %v11594_v34 = vpop.f32.mrb[68].mxu1  ;;  %v14277_v53 = vpack.c.bf16 %v6405_v6, %v6404_v57  ;;  %11700 = vmatprep.subr.bf16.mxu0 %v14273_v59  ;;  %v14314_v22 = vpack.c.bf16 %v6519_v10, %v6518_v21  ;;  %v6525_v57 = vld [vmem:[#allocation3 + $0x68] sm:$0xff]  ;;  %v6524_v6 = vld [vmem:[#allocation3 + $0x60] sm:$0xff] }
 0x5aa   : > { %v6378_v0 = vadd.f32 %v11594_v34, %v14216_v23  ;;  %v6270_v29 = vpop.f32.mrb[69].mxu1  ;;  %v13002_v34 = vld [vmem:[%s14742_s6 + $0x98] sm:$0xff]  }
 0x5ab   : > { %v6376_v18 = vadd.f32 %v14216_v23, %v6270_v29  ;;  %v11595_v3 = vpop.f32.mrb[70].mxu1  ;;  %11637 = vmatmul.mubr.bf16.gmra.mrb[64].mxu0 %v14277_v53  ;;  %v6527_v29 = vld [vmem:[#allocation3 + $0x80] sm:$0xff] }
 0x5ac   : > { %v6410_v27 = vmax.f32 %v6378_v0, 0.0  ;;  %v6379_v30 = vadd.f32 %v11595_v3, %v14216_v23  ;;  %v6273_v33 = vpop.f32.mrb[71].mxu1  ;;  %11640 = vmatprep.mubr.bf16.mxu0 %v14275_v61  ;;  %v13003_v0 = vld [vmem:[%s14742_s6 + $0xa0] sm:$0xff]   ;;  %v6526_v3 = vld [vmem:[#allocation3 + $0x78] sm:$0xff] }
 0x5ad   : > { %v6408_v39 = vmax.f32 %v6376_v18, 0.0  ;;  %v6377_v15 = vadd.f32 %v14216_v23, %v6273_v33  ;;  %v6529_v18 = vld [vmem:[#allocation3 + $0x98] sm:$0xff]  ;;  %v13004_v33 = vld [vmem:[%s14742_s6 + $0xa8] sm:$0xff]  }
 0x5ae   : > { %6506 = vst [vmem:[#allocation3 + $0x121] sm:$0xff] %v6410_v27  ;;  %v6411_v62 = vmax.f32 %v6379_v30, 0.0  ;;  %v6528_v30 = vld [vmem:[#allocation3 + $0x90] sm:$0xff] }
 0x5af   : > { %6504 = vst [vmem:[#allocation3 + $0x109] sm:$0xff] %v6408_v39  ;;  %v6409_v46 = vmax.f32 %v6377_v15, 0.0  ;;  %v13005_v15 = vld [vmem:[%s14742_s6 + $0xb0] sm:$0xff]  }
 0x5b0   : > { %6507 = vst [vmem:[#allocation3 + $0x129] sm:$0xff] %v6411_v62  ;;  %v14286_v51 = vpack.c.bf16 %v6411_v62, %v6410_v27  ;;  %v14339_v27 = vpack.c.bf16 %v6527_v29, %v6526_v3  ;;  %v6531_v62 = vld [vmem:[#allocation3 + $0xb0] sm:$0xff]  ;;  %v7071_v3 = vld [vmem:[#allocation3 + $0x62] sm:$0xff] }
 0x5b1   : > { %6505 = vst [vmem:[#allocation3 + $0x111] sm:$0xff] %v6409_v46  ;;  %v11598_v41 = vpop.f32.mrb[72].mxu1  ;;  %v14288_v25 = vpack.c.bf16 %v6409_v46, %v6408_v39  ;;  %v14344_v39 = vpack.c.bf16 %v6529_v18, %v6528_v30  ;;  %v6533_v46 = vld [vmem:[#allocation3 + $0xc8] sm:$0xff]  ;;  %v7070_v18 = vld [vmem:[#allocation3 + $0x52] sm:$0xff] }
 0x5b2   : > { %v6382_v2 = vadd.f32 %v11598_v41, %v14216_v23  ;;  %v6286_v5 = vpop.f32.mrb[73].mxu1  ;;  %v6530_v41 = vld [vmem:[#allocation3 + $0xa8] sm:$0xff] }
 0x5b3   : > { %v6380_v8 = vadd.f32 %v14216_v23, %v6286_v5  ;;  %v11599_v1 = vpop.f32.mrb[74].mxu1  ;;  %11641 = vmatmul.mubr.bf16.gmra.mrb[68].mxu0 %v14288_v25  ;;  %v6532_v5 = vld [vmem:[#allocation3 + $0xc0] sm:$0xff]  ;;  %v7069_v29 = vld [vmem:[#allocation3 + $0x4a] sm:$0xff] }
 0x5b4   : > { %v6414_v14 = vmax.f32 %v6382_v2, 0.0  ;;  %v6383_v7 = vadd.f32 %v11599_v1, %v14216_v23  ;;  %v6289_v16 = vpop.f32.mrb[75].mxu1  ;;  %11644 = vmatprep.mubr.bf16.mxu0 %v14286_v51  ;;  %v14351_v2 = vpack.c.bf16 %v6531_v62, %v6530_v41  ;;  %v14356_v1 = vpack.c.bf16 %v6533_v46, %v6532_v5  ;;  %v7072_v30 = vld [vmem:[#allocation3 + $0x6a] sm:$0xff]  ;;  %v13011_v46 = vld [vmem:[%s14742_s6 + $0xe0] sm:$0xff]  }
 0x5b5   : > { %v6412_v36 = vmax.f32 %v6380_v8, 0.0  ;;  %v6381_v28 = vadd.f32 %v14216_v23, %v6289_v16  ;;  %v13006_v8 = vld [vmem:[%s14742_s6 + $0xb8] sm:$0xff]   ;;  %v14401_v62 = vpack.c.bf16 %v7072_v30, %v7071_v3  ;;  %v7074_v5 = vld [vmem:[#allocation3 + $0x82] sm:$0xff] }
 0x5b6   : > { %6510 = vst [vmem:[#allocation3 + $0x151] sm:$0xff] %v6414_v14  ;;  %v6415_v35 = vmax.f32 %v6383_v7, 0.0  ;;  %v6535_v7 = vld [vmem:[#allocation3 + $0xe0] sm:$0xff]  ;;  %v6537_v16 = vld [vmem:[#allocation3 + $0xf8] sm:$0xff] }
 0x5b7   : > { %6508 = vst [vmem:[#allocation3 + $0x139] sm:$0xff] %v6412_v36  ;;  %v6413_v24 = vmax.f32 %v6381_v28, 0.0  ;;  %v7073_v41 = vld [vmem:[#allocation3 + $0x7a] sm:$0xff] }
 0x5b8   : > { %6511 = vst [vmem:[#allocation3 + $0x159] sm:$0xff] %v6415_v35  ;;  %v14296_v54 = vpack.c.bf16 %v6415_v35, %v6414_v14  ;;  %v13007_v14 = vld [vmem:[%s14742_s6 + $0xc0] sm:$0xff]   ;;  %v6536_v35 = vld [vmem:[#allocation3 + $0xf0] sm:$0xff] }
 0x5b9   : > { %6509 = vst [vmem:[#allocation3 + $0x141] sm:$0xff] %v6413_v24  ;;  %v11602_v12 = vpop.f32.mrb[76].mxu1  ;;  %v14298_v26 = vpack.c.bf16 %v6413_v24, %v6412_v36  ;;  %v6534_v36 = vld [vmem:[#allocation3 + $0xd8] sm:$0xff]  ;;  %v14365_v24 = vpack.c.bf16 %v6537_v16, %v6536_v35  ;;  %v13012_v16 = vld [vmem:[%s14742_s6 + $0xe8] sm:$0xff]   ;;  %v13013_v35 = vld [vmem:[%s14742_s6 + $0xf0] sm:$0xff]  }
 0x5ba   : > { %v6386_v17 = vadd.f32 %v11602_v12, %v14216_v23  ;;  %v6302_v45 = vpop.f32.mrb[77].mxu1  ;;  %v14363_v28 = vpack.c.bf16 %v6535_v7, %v6534_v36  ;;  %v6539_v12 = vld [vmem:[#allocation3 + $0x110] sm:$0xff]  ;;  %v14408_v7 = vpack.c.bf16 %v7074_v5, %v7073_v41 }
 0x5bb   : > { %v6384_v52 = vadd.f32 %v14216_v23, %v6302_v45  ;;  %v11603_v31 = vpop.f32.mrb[78].mxu1  ;;  %11645 = vmatmul.mubr.bf16.gmra.mrb[72].mxu0 %v14298_v26  ;;  %v6538_v45 = vld [vmem:[#allocation3 + $0x108] sm:$0xff] }
 0x5bc   : > { %v6418_v58 = vmax.f32 %v6386_v17, 0.0  ;;  %v6387_v42 = vadd.f32 %v11603_v31, %v14216_v23  ;;  %v6305_v4 = vpop.f32.mrb[79].mxu1  ;;  %11648 = vmatprep.mubr.bf16.mxu0 %v14296_v54  ;;  %v6541_v17 = vld [vmem:[#allocation3 + $0x128] sm:$0xff]  ;;  %v6540_v31 = vld [vmem:[#allocation3 + $0x120] sm:$0xff] }
 0x5bd   : > { %v6416_v47 = vmax.f32 %v6384_v52, 0.0  ;;  %v6385_v32 = vadd.f32 %v14216_v23, %v6305_v4  ;;  %v6521_v23 = vld [vmem:[#allocation3 + $0x38] sm:$0xff]  ;;  %v14369_v52 = vpack.c.bf16 %v6539_v12, %v6538_v45  ;;  %v6544_v40 = vld [vmem:[#allocation3 + $0x150] sm:$0xff]  ;;  %v7079_v45 = vld [vmem:[#allocation3 + $0xc2] sm:$0xff] }
 0x5be   : > { %6514 = vst [vmem:[#allocation3 + $0x181] sm:$0xff] %v6418_v58  ;;  %v6419_v48 = vmax.f32 %v6387_v42, 0.0  ;;  %v14319_v50 = vpack.c.bf16 %v6521_v23, %v6520_v37  ;;  %v7077_v12 = vld [vmem:[#allocation3 + $0xaa] sm:$0xff] }
 0x5bf   : > { %6512 = vst [vmem:[#allocation3 + $0x169] sm:$0xff] %v6416_v47  ;;  %v6417_v56 = vmax.f32 %v6385_v32, 0.0  ;;  %v6545_v4 = vld [vmem:[#allocation3 + $0x158] sm:$0xff] }
 0x5c0   : > { %6515 = vst [vmem:[#allocation3 + $0x189] sm:$0xff] %v6419_v48  ;;  %v14309_v20 = vpack.c.bf16 %v6419_v48, %v6418_v58  ;;  %v14371_v58 = vpack.c.bf16 %v6541_v17, %v6540_v31  ;;  %v6543_v42 = vld [vmem:[#allocation3 + $0x140] sm:$0xff]  ;;  %v14377_v48 = vpack.c.bf16 %v6545_v4, %v6544_v40  ;;  %v7078_v17 = vld [vmem:[#allocation3 + $0xb2] sm:$0xff]  ;;  %v7080_v31 = vld [vmem:[#allocation3 + $0xca] sm:$0xff] }
 0x5c1   : > { %6513 = vst [vmem:[#allocation3 + $0x171] sm:$0xff] %v6417_v56  ;;  %v14311_v38 = vpack.c.bf16 %v6417_v56, %v6416_v47  ;;  %v6542_v47 = vld [vmem:[#allocation3 + $0x138] sm:$0xff]  ;;  %v7063_v56 = vld [vmem:[#allocation3 + $0x2] sm:$0xff] }
 0x5c2   : > { %v14375_v32 = vpack.c.bf16 %v6543_v42, %v6542_v47  ;;  %v14420_v42 = vpack.c.bf16 %v7078_v17, %v7077_v12  ;;  %v13014_v4 = vld [vmem:[%s14742_s6 + $0xf8] sm:$0xff]   ;;  %v14425_v47 = vpack.c.bf16 %v7080_v31, %v7079_v45  ;;  %v13015_v40 = vld [vmem:[%s14742_s6 + $0x100] sm:$0xff]   ;;  %v13020_v17 = vld [vmem:[%s14742_s6 + $0x128] sm:$0xff]  }
 0x5c3   : > { %11649 = vmatmul.mubr.bf16.gmra.mrb[76].mxu0 %v14311_v38  ;;  %v7090_v3 = vld [vmem:[#allocation3 + $0x142] sm:$0xff]  ;;  %v7091_v30 = vld [vmem:[#allocation3 + $0x152] sm:$0xff] }
 0x5c4   : > { %11668 = vmatprep.mubr.bf16.mxu0 %v6548_v19  ;;  %v7064_v19 = vld [vmem:[#allocation3 + $0xa] sm:$0xff]  ;;  %v13019_v12 = vld [vmem:[%s14742_s6 + $0x120] sm:$0xff]   ;;  %v13022_v31 = vld [vmem:[%s14742_s6 + $0x138] sm:$0xff]  }
 0x5c5   : > { %v7095_v21 = vpack.c.bf16 %v7064_v19, %v7063_v56  ;;  %v7081_v56 = vld [vmem:[#allocation3 + $0xda] sm:$0xff]  ;;  %v7082_v19 = vld [vmem:[#allocation3 + $0xe2] sm:$0xff]  ;;  %v13021_v45 = vld [vmem:[%s14742_s6 + $0x130] sm:$0xff]  }
 0x5c6   : > { %v6546_v23 = vld [vmem:[#allocation3 + $0x168] sm:$0xff] }
 0x5c8   : > { %v6547_v10 = vld [vmem:[#allocation3 + $0x170] sm:$0xff] }
 0x5c9   : > { %v14381_v37 = vpack.c.bf16 %v6547_v10, %v6546_v23  ;;  %v7083_v10 = vld [vmem:[#allocation3 + $0xf2] sm:$0xff]  ;;  %v7084_v23 = vld [vmem:[#allocation3 + $0xfa] sm:$0xff]  ;;  %v7093_v5 = vld [vmem:[#allocation3 + $0x16a] sm:$0xff] }
 0x5cb   : > { %11669 = vmatmul.mubr.bf16.vlgmr.msra.gmra.mrb[48].mxu0 %v14314_v22 }
 0x5cc   : > { %11701 = vmatpush3.bf16.msra.mxu0 %v14273_v59  ;;  %11672 = vmatprep.mubr.bf16.mxu0 %v14319_v50  ;;  %v14332_v59 = vpack.c.bf16 %v6525_v57, %v6524_v6  ;;  %v7068_v57 = vld [vmem:[#allocation3 + $0x3a] sm:$0xff]  ;;  %v13008_v6 = vld [vmem:[%s14742_s6 + $0xc8] sm:$0xff]  }
 0x5cd   : > { %11702 = vmatprep.subr.bf16.mxu0 %v13000_v43 }
 0x5d0   : > { %11703 = vmatpush3.bf16.msra.mxu0 %v13000_v43  ;;  %v7065_v43 = vld [vmem:[#allocation3 + $0x1a] sm:$0xff] }
 0x5d1   : > { %11704 = vmatprep.subr.bf16.mxu0 %v13001_v44 }
 0x5d3   : > { %11673 = vmatmul.mubr.bf16.gmra.mrb[52].mxu0 %v14327_v63 }
 0x5d4   : > { %11676 = vmatprep.mubr.bf16.mxu0 %v14332_v59  ;;  %11705 = vmatpush3.bf16.msra.mxu0 %v13001_v44  ;;  %v7066_v44 = vld [vmem:[#allocation3 + $0x22] sm:$0xff] }
 0x5d5   : > { %11706 = vmatprep.subr.bf16.mxu0 %v13002_v34  ;;  %v14384_v11 = vpack.c.bf16 %v7066_v44, %v7065_v43  ;;  %v14434_v43 = vpack.c.bf16 %v7084_v23, %v7083_v10  ;;  %v7085_v44 = vld [vmem:[#allocation3 + $0x10a] sm:$0xff]  ;;  %v7675_v23 = vld [vmem:[#allocation3 + $0x19] sm:$0xff] }
 0x5d8   : > { %11707 = vmatpush3.bf16.msra.mxu0 %v13002_v34  ;;  %v14389_v34 = vpack.c.bf16 %v7068_v57, %v7067_v55  ;;  %v7086_v55 = vld [vmem:[#allocation3 + $0x112] sm:$0xff]  ;;  %v7087_v57 = vld [vmem:[#allocation3 + $0x122] sm:$0xff] }
 0x5d9   : > { %11708 = vmatprep.subr.bf16.mxu0 %v13003_v0 }
 0x5db   : > { %11677 = vmatmul.mubr.bf16.gmra.mrb[56].mxu0 %v14339_v27 }
 0x5dc   : > { %11680 = vmatprep.mubr.bf16.mxu0 %v14344_v39  ;;  %11709 = vmatpush3.bf16.msra.mxu0 %v13003_v0  ;;  %v13009_v0 = vld [vmem:[%s14742_s6 + $0xd0] sm:$0xff]  }
 0x5dd   : > { %11710 = vmatprep.subr.bf16.mxu0 %v13004_v33 }
 0x5e0   : > { %11711 = vmatpush3.bf16.msra.mxu0 %v13004_v33  ;;  %v14396_v33 = vpack.c.bf16 %v7070_v18, %v7069_v29  ;;  %v7089_v18 = vld [vmem:[#allocation3 + $0x13a] sm:$0xff] }
 0x5e1   : > { %11712 = vmatprep.subr.bf16.mxu0 %v13005_v15 }
 0x5e3   : > { %11681 = vmatmul.mubr.bf16.gmra.mrb[60].mxu0 %v14351_v2 }
 0x5e4   : > { %11684 = vmatprep.mubr.bf16.mxu0 %v14356_v1  ;;  %11713 = vmatpush3.bf16.msra.mxu0 %v13005_v15  ;;  %v13010_v15 = vld [vmem:[%s14742_s6 + $0xd8] sm:$0xff]  }
 0x5e5   : > { %11714 = vmatprep.subr.bf16.mxu0 %v13006_v8 }
 0x5e8   : > { %11715 = vmatpush3.bf16.msra.mxu0 %v13006_v8  ;;  %v7075_v8 = vld [vmem:[#allocation3 + $0x92] sm:$0xff] }
 0x5e9   : > { %11748 = vmatprep.subr.bf16.mxu0 %v13007_v14 }
 0x5eb   : > { %11685 = vmatmul.mubr.bf16.gmra.mrb[64].mxu0 %v14363_v28 }
 0x5ec   : > { %11688 = vmatprep.mubr.bf16.mxu0 %v14365_v24 }
 0x5f3   : > { %11689 = vmatmul.mubr.bf16.gmra.mrb[68].mxu0 %v14369_v52 }
 0x5f4   : > { %11692 = vmatprep.mubr.bf16.mxu0 %v14371_v58 }
 0x5fb   : > { %11693 = vmatmul.mubr.bf16.gmra.mrb[72].mxu0 %v14375_v32 }
 0x5fc   : > { %11696 = vmatprep.mubr.bf16.mxu0 %v14377_v48 }
 0x603   : > { %11697 = vmatmul.mubr.bf16.gmra.mrb[76].mxu0 %v14381_v37 }
 0x604   : > { %11716 = vmatprep.mubr.bf16.mxu0 %v7095_v21  ;;  %v14432_v21 = vpack.c.bf16 %v7082_v19, %v7081_v56  ;;  %v7676_v56 = vld [vmem:[#allocation3 + $0x21] sm:$0xff] }
 0x605   : > { %v7399_v19 = vld [vmem:[#allocation3 + $0x180] sm:$0xff] }
 0x60b   : > { %11717 = vmatmul.mubr.bf16.vlgmr.msra.gmra.mrb[48].mxu0 %v14384_v11 }
 0x60c   : > { %11749 = vmatpush3.bf16.msra.mxu0 %v13007_v14  ;;  %11720 = vmatprep.mubr.bf16.mxu0 %v14389_v34  ;;  %v7076_v14 = vld [vmem:[#allocation3 + $0x9a] sm:$0xff] }
 0x60d   : > { %11750 = vmatprep.subr.bf16.mxu0 %v13008_v6  ;;  %v14413_v36 = vpack.c.bf16 %v7076_v14, %v7075_v8  ;;  %v7094_v8 = vld [vmem:[#allocation3 + $0x172] sm:$0xff] }
 0x60e   : > { %v14450_v14 = vpack.c.bf16 %v7094_v8, %v7093_v5  ;;  %v13025_v5 = vld [vmem:[%s14742_s6 + $0x150] sm:$0xff]  }
 0x60f   : > { %v7682_v8 = vld [vmem:[#allocation3 + $0x69] sm:$0xff] }
 0x610   : > { %11751 = vmatpush3.bf16.msra.mxu0 %v13008_v6  ;;  %v7088_v6 = vld [vmem:[#allocation3 + $0x12a] sm:$0xff] }
 0x611   : > { %11752 = vmatprep.subr.bf16.mxu0 %v13009_v0  ;;  %v14440_v29 = vpack.c.bf16 %v7088_v6, %v7087_v57  ;;  %v7680_v57 = vld [vmem:[#allocation3 + $0x51] sm:$0xff] }
 0x612   : > { %v7677_v6 = vld [vmem:[#allocation3 + $0x31] sm:$0xff] }
 0x613   : > { %11721 = vmatmul.mubr.bf16.gmra.mrb[52].mxu0 %v14396_v33 }
 0x614   : > { %11724 = vmatprep.mubr.bf16.mxu0 %v14401_v62  ;;  %11753 = vmatpush3.bf16.msra.mxu0 %v13009_v0  ;;  %v14438_v0 = vpack.c.bf16 %v7086_v55, %v7085_v44  ;;  %v7707_v44 = vpack.c.bf16 %v7676_v56, %v7675_v23  ;;  %v7678_v55 = vld [vmem:[#allocation3 + $0x39] sm:$0xff]  ;;  %v13028_v56 = vld [vmem:[%s14742_s6 + $0x168] sm:$0xff]  }
 0x615   : > { %11754 = vmatprep.subr.bf16.mxu0 %v13010_v15 }
 0x618   : > { %11755 = vmatpush3.bf16.msra.mxu0 %v13010_v15  ;;  %v7092_v15 = vld [vmem:[#allocation3 + $0x15a] sm:$0xff] }
 0x619   : > { %11756 = vmatprep.subr.bf16.mxu0 %v13011_v46  ;;  %v14446_v41 = vpack.c.bf16 %v7092_v15, %v7091_v30  ;;  %v13024_v30 = vld [vmem:[%s14742_s6 + $0x148] sm:$0xff]  }
 0x61b   : > { %11725 = vmatmul.mubr.bf16.gmra.mrb[56].mxu0 %v14408_v7 }
 0x61c   : > { %11728 = vmatprep.mubr.bf16.mxu0 %v14413_v36  ;;  %11757 = vmatpush3.bf16.msra.mxu0 %v13011_v46  ;;  %v14444_v46 = vpack.c.bf16 %v7090_v3, %v7089_v18  ;;  %v14495_v18 = vpack.c.bf16 %v7678_v55, %v7677_v6  ;;  %v7679_v3 = vld [vmem:[#allocation3 + $0x49] sm:$0xff] }
 0x61d   : > { %11758 = vmatprep.subr.bf16.mxu0 %v13012_v16  ;;  %v14500_v15 = vpack.c.bf16 %v7680_v57, %v7679_v3  ;;  %v8612_v57 = vld [vmem:[#allocation3 + $0x111] sm:$0xff]  ;;  %v8614_v6 = vld [vmem:[#allocation3 + $0x129] sm:$0xff] }
 0x620   : > { %11759 = vmatpush3.bf16.msra.mxu0 %v13012_v16  ;;  %v13016_v16 = vld [vmem:[%s14742_s6 + $0x108] sm:$0xff]  }
 0x621   : > { %11760 = vmatprep.subr.bf16.mxu0 %v13013_v35 }
 0x623   : > { %11729 = vmatmul.mubr.bf16.gmra.mrb[60].mxu0 %v14420_v42 }
 0x624   : > { %11732 = vmatprep.mubr.bf16.mxu0 %v14425_v47  ;;  %11761 = vmatpush3.bf16.msra.mxu0 %v13013_v35  ;;  %v13017_v35 = vld [vmem:[%s14742_s6 + $0x110] sm:$0xff]  }
 0x625   : > { %11762 = vmatprep.subr.bf16.mxu0 %v13014_v4 }
 0x628   : > { %11763 = vmatpush3.bf16.msra.mxu0 %v13014_v4  ;;  %v13023_v4 = vld [vmem:[%s14742_s6 + $0x140] sm:$0xff]  }
 0x629   : > { %11796 = vmatprep.subr.bf16.mxu0 %v13015_v40 }
 0x62b   : > { %11733 = vmatmul.mubr.bf16.gmra.mrb[64].mxu0 %v14432_v21 }
 0x62c   : > { %11736 = vmatprep.mubr.bf16.mxu0 %v14434_v43 }
 0x633   : > { %11737 = vmatmul.mubr.bf16.gmra.mrb[68].mxu0 %v14438_v0 }
 0x634   : > { %11740 = vmatprep.mubr.bf16.mxu0 %v14440_v29 }
 0x63b   : > { %11741 = vmatmul.mubr.bf16.gmra.mrb[72].mxu0 %v14444_v46 }
 0x63c   : > { %11744 = vmatprep.mubr.bf16.mxu0 %v14446_v41 }
 0x643   : > { %11745 = vmatmul.mubr.bf16.gmra.mrb[76].mxu0 %v14450_v14 }
 0x644   : > { %11764 = vmatprep.mubr.bf16.mxu0 %v14314_v22  ;;  %v13018_v22 = vld [vmem:[%s14742_s6 + $0x118] sm:$0xff]  }
 0x64b   : > { %11765 = vmatmul.mubr.bf16.vlgmr.msra.gmra.mrb[48].mxu0 %v14319_v50 }
 0x64c   : > { %11797 = vmatpush3.bf16.msra.mxu0 %v13015_v40  ;;  %11768 = vmatprep.mubr.bf16.mxu0 %v14327_v63  ;;  %v7400_v40 = vld [vmem:[#allocation3 + $0x188] sm:$0xff] }
 0x64d   : > { %11798 = vmatprep.subr.bf16.mxu0 %v13016_v16  ;;  %v14492_v10 = vpack.c.bf16 %v7400_v40, %v7399_v19  ;;  %v14530_v19 = vld [vmem:[#allocation3 + $0xc1] sm:$0xff] }
 0x64e   : > { %v7714_v23 = vpack.c.bf16 %v14256_v49, %v14530_v19  ;;  %v13032_v49 = vld [vmem:[%s14742_s6 + $0x188] sm:$0xff]  }
 0x650   : > { %11799 = vmatpush3.bf16.msra.mxu0 %v13016_v16  ;;  %v14507_v16 = vld [vmem:[#allocation3 + $0x79] sm:$0xff] }
 0x651   : > { %11800 = vmatprep.subr.bf16.mxu0 %v13017_v35 }
 0x653   : > { %11769 = vmatmul.mubr.bf16.gmra.mrb[52].mxu0 %v14332_v59 }
 0x654   : > { %11772 = vmatprep.mubr.bf16.mxu0 %v14339_v27  ;;  %11801 = vmatpush3.bf16.msra.mxu0 %v13017_v35  ;;  %v7681_v35 = vld [vmem:[#allocation3 + $0x61] sm:$0xff] }
 0x655   : > { %11802 = vmatprep.subr.bf16.mxu0 %v13018_v22 }
 0x658   : > { %11803 = vmatpush3.bf16.msra.mxu0 %v13018_v22  ;;  %v14509_v22 = vpack.c.bf16 %v7682_v8, %v7681_v35  ;;  %v8618_v8 = vld [vmem:[#allocation3 + $0x159] sm:$0xff] }
 0x659   : > { %11804 = vmatprep.subr.bf16.mxu0 %v13019_v12 }
 0x65b   : > { %11773 = vmatmul.mubr.bf16.gmra.mrb[56].mxu0 %v14344_v39 }
 0x65c   : > { %11776 = vmatprep.mubr.bf16.mxu0 %v14351_v2  ;;  %11805 = vmatpush3.bf16.msra.mxu0 %v13019_v12  ;;  %v13026_v12 = vld [vmem:[%s14742_s6 + $0x158] sm:$0xff]  }
 0x65d   : > { %11806 = vmatprep.subr.bf16.mxu0 %v13020_v17 }
 0x660   : > { %11807 = vmatpush3.bf16.msra.mxu0 %v13020_v17  ;;  %v7711_v17 = vpack.c.bf16 %v14242_v60, %v14507_v16  ;;  %v13029_v60 = vld [vmem:[%s14742_s6 + $0x170] sm:$0xff]  }
 0x661   : > { %11808 = vmatprep.subr.bf16.mxu0 %v13021_v45 }
 0x663   : > { %11777 = vmatmul.mubr.bf16.gmra.mrb[60].mxu0 %v14356_v1 }
 0x664   : > { %11780 = vmatprep.mubr.bf16.mxu0 %v14363_v28  ;;  %11809 = vmatpush3.bf16.msra.mxu0 %v13021_v45  ;;  %v13027_v45 = vld [vmem:[%s14742_s6 + $0x160] sm:$0xff]  }
 0x665   : > { %11810 = vmatprep.subr.bf16.mxu0 %v13022_v31 }
 0x668   : > { %11811 = vmatpush3.bf16.msra.mxu0 %v13022_v31  ;;  %v7686_v31 = vld [vmem:[#allocation3 + $0x99] sm:$0xff] }
 0x669   : > { %11844 = vmatprep.subr.bf16.mxu0 %v13023_v4 }
 0x66b   : > { %11781 = vmatmul.mubr.bf16.gmra.mrb[64].mxu0 %v14365_v24 }
 0x66c   : > { %11784 = vmatprep.mubr.bf16.mxu0 %v14369_v52 }
 0x673   : > { %11785 = vmatmul.mubr.bf16.gmra.mrb[68].mxu0 %v14371_v58 }
 0x674   : > { %11788 = vmatprep.mubr.bf16.mxu0 %v14375_v32 }
 0x67b   : > { %11789 = vmatmul.mubr.bf16.gmra.mrb[72].mxu0 %v14377_v48 }
 0x67c   : > { %11792 = vmatprep.mubr.bf16.mxu0 %v14381_v37 }
 0x683   : > { %11793 = vmatmul.mubr.bf16.gmra.mrb[76].mxu0 %v14492_v10 }
 0x684   : > { %11812 = vmatprep.mubr.bf16.mxu0 %v7707_v44  ;;  %v13030_v44 = vld [vmem:[%s14742_s6 + $0x178] sm:$0xff]  }
 0x68b   : > { %11813 = vmatmul.mubr.bf16.vlgmr.msra.gmra.mrb[48].mxu0 %v14495_v18 }
 0x68c   : > { %11845 = vmatpush3.bf16.msra.mxu0 %v13023_v4  ;;  %11816 = vmatprep.mubr.bf16.mxu0 %v14500_v15  ;;  %v7685_v4 = vld [vmem:[#allocation3 + $0x91] sm:$0xff] }
 0x68d   : > { %11846 = vmatprep.subr.bf16.mxu0 %v13024_v30  ;;  %v14520_v40 = vpack.c.bf16 %v7686_v31, %v7685_v4  ;;  %v8619_v31 = vld [vmem:[#allocation3 + $0x169] sm:$0xff] }
 0x690   : > { %11847 = vmatpush3.bf16.msra.mxu0 %v13024_v30  ;;  %v8613_v30 = vld [vmem:[#allocation3 + $0x121] sm:$0xff] }
 0x691   : > { %11848 = vmatprep.subr.bf16.mxu0 %v13025_v5 }
 0x693   : > { %11817 = vmatmul.mubr.bf16.gmra.mrb[52].mxu0 %v14509_v22 }
 0x694   : > { %11820 = vmatprep.mubr.bf16.mxu0 %v7711_v17  ;;  %11849 = vmatpush3.bf16.msra.mxu0 %v13025_v5  ;;  %v8616_v5 = vld [vmem:[#allocation3 + $0x141] sm:$0xff]  ;;  %v8620_v17 = vld [vmem:[#allocation3 + $0x171] sm:$0xff] }
 0x695   : > { %11850 = vmatprep.subr.bf16.mxu0 %v13026_v12  ;;  %v8638_v4 = vpack.c.bf16 %v8620_v17, %v8619_v31 }
 0x698   : > { %11851 = vmatpush3.bf16.msra.mxu0 %v13026_v12 }
 0x699   : > { %11852 = vmatprep.subr.bf16.mxu0 %v13027_v45 }
 0x69b   : > { %11821 = vmatmul.mubr.bf16.gmra.mrb[56].mxu0 %v14520_v40 }
 0x69c   : > { %11824 = vmatprep.mubr.bf16.mxu0 %v14260_v9  ;;  %11853 = vmatpush3.bf16.msra.mxu0 %v13027_v45  ;;  %v13031_v9 = vld [vmem:[%s14742_s6 + $0x180] sm:$0xff]   ;;  %v8622_v45 = vld [vmem:[#allocation3 + $0x189] sm:$0xff] }
 0x69d   : > { %11854 = vmatprep.subr.bf16.mxu0 %v13028_v56 }
 0x6a0   : > { %11855 = vmatpush3.bf16.msra.mxu0 %v13028_v56 }
 0x6a1   : > { %11856 = vmatprep.subr.bf16.mxu0 %v13029_v60 }
 0x6a3   : > { %11825 = vmatmul.mubr.bf16.gmra.mrb[60].mxu0 %v7714_v23 }
 0x6a4   : > { %11828 = vmatprep.mubr.bf16.mxu0 %v14277_v53  ;;  %11857 = vmatpush3.bf16.msra.mxu0 %v13029_v60  ;;  %v13034_v53 = vld [vmem:[%s14742_s6 + $0x198] sm:$0xff]  }
 0x6a5   : > { %11858 = vmatprep.subr.bf16.mxu0 %v13030_v44  ;;  %v8623_v60 = vld [vmem:[#allocation3 + $0x199] sm:$0xff] }
 0x6a8   : > { %11859 = vmatpush3.bf16.msra.mxu0 %v13030_v44  ;;  %v8899_v44 = vld [vmem:[#allocation3 + $0x32] sm:$0xff] }
 0x6a9   : > { %11892 = vmatprep.subr.bf16.mxu0 %v13031_v9 }
 0x6ab   : > { %11829 = vmatmul.mubr.bf16.gmra.mrb[64].mxu0 %v14275_v61  ;;  %v13033_v61 = vld [vmem:[%s14742_s6 + $0x190] sm:$0xff]  }
 0x6ac   : > { %11832 = vmatprep.mubr.bf16.mxu0 %v14288_v25  ;;  %v13036_v25 = vld [vmem:[%s14742_s6 + $0x1a8] sm:$0xff]  }
 0x6b3   : > { %11833 = vmatmul.mubr.bf16.gmra.mrb[68].mxu0 %v14286_v51  ;;  %v13035_v51 = vld [vmem:[%s14742_s6 + $0x1a0] sm:$0xff]  }
 0x6b4   : > { %11836 = vmatprep.mubr.bf16.mxu0 %v14298_v26  ;;  %v13038_v26 = vld [vmem:[%s14742_s6 + $0x1b8] sm:$0xff]  }
 0x6bb   : > { %11837 = vmatmul.mubr.bf16.gmra.mrb[72].mxu0 %v14296_v54  ;;  %v13037_v54 = vld [vmem:[%s14742_s6 + $0x1b0] sm:$0xff]  }
 0x6bc   : > { %11840 = vmatprep.mubr.bf16.mxu0 %v14311_v38  ;;  %v8011_v38 = vld [vmem:[#allocation3 + $0x182] sm:$0xff] }
 0x6c3   : > { %11841 = vmatmul.mubr.bf16.gmra.mrb[76].mxu0 %v14309_v20  ;;  %v13039_v20 = vld [vmem:[%s14742_s6 + $0x1c0] sm:$0xff]  }
 0x6c4   : > { %11860 = vmatprep.mubr.bf16.mxu0 %v14384_v11  ;;  %v8012_v11 = vld [vmem:[#allocation3 + $0x18a] sm:$0xff] }
 0x6cb   : > { %11861 = vmatmul.mubr.bf16.vlgmr.msra.gmra.mrb[48].mxu0 %v14389_v34  ;;  %v14587_v34 = vpack.c.bf16 %v8012_v11, %v8011_v38  ;;  %v8906_v38 = vld [vmem:[#allocation3 + $0x82] sm:$0xff]  ;;  %v8907_v11 = vld [vmem:[#allocation3 + $0x92] sm:$0xff] }
 0x6cc   : > { %11893 = vmatpush3.bf16.msra.mxu0 %v13031_v9  ;;  %11864 = vmatprep.mubr.bf16.mxu0 %v14396_v33  ;;  %v13040_v33 = vld [vmem:[%s14742_s6 + $0x1c8] sm:$0xff]   ;;  %v8900_v9 = vld [vmem:[#allocation3 + $0x3a] sm:$0xff] }
 0x6cd   : > { %11894 = vmatprep.subr.bf16.mxu0 %v13032_v49 }
 0x6d0   : > { %11895 = vmatpush3.bf16.msra.mxu0 %v13032_v49  ;;  %v8931_v49 = vpack.c.bf16 %v8900_v9, %v8899_v44 }
 0x6d1   : > { %11896 = vmatprep.subr.bf16.mxu0 %v13033_v61 }
 0x6d3   : > { %11865 = vmatmul.mubr.bf16.gmra.mrb[52].mxu0 %v14401_v62  ;;  %v13041_v62 = vld [vmem:[%s14742_s6 + $0x1d0] sm:$0xff]  }
 0x6d4   : > { %11868 = vmatprep.mubr.bf16.mxu0 %v14408_v7  ;;  %11897 = vmatpush3.bf16.msra.mxu0 %v13033_v61  ;;  %v8606_v7 = vld [vmem:[#allocation3 + $0xc9] sm:$0xff] }
 0x6d5   : > { %11898 = vmatprep.subr.bf16.mxu0 %v13034_v53  ;;  %v8901_v61 = vld [vmem:[#allocation3 + $0x4a] sm:$0xff] }
 0x6d8   : > { %11899 = vmatpush3.bf16.msra.mxu0 %v13034_v53  ;;  %v8902_v53 = vld [vmem:[#allocation3 + $0x52] sm:$0xff] }
 0x6d9   : > { %11900 = vmatprep.subr.bf16.mxu0 %v13035_v51 }
 0x6db   : > { %11869 = vmatmul.mubr.bf16.gmra.mrb[56].mxu0 %v14413_v36  ;;  %v8603_v36 = vld [vmem:[#allocation3 + $0xa9] sm:$0xff] }
 0x6dc   : > { %11872 = vmatprep.mubr.bf16.mxu0 %v14420_v42  ;;  %11901 = vmatpush3.bf16.msra.mxu0 %v13035_v51  ;;  %v8903_v51 = vld [vmem:[#allocation3 + $0x62] sm:$0xff] }
 0x6dd   : > { %11902 = vmatprep.subr.bf16.mxu0 %v13036_v25 }
 0x6e0   : > { %11903 = vmatpush3.bf16.msra.mxu0 %v13036_v25  ;;  %v8904_v25 = vld [vmem:[#allocation3 + $0x6a] sm:$0xff] }
 0x6e1   : > { %11904 = vmatprep.subr.bf16.mxu0 %v13037_v54 }
 0x6e3   : > { %11873 = vmatmul.mubr.bf16.gmra.mrb[60].mxu0 %v14425_v47  ;;  %v13052_v47 = vld [vmem:[%s14742_s6 + $0x228] sm:$0xff]  }
 0x6e4   : > { %11876 = vmatprep.mubr.bf16.mxu0 %v14432_v21  ;;  %11905 = vmatpush3.bf16.msra.mxu0 %v13037_v54  ;;  %v8631_v21 = vpack.c.bf16 %v8606_v7, %v14530_v19  ;;  %v8624_v19 = vld [vmem:[#allocation3 + $0x1a1] sm:$0xff]  ;;  %v8932_v54 = vpack.c.bf16 %v8902_v53, %v8901_v61 }
 0x6e5   : > { %11906 = vmatprep.subr.bf16.mxu0 %v13038_v26  ;;  %v8640_v23 = vpack.c.bf16 %v8624_v19, %v8623_v60  ;;  %v8919_v7 = vld [vmem:[#allocation3 + $0x122] sm:$0xff] }
 0x6e8   : > { %11907 = vmatpush3.bf16.msra.mxu0 %v13038_v26  ;;  %v8933_v26 = vpack.c.bf16 %v8904_v25, %v8903_v51 }
 0x6e9   : > { %11940 = vmatprep.subr.bf16.mxu0 %v13039_v20 }
 0x6eb   : > { %11877 = vmatmul.mubr.bf16.gmra.mrb[64].mxu0 %v14434_v43  ;;  %v13053_v43 = vld [vmem:[%s14742_s6 + $0x230] sm:$0xff]  }
 0x6ec   : > { %11880 = vmatprep.mubr.bf16.mxu0 %v14438_v0  ;;  %v8608_v0 = vld [vmem:[#allocation3 + $0xe1] sm:$0xff] }
 0x6f3   : > { %11881 = vmatmul.mubr.bf16.gmra.mrb[68].mxu0 %v14440_v29  ;;  %v8610_v29 = vld [vmem:[#allocation3 + $0xf9] sm:$0xff] }
 0x6f4   : > { %11884 = vmatprep.mubr.bf16.mxu0 %v14444_v46  ;;  %v8607_v46 = vld [vmem:[#allocation3 + $0xd9] sm:$0xff] }
 0x6fb   : > { %11885 = vmatmul.mubr.bf16.gmra.mrb[72].mxu0 %v14446_v41  ;;  %v8632_v41 = vpack.c.bf16 %v8608_v0, %v8607_v46  ;;  %v8923_v0 = vld [vmem:[#allocation3 + $0x152] sm:$0xff] }
 0x6fc   : > { %11888 = vmatprep.mubr.bf16.mxu0 %v14450_v14  ;;  %v8609_v14 = vld [vmem:[#allocation3 + $0xf1] sm:$0xff] }
 0x6fd   : > { %v8633_v55 = vpack.c.bf16 %v8610_v29, %v8609_v14  ;;  %v8924_v29 = vld [vmem:[#allocation3 + $0x15a] sm:$0xff]  ;;  %v8925_v14 = vld [vmem:[#allocation3 + $0x16a] sm:$0xff] }
 0x703   : > { %11889 = vmatmul.mubr.bf16.gmra.mrb[76].mxu0 %v14587_v34 }
 0x704   : > { %11908 = vmatprep.mubr.bf16.mxu0 %v14319_v50  ;;  %v13042_v50 = vld [vmem:[%s14742_s6 + $0x1d8] sm:$0xff]  }
 0x70b   : > { %11909 = vmatmul.mubr.bf16.vlgmr.msra.gmra.mrb[48].mxu0 %v14327_v63  ;;  %v13043_v63 = vld [vmem:[%s14742_s6 + $0x1e0] sm:$0xff]  }
 0x70c   : > { %11941 = vmatpush3.bf16.msra.mxu0 %v13039_v20  ;;  %11912 = vmatprep.mubr.bf16.mxu0 %v14332_v59  ;;  %v13044_v59 = vld [vmem:[%s14742_s6 + $0x1e8] sm:$0xff]   ;;  %v8905_v20 = vld [vmem:[#allocation3 + $0x7a] sm:$0xff] }
 0x70d   : > { %11942 = vmatprep.subr.bf16.mxu0 %v13040_v33 }
 0x710   : > { %11943 = vmatpush3.bf16.msra.mxu0 %v13040_v33  ;;  %v8908_v33 = vld [vmem:[#allocation3 + $0x9a] sm:$0xff] }
 0x711   : > { %11944 = vmatprep.subr.bf16.mxu0 %v13041_v62 }
 0x713   : > { %11913 = vmatmul.mubr.bf16.gmra.mrb[52].mxu0 %v14339_v27  ;;  %v13045_v27 = vld [vmem:[%s14742_s6 + $0x1f0] sm:$0xff]  }
 0x714   : > { %11916 = vmatprep.mubr.bf16.mxu0 %v14344_v39  ;;  %11945 = vmatpush3.bf16.msra.mxu0 %v13041_v62  ;;  %v13046_v39 = vld [vmem:[%s14742_s6 + $0x1f8] sm:$0xff]   ;;  %v8934_v62 = vpack.c.bf16 %v8906_v38, %v8905_v20 }
 0x715   : > { %11946 = vmatprep.subr.bf16.mxu0 %v13042_v50 }
 0x718   : > { %11947 = vmatpush3.bf16.msra.mxu0 %v13042_v50  ;;  %v8935_v50 = vpack.c.bf16 %v8908_v33, %v8907_v11 }
 0x719   : > { %11948 = vmatprep.subr.bf16.mxu0 %v13043_v63 }
 0x71b   : > { %11917 = vmatmul.mubr.bf16.gmra.mrb[56].mxu0 %v14351_v2  ;;  %v13047_v2 = vld [vmem:[%s14742_s6 + $0x200] sm:$0xff]  }
 0x71c   : > { %11920 = vmatprep.mubr.bf16.mxu0 %v14356_v1  ;;  %11949 = vmatpush3.bf16.msra.mxu0 %v13043_v63  ;;  %v8317_v1 = vld [vmem:[#allocation3 + $0x198] sm:$0xff]  ;;  %v8909_v63 = vld [vmem:[#allocation3 + $0xaa] sm:$0xff] }
 0x71d   : > { %11950 = vmatprep.subr.bf16.mxu0 %v13044_v59 }
 0x720   : > { %11951 = vmatpush3.bf16.msra.mxu0 %v13044_v59  ;;  %v8910_v59 = vld [vmem:[#allocation3 + $0xb2] sm:$0xff] }
 0x721   : > { %11952 = vmatprep.subr.bf16.mxu0 %v13045_v27 }
 0x723   : > { %11921 = vmatmul.mubr.bf16.gmra.mrb[60].mxu0 %v14363_v28  ;;  %v8334_v28 = vpack.c.bf16 %v14306_v13, %v8317_v1 }
 0x724   : > { %11924 = vmatprep.mubr.bf16.mxu0 %v14365_v24  ;;  %11953 = vmatpush3.bf16.msra.mxu0 %v13045_v27  ;;  %v13048_v24 = vld [vmem:[%s14742_s6 + $0x208] sm:$0xff]  }
 0x725   : > { %11954 = vmatprep.subr.bf16.mxu0 %v13046_v39  ;;  %v8911_v27 = vld [vmem:[#allocation3 + $0xc2] sm:$0xff] }
 0x728   : > { %11955 = vmatpush3.bf16.msra.mxu0 %v13046_v39  ;;  %v8912_v39 = vld [vmem:[#allocation3 + $0xca] sm:$0xff] }
 0x729   : > { %11988 = vmatprep.subr.bf16.mxu0 %v13047_v2  ;;  %v8937_v1 = vpack.c.bf16 %v8912_v39, %v8911_v27 }
 0x72b   : > { %11925 = vmatmul.mubr.bf16.gmra.mrb[64].mxu0 %v14369_v52  ;;  %v13049_v52 = vld [vmem:[%s14742_s6 + $0x210] sm:$0xff]  }
 0x72c   : > { %11928 = vmatprep.mubr.bf16.mxu0 %v14371_v58  ;;  %v8600_v58 = vld [vmem:[#allocation3 + $0x81] sm:$0xff] }
 0x72d   : > { %v8628_v13 = vpack.c.bf16 %v8600_v58, %v14507_v16  ;;  %v8615_v16 = vld [vmem:[#allocation3 + $0x139] sm:$0xff] }
 0x72e   : > { %v8636_v35 = vpack.c.bf16 %v8616_v5, %v8615_v16  ;;  %v8916_v58 = vld [vmem:[#allocation3 + $0xfa] sm:$0xff] }
 0x733   : > { %11929 = vmatmul.mubr.bf16.gmra.mrb[68].mxu0 %v14375_v32  ;;  %v13050_v32 = vld [vmem:[%s14742_s6 + $0x218] sm:$0xff]  }
 0x734   : > { %11932 = vmatprep.mubr.bf16.mxu0 %v14377_v48  ;;  %v13051_v48 = vld [vmem:[%s14742_s6 + $0x220] sm:$0xff]  }
 0x73b   : > { %11933 = vmatmul.mubr.bf16.gmra.mrb[72].mxu0 %v14381_v37  ;;  %v8604_v37 = vld [vmem:[#allocation3 + $0xb1] sm:$0xff] }
 0x73c   : > { %11936 = vmatprep.mubr.bf16.mxu0 %v14492_v10  ;;  %v8630_v42 = vpack.c.bf16 %v8604_v37, %v8603_v36  ;;  %v13054_v10 = vld [vmem:[%s14742_s6 + $0x238] sm:$0xff]   ;;  %v8920_v36 = vld [vmem:[#allocation3 + $0x12a] sm:$0xff] }
 0x73d   : > { %v8918_v37 = vld [vmem:[#allocation3 + $0x112] sm:$0xff] }
 0x743   : > { %11937 = vmatmul.mubr.bf16.gmra.mrb[76].mxu0 %v8334_v28  ;;  %v8913_v28 = vld [vmem:[#allocation3 + $0xda] sm:$0xff] }
 0x744   : > { %11956 = vmatprep.mubr.bf16.mxu0 %v14495_v18  ;;  %v8611_v18 = vld [vmem:[#allocation3 + $0x109] sm:$0xff] }
 0x745   : > { %v8634_v3 = vpack.c.bf16 %v8612_v57, %v8611_v18  ;;  %v8929_v57 = vld [vmem:[#allocation3 + $0x19a] sm:$0xff] }
 0x74b   : > { %11957 = vmatmul.mubr.bf16.vlgmr.msra.gmra.mrb[48].mxu0 %v14500_v15  ;;  %v8635_v15 = vpack.c.bf16 %v8614_v6, %v8613_v30  ;;  %v8930_v6 = vld [vmem:[#allocation3 + $0x1a2] sm:$0xff] }
 0x74c   : > { %11989 = vmatpush3.bf16.msra.mxu0 %v13047_v2  ;;  %11960 = vmatprep.mubr.bf16.mxu0 %v14509_v22  ;;  %v8617_v22 = vld [vmem:[#allocation3 + $0x151] sm:$0xff]  ;;  %v8936_v2 = vpack.c.bf16 %v8910_v59, %v8909_v63  ;;  %v8946_v18 = vpack.c.bf16 %v8930_v6, %v8929_v57 }
 0x74d   : > { %11990 = vmatprep.subr.bf16.mxu0 %v13048_v24  ;;  %v8637_v12 = vpack.c.bf16 %v8618_v8, %v8617_v22 }
 0x750   : > { %11991 = vmatpush3.bf16.msra.mxu0 %v13048_v24  ;;  %v8914_v24 = vld [vmem:[#allocation3 + $0xe2] sm:$0xff] }
 0x751   : > { %11992 = vmatprep.subr.bf16.mxu0 %v13049_v52 }
 0x753   : > { %11961 = vmatmul.mubr.bf16.gmra.mrb[52].mxu0 %v8628_v13  ;;  %v8938_v13 = vpack.c.bf16 %v8914_v24, %v8913_v28 }
 0x754   : > { %11964 = vmatprep.mubr.bf16.mxu0 %v14520_v40  ;;  %11993 = vmatpush3.bf16.msra.mxu0 %v13049_v52  ;;  %v8621_v40 = vld [vmem:[#allocation3 + $0x181] sm:$0xff]  ;;  %v8915_v52 = vld [vmem:[#allocation3 + $0xf2] sm:$0xff] }
 0x755   : > { %11994 = vmatprep.subr.bf16.mxu0 %v13050_v32  ;;  %v8639_v56 = vpack.c.bf16 %v8622_v45, %v8621_v40 }
 0x758   : > { %11995 = vmatpush3.bf16.msra.mxu0 %v13050_v32  ;;  %v8939_v32 = vpack.c.bf16 %v8916_v58, %v8915_v52 }
 0x759   : > { %11996 = vmatprep.subr.bf16.mxu0 %v13051_v48 }
 0x75b   : > { %11965 = vmatmul.mubr.bf16.gmra.mrb[56].mxu0 %v8630_v42 }
 0x75c   : > { %11968 = vmatprep.mubr.bf16.mxu0 %v8631_v21  ;;  %11997 = vmatpush3.bf16.msra.mxu0 %v13051_v48  ;;  %v8917_v48 = vld [vmem:[#allocation3 + $0x10a] sm:$0xff]  ;;  %v8921_v21 = vld [vmem:[#allocation3 + $0x13a] sm:$0xff] }
 0x75d   : > { %11998 = vmatprep.subr.bf16.mxu0 %v13052_v47  ;;  %v8940_v42 = vpack.c.bf16 %v8918_v37, %v8917_v48 }
 0x760   : > { %11999 = vmatpush3.bf16.msra.mxu0 %v13052_v47  ;;  %v8941_v47 = vpack.c.bf16 %v8920_v36, %v8919_v7 }
 0x761   : > { %12000 = vmatprep.subr.bf16.mxu0 %v13053_v43 }
 0x763   : > { %11969 = vmatmul.mubr.bf16.gmra.mrb[60].mxu0 %v8632_v41  ;;  %v8943_v41 = vpack.c.bf16 %v8924_v29, %v8923_v0 }
 0x764   : > { %11972 = vmatprep.mubr.bf16.mxu0 %v8633_v55  ;;  %12001 = vmatpush3.bf16.msra.mxu0 %v13053_v43  ;;  %v8922_v43 = vld [vmem:[#allocation3 + $0x142] sm:$0xff] }
 0x765   : > { %12002 = vmatprep.subr.bf16.mxu0 %v13054_v10  ;;  %v8942_v46 = vpack.c.bf16 %v8922_v43, %v8921_v21 }
 0x768   : > { %12003 = vmatpush3.bf16.msra.mxu0 %v13054_v10  ;;  %v8926_v10 = vld [vmem:[#allocation3 + $0x172] sm:$0xff] }
 0x769   : > { %v8944_v55 = vpack.c.bf16 %v8926_v10, %v8925_v14 }
 0x76b   : > { %11973 = vmatmul.mubr.bf16.gmra.mrb[64].mxu0 %v8634_v3  ;;  %v14662_v3 = vld [vmem:[%s14743_s7] ss:$0 sm:$0xff] }
 0x76c   : > { %11976 = vmatprep.mubr.bf16.mxu0 %v8635_v15 }
 0x773   : > { %11977 = vmatmul.mubr.bf16.gmra.mrb[68].mxu0 %v8636_v35 }
 0x774   : > { %11980 = vmatprep.mubr.bf16.mxu0 %v8637_v12 }
 0x77b   : > { %11981 = vmatmul.mubr.bf16.gmra.mrb[72].mxu0 %v8638_v4 }
 0x77c   : > { %11984 = vmatprep.mubr.bf16.mxu0 %v8639_v56 }
 0x783   : > { %11985 = vmatmul.mubr.bf16.gmra.mrb[76].mxu0 %v8640_v23 }
 0x784   : > { %12004 = vmatprep.mubr.bf16.mxu0 %v8931_v49 }
 0x78b   : > { %12005 = vmatmul.mubr.bf16.vlgmr.msra.gmra.mrb[48].mxu0 %v8932_v54 }
 0x78c   : > { %12008 = vmatprep.mubr.bf16.mxu0 %v8933_v26 }
 0x793   : > { %12009 = vmatmul.mubr.bf16.gmra.mrb[52].mxu0 %v8934_v62 }
 0x794   : > { %12012 = vmatprep.mubr.bf16.mxu0 %v8935_v50 }
 0x79b   : > { %12013 = vmatmul.mubr.bf16.gmra.mrb[56].mxu0 %v8936_v2 }
 0x79c   : > { %12016 = vmatprep.mubr.bf16.mxu0 %v8937_v1 }
 0x7a3   : > { %12017 = vmatmul.mubr.bf16.gmra.mrb[60].mxu0 %v8938_v13 }
 0x7a4   : > { %12020 = vmatprep.mubr.bf16.mxu0 %v8939_v32 }
 0x7ab   : > { %12021 = vmatmul.mubr.bf16.gmra.mrb[64].mxu0 %v8940_v42 }
 0x7ac   : > { %12024 = vmatprep.mubr.bf16.mxu0 %v8941_v47 }
 0x7b3   : > { %12025 = vmatmul.mubr.bf16.gmra.mrb[68].mxu0 %v8942_v46 }
 0x7b4   : > { %12028 = vmatprep.mubr.bf16.mxu0 %v8943_v41 }
 0x7bb   : > { %12029 = vmatmul.mubr.bf16.gmra.mrb[72].mxu0 %v8944_v55 }
 0x7bc   : > { %12032 = vmatprep.mubr.bf16.mxu0 %v14587_v34 }
 0x7c3   : > { %12033 = vmatmul.mubr.bf16.gmra.mrb[76].mxu0 %v8946_v18 }
 0x85e   : > { %v12006_v34 = vpop.f32.mrb[48].mxu0 }
 0x85f   : > { %v9214_v30 = vadd.f32 %v12006_v34, %v14662_v3  ;;  %v9046_v15 = vpop.f32.mrb[49].mxu0 }
 0x860   : > { %v9212_v5 = vadd.f32 %v14662_v3, %v9046_v15  ;;  %v12007_v8 = vpop.f32.mrb[50].mxu0 }
 0x861   : > { %9310 = vst [vmem:[%s14667_s11 + $0x10] sm:$0xff] %v9214_v30  ;;  %v9215_v16 = vadd.f32 %v12007_v8, %v14662_v3  ;;  %v9049_v35 = vpop.f32.mrb[51].mxu0 }
 0x862   : > { %9308 = vst [vmem:[%s14667_s11] sm:$0xff] %v9212_v5  ;;  %v9213_v22 = vadd.f32 %v14662_v3, %v9049_v35 }
 0x863   : > { %9311 = vst [vmem:[%s14667_s11 + $0x18] sm:$0xff] %v9215_v16 }
 0x864   : > { %9309 = vst [vmem:[%s14667_s11 + $0x8] sm:$0xff] %v9213_v22 }
 0x866   : > { %v12010_v12 = vpop.f32.mrb[52].mxu0 }
 0x867   : > { %v9218_v17 = vadd.f32 %v12010_v12, %v14662_v3  ;;  %v9062_v45 = vpop.f32.mrb[53].mxu0 }
 0x868   : > { %v9216_v31 = vadd.f32 %v14662_v3, %v9062_v45  ;;  %v12011_v4 = vpop.f32.mrb[54].mxu0 }
 0x869   : > { %9314 = vst [vmem:[%s14667_s11 + $0x30] sm:$0xff] %v9218_v17  ;;  %v9219_v40 = vadd.f32 %v12011_v4, %v14662_v3  ;;  %v9065_v56 = vpop.f32.mrb[55].mxu0 }
 0x86a   : > { %9312 = vst [vmem:[%s14667_s11 + $0x20] sm:$0xff] %v9216_v31  ;;  %v9217_v60 = vadd.f32 %v14662_v3, %v9065_v56 }
 0x86b   : > { %9315 = vst [vmem:[%s14667_s11 + $0x38] sm:$0xff] %v9219_v40 }
 0x86c   : > { %9313 = vst [vmem:[%s14667_s11 + $0x28] sm:$0xff] %v9217_v60 }
 0x86e   : > { %v12014_v19 = vpop.f32.mrb[56].mxu0 }
 0x86f   : > { %v9222_v23 = vadd.f32 %v12014_v19, %v14662_v3  ;;  %v9078_v44 = vpop.f32.mrb[57].mxu0 }
 0x870   : > { %v9220_v9 = vadd.f32 %v14662_v3, %v9078_v44  ;;  %v12015_v49 = vpop.f32.mrb[58].mxu0 }
 0x871   : > { %9318 = vst [vmem:[%s14667_s11 + $0x50] sm:$0xff] %v9222_v23  ;;  %v9223_v61 = vadd.f32 %v12015_v49, %v14662_v3  ;;  %v9081_v53 = vpop.f32.mrb[59].mxu0 }
 0x872   : > { %9316 = vst [vmem:[%s14667_s11 + $0x40] sm:$0xff] %v9220_v9  ;;  %v9221_v51 = vadd.f32 %v14662_v3, %v9081_v53 }
 0x873   : > { %9319 = vst [vmem:[%s14667_s11 + $0x58] sm:$0xff] %v9223_v61 }
 0x874   : > { %9317 = vst [vmem:[%s14667_s11 + $0x48] sm:$0xff] %v9221_v51 }
 0x876   : > { %v12018_v25 = vpop.f32.mrb[60].mxu0 }
 0x877   : > { %v9226_v54 = vadd.f32 %v12018_v25, %v14662_v3  ;;  %v9094_v26 = vpop.f32.mrb[61].mxu0 }
 0x878   : > { %v9224_v20 = vadd.f32 %v14662_v3, %v9094_v26  ;;  %v12019_v38 = vpop.f32.mrb[62].mxu0 }
 0x879   : > { %9322 = vst [vmem:[%s14667_s11 + $0x70] sm:$0xff] %v9226_v54  ;;  %v9227_v11 = vadd.f32 %v12019_v38, %v14662_v3  ;;  %v9097_v33 = vpop.f32.mrb[63].mxu0 }
 0x87a   : > { %9320 = vst [vmem:[%s14667_s11 + $0x60] sm:$0xff] %v9224_v20  ;;  %v9225_v62 = vadd.f32 %v14662_v3, %v9097_v33 }
 0x87b   : > { %9323 = vst [vmem:[%s14667_s11 + $0x78] sm:$0xff] %v9227_v11 }
 0x87c   : > { %9321 = vst [vmem:[%s14667_s11 + $0x68] sm:$0xff] %v9225_v62 }
 0x87e   : > { %v12022_v50 = vpop.f32.mrb[64].mxu0 }
 0x87f   : > { %v9230_v63 = vadd.f32 %v12022_v50, %v14662_v3  ;;  %v9110_v59 = vpop.f32.mrb[65].mxu0 }
 0x880   : > { %v9228_v27 = vadd.f32 %v14662_v3, %v9110_v59  ;;  %v12023_v39 = vpop.f32.mrb[66].mxu0 }
 0x881   : > { %9326 = vst [vmem:[%s14667_s11 + $0x90] sm:$0xff] %v9230_v63  ;;  %v9231_v2 = vadd.f32 %v12023_v39, %v14662_v3  ;;  %v9113_v1 = vpop.f32.mrb[67].mxu0 }
 0x882   : > { %9324 = vst [vmem:[%s14667_s11 + $0x80] sm:$0xff] %v9228_v27  ;;  %v9229_v28 = vadd.f32 %v14662_v3, %v9113_v1 }
 0x883   : > { %9327 = vst [vmem:[%s14667_s11 + $0x98] sm:$0xff] %v9231_v2 }
 0x884   : > { %9325 = vst [vmem:[%s14667_s11 + $0x88] sm:$0xff] %v9229_v28 }
 0x886   : > { %v12026_v24 = vpop.f32.mrb[68].mxu0 }
 0x887   : > { %v9234_v52 = vadd.f32 %v12026_v24, %v14662_v3  ;;  %v9126_v58 = vpop.f32.mrb[69].mxu0 }
 0x888   : > { %v9232_v13 = vadd.f32 %v14662_v3, %v9126_v58  ;;  %v12027_v32 = vpop.f32.mrb[70].mxu0 }
 0x889   : > { %9330 = vst [vmem:[%s14667_s11 + $0xb0] sm:$0xff] %v9234_v52  ;;  %v9235_v48 = vadd.f32 %v12027_v32, %v14662_v3  ;;  %v9129_v37 = vpop.f32.mrb[71].mxu0 }
 0x88a   : > { %9328 = vst [vmem:[%s14667_s11 + $0xa0] sm:$0xff] %v9232_v13  ;;  %v9233_v7 = vadd.f32 %v14662_v3, %v9129_v37 }
 0x88b   : > { %9331 = vst [vmem:[%s14667_s11 + $0xb8] sm:$0xff] %v9235_v48 }
 0x88c   : > { %9329 = vst [vmem:[%s14667_s11 + $0xa8] sm:$0xff] %v9233_v7 }
 0x88e   : > { %v12030_v36 = vpop.f32.mrb[72].mxu0 }
 0x88f   : > { %v9238_v42 = vadd.f32 %v12030_v36, %v14662_v3  ;;  %v9142_v47 = vpop.f32.mrb[73].mxu0 }
 0x890   : > { %v9236_v21 = vadd.f32 %v14662_v3, %v9142_v47  ;;  %v12031_v43 = vpop.f32.mrb[74].mxu0 }
 0x891   : > { %9334 = vst [vmem:[%s14667_s11 + $0xd0] sm:$0xff] %v9238_v42  ;;  %v9239_v0 = vadd.f32 %v12031_v43, %v14662_v3  ;;  %v9145_v29 = vpop.f32.mrb[75].mxu0 }
 0x892   : > { %9332 = vst [vmem:[%s14667_s11 + $0xc0] sm:$0xff] %v9236_v21  ;;  %v9237_v46 = vadd.f32 %v14662_v3, %v9145_v29 }
 0x893   : > { %9335 = vst [vmem:[%s14667_s11 + $0xd8] sm:$0xff] %v9239_v0 }
 0x894   : > { %9333 = vst [vmem:[%s14667_s11 + $0xc8] sm:$0xff] %v9237_v46 }
 0x896   : > { %v12034_v41 = vpop.f32.mrb[76].mxu0 }
 0x897   : > { %v9242_v14 = vadd.f32 %v12034_v41, %v14662_v3  ;;  %v9158_v10 = vpop.f32.mrb[77].mxu0 }
 0x898   : > { %v9240_v55 = vadd.f32 %v14662_v3, %v9158_v10  ;;  %v12035_v57 = vpop.f32.mrb[78].mxu0 }
 0x899   : > { %9338 = vst [vmem:[%s14667_s11 + $0xf0] sm:$0xff] %v9242_v14  ;;  %v9243_v6 = vadd.f32 %v12035_v57, %v14662_v3  ;;  %v9161_v18 = vpop.f32.mrb[79].mxu0 }
 0x89a   : > { %9336 = vst [vmem:[%s14667_s11 + $0xe0] sm:$0xff] %v9240_v55  ;;  %v9241_v34 = vadd.f32 %v14662_v3, %v9161_v18 }
 0x89b   : > { %9339 = vst [vmem:[%s14667_s11 + $0xf8] sm:$0xff] %v9243_v6 }
 0x89c   : > { %9337 = vst [vmem:[%s14667_s11 + $0xe8] sm:$0xff] %v9241_v34 }
 0x89d PF: > { %s18_s27 = sadd.s32 1, %s13072_s27  }
 0x89e   : > { %p15_p4 = scmp.ge.s32.totalorder %s18_s27, 4  }
 0x8a0   :  { %17 = sbr.rel (!%p15_p4) target bundleno = 1 (0x1), region = 109 }

</bundles_post_ra>
